<compile_context>
chip_gen: v7x
topology: tpu7x:2x2x1
jax: 0.10.0
libtpu: 0.0.40
codegen_flags: <defaults>
</compile_context>

<pallas_src>
import math
from functools import partial

import jax
import jax.numpy as jnp
from jax.experimental import pallas as pl
from jax.experimental.pallas import tpu as pltpu

BN_EPS = 1e-5            # PyTorch BatchNorm1d default eps
POINT_TILE_ROWS = 1024   # row tile for the fused point-wise kernel


# ----------------------------------------------------------------------------
# helpers
# ----------------------------------------------------------------------------
def _round_up(x, m):
    return ((x + m - 1) // m) * m


def _fold_bn(gamma, beta, mean, var):
    """Fold eval-mode BatchNorm into per-channel scale/shift.
    # TODO(synk): training-mode batch statistics would need a multi-pass
    # sum/sumsq reduction (stats of layer k+1 depend on BN(k) over all rows).
    """
    scale = gamma * jax.lax.rsqrt(var + BN_EPS)
    return scale, beta - mean * scale


def _pick_kv_tile(n, target=1024):
    cand = min(target, n)
    cand -= cand % 16
    while cand >= 16:
        if n % cand == 0:
            return cand
        cand -= 16
    return n  # single full block (full-dim blocks are exempt from (8,128) rule)


# ----------------------------------------------------------------------------
# Kernel 1 (fused): coord_encrypt (Conv1d 3->8 + BN + ReLU)
#                   + backbone shared MLP [8 -> 64 -> 128] (1x1 conv + BN + ReLU)
#                   + sinusoidal position encoding
#                   + mem = feat + pos     (stored bf16)
# One row-tiled pass over [B*N] points; only feat (f32) and mem (bf16) hit HBM.
# ----------------------------------------------------------------------------
def _pointwise_mem_kernel(xyz_ref, ce_w_ref, ce_s_ref, ce_b_ref,
                          w1_ref, s1_ref, b1_ref, w2_ref, s2_ref, b2_ref,
                          invx_ref, invy_ref, phase_ref,
                          feat_ref, mem_ref):
    xyz = xyz_ref[...]                                   # (TR, 3)

    # coord_encrypt: K=3 would waste the MXU systolic depth -> VPU broadcast-FMA.
    ce_w = ce_w_ref[...]                                 # (3, 8)
    h = (xyz[:, 0:1] * ce_w[0:1, :]
         + xyz[:, 1:2] * ce_w[1:2, :]
         + xyz[:, 2:3] * ce_w[2:3, :])                   # (TR, 8)
    h = jnp.maximum(h * ce_s_ref[...] + ce_b_ref[...], 0.0)

    # backbone shared point-wise MLP 8 -> 64 -> 128 (BN folded into scale/shift).
    # TODO(synk): ball-query grouping (radius=0.2, nsample=64), normalize_xyz and
    # the neighborhood max-pool of PointnetSAModuleVotes are data-dependent
    # gathers whose definition is not provided; only the shared MLP is implemented.
    t = jnp.dot(h, w1_ref[...], preferred_element_type=jnp.float32)
    t = jnp.maximum(t * s1_ref[...] + b1_ref[...], 0.0)            # (TR, 64)
    feat = jnp.dot(t, w2_ref[...], preferred_element_type=jnp.float32)
    feat = jnp.maximum(feat * s2_ref[...] + b2_ref[...], 0.0)      # (TR, 128)
    feat_ref[...] = feat

    # sinusoidal position encoding: constants hoisted to the wrapper.
    # invx has the x-axis 2*pi/((346+eps)*dim_t) factors in lanes [0, C/2) and
    # zeros elsewhere; invy symmetric for y; phase adds pi/2 on odd lanes so a
    # single sin covers both sin/cos.  One transcendental per lane.
    ang = (xyz[:, 1:2] * invx_ref[...]
           + xyz[:, 2:3] * invy_ref[...]
           + phase_ref[...])                                       # (TR, C)
    mem_ref[...] = (feat + jnp.sin(ang)).astype(mem_ref.dtype)


def pointwise_memory(xyz, params):
    """Returns (feat f32, mem bf16) each of shape (B, N, 128)."""
    B, N, _ = xyz.shape
    C = params["bb_w2"].shape[1]

    ce_s, ce_b = _fold_bn(params["ce_gamma"], params["ce_beta"],
                          params["ce_mean"], params["ce_var"])
    s1, b1 = _fold_bn(params["bb_g1"], params["bb_b1"],
                      params["bb_m1"], params["bb_v1"])
    s2, b2 = _fold_bn(params["bb_g2"], params["bb_b2"],
                      params["bb_m2"], params["bb_v2"])

    # --- hoisted positional-encoding constants ---
    half = C // 2
    j = jnp.arange(half, dtype=jnp.float32)
    dim_t = 10000.0 ** (2.0 * jnp.floor(j / 2.0) / float(half))        # (half,)
    phase_h = jnp.where(jnp.arange(half) % 2 == 0, 0.0, 0.5 * math.pi)
    scale = 2.0 * math.pi
    eps = 1e-6
    zeros_h = jnp.zeros((half,), jnp.float32)
    invx = jnp.concatenate([scale / ((346.0 + eps) * dim_t), zeros_h]
                           ).reshape(1, C).astype(jnp.float32)
    invy = jnp.concatenate([zeros_h, scale / ((260.0 + eps) * dim_t)]
                           ).reshape(1, C).astype(jnp.float32)
    phase = jnp.concatenate([phase_h, phase_h]).reshape(1, C).astype(jnp.float32)

    rows = B * N
    tile = min(POINT_TILE_ROWS, _round_up(rows, 16))
    x_flat = xyz.reshape(rows, 3)
    pad = (-rows) % tile
    if pad:
        x_flat = jnp.pad(x_flat, ((0, pad), (0, 0)))
    rows_p = rows + pad
    n_tiles = rows_p // tile

    full = lambda arr: pl.BlockSpec(arr.shape, lambda i: (0,) * arr.ndim)
    feat, mem = pl.pallas_call(
        _pointwise_mem_kernel,
        grid=(n_tiles,),
        in_specs=[
            pl.BlockSpec((tile, 3), lambda i: (i, 0)),
            full(params["ce_w"]), full(ce_s), full(ce_b),
            full(params["bb_w1"]), full(s1), full(b1),
            full(params["bb_w2"]), full(s2), full(b2),
            full(invx), full(invy), full(phase),
        ],
        out_specs=[
            pl.BlockSpec((tile, C), lambda i: (i, 0)),
            pl.BlockSpec((tile, C), lambda i: (i, 0)),
        ],
        out_shape=(
            jax.ShapeDtypeStruct((rows_p, C), jnp.float32),
            jax.ShapeDtypeStruct((rows_p, C), jnp.bfloat16),
        ),
        compiler_params=pltpu.CompilerParams(dimension_semantics=("parallel",)),
    )(x_flat, params["ce_w"], ce_s, ce_b,
      params["bb_w1"], s1, b1, params["bb_w2"], s2, b2,
      invx, invy, phase)

    feat = feat[:rows].reshape(B, N, C)
    mem = mem[:rows].reshape(B, N, C)
    return feat, mem


# ----------------------------------------------------------------------------
# Kernel 2 (fused): transformer stand-in = single-head cross-attention decoder
# layer, K-tiled with online softmax (flash-style), bf16 MXU operands, with the
# detection heads (Linear(128->2) and MLP(128,128,4,3)+sigmoid) folded into the
# last-kt epilogue and emitted as one lane-dense (Q, 128) slab.
# ----------------------------------------------------------------------------
def _attn_heads_kernel(n_cls, q_ref, mem_ref,
                       wc_ref, bc_ref, w1_ref, b1_ref, w2_ref, b2_ref,
                       w3_ref, b3_ref, o_ref, m_sc, l_sc, acc_sc):
    # TODO(synk): build_transformer() definition is unavailable; a single-head
    # cross-attention over (feat + pos) memory (no self-attn/LayerNorm/FFN/out
    # projection) is a minimal stand-in with the same interface / output shape.
    kt = pl.program_id(1)

    @pl.when(kt == 0)
    def _():
        m_sc[...] = jnp.full_like(m_sc, -jnp.inf)
        l_sc[...] = jnp.zeros_like(l_sc)
        acc_sc[...] = jnp.zeros_like(acc_sc)

    q = q_ref[...]                  # (Q, C) bf16, pre-scaled by 1/sqrt(C)
    mem = mem_ref[0]                # (TK, C) bf16
    # scores = q @ mem^T without materializing the transpose; f32 accumulation.
    s = jax.lax.dot_general(q, mem, (((1,), (1,)), ((), ())),
                            preferred_element_type=jnp.float32)      # (Q, TK)

    m_new = jnp.maximum(m_sc[...], jnp.max(s, axis=-1, keepdims=True))
    alpha = jnp.exp(m_sc[...] - m_new)
    p = jnp.exp(s - m_new)                                           # f32 EUP
    l_sc[...] = alpha * l_sc[...] + jnp.sum(p, axis=-1, keepdims=True)
    acc_sc[...] = alpha * acc_sc[...] + jnp.dot(
        p.astype(jnp.bfloat16), mem, preferred_element_type=jnp.float32)
    m_sc[...] = m_new

    @pl.when(kt == pl.num_programs(1) - 1)
    def _():
        # exact normalization (review correctness note on approx reciprocal)
        hs = acc_sc[...] / l_sc[...]                                  # (Q, C) f32

        # ---- fused detection heads (weights pre-padded to full C lanes) ----
        cls_slab = jnp.dot(hs, wc_ref[...],
                           preferred_element_type=jnp.float32) + bc_ref[...]
        t = jnp.maximum(jnp.dot(hs, w1_ref[...],
                                preferred_element_type=jnp.float32) + b1_ref[...], 0.0)
        t = jnp.maximum(jnp.dot(t, w2_ref[...],
                                preferred_element_type=jnp.float32) + b2_ref[...], 0.0)
        box_slab = jnp.dot(t, w3_ref[...],
                           preferred_element_type=jnp.float32) + b3_ref[...]

        lane = jax.lax.broadcasted_iota(jnp.int32, cls_slab.shape, 1)
        cls_mask = lane < n_cls
        box_mask = (lane >= n_cls) & (lane < n_cls + 4)
        o_ref[0] = (jnp.where(cls_mask, cls_slab, 0.0)
                    + jnp.where(box_mask, jax.nn.sigmoid(box_slab), 0.0))


def attention_and_heads(mem, params):
    """mem: (B, N, C) bf16. Returns (logits (B,Q,n_cls) f32, boxes (B,Q,4) f32)."""
    B, N, C = mem.shape
    Q = params["query_embed"].shape[0]
    n_cls = params["cls_w"].shape[1]

    # Query projection hoisted out of Pallas: input-independent, constant-folded
    # under jit.  Fold the 1/sqrt(C) score scale into q and cast to bf16 once.
    q = (params["query_embed"] @ params["wq_proj"]) * (1.0 / math.sqrt(float(C)))
    q = q.astype(jnp.bfloat16)

    # Pad head weights so matmuls directly produce full-lane (C-wide) slabs.
    wc_pad = jnp.zeros((C, C), jnp.float32).at[:, :n_cls].set(params["cls_w"])
    bc_pad = jnp.zeros((1, C), jnp.float32).at[:, :n_cls].set(params["cls_b"])
    w3_pad = jnp.zeros((C, C), jnp.float32).at[:, n_cls:n_cls + 4].set(params["box_w3"])
    b3_pad = jnp.zeros((1, C), jnp.float32).at[:, n_cls:n_cls + 4].set(params["box_b3"])

    tile_k = _pick_kv_tile(N, target=1024)

    full = lambda arr: pl.BlockSpec(arr.shape, lambda b, k: (0,) * arr.ndim)
    slab = pl.pallas_call(
        partial(_attn_heads_kernel, n_cls),
        grid=(B, N // tile_k),
        in_specs=[
            pl.BlockSpec((Q, C), lambda b, k: (0, 0)),
            pl.BlockSpec((1, tile_k, C), lambda b, k: (b, k, 0)),
            full(wc_pad), full(bc_pad),
            full(params["box_w1"]), full(params["box_b1"]),
            full(params["box_w2"]), full(params["box_b2"]),
            full(w3_pad), full(b3_pad),
        ],
        out_specs=pl.BlockSpec((1, Q, C), lambda b, k: (b, 0, 0)),
        out_shape=jax.ShapeDtypeStruct((B, Q, C), jnp.float32),
        scratch_shapes=[
            pltpu.VMEM((Q, 1), jnp.float32),
            pltpu.VMEM((Q, 1), jnp.float32),
            pltpu.VMEM((Q, C), jnp.float32),
        ],
        compiler_params=pltpu.CompilerParams(
            dimension_semantics=("parallel", "arbitrary")),
    )(q, mem, wc_pad, bc_pad,
      params["box_w1"], params["box_b1"],
      params["box_w2"], params["box_b2"], w3_pad, b3_pad)

    logits = slab[:, :, :n_cls]
    boxes = slab[:, :, n_cls:n_cls + 4]
    return logits, boxes


# ----------------------------------------------------------------------------
# Full forward (glue in plain JAX)
# ----------------------------------------------------------------------------
def point_mlp_forward(xyz, params):
    feat, mem = pointwise_memory(xyz, params)          # (B,N,128) f32, bf16
    logits, boxes = attention_and_heads(mem, params)   # (B,Q,2), (B,Q,4)

    # _post_process vectorized over the whole batch (single softmax/argmax).
    probs = jax.nn.softmax(logits, axis=-1)
    scores = probs.max(-1)
    labels = probs.argmax(-1)
    return tuple(
        {"logits": logits[b], "bboxes": boxes[b], "scores": scores[b],
         "labels": labels[b], "feats": feat[b]}
        for b in range(xyz.shape[0])
    )


def init_params(key, encrypt_dim=8, d_model=128, num_classes=1,
                query_dim=50, num_queries=128):
    ks = jax.random.split(key, 16)
    w = lambda k, shape, s: jax.random.normal(k, shape, jnp.float32) * s
    return {
        # coord_encrypt: Conv1d(3->8, k=1, bias=False) + BatchNorm1d (eval stats)
        "ce_w": w(ks[0], (3, encrypt_dim), 0.5),
        "ce_gamma": jnp.ones((1, encrypt_dim), jnp.float32),
        "ce_beta": jnp.zeros((1, encrypt_dim), jnp.float32),
        "ce_mean": jnp.zeros((1, encrypt_dim), jnp.float32),
        "ce_var": jnp.ones((1, encrypt_dim), jnp.float32),
        # backbone shared MLP [8 -> 64 -> 128]
        "bb_w1": w(ks[1], (encrypt_dim, 64), 0.2),
        "bb_g1": jnp.ones((1, 64), jnp.float32),
        "bb_b1": jnp.zeros((1, 64), jnp.float32),
        "bb_m1": jnp.zeros((1, 64), jnp.float32),
        "bb_v1": jnp.ones((1, 64), jnp.float32),
        "bb_w2": w(ks[2], (64, d_model), 0.1),
        "bb_g2": jnp.ones((1, d_model), jnp.float32),
        "bb_b2": jnp.zeros((1, d_model), jnp.float32),
        "bb_m2": jnp.zeros((1, d_model), jnp.float32),
        "bb_v2": jnp.ones((1, d_model), jnp.float32),
        # query_embed = nn.Embedding(last_channels=128, 50) + projection to d_model
        "query_embed": w(ks[3], (num_queries, query_dim), 1.0),
        "wq_proj": w(ks[4], (query_dim, d_model), 0.1),
        # tf_class_embed = Linear(128, num_classes+1)
        "cls_w": w(ks[5], (d_model, num_classes + 1), 0.1),
        "cls_b": jnp.zeros((1, num_classes + 1), jnp.float32),
        # tf_bbox_embed = MLP(128, 128, 4, 3)
        "box_w1": w(ks[6], (d_model, d_model), 0.1),
        "box_b1": jnp.zeros((1, d_model), jnp.float32),
        "box_w2": w(ks[7], (d_model, d_model), 0.1),
        "box_b2": jnp.zeros((1, d_model), jnp.float32),
        "box_w3": w(ks[8], (d_model, 4), 0.1),
        "box_b3": jnp.zeros((1, 4), jnp.float32),
    }


if __name__ == "__main__":
    B, N = 2, 128  # small stand-ins for (batch, encrypt_pts)
    key = jax.random.PRNGKey(0)
    kp, kt, kx, ky = jax.random.split(key, 4)

    params = init_params(kp)

    # emulate _pre_process: xyz[..., 0] = delta_timestamp * 0.001, xyz[..., 1:3] = pixel coords
    t = jnp.cumsum(jax.random.uniform(kt, (B, N), jnp.float32), axis=-1)
    x_pix = jax.random.uniform(kx, (B, N), jnp.float32) * 346.0
    y_pix = jax.random.uniform(ky, (B, N), jnp.float32) * 260.0
    xyz = jnp.stack([(t - t[:, :1]) * 1e-3, x_pix, y_pix], axis=-1)  # (B, N, 3)

    fwd = jax.jit(point_mlp_forward)
    outputs = fwd(xyz, params)
    jax.block_until_ready(outputs)

    # light sanity checks on shapes / values
    assert outputs[0]["logits"].shape == (128, 2)
    assert outputs[0]["bboxes"].shape == (128, 4)
    assert outputs[0]["feats"].shape == (N, 128)
    assert bool(jnp.all(jnp.isfinite(outputs[0]["bboxes"])))
    assert bool(jnp.all(jnp.isfinite(outputs[0]["logits"])))
    print("KERNEL_OK")
</pallas_src>

<mosaic_0001>
module attributes {stable_mosaic.version = 11 : i64} {
  func.func @_pointwise_mem_kernel(%arg0: i32, %arg1: memref<256x3xf32, #tpu.memory_space<vmem>>, %arg2: memref<3x8xf32, #tpu.memory_space<vmem>>, %arg3: memref<1x8xf32, #tpu.memory_space<vmem>>, %arg4: memref<1x8xf32, #tpu.memory_space<vmem>>, %arg5: memref<8x64xf32, #tpu.memory_space<vmem>>, %arg6: memref<1x64xf32, #tpu.memory_space<vmem>>, %arg7: memref<1x64xf32, #tpu.memory_space<vmem>>, %arg8: memref<64x128xf32, #tpu.memory_space<vmem>>, %arg9: memref<1x128xf32, #tpu.memory_space<vmem>>, %arg10: memref<1x128xf32, #tpu.memory_space<vmem>>, %arg11: memref<1x128xf32, #tpu.memory_space<vmem>>, %arg12: memref<1x128xf32, #tpu.memory_space<vmem>>, %arg13: memref<1x128xf32, #tpu.memory_space<vmem>>, %arg14: memref<256x128xf32, #tpu.memory_space<vmem>>, %arg15: memref<256x128xbf16, #tpu.memory_space<vmem>>) attributes {dimension_semantics = [#tpu.dimension_semantics<parallel>], iteration_bounds = array<i64: 1>, scalar_prefetch = 0 : i64, scratch_operands = 0 : i64, tpu.core_type = #tpu.core_type<tc>, window_params = [{transform_indices = @transform_0, window_bounds = array<i64: 256, 3>}, {pipeline_mode = #tpu.pipeline_mode<synchronous>, transform_indices = @transform_1, window_bounds = array<i64: 3, 8>}, {pipeline_mode = #tpu.pipeline_mode<synchronous>, transform_indices = @transform_2, window_bounds = array<i64: 1, 8>}, {pipeline_mode = #tpu.pipeline_mode<synchronous>, transform_indices = @transform_3, window_bounds = array<i64: 1, 8>}, {pipeline_mode = #tpu.pipeline_mode<synchronous>, transform_indices = @transform_4, window_bounds = array<i64: 8, 64>}, {pipeline_mode = #tpu.pipeline_mode<synchronous>, transform_indices = @transform_5, window_bounds = array<i64: 1, 64>}, {pipeline_mode = #tpu.pipeline_mode<synchronous>, transform_indices = @transform_6, window_bounds = array<i64: 1, 64>}, {pipeline_mode = #tpu.pipeline_mode<synchronous>, transform_indices = @transform_7, window_bounds = array<i64: 64, 128>}, {pipeline_mode = #tpu.pipeline_mode<synchronous>, transform_indices = @transform_8, window_bounds = array<i64: 1, 128>}, {pipeline_mode = #tpu.pipeline_mode<synchronous>, transform_indices = @transform_9, window_bounds = array<i64: 1, 128>}, {pipeline_mode = #tpu.pipeline_mode<synchronous>, transform_indices = @transform_10, window_bounds = array<i64: 1, 128>}, {pipeline_mode = #tpu.pipeline_mode<synchronous>, transform_indices = @transform_11, window_bounds = array<i64: 1, 128>}, {pipeline_mode = #tpu.pipeline_mode<synchronous>, transform_indices = @transform_12, window_bounds = array<i64: 1, 128>}, {transform_indices = @transform_13, window_bounds = array<i64: 256, 128>}, {transform_indices = @transform_14, window_bounds = array<i64: 256, 128>}]} {
    %c0 = arith.constant 0 : index
    %c0_0 = arith.constant 0 : index
    %0 = vector.load %arg1[%c0, %c0_0] : memref<256x3xf32, #tpu.memory_space<vmem>>, vector<256x3xf32>
    %c0_1 = arith.constant 0 : index
    %c0_2 = arith.constant 0 : index
    %1 = vector.load %arg2[%c0_1, %c0_2] : memref<3x8xf32, #tpu.memory_space<vmem>>, vector<3x8xf32>
    %2 = vector.extract_strided_slice %0 {offsets = [0, 0], sizes = [256, 1], strides = [1, 1]} : vector<256x3xf32> to vector<256x1xf32>
    %3 = vector.extract_strided_slice %1 {offsets = [0, 0], sizes = [1, 8], strides = [1, 1]} : vector<3x8xf32> to vector<1x8xf32>
    %4 = vector.broadcast %2 : vector<256x1xf32> to vector<256x8xf32>
    %5 = vector.broadcast %3 : vector<1x8xf32> to vector<256x8xf32>
    %6 = arith.mulf %4, %5 : vector<256x8xf32>
    %7 = vector.extract_strided_slice %0 {offsets = [0, 1], sizes = [256, 1], strides = [1, 1]} : vector<256x3xf32> to vector<256x1xf32>
    %8 = vector.extract_strided_slice %1 {offsets = [1, 0], sizes = [1, 8], strides = [1, 1]} : vector<3x8xf32> to vector<1x8xf32>
    %9 = vector.broadcast %7 : vector<256x1xf32> to vector<256x8xf32>
    %10 = vector.broadcast %8 : vector<1x8xf32> to vector<256x8xf32>
    %11 = arith.mulf %9, %10 : vector<256x8xf32>
    %12 = arith.addf %6, %11 : vector<256x8xf32>
    %13 = vector.extract_strided_slice %0 {offsets = [0, 2], sizes = [256, 1], strides = [1, 1]} : vector<256x3xf32> to vector<256x1xf32>
    %14 = vector.extract_strided_slice %1 {offsets = [2, 0], sizes = [1, 8], strides = [1, 1]} : vector<3x8xf32> to vector<1x8xf32>
    %15 = vector.broadcast %13 : vector<256x1xf32> to vector<256x8xf32>
    %16 = vector.broadcast %14 : vector<1x8xf32> to vector<256x8xf32>
    %17 = arith.mulf %15, %16 : vector<256x8xf32>
    %18 = arith.addf %12, %17 : vector<256x8xf32>
    %c0_3 = arith.constant 0 : index
    %c0_4 = arith.constant 0 : index
    %19 = vector.load %arg3[%c0_3, %c0_4] : memref<1x8xf32, #tpu.memory_space<vmem>>, vector<1x8xf32>
    %20 = vector.broadcast %19 : vector<1x8xf32> to vector<256x8xf32>
    %21 = arith.mulf %18, %20 : vector<256x8xf32>
    %c0_5 = arith.constant 0 : index
    %c0_6 = arith.constant 0 : index
    %22 = vector.load %arg4[%c0_5, %c0_6] : memref<1x8xf32, #tpu.memory_space<vmem>>, vector<1x8xf32>
    %23 = vector.broadcast %22 : vector<1x8xf32> to vector<256x8xf32>
    %24 = arith.addf %21, %23 : vector<256x8xf32>
    %cst = arith.constant 0.000000e+00 : f32
    %25 = vector.broadcast %cst : f32 to vector<256x8xf32>
    %26 = arith.maximumf %24, %25 : vector<256x8xf32>
    %c0_7 = arith.constant 0 : index
    %c0_8 = arith.constant 0 : index
    %27 = vector.load %arg5[%c0_7, %c0_8] : memref<8x64xf32, #tpu.memory_space<vmem>>, vector<8x64xf32>
    %cst_9 = arith.constant dense<0.000000e+00> : vector<256x64xf32>
    %28 = tpu.matmul %26, %27, %cst_9 {dimension_numbers = #tpu.dot_dimension_numbers<[1], [0], [0], [1], [0, 0, 1, 1], [], []>} : vector<256x8xf32>, vector<8x64xf32>, vector<256x64xf32> -> vector<256x64xf32>
    %c0_10 = arith.constant 0 : index
    %c0_11 = arith.constant 0 : index
    %29 = vector.load %arg6[%c0_10, %c0_11] : memref<1x64xf32, #tpu.memory_space<vmem>>, vector<1x64xf32>
    %30 = vector.broadcast %29 : vector<1x64xf32> to vector<256x64xf32>
    %31 = arith.mulf %28, %30 : vector<256x64xf32>
    %c0_12 = arith.constant 0 : index
    %c0_13 = arith.constant 0 : index
    %32 = vector.load %arg7[%c0_12, %c0_13] : memref<1x64xf32, #tpu.memory_space<vmem>>, vector<1x64xf32>
    %33 = vector.broadcast %32 : vector<1x64xf32> to vector<256x64xf32>
    %34 = arith.addf %31, %33 : vector<256x64xf32>
    %cst_14 = arith.constant 0.000000e+00 : f32
    %35 = vector.broadcast %cst_14 : f32 to vector<256x64xf32>
    %36 = arith.maximumf %34, %35 : vector<256x64xf32>
    %c0_15 = arith.constant 0 : index
    %c0_16 = arith.constant 0 : index
    %37 = vector.load %arg8[%c0_15, %c0_16] : memref<64x128xf32, #tpu.memory_space<vmem>>, vector<64x128xf32>
    %cst_17 = arith.constant dense<0.000000e+00> : vector<256x128xf32>
    %38 = tpu.matmul %36, %37, %cst_17 {dimension_numbers = #tpu.dot_dimension_numbers<[1], [0], [0], [1], [0, 0, 1, 1], [], []>} : vector<256x64xf32>, vector<64x128xf32>, vector<256x128xf32> -> vector<256x128xf32>
    %c0_18 = arith.constant 0 : index
    %c0_19 = arith.constant 0 : index
    %39 = vector.load %arg9[%c0_18, %c0_19] : memref<1x128xf32, #tpu.memory_space<vmem>>, vector<1x128xf32>
    %40 = vector.broadcast %39 : vector<1x128xf32> to vector<256x128xf32>
    %41 = arith.mulf %38, %40 : vector<256x128xf32>
    %c0_20 = arith.constant 0 : index
    %c0_21 = arith.constant 0 : index
    %42 = vector.load %arg10[%c0_20, %c0_21] : memref<1x128xf32, #tpu.memory_space<vmem>>, vector<1x128xf32>
    %43 = vector.broadcast %42 : vector<1x128xf32> to vector<256x128xf32>
    %44 = arith.addf %41, %43 : vector<256x128xf32>
    %cst_22 = arith.constant 0.000000e+00 : f32
    %45 = vector.broadcast %cst_22 : f32 to vector<256x128xf32>
    %46 = arith.maximumf %44, %45 : vector<256x128xf32>
    %c0_23 = arith.constant 0 : index
    %c0_24 = arith.constant 0 : index
    %47 = vector.load %arg14[%c0_23, %c0_24] : memref<256x128xf32, #tpu.memory_space<vmem>>, vector<256x128xf32>
    tpu.vector_store %arg14[%c0_23, %c0_24], %46 {strides = array<i32>} : memref<256x128xf32, #tpu.memory_space<vmem>>, vector<256x128xf32>,
    %48 = vector.extract_strided_slice %0 {offsets = [0, 1], sizes = [256, 1], strides = [1, 1]} : vector<256x3xf32> to vector<256x1xf32>
    %c0_25 = arith.constant 0 : index
    %c0_26 = arith.constant 0 : index
    %49 = vector.load %arg11[%c0_25, %c0_26] : memref<1x128xf32, #tpu.memory_space<vmem>>, vector<1x128xf32>
    %50 = vector.broadcast %48 : vector<256x1xf32> to vector<256x128xf32>
    %51 = vector.broadcast %49 : vector<1x128xf32> to vector<256x128xf32>
    %52 = arith.mulf %50, %51 : vector<256x128xf32>
    %53 = vector.extract_strided_slice %0 {offsets = [0, 2], sizes = [256, 1], strides = [1, 1]} : vector<256x3xf32> to vector<256x1xf32>
    %c0_27 = arith.constant 0 : index
    %c0_28 = arith.constant 0 : index
    %54 = vector.load %arg12[%c0_27, %c0_28] : memref<1x128xf32, #tpu.memory_space<vmem>>, vector<1x128xf32>
    %55 = vector.broadcast %53 : vector<256x1xf32> to vector<256x128xf32>
    %56 = vector.broadcast %54 : vector<1x128xf32> to vector<256x128xf32>
    %57 = arith.mulf %55, %56 : vector<256x128xf32>
    %58 = arith.addf %52, %57 : vector<256x128xf32>
    %c0_29 = arith.constant 0 : index
    %c0_30 = arith.constant 0 : index
    %59 = vector.load %arg13[%c0_29, %c0_30] : memref<1x128xf32, #tpu.memory_space<vmem>>, vector<1x128xf32>
    %60 = vector.broadcast %59 : vector<1x128xf32> to vector<256x128xf32>
    %61 = arith.addf %58, %60 : vector<256x128xf32>
    %62 = math.sin %61 : vector<256x128xf32>
    %63 = arith.addf %46, %62 : vector<256x128xf32>
    %64 = arith.truncf %63 : vector<256x128xf32> to vector<256x128xbf16>
    %c0_31 = arith.constant 0 : index
    %c0_32 = arith.constant 0 : index
    %65 = vector.load %arg15[%c0_31, %c0_32] : memref<256x128xbf16, #tpu.memory_space<vmem>>, vector<256x128xbf16>
    tpu.vector_store %arg15[%c0_31, %c0_32], %64 {strides = array<i32>} : memref<256x128xbf16, #tpu.memory_space<vmem>>, vector<256x128xbf16>,
    return
  }
  func.func @transform_0(%arg0: i32) -> (i32, i32) {
    %c0_i32 = arith.constant 0 : i32
    %c0_i32_0 = arith.constant 0 : i32
    return %arg0, %c0_i32 : i32, i32
  }
  func.func @transform_1(%arg0: i32) -> (i32, i32) {
    %c0_i32 = arith.constant 0 : i32
    %c0_i32_0 = arith.constant 0 : i32
    %c0_i32_1 = arith.constant 0 : i32
    return %c0_i32, %c0_i32_0 : i32, i32
  }
  func.func @transform_2(%arg0: i32) -> (i32, i32) {
    %c0_i32 = arith.constant 0 : i32
    %c0_i32_0 = arith.constant 0 : i32
    %c0_i32_1 = arith.constant 0 : i32
    return %c0_i32, %c0_i32_0 : i32, i32
  }
  func.func @transform_3(%arg0: i32) -> (i32, i32) {
    %c0_i32 = arith.constant 0 : i32
    %c0_i32_0 = arith.constant 0 : i32
    %c0_i32_1 = arith.constant 0 : i32
    return %c0_i32, %c0_i32_0 : i32, i32
  }
  func.func @transform_4(%arg0: i32) -> (i32, i32) {
    %c0_i32 = arith.constant 0 : i32
    %c0_i32_0 = arith.constant 0 : i32
    %c0_i32_1 = arith.constant 0 : i32
    return %c0_i32, %c0_i32_0 : i32, i32
  }
  func.func @transform_5(%arg0: i32) -> (i32, i32) {
    %c0_i32 = arith.constant 0 : i32
    %c0_i32_0 = arith.constant 0 : i32
    %c0_i32_1 = arith.constant 0 : i32
    return %c0_i32, %c0_i32_0 : i32, i32
  }
  func.func @transform_6(%arg0: i32) -> (i32, i32) {
    %c0_i32 = arith.constant 0 : i32
    %c0_i32_0 = arith.constant 0 : i32
    %c0_i32_1 = arith.constant 0 : i32
    return %c0_i32, %c0_i32_0 : i32, i32
  }
  func.func @transform_7(%arg0: i32) -> (i32, i32) {
    %c0_i32 = arith.constant 0 : i32
    %c0_i32_0 = arith.constant 0 : i32
    %c0_i32_1 = arith.constant 0 : i32
    return %c0_i32, %c0_i32_0 : i32, i32
  }
  func.func @transform_8(%arg0: i32) -> (i32, i32) {
    %c0_i32 = arith.constant 0 : i32
    %c0_i32_0 = arith.constant 0 : i32
    %c0_i32_1 = arith.constant 0 : i32
    return %c0_i32, %c0_i32_0 : i32, i32
  }
  func.func @transform_9(%arg0: i32) -> (i32, i32) {
    %c0_i32 = arith.constant 0 : i32
    %c0_i32_0 = arith.constant 0 : i32
    %c0_i32_1 = arith.constant 0 : i32
    return %c0_i32, %c0_i32_0 : i32, i32
  }
  func.func @transform_10(%arg0: i32) -> (i32, i32) {
    %c0_i32 = arith.constant 0 : i32
    %c0_i32_0 = arith.constant 0 : i32
    %c0_i32_1 = arith.constant 0 : i32
    return %c0_i32, %c0_i32_0 : i32, i32
  }
  func.func @transform_11(%arg0: i32) -> (i32, i32) {
    %c0_i32 = arith.constant 0 : i32
    %c0_i32_0 = arith.constant 0 : i32
    %c0_i32_1 = arith.constant 0 : i32
    return %c0_i32, %c0_i32_0 : i32, i32
  }
  func.func @transform_12(%arg0: i32) -> (i32, i32) {
    %c0_i32 = arith.constant 0 : i32
    %c0_i32_0 = arith.constant 0 : i32
    %c0_i32_1 = arith.constant 0 : i32
    return %c0_i32, %c0_i32_0 : i32, i32
  }
  func.func @transform_13(%arg0: i32) -> (i32, i32) {
    %c0_i32 = arith.constant 0 : i32
    %c0_i32_0 = arith.constant 0 : i32
    return %arg0, %c0_i32 : i32, i32
  }
  func.func @transform_14(%arg0: i32) -> (i32, i32) {
    %c0_i32 = arith.constant 0 : i32
    %c0_i32_0 = arith.constant 0 : i32
    return %arg0, %c0_i32 : i32, i32
  }
}

module attributes {stable_mosaic.version = 11 : i64} {
  func.func @_attn_heads_kernel(%arg0: i32, %arg1: i32, %arg2: memref<128x128xbf16, #tpu.memory_space<vmem>>, %arg3: memref<1x128x128xbf16, #tpu.memory_space<vmem>>, %arg4: memref<128x128xf32, #tpu.memory_space<vmem>>, %arg5: memref<1x128xf32, #tpu.memory_space<vmem>>, %arg6: memref<128x128xf32, #tpu.memory_space<vmem>>, %arg7: memref<1x128xf32, #tpu.memory_space<vmem>>, %arg8: memref<128x128xf32, #tpu.memory_space<vmem>>, %arg9: memref<1x128xf32, #tpu.memory_space<vmem>>, %arg10: memref<128x128xf32, #tpu.memory_space<vmem>>, %arg11: memref<1x128xf32, #tpu.memory_space<vmem>>, %arg12: memref<1x128x128xf32, #tpu.memory_space<vmem>>, %arg13: memref<128x1xf32, #tpu.memory_space<vmem>>, %arg14: memref<128x1xf32, #tpu.memory_space<vmem>>, %arg15: memref<128x128xf32, #tpu.memory_space<vmem>>) attributes {dimension_semantics = [#tpu.dimension_semantics<parallel>, #tpu.dimension_semantics<arbitrary>], iteration_bounds = array<i64: 2, 1>, scalar_prefetch = 0 : i64, scratch_operands = 3 : i64, tpu.core_type = #tpu.core_type<tc>, window_params = [{pipeline_mode = #tpu.pipeline_mode<synchronous>, transform_indices = @transform_0, window_bounds = array<i64: 128, 128>}, {transform_indices = @transform_1, window_bounds = array<i64: 1, 128, 128>}, {pipeline_mode = #tpu.pipeline_mode<synchronous>, transform_indices = @transform_2, window_bounds = array<i64: 128, 128>}, {pipeline_mode = #tpu.pipeline_mode<synchronous>, transform_indices = @transform_3, window_bounds = array<i64: 1, 128>}, {pipeline_mode = #tpu.pipeline_mode<synchronous>, transform_indices = @transform_4, window_bounds = array<i64: 128, 128>}, {pipeline_mode = #tpu.pipeline_mode<synchronous>, transform_indices = @transform_5, window_bounds = array<i64: 1, 128>}, {pipeline_mode = #tpu.pipeline_mode<synchronous>, transform_indices = @transform_6, window_bounds = array<i64: 128, 128>}, {pipeline_mode = #tpu.pipeline_mode<synchronous>, transform_indices = @transform_7, window_bounds = array<i64: 1, 128>}, {pipeline_mode = #tpu.pipeline_mode<synchronous>, transform_indices = @transform_8, window_bounds = array<i64: 128, 128>}, {pipeline_mode = #tpu.pipeline_mode<synchronous>, transform_indices = @transform_9, window_bounds = array<i64: 1, 128>}, {transform_indices = @transform_10, window_bounds = array<i64: 1, 128, 128>}]} {
    %c0_i32 = arith.constant 0 : i32
    %0 = arith.cmpi eq, %arg1, %c0_i32 : i32
    %1 = arith.extui %0 : i1 to i32
    %c0_i32_0 = arith.constant 0 : i32
    %2 = arith.cmpi ne, %1, %c0_i32_0 : i32
    scf.if %2 {
      %cst_24 = arith.constant 0xFF800000 : f32
      %34 = vector.broadcast %cst_24 : f32 to vector<128x1xf32>
      %c0_25 = arith.constant 0 : index
      %c0_26 = arith.constant 0 : index
      %35 = vector.load %arg13[%c0_25, %c0_26] : memref<128x1xf32, #tpu.memory_space<vmem>>, vector<128x1xf32>
      tpu.vector_store %arg13[%c0_25, %c0_26], %34 {strides = array<i32>} : memref<128x1xf32, #tpu.memory_space<vmem>>, vector<128x1xf32>,
      %cst_27 = arith.constant 0.000000e+00 : f32
      %36 = vector.broadcast %cst_27 : f32 to vector<128x1xf32>
      %c0_28 = arith.constant 0 : index
      %c0_29 = arith.constant 0 : index
      %37 = vector.load %arg14[%c0_28, %c0_29] : memref<128x1xf32, #tpu.memory_space<vmem>>, vector<128x1xf32>
      tpu.vector_store %arg14[%c0_28, %c0_29], %36 {strides = array<i32>} : memref<128x1xf32, #tpu.memory_space<vmem>>, vector<128x1xf32>,
      %cst_30 = arith.constant 0.000000e+00 : f32
      %38 = vector.broadcast %cst_30 : f32 to vector<128x128xf32>
      %c0_31 = arith.constant 0 : index
      %c0_32 = arith.constant 0 : index
      %39 = vector.load %arg15[%c0_31, %c0_32] : memref<128x128xf32, #tpu.memory_space<vmem>>, vector<128x128xf32>
      tpu.vector_store %arg15[%c0_31, %c0_32], %38 {strides = array<i32>} : memref<128x128xf32, #tpu.memory_space<vmem>>, vector<128x128xf32>,
    } else {
    }
    %c0 = arith.constant 0 : index
    %c0_1 = arith.constant 0 : index
    %3 = vector.load %arg2[%c0, %c0_1] : memref<128x128xbf16, #tpu.memory_space<vmem>>, vector<128x128xbf16>
    %c0_2 = arith.constant 0 : index
    %c0_3 = arith.constant 0 : index
    %c0_4 = arith.constant 0 : index
    %4 = vector.load %arg3[%c0_2, %c0_3, %c0_4] : memref<1x128x128xbf16, #tpu.memory_space<vmem>>, vector<1x128x128xbf16>
    %5 = vector.shape_cast %4 : vector<1x128x128xbf16> to vector<128x128xbf16>
    %cst = arith.constant dense<0.000000e+00> : vector<128x128xf32>
    %6 = tpu.matmul %3, %5, %cst {dimension_numbers = #tpu.dot_dimension_numbers<[1], [1], [0], [0], [0, 0, 1, 0], [], []>} : vector<128x128xbf16>, vector<128x128xbf16>, vector<128x128xf32> -> vector<128x128xf32>
    %c0_5 = arith.constant 0 : index
    %c0_6 = arith.constant 0 : index
    %7 = vector.load %arg13[%c0_5, %c0_6] : memref<128x1xf32, #tpu.memory_space<vmem>>, vector<128x1xf32>
    %cst_7 = arith.constant dense<0xFF800000> : vector<128xf32>
    %8 = vector.multi_reduction <maximumf>, %6, %cst_7 [1] : vector<128x128xf32> to vector<128xf32>
    %9 = vector.shape_cast %8 : vector<128xf32> to vector<128x1xf32>
    %10 = arith.maximumf %7, %9 : vector<128x1xf32>
    %c0_8 = arith.constant 0 : index
    %c0_9 = arith.constant 0 : index
    %11 = vector.load %arg13[%c0_8, %c0_9] : memref<128x1xf32, #tpu.memory_space<vmem>>, vector<128x1xf32>
    %12 = arith.subf %11, %10 : vector<128x1xf32>
    %13 = math.exp %12 : vector<128x1xf32>
    %14 = vector.broadcast %10 : vector<128x1xf32> to vector<128x128xf32>
    %15 = arith.subf %6, %14 : vector<128x128xf32>
    %16 = math.exp %15 : vector<128x128xf32>
    %c0_10 = arith.constant 0 : index
    %c0_11 = arith.constant 0 : index
    %17 = vector.load %arg14[%c0_10, %c0_11] : memref<128x1xf32, #tpu.memory_space<vmem>>, vector<128x1xf32>
    %18 = arith.mulf %13, %17 : vector<128x1xf32>
    %cst_12 = arith.constant dense<0.000000e+00> : vector<128xf32>
    %19 = vector.multi_reduction <add>, %16, %cst_12 [1] : vector<128x128xf32> to vector<128xf32>
    %20 = vector.shape_cast %19 : vector<128xf32> to vector<128x1xf32>
    %21 = arith.addf %18, %20 : vector<128x1xf32>
    %c0_13 = arith.constant 0 : index
    %c0_14 = arith.constant 0 : index
    %22 = vector.load %arg14[%c0_13, %c0_14] : memref<128x1xf32, #tpu.memory_space<vmem>>, vector<128x1xf32>
    tpu.vector_store %arg14[%c0_13, %c0_14], %21 {strides = array<i32>} : memref<128x1xf32, #tpu.memory_space<vmem>>, vector<128x1xf32>,
    %c0_15 = arith.constant 0 : index
    %c0_16 = arith.constant 0 : index
    %23 = vector.load %arg15[%c0_15, %c0_16] : memref<128x128xf32, #tpu.memory_space<vmem>>, vector<128x128xf32>
    %24 = vector.broadcast %13 : vector<128x1xf32> to vector<128x128xf32>
    %25 = arith.mulf %24, %23 : vector<128x128xf32>
    %26 = arith.truncf %16 : vector<128x128xf32> to vector<128x128xbf16>
    %cst_17 = arith.constant dense<0.000000e+00> : vector<128x128xf32>
    %27 = tpu.matmul %26, %5, %cst_17 {dimension_numbers = #tpu.dot_dimension_numbers<[1], [0], [0], [1], [0, 0, 1, 1], [], []>} : vector<128x128xbf16>, vector<128x128xbf16>, vector<128x128xf32> -> vector<128x128xf32>
    %28 = arith.addf %25, %27 : vector<128x128xf32>
    %c0_18 = arith.constant 0 : index
    %c0_19 = arith.constant 0 : index
    %29 = vector.load %arg15[%c0_18, %c0_19] : memref<128x128xf32, #tpu.memory_space<vmem>>, vector<128x128xf32>
    tpu.vector_store %arg15[%c0_18, %c0_19], %28 {strides = array<i32>} : memref<128x128xf32, #tpu.memory_space<vmem>>, vector<128x128xf32>,
    %c0_20 = arith.constant 0 : index
    %c0_21 = arith.constant 0 : index
    %30 = vector.load %arg13[%c0_20, %c0_21] : memref<128x1xf32, #tpu.memory_space<vmem>>, vector<128x1xf32>
    tpu.vector_store %arg13[%c0_20, %c0_21], %10 {strides = array<i32>} : memref<128x1xf32, #tpu.memory_space<vmem>>, vector<128x1xf32>,
    %c0_i32_22 = arith.constant 0 : i32
    %31 = arith.cmpi eq, %arg1, %c0_i32_22 : i32
    %32 = arith.extui %31 : i1 to i32
    %c0_i32_23 = arith.constant 0 : i32
    %33 = arith.cmpi ne, %32, %c0_i32_23 : i32
    scf.if %33 {
      %c0_24 = arith.constant 0 : index
      %c0_25 = arith.constant 0 : index
      %34 = vector.load %arg15[%c0_24, %c0_25] : memref<128x128xf32, #tpu.memory_space<vmem>>, vector<128x128xf32>
      %c0_26 = arith.constant 0 : index
      %c0_27 = arith.constant 0 : index
      %35 = vector.load %arg14[%c0_26, %c0_27] : memref<128x1xf32, #tpu.memory_space<vmem>>, vector<128x1xf32>
      %36 = vector.broadcast %35 : vector<128x1xf32> to vector<128x128xf32>
      %37 = arith.divf %34, %36 : vector<128x128xf32>
      %c0_28 = arith.constant 0 : index
      %c0_29 = arith.constant 0 : index
      %38 = vector.load %arg4[%c0_28, %c0_29] : memref<128x128xf32, #tpu.memory_space<vmem>>, vector<128x128xf32>
      %cst_30 = arith.constant dense<0.000000e+00> : vector<128x128xf32>
      %39 = tpu.matmul %37, %38, %cst_30 {dimension_numbers = #tpu.dot_dimension_numbers<[1], [0], [0], [1], [0, 0, 1, 1], [], []>} : vector<128x128xf32>, vector<128x128xf32>, vector<128x128xf32> -> vector<128x128xf32>
      %c0_31 = arith.constant 0 : index
      %c0_32 = arith.constant 0 : index
      %40 = vector.load %arg5[%c0_31, %c0_32] : memref<1x128xf32, #tpu.memory_space<vmem>>, vector<1x128xf32>
      %41 = vector.broadcast %40 : vector<1x128xf32> to vector<128x128xf32>
      %42 = arith.addf %39, %41 : vector<128x128xf32>
      %c0_33 = arith.constant 0 : index
      %c0_34 = arith.constant 0 : index
      %43 = vector.load %arg6[%c0_33, %c0_34] : memref<128x128xf32, #tpu.memory_space<vmem>>, vector<128x128xf32>
      %cst_35 = arith.constant dense<0.000000e+00> : vector<128x128xf32>
      %44 = tpu.matmul %37, %43, %cst_35 {dimension_numbers = #tpu.dot_dimension_numbers<[1], [0], [0], [1], [0, 0, 1, 1], [], []>} : vector<128x128xf32>, vector<128x128xf32>, vector<128x128xf32> -> vector<128x128xf32>
      %c0_36 = arith.constant 0 : index
      %c0_37 = arith.constant 0 : index
      %45 = vector.load %arg7[%c0_36, %c0_37] : memref<1x128xf32, #tpu.memory_space<vmem>>, vector<1x128xf32>
      %46 = vector.broadcast %45 : vector<1x128xf32> to vector<128x128xf32>
      %47 = arith.addf %44, %46 : vector<128x128xf32>
      %cst_38 = arith.constant 0.000000e+00 : f32
      %48 = vector.broadcast %cst_38 : f32 to vector<128x128xf32>
      %49 = arith.maximumf %47, %48 : vector<128x128xf32>
      %c0_39 = arith.constant 0 : index
      %c0_40 = arith.constant 0 : index
      %50 = vector.load %arg8[%c0_39, %c0_40] : memref<128x128xf32, #tpu.memory_space<vmem>>, vector<128x128xf32>
      %cst_41 = arith.constant dense<0.000000e+00> : vector<128x128xf32>
      %51 = tpu.matmul %49, %50, %cst_41 {dimension_numbers = #tpu.dot_dimension_numbers<[1], [0], [0], [1], [0, 0, 1, 1], [], []>} : vector<128x128xf32>, vector<128x128xf32>, vector<128x128xf32> -> vector<128x128xf32>
      %c0_42 = arith.constant 0 : index
      %c0_43 = arith.constant 0 : index
      %52 = vector.load %arg9[%c0_42, %c0_43] : memref<1x128xf32, #tpu.memory_space<vmem>>, vector<1x128xf32>
      %53 = vector.broadcast %52 : vector<1x128xf32> to vector<128x128xf32>
      %54 = arith.addf %51, %53 : vector<128x128xf32>
      %cst_44 = arith.constant 0.000000e+00 : f32
      %55 = vector.broadcast %cst_44 : f32 to vector<128x128xf32>
      %56 = arith.maximumf %54, %55 : vector<128x128xf32>
      %c0_45 = arith.constant 0 : index
      %c0_46 = arith.constant 0 : index
      %57 = vector.load %arg10[%c0_45, %c0_46] : memref<128x128xf32, #tpu.memory_space<vmem>>, vector<128x128xf32>
      %cst_47 = arith.constant dense<0.000000e+00> : vector<128x128xf32>
      %58 = tpu.matmul %56, %57, %cst_47 {dimension_numbers = #tpu.dot_dimension_numbers<[1], [0], [0], [1], [0, 0, 1, 1], [], []>} : vector<128x128xf32>, vector<128x128xf32>, vector<128x128xf32> -> vector<128x128xf32>
      %c0_48 = arith.constant 0 : index
      %c0_49 = arith.constant 0 : index
      %59 = vector.load %arg11[%c0_48, %c0_49] : memref<1x128xf32, #tpu.memory_space<vmem>>, vector<1x128xf32>
      %60 = vector.broadcast %59 : vector<1x128xf32> to vector<128x128xf32>
      %61 = arith.addf %58, %60 : vector<128x128xf32>
      %62 = tpu.iota {dimensions = array<i32: 1>} : vector<128x128xi32>
      %c2_i32 = arith.constant 2 : i32
      %63 = vector.broadcast %c2_i32 : i32 to vector<128x128xi32>
      %64 = arith.cmpi slt, %62, %63 : vector<128x128xi32>
      %c2_i32_50 = arith.constant 2 : i32
      %65 = vector.broadcast %c2_i32_50 : i32 to vector<128x128xi32>
      %66 = arith.cmpi sge, %62, %65 : vector<128x128xi32>
      %c6_i32 = arith.constant 6 : i32
      %67 = vector.broadcast %c6_i32 : i32 to vector<128x128xi32>
      %68 = arith.cmpi slt, %62, %67 : vector<128x128xi32>
      %69 = arith.andi %66, %68 : vector<128x128xi1>
      %cst_51 = arith.constant 0.000000e+00 : f32
      %70 = vector.broadcast %cst_51 : f32 to vector<128x128xf32>
      %71 = arith.select %64, %42, %70 : vector<128x128xi1>, vector<128x128xf32>
      %72 = arith.negf %61 : vector<128x128xf32>
      %73 = math.exp %72 : vector<128x128xf32>
      %cst_52 = arith.constant 1.000000e+00 : f32
      %74 = vector.broadcast %cst_52 : f32 to vector<128x128xf32>
      %75 = arith.addf %74, %73 : vector<128x128xf32>
      %76 = arith.divf %74, %75 : vector<128x128xf32>
      %cst_53 = arith.constant 0.000000e+00 : f32
      %77 = vector.broadcast %cst_53 : f32 to vector<128x128xf32>
      %78 = arith.select %69, %76, %77 : vector<128x128xi1>, vector<128x128xf32>
      %79 = arith.addf %71, %78 : vector<128x128xf32>
      %c0_54 = arith.constant 0 : index
      %c0_55 = arith.constant 0 : index
      %c0_56 = arith.constant 0 : index
      %80 = vector.load %arg12[%c0_54, %c0_55, %c0_56] : memref<1x128x128xf32, #tpu.memory_space<vmem>>, vector<1x128x128xf32>
      %81 = vector.shape_cast %80 : vector<1x128x128xf32> to vector<128x128xf32>
      %82 = vector.shape_cast %79 : vector<128x128xf32> to vector<1x128x128xf32>
      tpu.vector_store %arg12[%c0_54, %c0_55, %c0_56], %82 {strides = array<i32>} : memref<1x128x128xf32, #tpu.memory_space<vmem>>, vector<1x128x128xf32>,
    } else {
    }
    return
  }
  func.func @transform_0(%arg0: i32, %arg1: i32) -> (i32, i32) {
    %c0_i32 = arith.constant 0 : i32
    %c0_i32_0 = arith.constant 0 : i32
    %c0_i32_1 = arith.constant 0 : i32
    return %c0_i32, %c0_i32_0 : i32, i32
  }
  func.func @transform_1(%arg0: i32, %arg1: i32) -> (i32, i32, i32) {
    %c0_i32 = arith.constant 0 : i32
    %c0_i32_0 = arith.constant 0 : i32
    return %arg0, %arg1, %c0_i32 : i32, i32, i32
  }
  func.func @transform_2(%arg0: i32, %arg1: i32) -> (i32, i32) {
    %c0_i32 = arith.constant 0 : i32
    %c0_i32_0 = arith.constant 0 : i32
    %c0_i32_1 = arith.constant 0 : i32
    return %c0_i32, %c0_i32_0 : i32, i32
  }
  func.func @transform_3(%arg0: i32, %arg1: i32) -> (i32, i32) {
    %c0_i32 = arith.constant 0 : i32
    %c0_i32_0 = arith.constant 0 : i32
    %c0_i32_1 = arith.constant 0 : i32
    return %c0_i32, %c0_i32_0 : i32, i32
  }
  func.func @transform_4(%arg0: i32, %arg1: i32) -> (i32, i32) {
    %c0_i32 = arith.constant 0 : i32
    %c0_i32_0 = arith.constant 0 : i32
    %c0_i32_1 = arith.constant 0 : i32
    return %c0_i32, %c0_i32_0 : i32, i32
  }
  func.func @transform_5(%arg0: i32, %arg1: i32) -> (i32, i32) {
    %c0_i32 = arith.constant 0 : i32
    %c0_i32_0 = arith.constant 0 : i32
    %c0_i32_1 = arith.constant 0 : i32
    return %c0_i32, %c0_i32_0 : i32, i32
  }
  func.func @transform_6(%arg0: i32, %arg1: i32) -> (i32, i32) {
    %c0_i32 = arith.constant 0 : i32
    %c0_i32_0 = arith.constant 0 : i32
    %c0_i32_1 = arith.constant 0 : i32
    return %c0_i32, %c0_i32_0 : i32, i32
  }
  func.func @transform_7(%arg0: i32, %arg1: i32) -> (i32, i32) {
    %c0_i32 = arith.constant 0 : i32
    %c0_i32_0 = arith.constant 0 : i32
    %c0_i32_1 = arith.constant 0 : i32
    return %c0_i32, %c0_i32_0 : i32, i32
  }
  func.func @transform_8(%arg0: i32, %arg1: i32) -> (i32, i32) {
    %c0_i32 = arith.constant 0 : i32
    %c0_i32_0 = arith.constant 0 : i32
    %c0_i32_1 = arith.constant 0 : i32
    return %c0_i32, %c0_i32_0 : i32, i32
  }
  func.func @transform_9(%arg0: i32, %arg1: i32) -> (i32, i32) {
    %c0_i32 = arith.constant 0 : i32
    %c0_i32_0 = arith.constant 0 : i32
    %c0_i32_1 = arith.constant 0 : i32
    return %c0_i32, %c0_i32_0 : i32, i32
  }
  func.func @transform_10(%arg0: i32, %arg1: i32) -> (i32, i32, i32) {
    %c0_i32 = arith.constant 0 : i32
    %c0_i32_0 = arith.constant 0 : i32
    %c0_i32_1 = arith.constant 0 : i32
    return %arg0, %c0_i32, %c0_i32_0 : i32, i32, i32
  }
}

</mosaic_0001>

<bundles_post_ra>
// kernel: point_mlp_forward.2
= control target key start
LH: loop header
LB: loop body
LE: loop exit
PB: predicated region body
PF: predicated region fallthrough
CT: control target
= control target key end

     0   :  { %v12113_v0 = vmov 1   ;;  %v12115_v1 = vmov 0   ;;  %v12117_v5 = vmov 2   ;;  %v239_v27 = vlaneseq  ;;  %s12098_s0 = inlined_call_operand.vmem [shape: f32[256,3], index: 0, kind: input, shape index: {}]   ;;  %s12099_s4 = inlined_call_operand.vmem [shape: f32[8,64], index: 4, kind: input, shape index: {}]   ;;  %s12100_s1 = inlined_call_operand.vmem [shape: f32[3,8], index: 1, kind: input, shape index: {}]   ;;  %s12101_s2 = inlined_call_operand.vmem [shape: f32[1,8], index: 2, kind: input, shape index: {}]   ;;  %s12102_s3 = inlined_call_operand.vmem [shape: f32[1,8], index: 3, kind: input, shape index: {}]   ;;  %s12103_s11 = inlined_call_operand.vmem [shape: f32[1,128], index: 11, kind: input, shape index: {}]   ;;  %s12104_s10 = inlined_call_operand.vmem [shape: f32[1,128], index: 10, kind: input, shape index: {}]   ;;  %s12105_s12 = inlined_call_operand.vmem [shape: f32[1,128], index: 12, kind: input, shape index: {}]   ;;  %s12106_s7 = inlined_call_operand.vmem [shape: f32[64,128], index: 7, kind: input, shape index: {}]   ;;  %s12107_s5 = inlined_call_operand.vmem [shape: f32[1,64], index: 5, kind: input, shape index: {}]   ;;  %s12108_s6 = inlined_call_operand.vmem [shape: f32[1,64], index: 6, kind: input, shape index: {}]   ;;  %s12109_s8 = inlined_call_operand.vmem [shape: f32[1,128], index: 8, kind: input, shape index: {}]   ;;  %s12110_s9 = inlined_call_operand.vmem [shape: f32[1,128], index: 9, kind: input, shape index: {}]   ;;  %s12111_s13 = inlined_call_operand.vmem [shape: f32[256,128], index: 13, kind: output, shape index: {0}]   ;;  %s12112_s14 = inlined_call_operand.vmem [shape: bf16[256,128], index: 14, kind: output, shape index: {1}]  }
   0x1   :  { %6067 = vset.pattern.permute.xlu0 %v12113_v0  ;;  %6069 = vset.pattern.permute.xlu1 %v12115_v1  ;;  %v6352_v2 = vld [vmem:[%s12098_s0 + $0x8] sm:$0xff]  ;;  %v46_v3 = vld [vmem:[%s12098_s0] sm:$0xff]  ;;  %v49_v4 = vld [vmem:[%s12098_s0 + $0x18] sm:$0xff]  ;;  %vm778_vm0 = vcmask 64512  }
   0x2   :  { %86 = vperm.xlu1 %6069, %v6352_v2   ;;  %276 = vperm.xlu0 %6067, %v46_v3   ;;  %v51_v6 = vld [vmem:[%s12098_s0 + $0x28] sm:$0xff]  ;;  %v48_v7 = vld [vmem:[%s12098_s0 + $0x10] sm:$0xff]  ;;  %v53_v8 = vld [vmem:[%s12098_s0 + $0x38] sm:$0xff]  ;;  %v240_v28 = vshrl.u32 %v239_v27, 7 }
   0x3   :  { %v55_v9 = vld [vmem:[%s12098_s0 + $0x48] sm:$0xff]  ;;  %v6382_v10 = vld [vmem:[%s12098_s0 + $0x58] sm:$0xff]  ;;  %v50_v13 = vld [vmem:[%s12098_s0 + $0x20] sm:$0xff] }
   0x4   :  { %v6388_v11 = vld [vmem:[%s12098_s0 + $0x68] sm:$0xff]  ;;  %v6395_v12 = vld [vmem:[%s12098_s0 + $0x78] sm:$0xff]  ;;  %v52_v18 = vld [vmem:[%s12098_s0 + $0x30] sm:$0xff]  ;;  %v405_v30 = vsub.s32 1, %v240_v28  ;;  %v241_v31 = vsub.s32 0, %v240_v28  ;;  %v601_v36 = vsub.s32 2, %v240_v28 }
   0x5   :  { %v6405_v14 = vld [vmem:[%s12098_s0 + $0x88] sm:$0xff]  ;;  %v6412_v15 = vld [vmem:[%s12098_s0 + $0x98] sm:$0xff]  ;;  %v54_v23 = vld [vmem:[%s12098_s0 + $0x40] sm:$0xff] }
   0x6   :  { %6070 = vset.pattern.permute.xlu1 %v12113_v0  ;;  %6068 = vset.pattern.permute.xlu0 %v12115_v1  ;;  %v6418_v16 = vld [vmem:[%s12098_s0 + $0xa8] sm:$0xff]  ;;  %v6424_v17 = vld [vmem:[%s12098_s0 + $0xb8] sm:$0xff]  ;;  %v777_v24 = vld [vmem:[%s12099_s4] sm:$0xff] }
   0x7   :  { %280 = vperm.xlu1 %6070, %v6352_v2   ;;  %81 = vperm.xlu0 %6068, %v46_v3   ;;  %v6434_v19 = vld [vmem:[%s12098_s0 + $0xc8] sm:$0xff]  ;;  %v6441_v20 = vld [vmem:[%s12098_s0 + $0xd8] sm:$0xff]  ;;  %v56_v25 = vld [vmem:[%s12098_s0 + $0x50] sm:$0xff] }
   0x8   :  { %v6448_v21 = vld [vmem:[%s12098_s0 + $0xe8] sm:$0xff]  ;;  %v77_v22 = vld [vmem:[%s12098_s0 + $0xf8] sm:$0xff]  ;;  %5792 = vmatprep.subr.mxu0 %v777_v24  ;;  %v58_v26 = vld [vmem:[%s12098_s0 + $0x60] sm:$0xff] }
   0x9   :  { %5793 = vmatpush3.msra.mxu0 %v777_v24  ;;  %v60_v29 = vld [vmem:[%s12098_s0 + $0x70] sm:$0xff]  ;;  %v78_v34 = vld [vmem:[%s12100_s1] sm:$0x7] }
   0xa   :  { %v6501_v35 = vrot.slane %v78_v34, %v405_v30  ;;  %v6503_v37 = vrot.slane %v78_v34, %v241_v31  ;;  %v6511_v42 = vrot.slane %v78_v34, %v601_v36  ;;  %v6523_v47 = vld [vmem:[%s12101_s2] ss:$0 sm:$0xff] }
   0xb   :  { %6071 = vset.pattern.permute.xlu1 %v12117_v5  ;;  %96 = vperm.xlu0 %6068, %v49_v4   ;;  %v6530_v50 = vld [vmem:[%s12102_s3] ss:$0 sm:$0xff] }
   0xc   :  { %472 = vperm.xlu1 %6071, %v46_v3   ;;  %v62_v55 = vld [vmem:[%s12098_s0 + $0x80] sm:$0xff] }
   0xf   :  { %106 = vperm.xlu0 %6068, %v51_v6  }
  0x10   :  { %6072 = vset.pattern.permute.xlu1 %v12115_v1 }
  0x11   :  { %91 = vperm.xlu1 %6072, %v48_v7  }
  0x13   :  { %116 = vperm.xlu0 %6068, %v53_v8  }
  0x15   :  { %6073 = vset.pattern.permute.xlu1 %v12113_v0 }
  0x16   :  { %284 = vperm.xlu1 %6073, %v48_v7  }
  0x17   :  { %126 = vperm.xlu0 %6068, %v55_v9  }
  0x1a   :  { %288 = vperm.xlu1 %6073, %v49_v4  }
  0x1b   :  { %136 = vperm.xlu0 %6068, %v6382_v10  }
  0x1e   :  { %6074 = vset.pattern.permute.xlu1 %v12117_v5 }
  0x1f   :  { %480 = vperm.xlu1 %6074, %v48_v7   ;;  %146 = vperm.xlu0 %6068, %v6388_v11  }
  0x23   :  { %6075 = vset.pattern.permute.xlu1 %v12115_v1  ;;  %156 = vperm.xlu0 %6068, %v6395_v12  }
  0x24   :  { %101 = vperm.xlu1 %6075, %v50_v13  }
  0x27   :  { %166 = vperm.xlu0 %6068, %v6405_v14  }
  0x28   :  { %6076 = vset.pattern.permute.xlu1 %v12113_v0 }
  0x29   :  { %292 = vperm.xlu1 %6076, %v50_v13  }
  0x2b   :  { %176 = vperm.xlu0 %6068, %v6412_v15  }
  0x2d   :  { %296 = vperm.xlu1 %6076, %v51_v6  }
  0x2f   :  { %186 = vperm.xlu0 %6068, %v6418_v16  }
  0x31   :  { %6077 = vset.pattern.permute.xlu1 %v12117_v5 }
  0x32   :  { %488 = vperm.xlu1 %6077, %v50_v13  }
  0x33   :  { %196 = vperm.xlu0 %6068, %v6424_v17  }
  0x36   :  { %6078 = vset.pattern.permute.xlu1 %v12115_v1 }
  0x37   :  { %111 = vperm.xlu1 %6078, %v52_v18   ;;  %206 = vperm.xlu0 %6068, %v6434_v19  }
  0x3b   :  { %6079 = vset.pattern.permute.xlu1 %v12113_v0  ;;  %216 = vperm.xlu0 %6068, %v6441_v20  }
  0x3c   :  { %300 = vperm.xlu1 %6079, %v52_v18  }
  0x3f   :  { %226 = vperm.xlu0 %6068, %v6448_v21  }
  0x40   :  { %304 = vperm.xlu1 %6079, %v53_v8  }
  0x43   :  { %236 = vperm.xlu0 %6068, %v77_v22  }
  0x44   :  { %6080 = vset.pattern.permute.xlu1 %v12117_v5 }
  0x45   :  { %496 = vperm.xlu1 %6080, %v52_v18  }
  0x47   :  { %6116 = vset.pattern.permute.xlu0 %v12117_v5 }
  0x48   :  { %476 = vperm.xlu0 %6116, %v6352_v2  }
  0x49   :  { %6081 = vset.pattern.permute.xlu1 %v12115_v1 }
  0x4a   :  { %121 = vperm.xlu1 %6081, %v54_v23  }
  0x4c   :  { %484 = vperm.xlu0 %6116, %v49_v4   ;;  %v64_v4 = vld [vmem:[%s12098_s0 + $0x90] sm:$0xff] }
  0x4e   :  { %6082 = vset.pattern.permute.xlu1 %v12113_v0 }
  0x4f   :  { %308 = vperm.xlu1 %6082, %v54_v23  }
  0x50   :  { %492 = vperm.xlu0 %6116, %v51_v6  }
  0x53   :  { %312 = vperm.xlu1 %6082, %v55_v9  }
  0x54   :  { %500 = vperm.xlu0 %6116, %v53_v8  }
  0x57   :  { %6083 = vset.pattern.permute.xlu1 %v12117_v5 }
  0x58   :  { %504 = vperm.xlu1 %6083, %v54_v23   ;;  %508 = vperm.xlu0 %6116, %v55_v9  }
  0x5c   :  { %6084 = vset.pattern.permute.xlu1 %v12115_v1  ;;  %516 = vperm.xlu0 %6116, %v6382_v10  }
  0x5d   :  { %131 = vperm.xlu1 %6084, %v56_v25  }
  0x60   :  { %524 = vperm.xlu0 %6116, %v6388_v11  }
  0x61   :  { %6085 = vset.pattern.permute.xlu1 %v12113_v0 }
  0x62   :  { %316 = vperm.xlu1 %6085, %v56_v25  }
  0x64   :  { %532 = vperm.xlu0 %6116, %v6395_v12  }
  0x66   :  { %320 = vperm.xlu1 %6085, %v6382_v10  }
  0x68   :  { %540 = vperm.xlu0 %6116, %v6405_v14  }
  0x6a   :  { %6086 = vset.pattern.permute.xlu1 %v12117_v5 }
  0x6b   :  { %512 = vperm.xlu1 %6086, %v56_v25  }
  0x6c   :  { %548 = vperm.xlu0 %6116, %v6412_v15  }
  0x6f   :  { %6087 = vset.pattern.permute.xlu1 %v12115_v1 }
  0x70   :  { %141 = vperm.xlu1 %6087, %v58_v26   ;;  %556 = vperm.xlu0 %6116, %v6418_v16  }
  0x74   :  { %6088 = vset.pattern.permute.xlu1 %v12113_v0  ;;  %564 = vperm.xlu0 %6116, %v6424_v17  }
  0x75   :  { %324 = vperm.xlu1 %6088, %v58_v26  }
  0x78   :  { %572 = vperm.xlu0 %6116, %v6434_v19  }
  0x79   :  { %328 = vperm.xlu1 %6088, %v6388_v11  }
  0x7c   :  { %580 = vperm.xlu0 %6116, %v6441_v20  }
  0x7d   :  { %6089 = vset.pattern.permute.xlu1 %v12117_v5 }
  0x7e   :  { %520 = vperm.xlu1 %6089, %v58_v26  }
  0x80   :  { %588 = vperm.xlu0 %6116, %v6448_v21  }
  0x81   :  { %v6493_v32 = vpop.permute.xlu1 %86  ;;  %v6495_v33 = vpop.permute.xlu0 %276 }
  0x82   :  { %6090 = vset.pattern.permute.xlu1 %v12115_v1  ;;  %v407_v38 = vmul.f32 %v6501_v35, %v6495_v33  ;;  %v244_v31 = vmul.f32 %v6503_v37, %v6493_v32 }
  0x83   :  { %151 = vperm.xlu1 %6090, %v60_v29  }
  0x84   :  { %596 = vperm.xlu0 %6116, %v77_v22  }
  0x86   :  { %v6507_v39 = vpop.permute.xlu1 %280  ;;  %v82_v40 = vpop.permute.xlu0 %81 }
  0x87   :  { %6091 = vset.pattern.permute.xlu1 %v12113_v0  ;;  %v243_v41 = vmul.f32 %v6503_v37, %v82_v40  ;;  %v408_v28 = vmul.f32 %v6501_v35, %v6507_v39 }
  0x88   :  { %332 = vperm.xlu1 %6091, %v60_v29  }
  0x89   :  { %v439_v43 = vadd.f32 %v407_v38, %v243_v41  ;;  %v440_v38 = vadd.f32 %v408_v28, %v244_v31 }
  0x8a   :  { %v6513_v44 = vpop.permute.xlu0 %96 }
  0x8b   :  { %v6515_v45 = vpop.permute.xlu1 %472 }
  0x8c   :  { %v603_v46 = vmul.f32 %v6511_v42, %v6515_v45  ;;  %336 = vperm.xlu1 %6091, %v6395_v12  }
  0x8e   :  { %v635_v48 = vadd.f32 %v603_v46, %v439_v43  ;;  %v6525_v49 = vpop.permute.xlu0 %106 }
  0x90   :  { %6092 = vset.pattern.permute.xlu1 %v12117_v5  ;;  %v92_v51 = vpop.permute.xlu1 %91  ;;  %v674_v52 = vmul.f32 %v6523_v47, %v635_v48  ;;  %v6631_v48 = vld [vmem:[%s12104_s10] ss:$0 sm:$0xff] }
  0x91   :  { %528 = vperm.xlu1 %6092, %v60_v29   ;;  %v245_v25 = vmul.f32 %v6503_v37, %v92_v51 }
  0x92   :  { %v6534_v53 = vpop.permute.xlu0 %116  ;;  %v713_v54 = vadd.f32 %v6530_v50, %v674_v52  ;;  %v68_v52 = vld [vmem:[%s12098_s0 + $0xb0] sm:$0xff] }
  0x94   :  { %v745_v56 = vmax.f32 %v713_v54, 0.0  ;;  %v1689_v54 = vmul.f32 %v6631_v48, %v6495_v33 }
  0x95   :  { %6093 = vset.pattern.permute.xlu1 %v12115_v1  ;;  %v6541_v57 = vpop.permute.xlu1 %284 }
  0x96   :  { %161 = vperm.xlu1 %6093, %v62_v55   ;;  %5794 = vmatprep.mubr.msk.f32.mxu0 %vm778_vm0, %v745_v56  ;;  %v6544_v58 = vpop.permute.xlu0 %126  ;;  %v409_v24 = vmul.f32 %v6501_v35, %v6541_v57 }
  0x98   :  { %v441_v29 = vadd.f32 %v409_v24, %v245_v25 }
  0x99   :  { %v6546_v59 = vpop.permute.xlu1 %288 }
  0x9a   :  { %6094 = vset.pattern.permute.xlu1 %v12113_v0  ;;  %v6549_v60 = vpop.permute.xlu0 %136  ;;  %v410_v56 = vmul.f32 %v6501_v35, %v6546_v59 }
  0x9b   :  { %340 = vperm.xlu1 %6094, %v62_v55  }
  0x9e   :  { %v6551_v61 = vpop.permute.xlu1 %480  ;;  %v6553_v62 = vpop.permute.xlu0 %146 }
  0x9f   :  { %344 = vperm.xlu1 %6094, %v6405_v14   ;;  %v66_v14 = vld [vmem:[%s12098_s0 + $0xa0] sm:$0xff]  ;;  %v605_v26 = vmul.f32 %v6511_v42, %v6551_v61 }
  0xa1   :  { %v637_v34 = vadd.f32 %v605_v26, %v441_v29 }
  0xa2   :  { %v6556_v63 = vpop.permute.xlu0 %156 }
  0xa3   :  { %6095 = vset.pattern.permute.xlu1 %v12117_v5  ;;  %v6559_v2 = vpop.permute.xlu1 %101  ;;  %v676_v43 = vmul.f32 %v6523_v47, %v637_v34 }
  0xa4   :  { %536 = vperm.xlu1 %6095, %v62_v55   ;;  %v246_v55 = vmul.f32 %v6503_v37, %v6513_v44  ;;  %v247_v26 = vmul.f32 %v6503_v37, %v6559_v2 }
  0xa5   :  { %v715_v33 = vadd.f32 %v6530_v50, %v676_v43  ;;  %v6665_v43 = vld [vmem:[%s12105_s12] ss:$0 sm:$0xff] }
  0xa6   :  { %v6561_v3 = vpop.permute.xlu0 %166  ;;  %v442_v28 = vadd.f32 %v410_v56, %v246_v55 }
  0xa8   :  { %6096 = vset.pattern.permute.xlu1 %v12115_v1  ;;  %v6567_v6 = vpop.permute.xlu1 %292 }
  0xa9   :  { %171 = vperm.xlu1 %6096, %v64_v4  }
  0xaa   :  { %v6569_v7 = vpop.permute.xlu0 %176 }
  0xac   :  { %v6571_v8 = vpop.permute.xlu1 %296 }
  0xad   :  { %6097 = vset.pattern.permute.xlu1 %v12113_v0 }
  0xae   :  { %348 = vperm.xlu1 %6097, %v64_v4   ;;  %v6574_v9 = vpop.permute.xlu0 %186 }
  0xb1   :  { %v6576_v10 = vpop.permute.xlu1 %488 }
  0xb2   :  { %352 = vperm.xlu1 %6097, %v6412_v15   ;;  %v6579_v11 = vpop.permute.xlu0 %196 }
  0xb6   :  { %6098 = vset.pattern.permute.xlu1 %v12117_v5  ;;  %v6582_v12 = vpop.permute.xlu1 %111  ;;  %v6584_v13 = vpop.permute.xlu0 %206 }
  0xb7   :  { %544 = vperm.xlu1 %6098, %v64_v4  }
  0xba   :  { %v6589_v18 = vpop.permute.xlu0 %216 }
  0xbb   :  { %6099 = vset.pattern.permute.xlu1 %v12115_v1  ;;  %v6592_v22 = vpop.permute.xlu1 %300 }
  0xbc   :  { %181 = vperm.xlu1 %6099, %v66_v14  }
  0xbe   :  { %v6594_v15 = vpop.permute.xlu0 %226 }
  0xbf   :  { %v6596_v23 = vpop.permute.xlu1 %304 }
  0xc0   :  { %6100 = vset.pattern.permute.xlu1 %v12113_v0 }
  0xc1   :  { %356 = vperm.xlu1 %6100, %v66_v14  }
  0xc2   :  { %v6604_v27 = vpop.permute.xlu0 %236 }
  0xc4   :  { %v6608_v30 = vpop.permute.xlu1 %496 }
  0xc5   :  { %360 = vperm.xlu1 %6100, %v6418_v16   ;;  %v6624_v16 = vld [vmem:[%s12103_s11] ss:$0 sm:$0xff] }
  0xc6   :  { %v1728_v4 = vmul.f32 %v6624_v16, %v6515_v45  ;;  %v607_v45 = vmul.f32 %v6511_v42, %v6576_v10  ;;  %v1730_v2 = vmul.f32 %v6624_v16, %v6551_v61  ;;  %v412_v61 = vmul.f32 %v6501_v35, %v6571_v8 }
  0xc7   :  { %v6613_v36 = vpop.permute.xlu0 %476 }
  0xc8   :  { %v604_v40 = vmul.f32 %v6511_v42, %v6613_v36  ;;  %v1760_v34 = vadd.f32 %v1728_v4, %v1689_v54  ;;  %v1691_v54 = vmul.f32 %v6631_v48, %v6541_v57  ;;  %v248_v4 = vmul.f32 %v6503_v37, %v6525_v49 }
  0xc9   :  { %6101 = vset.pattern.permute.xlu1 %v12117_v5  ;;  %v6618_v41 = vpop.permute.xlu1 %121  ;;  %v250_v57 = vmul.f32 %v6503_v37, %v6534_v53  ;;  %v414_v49 = vmul.f32 %v6501_v35, %v6596_v23 }
  0xca   :  { %v636_v46 = vadd.f32 %v604_v40, %v440_v38  ;;  %552 = vperm.xlu1 %6101, %v66_v14   ;;  %v411_v14 = vmul.f32 %v6501_v35, %v6567_v6  ;;  %v6675_v56 = vadd.f32 %v6665_v43, %v1760_v34  ;;  %v609_v34 = vmul.f32 %v6511_v42, %v6608_v30 }
  0xcb   :  { %v6626_v32 = vpop.permute.xlu0 %484 }
  0xcc   :  { %v675_v51 = vmul.f32 %v6523_v47, %v636_v46  ;;  %v606_v44 = vmul.f32 %v6511_v42, %v6626_v32  ;;  %v443_v38 = vadd.f32 %v411_v14, %v247_v26  ;;  %v747_v46 = vmax.f32 %v715_v33, 0.0  ;;  %12439 = vst [vmem:[#allocation2_spill] sm:$0xff] %v6675_v56 }
  0xcd   :  { %v1762_v14 = vadd.f32 %v1730_v2, %v1691_v54  ;;  %v446_v54 = vadd.f32 %v414_v49, %v250_v57 }
  0xce   :  { %v714_v24 = vadd.f32 %v6530_v50, %v675_v51  ;;  %6102 = vset.pattern.permute.xlu1 %v12115_v1  ;;  %v6649_v25 = vpop.permute.xlu1 %308  ;;  %v638_v51 = vadd.f32 %v606_v44, %v442_v28  ;;  %v639_v55 = vadd.f32 %v607_v45, %v443_v38  ;;  %v1834_v38 = vand.u32 2139095040, %v6675_v56 }
  0xcf   :  { %191 = vperm.xlu1 %6102, %v68_v52   ;;  %v6658_v29 = vpop.permute.xlu0 %492  ;;  %v6702_v2 = vadd.f32 %v6665_v43, %v1762_v14  ;;  %v1693_v14 = vmul.f32 %v6631_v48, %v6567_v6  ;;  %v252_v6 = vmul.f32 %v6503_v37, %v6544_v58 }
  0xd0   :  { %v746_v31 = vmax.f32 %v714_v24, 0.0  ;;  %v413_v24 = vmul.f32 %v6501_v35, %v6592_v22  ;;  %v677_v33 = vmul.f32 %v6523_v47, %v638_v51  ;;  %v678_v45 = vmul.f32 %v6523_v47, %v639_v55 }
  0xd1   :  { %v608_v28 = vmul.f32 %v6511_v42, %v6658_v29  ;;  %12440 = vst [vmem:[#allocation3_spill] sm:$0xff] %v6702_v2 }
  0xd2   :  { %v6660_v40 = vpop.permute.xlu1 %312  ;;  %5795 = vmatmul.mubr.msk.f32.vlgmr.msra.gmra.mrb[0].mxu0 %vm778_vm0, %v746_v31  ;;  %v249_v31 = vmul.f32 %v6503_v37, %v6582_v12  ;;  %v716_v55 = vadd.f32 %v6530_v50, %v677_v33 }
  0xd3   :  { %6103 = vset.pattern.permute.xlu1 %v12113_v0  ;;  %5797 = vmatprep.mubr.msk.f32.mxu0 %vm778_vm0, %v747_v46  ;;  %v6684_v44 = vpop.permute.xlu0 %500  ;;  %v444_v46 = vadd.f32 %v412_v61, %v248_v4  ;;  %v717_v0 = vadd.f32 %v6530_v50, %v678_v45  ;;  %v1835_v61 = vshrl.u32 %v1834_v38, 23  ;;  %v6719_v45 = vld [vmem:[%s12098_s0 + $0xc0] sm:$0xff]  ;;  %v416_v38 = vmul.f32 %v6501_v35, %v6660_v40 }
  0xd4   :  { %364 = vperm.xlu1 %6103, %v68_v52   ;;  %v610_v53 = vmul.f32 %v6511_v42, %v6684_v44  ;;  %v445_v51 = vadd.f32 %v413_v24, %v249_v31  ;;  %v415_v24 = vmul.f32 %v6501_v35, %v6649_v25  ;;  %v748_v57 = vmax.f32 %v716_v55, 0.0 }
  0xd5   :  { %v640_v12 = vadd.f32 %v608_v28, %v444_v46  ;;  %v749_v31 = vmax.f32 %v717_v0, 0.0  ;;  %v5432_v55 = vadd.s32 4294967169, %v1835_v61 }
  0xd6   :  { %v641_v4 = vadd.f32 %v609_v34, %v445_v51  ;;  %v642_v33 = vadd.f32 %v610_v53, %v446_v54  ;;  %5798 = vmatmul.mubr.msk.f32.gmra.mrb[2].mxu0 %vm778_vm0, %v748_v57  ;;  %v12441_v53 = vmov 0   ;;  %v1734_v54 = vmul.f32 %v6624_v16, %v6608_v30 }
  0xd7   :  { %v505_v26 = vpop.permute.xlu1 %504  ;;  %v679_v28 = vmul.f32 %v6523_v47, %v640_v12  ;;  %v509_v46 = vpop.permute.xlu0 %508  ;;  %5800 = vmatprep.mubr.msk.f32.mxu0 %vm778_vm0, %v749_v31  ;;  %v1841_v31 = vadd.s32 1, %v5432_v55 }
  0xd8   :  { %368 = vperm.xlu1 %6103, %v6424_v17   ;;  %v1732_v17 = vmul.f32 %v6624_v16, %v6576_v10  ;;  %v2042_v10 = vand.u32 2139095040, %v6702_v2  ;;  %v680_v34 = vmul.f32 %v6523_v47, %v641_v4  ;;  %v611_v0 = vmul.f32 %v6511_v42, %v505_v26 }
  0xd9   :  { %v1736_v12 = vmul.f32 %v6624_v16, %v505_v26  ;;  %v718_v61 = vadd.f32 %v6530_v50, %v679_v28  ;;  %vm1842_vm1 = vcmp.gt.s32.totalorder %v1841_v31, 0 }
  0xda   :  { %v1764_v49 = vadd.f32 %v1732_v17, %v1693_v14  ;;  %v681_v17 = vmul.f32 %v6523_v47, %v642_v33  ;;  %v2043_v58 = vshrl.u32 %v2042_v10, 23  ;;  %v1695_v33 = vmul.f32 %v6631_v48, %v6592_v22 }
  0xdb   :  { %v719_v57 = vadd.f32 %v6530_v50, %v680_v34  ;;  %v1697_v10 = vmul.f32 %v6631_v48, %v6649_v25  ;;  %v1698_v25 = vmul.f32 %v6631_v48, %v6660_v40  ;;  %v750_v34 = vmax.f32 %v718_v61, 0.0 }
  0xdc   :  { %6104 = vset.pattern.permute.xlu1 %v12117_v5  ;;  %v6709_v1 = vpop.permute.xlu1 %131  ;;  %v6741_v4 = vadd.f32 %v6665_v43, %v1764_v49  ;;  %v720_v26 = vadd.f32 %v6530_v50, %v681_v17  ;;  %v12443_v5 = vmov 1   ;;  %v5440_v28 = vadd.s32 4294967169, %v2043_v58 }
  0xdd   :  { %560 = vperm.xlu1 %6104, %v68_v52   ;;  %v251_v52 = vmul.f32 %v6503_v37, %v6618_v41  ;;  %v751_v17 = vmax.f32 %v719_v57, 0.0  ;;  %5801 = vmatmul.mubr.msk.f32.gmra.mrb[4].mxu0 %vm778_vm0, %v750_v34  ;;  %v1729_v40 = vmul.f32 %v6624_v16, %v6613_v36 }
  0xde   :  { %12442 = vst [vmem:[#allocation4_spill] sm:$0xff] %v6741_v4  ;;  %v2250_v22 = vand.u32 2139095040, %v6741_v4 }
  0xdf   :  { %v447_v41 = vadd.f32 %v415_v24, %v251_v52  ;;  %v612_v24 = vmul.f32 %v6511_v42, %v509_v46  ;;  %v448_v52 = vadd.f32 %v416_v38, %v252_v6  ;;  %v1737_v6 = vmul.f32 %v6624_v16, %v509_v46  ;;  %5803 = vmatprep.mubr.msk.f32.mxu0 %vm778_vm0, %v751_v17 }
  0xe0   :  { %v2251_v61 = vshrl.u32 %v2250_v22, 23  ;;  %v253_v22 = vmul.f32 %v6503_v37, %v6709_v1 }
  0xe1   :  { %6105 = vset.pattern.permute.xlu1 %v12441_v53  ;;  %v6731_v51 = vpop.permute.xlu1 %316  ;;  %v643_v14 = vadd.f32 %v611_v0, %v447_v41  ;;  %v1766_v41 = vadd.f32 %v1734_v54, %v1695_v33  ;;  %v6753_v0 = vadd.f32 %v1736_v12, %v1697_v10  ;;  %v644_v56 = vadd.f32 %v612_v24, %v448_v52 }
  0xe2   :  { %201 = vperm.xlu1 %6105, %v6719_v45   ;;  %v6762_v58 = vadd.f32 %v1737_v6, %v1698_v25  ;;  %v752_v54 = vmax.f32 %v720_v26, 0.0  ;;  %v1690_v24 = vmul.f32 %v6631_v48, %v6507_v39  ;;  %v254_v33 = vmul.f32 %v6503_v37, %v6549_v60  ;;  %v517_v26 = vpop.permute.xlu0 %516 }
  0xe3   :  { %v682_v49 = vmul.f32 %v6523_v47, %v643_v14  ;;  %v683_v55 = vmul.f32 %v6523_v47, %v644_v56  ;;  %v6766_v14 = vadd.f32 %v6665_v43, %v1766_v41  ;;  %v2049_v56 = vadd.s32 1, %v5440_v28 }
  0xe4   :  { %v1843_v10 = vsel %vm1842_vm1, %v1841_v31, 0  ;;  %5804 = vmatmul.mubr.msk.f32.gmra.mrb[6].mxu0 %vm778_vm0, %v752_v54  ;;  %v417_v36 = vmul.f32 %v6501_v35, %v6731_v51  ;;  %v12445_v41 = vmov 2   ;;  %v5448_v31 = vadd.s32 4294967169, %v2251_v61 }
  0xe5   :  { %v321_v30 = vpop.permute.xlu1 %320  ;;  %v721_v38 = vadd.f32 %v6530_v50, %v682_v49  ;;  %12444 = vst [vmem:[#allocation5_spill] sm:$0xff] %v6766_v14  ;;  %v722_v46 = vadd.f32 %v6530_v50, %v683_v55  ;;  %v2458_v49 = vand.u32 2139095040, %v6766_v14  ;;  %vm2050_vm2 = vcmp.gt.s32.totalorder %v2049_v56, 0 }
  0xe6   :  { %6106 = vset.pattern.permute.xlu1 %v12443_v5  ;;  %v418_v28 = vmul.f32 %v6501_v35, %v321_v30  ;;  %v1700_v39 = vmul.f32 %v6631_v48, %v321_v30  ;;  %v614_v25 = vmul.f32 %v6511_v42, %v517_v26  ;;  %v1731_v6 = vmul.f32 %v6624_v16, %v6626_v32 }
  0xe7   :  { %372 = vperm.xlu1 %6106, %v6719_v45   ;;  %v753_v57 = vmax.f32 %v721_v38, 0.0  ;;  %v754_v52 = vmax.f32 %v722_v46, 0.0  ;;  %v1739_v38 = vmul.f32 %v6624_v16, %v517_v26  ;;  %v6794_v30 = vand.u32 31, %v1843_v10 }
  0xe8   :  { %v450_v34 = vadd.f32 %v418_v28, %v254_v33  ;;  %v1692_v55 = vmul.f32 %v6631_v48, %v6546_v59  ;;  %v449_v17 = vadd.f32 %v417_v36, %v253_v22  ;;  %v2051_v54 = vsel %vm2050_vm2, %v2049_v56, 0 }
  0xe9   :  { %5806 = vmatprep.mubr.msk.f32.mxu0 %vm778_vm0, %v753_v57  ;;  %12446 = vst [vmem:[#allocation6_spill] sm:$0xff] %v6794_v30  ;;  %v2459_v32 = vshrl.u32 %v2458_v49, 23  ;;  %v6808_v46 = vadd.f32 %v1739_v38, %v1700_v39  ;;  %v2257_v61 = vadd.s32 1, %v5448_v31  ;;  %v6813_v57 = vshrl.u32 %v1843_v10, 5 }
  0xea   :  { %v513_v12 = vpop.permute.xlu1 %512  ;;  %5807 = vmatmul.mubr.msk.f32.gmra.mrb[8].mxu0 %vm778_vm0, %v754_v52  ;;  %v1763_v36 = vadd.f32 %v1731_v6, %v1692_v55  ;;  %v12121_v56 = vand.u32 2147483647, %v6702_v2  ;;  %v6819_v26 = vsub.s32 32, %v6794_v30  ;;  %v6821_v49 = vand.u32 31, %v2051_v54 }
  0xeb   :  { %376 = vperm.xlu1 %6106, %v6434_v19   ;;  %v1761_v19 = vadd.f32 %v1729_v40, %v1690_v24  ;;  %v613_v1 = vmul.f32 %v6511_v42, %v513_v12  ;;  %v646_v24 = vadd.f32 %v614_v25, %v450_v34  ;;  %12448 = vst [vmem:[#allocation8_spill] sm:$0xff] %v6813_v57  ;;  %v5456_v10 = vadd.s32 4294967169, %v2459_v32 }
  0xec   :  { %v1738_v52 = vmul.f32 %v6624_v16, %v513_v12  ;;  %12449 = vst [vmem:[#allocation9_spill] sm:$0xff] %v6819_v26  ;;  %v6827_v28 = vmul.f32 %v6503_v37, %v6556_v63  ;;  %v1699_v12 = vmul.f32 %v6631_v48, %v6731_v51  ;;  %v6835_v22 = vmul.f32 %v6503_v37, %v6561_v3 }
  0xed   :  { %v6806_v40 = vadd.f32 %v6665_v43, %v1761_v19  ;;  %v645_v59 = vadd.f32 %v613_v1, %v449_v17  ;;  %v256_v19 = vmul.f32 %v6503_v37, %v6553_v62  ;;  %v6839_v25 = vmul.f32 %v6503_v37, %v6569_v7 }
  0xee   :  { %vm2258_vm3 = vcmp.gt.s32.totalorder %v2257_v61, 0  ;;  %v685_v62 = vmul.f32 %v6523_v47, %v646_v24  ;;  %v6843_v6 = vadd.f32 %v6665_v43, %v1763_v36  ;;  %v1733_v51 = vmul.f32 %v6624_v16, %v6658_v29 }
  0xef   :  { %6107 = vset.pattern.permute.xlu1 %v12445_v41  ;;  %v6785_v60 = vpop.permute.xlu1 %141  ;;  %12447 = vst [vmem:[#allocation7_spill] sm:$0xff] %v6806_v40  ;;  %v1938_v39 = vand.u32 2139095040, %v6806_v40  ;;  %v684_v31 = vmul.f32 %v6523_v47, %v645_v59  ;;  %v6847_v34 = vadd.f32 %v1738_v52, %v1699_v12  ;;  %v6852_v3 = vand.u32 8388607, %v12121_v56 }
  0xf0   :  { %568 = vperm.xlu1 %6107, %v6719_v45   ;;  %v6803_v45 = vld [vmem:[%s12098_s0 + $0xd0] sm:$0xff]  ;;  %12450 = vst [vmem:[#allocation10_spill] sm:$0xff] %v6843_v6  ;;  %v6854_v7 = vshrl.u32 %v2051_v54, 5  ;;  %v6857_v38 = vsub.s32 32, %v6821_v49  ;;  %v1694_v55 = vmul.f32 %v6631_v48, %v6571_v8  ;;  %v6863_v17 = vmul.f32 %v6503_v37, %v6574_v9 }
  0xf1   :  { %12451 = vst [vmem:[#allocation11_spill] sm:$0xff] %v6852_v3  ;;  %v2259_v29 = vsel %vm2258_vm3, %v2257_v61, 0  ;;  %v2465_v1 = vadd.s32 1, %v5456_v10  ;;  %v1939_v32 = vshrl.u32 %v1938_v39, 23  ;;  %v723_v24 = vadd.f32 %v6530_v50, %v684_v31  ;;  %v525_v31 = vpop.permute.xlu0 %524 }
  0xf2   :  { %v6869_v54 = vmul.f32 %v6503_v37, %v6579_v11  ;;  %v6873_v59 = vmul.f32 %v6503_v37, %v6584_v13  ;;  %v6877_v8 = vmul.f32 %v6503_v37, %v6589_v18  ;;  %v724_v9 = vadd.f32 %v6530_v50, %v685_v62 }
  0xf3   :  { %v6882_v61 = vmul.f32 %v6503_v37, %v6594_v15  ;;  %v2146_v36 = vand.u32 2139095040, %v6843_v6  ;;  %v1765_v52 = vadd.f32 %v1733_v51, %v1694_v55  ;;  %v6886_v39 = vshrl.u32 %v2259_v29, 5 }
  0xf4   :  { %6108 = vset.pattern.permute.xlu1 %v12441_v53  ;;  %v6811_v33 = vpop.permute.xlu1 %324  ;;  %v6888_v13 = vand.u32 31, %v2259_v29  ;;  %v1696_v18 = vmul.f32 %v6631_v48, %v6596_v23  ;;  %v1735_v12 = vmul.f32 %v6624_v16, %v6684_v44  ;;  %v6897_v15 = vmul.f32 %v6503_v37, %v6604_v27 }
  0xf5   :  { %211 = vperm.xlu1 %6108, %v6803_v45   ;;  %12452 = vst [vmem:[#allocation12_spill] sm:$0xff] %v6882_v61  ;;  %12453 = vst [vmem:[#allocation13_spill] sm:$0xff] %v6886_v39  ;;  %vm2466_vm4 = vcmp.gt.s32.totalorder %v2465_v1, 0  ;;  %v5436_v62 = vadd.s32 4294967169, %v1939_v32  ;;  %v755_v51 = vmax.f32 %v723_v24, 0.0  ;;  %v419_v55 = vmul.f32 %v6501_v35, %v6811_v33 }
  0xf6   :  { %12454 = vst [vmem:[#allocation14_spill] sm:$0xff] %v6888_v13  ;;  %12455 = vst [vmem:[#allocation15_spill] sm:$0xff] %v6897_v15  ;;  %v756_v29 = vmax.f32 %v724_v9, 0.0  ;;  %v2147_v11 = vshrl.u32 %v2146_v36, 23  ;;  %v6904_v44 = vadd.f32 %v6665_v43, %v1765_v52  ;;  %v1741_v27 = vmul.f32 %v6624_v16, %v525_v31 }
  0xf7   :  { %5809 = vmatprep.mubr.msk.f32.mxu0 %vm778_vm0, %v755_v51  ;;  %v6909_v32 = vsel %vm2466_vm4, %v2465_v1, 0  ;;  %v1767_v24 = vadd.f32 %v1735_v12, %v1696_v18  ;;  %v255_v9 = vmul.f32 %v6503_v37, %v6785_v60  ;;  %v6918_v36 = vsub.s32 32, %v6888_v13 }
  0xf8   :  { %v329_v63 = vpop.permute.xlu1 %328  ;;  %12456 = vst [vmem:[#allocation16_spill] sm:$0xff] %v6904_v44  ;;  %5810 = vmatmul.mubr.msk.f32.gmra.mrb[10].mxu0 %vm778_vm0, %v756_v29  ;;  %v12124_v1 = vmov 683565275   ;;  %v12129_v12 = vmov 2475754826   ;;  %v6930_v29 = vand.u32 31, %v6909_v32 }
  0xf9   :  { %6109 = vset.pattern.permute.xlu1 %v12443_v5  ;;  %v420_v56 = vmul.f32 %v6501_v35, %v329_v63  ;;  %v1702_v23 = vmul.f32 %v6631_v48, %v329_v63  ;;  %12457 = vst [vmem:[#allocation17_spill] sm:$0xff] %v6918_v36  ;;  %v2056_v18 = vshll.u32 %v12124_v1, %v6821_v49  ;;  %v6937_v1 = vld [vmem:[%s12098_s0 + $0xe0] sm:$0xff]  ;;  %v12461_v2 = vmov 683565275  }
  0xfa   :  { %380 = vperm.xlu1 %6109, %v6803_v45   ;;  %v2059_v60 = vshll.u32 %v12129_v12, %v6821_v49  ;;  %12458 = vst [vmem:[#allocation18_spill] sm:$0xff] %v6930_v29  ;;  %vm2071_vm7 = vcmp.lt.s32.totalorder %v6854_v7, 1 }
  0xfb   :  { %v452_v14 = vadd.f32 %v420_v56, %v256_v19  ;;  %v6920_v52 = vadd.f32 %v1741_v27, %v1702_v23  ;;  %v451_v56 = vadd.f32 %v419_v55, %v255_v9  ;;  %v1945_v23 = vadd.s32 1, %v5436_v62 }
  0xfc   :  { %v5444_v27 = vadd.s32 4294967169, %v2147_v11  ;;  %v2354_v55 = vand.u32 2139095040, %v6904_v44  ;;  %v12131_v62 = vmov 2131351028   ;;  %v6977_v44 = vshrl.u32 %v12461_v2, %v6857_v38 }
  0xfd   :  { %v521_v10 = vpop.permute.xlu1 %520  ;;  %v2060_v57 = vshrl.u32 %v12131_v62, %v6857_v38  ;;  %v2062_v30 = vshll.u32 %v12131_v62, %v6821_v49  ;;  %v6965_v62 = vsub.s32 32, %v6930_v29  ;;  %vm1946_vm5 = vcmp.gt.s32.totalorder %v1945_v23, 0 }
  0xfe   :  { %384 = vperm.xlu1 %6109, %v6441_v20   ;;  %v616_v20 = vmul.f32 %v6511_v42, %v525_v31  ;;  %v615_v31 = vmul.f32 %v6511_v42, %v521_v10  ;;  %v1740_v51 = vmul.f32 %v6624_v16, %v521_v10  ;;  %v2153_v26 = vadd.s32 1, %v5444_v27 }
  0xff   :  { %12460 = vst [vmem:[#allocation20_spill] sm:$0xff] %v6965_v62  ;;  %v2355_v39 = vshrl.u32 %v2354_v55, 23  ;;  %v6981_v27 = vor.u32 %v2060_v57, %v2059_v60  ;;  %v1947_v55 = vsel %vm1946_vm5, %v1945_v23, 0 }
 0x100   :  { %v648_v19 = vadd.f32 %v616_v20, %v452_v14  ;;  %v6941_v14 = vadd.f32 %v6665_v43, %v1767_v24  ;;  %v647_v20 = vadd.f32 %v615_v31, %v451_v56  ;;  %v12139_v24 = vmov 2102212464  }
 0x101   :  { %v2063_v56 = vshrl.u32 %v12139_v24, %v6857_v38  ;;  %v12150_v31 = vmov 920167782   ;;  %vm2154_vm6 = vcmp.gt.s32.totalorder %v2153_v26, 0  ;;  %v5452_v57 = vadd.s32 4294967169, %v2355_v39 }
 0x102   :  { %6110 = vset.pattern.permute.xlu1 %v12445_v41  ;;  %v6915_v63 = vpop.permute.xlu1 %151  ;;  %12459 = vst [vmem:[#allocation19_spill] sm:$0xff] %v6941_v14  ;;  %v687_v10 = vmul.f32 %v6523_v47, %v648_v19  ;;  %v2065_v19 = vshll.u32 %v12139_v24, %v6821_v49  ;;  %v686_v40 = vmul.f32 %v6523_v47, %v647_v20  ;;  %v2562_v13 = vand.u32 2139095040, %v6941_v14 }
 0x103   :  { %576 = vperm.xlu1 %6110, %v6803_v45   ;;  %v1701_v45 = vmul.f32 %v6631_v48, %v6811_v33  ;;  %v2057_v33 = vshrl.u32 %v12129_v12, %v6857_v38  ;;  %v6972_v36 = vshll.u32 %v12150_v31, %v6821_v49  ;;  %v6984_v20 = vor.u32 %v2063_v56, %v2062_v30 }
 0x104   :  { %v726_v24 = vadd.f32 %v6530_v50, %v687_v10  ;;  %v725_v4 = vadd.f32 %v6530_v50, %v686_v40  ;;  %v2482_v40 = vshrl.u32 %v12150_v31, %v6965_v62  ;;  %v2563_v60 = vshrl.u32 %v2562_v13, 23 }
 0x105   :  { %v6944_v9 = vadd.f32 %v1740_v51, %v1701_v45  ;;  %v2066_v51 = vshrl.u32 %v12150_v31, %v6857_v38  ;;  %v12144_v45 = vmov 1326507024   ;;  %v6979_v15 = vor.u32 %v2057_v33, %v2056_v18  ;;  %12463 = vst [vmem:[#allocation22_spill] sm:$0xff] %v6984_v20  ;;  %v533_v33 = vpop.permute.xlu0 %532 }
 0x106   :  { %v6962_v12 = vshrl.u32 %v12144_v45, %v6857_v38  ;;  %v757_v18 = vmax.f32 %v725_v4, 0.0  ;;  %v6996_v30 = vadd.f32 %v6665_v43, %v6753_v0  ;;  %v758_v23 = vmax.f32 %v726_v24, 0.0 }
 0x107   :  { %6111 = vset.pattern.permute.xlu1 %v12441_v53  ;;  %v333_v11 = vpop.permute.xlu1 %332  ;;  %12462 = vst [vmem:[#allocation21_spill] sm:$0xff] %v6979_v15  ;;  %v6986_v10 = vor.u32 %v2066_v51, %v2065_v19  ;;  %v257_v56 = vmul.f32 %v6503_v37, %v6915_v63  ;;  %v618_v4 = vmul.f32 %v6511_v42, %v533_v33  ;;  %v12465_v49 = vmov 1326507024  }
 0x108   :  { %221 = vperm.xlu1 %6111, %v6937_v1   ;;  %v421_v38 = vmul.f32 %v6501_v35, %v333_v11  ;;  %12464 = vst [vmem:[#allocation23_spill] sm:$0xff] %v6996_v30  ;;  %5812 = vmatprep.mubr.msk.f32.mxu0 %vm778_vm0, %v757_v18  ;;  %v2485_v39 = vshrl.u32 %v12465_v49, %v6965_v62  ;;  %v7006_v13 = vand.u32 31, %v1947_v55  ;;  %v2155_v0 = vsel %vm2154_vm6, %v2153_v26, 0 }
 0x109   :  { %5813 = vmatmul.mubr.msk.f32.gmra.mrb[12].mxu0 %vm778_vm0, %v758_v23  ;;  %v1743_v24 = vmul.f32 %v6624_v16, %v533_v33  ;;  %v2361_v3 = vadd.s32 1, %v5452_v57  ;;  %v2666_v62 = vand.u32 2139095040, %v6996_v30  ;;  %v1703_v61 = vmul.f32 %v6631_v48, %v333_v11 }
 0x10a   :  { %12466 = vst [vmem:[#allocation24_spill] sm:$0xff] %v7006_v13  ;;  %v453_v31 = vadd.f32 %v421_v38, %v257_v56  ;;  %v5460_v23 = vadd.s32 4294967169, %v2563_v60  ;;  %v7021_v33 = vadd.f32 %v6665_v43, %v6762_v58  ;;  %v7024_v56 = vshrl.u32 %v6909_v32, 5 }
 0x10b   :  { %v337_v45 = vpop.permute.xlu1 %336  ;;  %v12470_v11 = vmov 2102212464   ;;  %v12471_v60 = vmov 920167782   ;;  %v7036_v58 = vshrl.u32 %v1947_v55, 5  ;;  %vm2362_vm8 = vcmp.gt.s32.totalorder %v2361_v3, 0 }
 0x10c   :  { %6112 = vset.pattern.permute.xlu1 %v12443_v5  ;;  %v422_v19 = vmul.f32 %v6501_v35, %v337_v45  ;;  %v1704_v51 = vmul.f32 %v6631_v48, %v337_v45  ;;  %12467 = vst [vmem:[#allocation25_spill] sm:$0xff] %v7021_v33  ;;  %12468 = vst [vmem:[#allocation26_spill] sm:$0xff] %v7024_v56  ;;  %v2481_v57 = vshll.u32 %v12470_v11, %v6930_v29 }
 0x10d   :  { %388 = vperm.xlu1 %6112, %v6937_v1   ;;  %12472 = vst [vmem:[#allocation28_spill] sm:$0xff] %v7036_v58  ;;  %v2770_v55 = vand.u32 2139095040, %v7021_v33  ;;  %vm2490_vm9 = vcmp.lt.s32.totalorder %v7024_v56, 4  ;;  %vm1970_vm10 = vcmp.lt.s32.totalorder %v7036_v58, 4 }
 0x10e   :  { %v454_v18 = vadd.f32 %v422_v19, %v6827_v28  ;;  %v7017_v26 = vadd.f32 %v1743_v24, %v1704_v51  ;;  %v7027_v19 = vsub.s32 32, %v7006_v13  ;;  %v2484_v51 = vshll.u32 %v12471_v60, %v6930_v29 }
 0x10f   :  { %v7046_v24 = vor.u32 %v2482_v40, %v2481_v57  ;;  %v1961_v40 = vshll.u32 %v12470_v11, %v7006_v13  ;;  %v1964_v57 = vshll.u32 %v12471_v60, %v7006_v13  ;;  %v7091_v29 = vshrl.u32 %v2155_v0, 5 }
 0x110   :  { %v529_v63 = vpop.permute.xlu1 %528  ;;  %v650_v38 = vadd.f32 %v618_v4, %v454_v18  ;;  %12469 = vst [vmem:[#allocation27_spill] sm:$0xff] %v7027_v19  ;;  %v7038_v4 = vand.u32 31, %v2155_v0  ;;  %v2569_v18 = vadd.s32 1, %v5460_v23  ;;  %v2363_v23 = vsel %vm2362_vm8, %v2361_v3, 0 }
 0x111   :  { %v617_v14 = vmul.f32 %v6511_v42, %v529_v63  ;;  %v1742_v45 = vmul.f32 %v6624_v16, %v529_v63  ;;  %392 = vperm.xlu1 %6112, %v6448_v21   ;;  %12473 = vst [vmem:[#allocation29_spill] sm:$0xff] %v7046_v24  ;;  %v2486_v63 = vor.u32 %v2485_v39, %v2484_v51  ;;  %v7082_v33 = vsel %vm2490_vm9, %v7046_v24, 920167782 }
 0x112   :  { %v7068_v39 = vsub.s32 32, %v7038_v4  ;;  %12475 = vst [vmem:[#allocation31_spill] sm:$0xff] %v7082_v33  ;;  %vm2570_vm11 = vcmp.gt.s32.totalorder %v2569_v18, 0  ;;  %v2169_v24 = vshll.u32 %v12470_v11, %v7038_v4  ;;  %v7105_v0 = vadd.f32 %v6665_v43, %v6808_v46 }
 0x113   :  { %v649_v28 = vadd.f32 %v617_v14, %v453_v31  ;;  %v7029_v21 = vadd.f32 %v1742_v45, %v1703_v61  ;;  %v2667_v14 = vshrl.u32 %v2666_v62, 23  ;;  %v689_v61 = vmul.f32 %v6523_v47, %v650_v38  ;;  %v7057_v38 = vld [vmem:[%s12098_s0 + $0xf0] sm:$0xff] }
 0x114   :  { %v1962_v45 = vshrl.u32 %v12471_v60, %v7027_v19  ;;  %v1965_v62 = vshrl.u32 %v12465_v49, %v7027_v19  ;;  %v7086_v3 = vsel %vm2490_vm9, %v2486_v63, 1326507024  ;;  %v541_v19 = vpop.permute.xlu0 %540  ;;  %v2170_v33 = vshrl.u32 %v12471_v60, %v7068_v39  ;;  %12479 = vst [vmem:[#allocation35_spill] sm:$0xff] %v7105_v0 }
 0x115   :  { %6113 = vset.pattern.permute.xlu1 %v12445_v41  ;;  %v7041_v32 = vpop.permute.xlu1 %161  ;;  %v688_v31 = vmul.f32 %v6523_v47, %v649_v28  ;;  %v5464_v51 = vadd.s32 4294967169, %v2667_v14  ;;  %v728_v30 = vadd.f32 %v6530_v50, %v689_v61  ;;  %12476 = vst [vmem:[#allocation32_spill] sm:$0xff] %v7086_v3  ;;  %v7101_v63 = vshll.u32 %v12471_v60, %v7038_v4 }
 0x116   :  { %584 = vperm.xlu1 %6113, %v6937_v1   ;;  %v7063_v1 = vsel %vm2071_vm7, %v6977_v44, %v6979_v15  ;;  %v7089_v14 = vor.u32 %v1962_v45, %v1961_v40  ;;  %v1966_v61 = vor.u32 %v1965_v62, %v1964_v57  ;;  %v2571_v3 = vsel %vm2570_vm11, %v2569_v18, 0 }
 0x117   :  { %12474 = vst [vmem:[#allocation30_spill] sm:$0xff] %v7063_v1  ;;  %v727_v28 = vadd.f32 %v6530_v50, %v688_v31  ;;  %v2771_v31 = vshrl.u32 %v2770_v55, 23  ;;  %v2673_v45 = vadd.s32 1, %v5464_v51  ;;  %v760_v62 = vmax.f32 %v728_v30, 0.0 }
 0x118   :  { %12477 = vst [vmem:[#allocation33_spill] sm:$0xff] %v7089_v14  ;;  %v620_v13 = vmul.f32 %v6511_v42, %v541_v19  ;;  %v1745_v1 = vmul.f32 %v6624_v16, %v541_v19  ;;  %v7115_v18 = vsel %vm1970_vm10, %v7089_v14, 920167782  ;;  %v2173_v19 = vshrl.u32 %v12465_v49, %v7068_v39 }
 0x119   :  { %v759_v55 = vmax.f32 %v727_v28, 0.0  ;;  %v5468_v57 = vadd.s32 4294967169, %v2771_v31  ;;  %12480 = vst [vmem:[#allocation36_spill] sm:$0xff] %v7115_v18  ;;  %v7131_v51 = vand.u32 31, %v2571_v3  ;;  %v7136_v14 = vshrl.u32 %v2363_v23, 5 }
 0x11a   :  { %6114 = vset.pattern.permute.xlu1 %v12441_v53  ;;  %v7077_v44 = vpop.permute.xlu1 %340  ;;  %v7093_v53 = vand.u32 31, %v2363_v23  ;;  %vm2674_vm12 = vcmp.gt.s32.totalorder %v2673_v45, 0  ;;  %vm2178_vm13 = vcmp.lt.s32.totalorder %v7091_v29, 4  ;;  %v2174_v23 = vor.u32 %v2173_v19, %v7101_v63 }
 0x11b   :  { %231 = vperm.xlu1 %6114, %v7057_v38   ;;  %5815 = vmatprep.mubr.msk.f32.mxu0 %vm778_vm0, %v759_v55  ;;  %v423_v30 = vmul.f32 %v6501_v35, %v7077_v44  ;;  %12483 = vst [vmem:[#allocation39_spill] sm:$0xff] %v7131_v51  ;;  %v7134_v55 = vor.u32 %v2170_v33, %v2169_v24  ;;  %12484 = vst [vmem:[#allocation40_spill] sm:$0xff] %v7136_v14  ;;  %vm2386_vm15 = vcmp.lt.s32.totalorder %v7136_v14, 4 }
 0x11c   :  { %12478 = vst [vmem:[#allocation34_spill] sm:$0xff] %v7093_v53  ;;  %v7118_v46 = vsub.s32 32, %v7093_v53  ;;  %5816 = vmatmul.mubr.msk.f32.gmra.mrb[14].mxu0 %vm778_vm0, %v760_v62  ;;  %v259_v62 = vmul.f32 %v6503_v37, %v7041_v32  ;;  %v6246_v32 = vld [vmem:[%s12098_s0 + $0xf8] sm:$0xff]  ;;  %v7165_v63 = vadd.f32 %v6665_v43, %v6847_v34  ;;  %v1705_v19 = vmul.f32 %v6631_v48, %v7077_v44 }
 0x11d   :  { %v2585_v44 = vshll.u32 %v12470_v11, %v7131_v51 }
 0x11e   :  { %v345_v40 = vpop.permute.xlu1 %344  ;;  %12481 = vst [vmem:[#allocation37_spill] sm:$0xff] %v7118_v46  ;;  %v2381_v33 = vshrl.u32 %v12465_v49, %v7118_v46  ;;  %12486 = vst [vmem:[#allocation42_spill] sm:$0xff] %v7165_v63 }
 0x11f   :  { %v424_v56 = vmul.f32 %v6501_v35, %v345_v40  ;;  %6115 = vset.pattern.permute.xlu1 %v12443_v5  ;;  %v1706_v28 = vmul.f32 %v6631_v48, %v345_v40  ;;  %v7127_v5 = vsel %vm1970_vm10, %v1966_v61, 1326507024  ;;  %v2777_v40 = vadd.s32 1, %v5468_v57 }
 0x120   :  { %396 = vperm.xlu1 %6115, %v7057_v38   ;;  %12482 = vst [vmem:[#allocation38_spill] sm:$0xff] %v7127_v5  ;;  %v2978_v61 = vand.u32 2139095040, %v7105_v0  ;;  %v2675_v57 = vsel %vm2674_vm12, %v2673_v45, 0 }
 0x121   :  { %v456_v31 = vadd.f32 %v424_v56, %v6835_v22  ;;  %v7142_v18 = vadd.f32 %v1745_v1, %v1706_v28  ;;  %v2378_v22 = vshrl.u32 %v12471_v60, %v7118_v46  ;;  %v455_v56 = vadd.f32 %v423_v30, %v259_v62 }
 0x122   :  { %v7156_v1 = vsub.s32 32, %v7131_v51  ;;  %v2380_v30 = vshll.u32 %v12471_v60, %v7093_v53  ;;  %vm2778_vm14 = vcmp.gt.s32.totalorder %v2777_v40, 0 }
 0x123   :  { %v652_v5 = vadd.f32 %v620_v13, %v456_v31  ;;  %v537_v58 = vpop.permute.xlu1 %536  ;;  %v2377_v13 = vshll.u32 %v12470_v11, %v7093_v53  ;;  %v7172_v53 = vand.u32 31, %v2675_v57 }
 0x124   :  { %v619_v24 = vmul.f32 %v6511_v42, %v537_v58  ;;  %400 = vperm.xlu1 %6115, %v6246_v32   ;;  %12485 = vst [vmem:[#allocation41_spill] sm:$0xff] %v7156_v1  ;;  %v1744_v62 = vmul.f32 %v6624_v16, %v537_v58  ;;  %v2979_v32 = vshrl.u32 %v2978_v61, 23  ;;  %v2382_v45 = vor.u32 %v2381_v33, %v2380_v30 }
 0x125   :  { %v691_v28 = vmul.f32 %v6523_v47, %v652_v5  ;;  %v7169_v0 = vor.u32 %v2378_v22, %v2377_v13  ;;  %12488 = vst [vmem:[#allocation44_spill] sm:$0xff] %v7172_v53  ;;  %v7177_v58 = vshrl.u32 %v2571_v3, 5  ;;  %v2586_v34 = vshrl.u32 %v12471_v60, %v7156_v1 }
 0x126   :  { %v651_v31 = vadd.f32 %v619_v24, %v455_v56  ;;  %v7182_v56 = vadd.f32 %v1744_v62, %v1705_v19  ;;  %v2589_v22 = vshrl.u32 %v12465_v49, %v7156_v1  ;;  %v5476_v33 = vadd.s32 4294967169, %v2979_v32 }
 0x127   :  { %12487 = vst [vmem:[#allocation43_spill] sm:$0xff] %v7169_v0  ;;  %12489 = vst [vmem:[#allocation45_spill] sm:$0xff] %v7177_v58  ;;  %v730_v3 = vadd.f32 %v6530_v50, %v691_v28  ;;  %v2874_v24 = vand.u32 2139095040, %v7165_v63  ;;  %v7202_v13 = vsel %vm2178_vm13, %v7134_v55, 920167782  ;;  %v7209_v30 = vsub.s32 32, %v7172_v53 }
 0x128   :  { %6117 = vset.pattern.permute.xlu1 %v12445_v41  ;;  %v7175_v5 = vpop.permute.xlu1 %171  ;;  %v690_v61 = vmul.f32 %v6523_v47, %v651_v31  ;;  %v7190_v41 = vsel %vm2778_vm14, %v2777_v40, 0  ;;  %v7196_v47 = vadd.f32 %v6665_v43, %v6920_v52  ;;  %v7206_v40 = vsel %vm2178_vm13, %v2174_v23, 1326507024 }
 0x129   :  { %592 = vperm.xlu1 %6117, %v7057_v38   ;;  %12491 = vst [vmem:[#allocation47_spill] sm:$0xff] %v7209_v30  ;;  %v7213_v28 = vadd.f32 %v6665_v43, %v6944_v9  ;;  %v7220_v52 = vor.u32 %v2586_v34, %v2585_v44  ;;  %v2588_v31 = vshll.u32 %v12471_v60, %v7131_v51  ;;  %v7228_v32 = vsel %vm2386_vm15, %v2382_v45, 1326507024 }
 0x12a   :  { %12490 = vst [vmem:[#allocation46_spill] sm:$0xff] %v7196_v47  ;;  %v729_v38 = vadd.f32 %v6530_v50, %v690_v61  ;;  %v7218_v50 = vsel %vm2386_vm15, %v7169_v0, 920167782  ;;  %12495 = vst [vmem:[#allocation51_spill] sm:$0xff] %v7228_v32  ;;  %vm2594_vm1 = vcmp.lt.s32.totalorder %v7177_v58, 4  ;;  %v7232_v9 = vand.u32 31, %v7190_v41  ;;  %v549_v61 = vpop.permute.xlu0 %548 }
 0x12b   :  { %12492 = vst [vmem:[#allocation48_spill] sm:$0xff] %v7213_v28  ;;  %12493 = vst [vmem:[#allocation49_spill] sm:$0xff] %v7218_v50  ;;  %v762_v19 = vmax.f32 %v730_v3, 0.0  ;;  %v2590_v63 = vor.u32 %v2589_v22, %v2588_v31  ;;  %v2985_v34 = vadd.s32 1, %v5476_v33  ;;  %v2875_v44 = vshrl.u32 %v2874_v24, 23  ;;  %v1210_v22 = vld [vmem:[%s12106_s7] sm:$0xff] }
 0x12c   :  { %12494 = vst [vmem:[#allocation50_spill] sm:$0xff] %v7220_v52  ;;  %v761_v23 = vmax.f32 %v729_v38, 0.0  ;;  %12496 = vst [vmem:[#allocation52_spill] sm:$0xff] %v7232_v9  ;;  %v3186_v1 = vand.u32 2139095040, %v7196_v47  ;;  %v7236_v51 = vshrl.u32 %v2675_v57, 5  ;;  %v2690_v45 = vshrl.u32 %v12471_v60, %v7209_v30  ;;  %v1211_v57 = vld [vmem:[%s12106_s7 + $0x8] sm:$0xff] }
 0x12d   :  { %v7224_v62 = vpop.permute.xlu1 %348  ;;  %v7242_v38 = vshrl.u32 %v12465_v49, %v7209_v30  ;;  %v3082_v0 = vand.u32 2139095040, %v7213_v28  ;;  %v7255_v3 = vsel %vm2594_vm1, %v7220_v52, 920167782  ;;  %v2689_v33 = vshll.u32 %v12470_v11, %v7172_v53 }
 0x12e   :  { %5818 = vmatprep.mubr.msk.f32.mxu0 %vm778_vm0, %v761_v23  ;;  %12497 = vst [vmem:[#allocation53_spill] sm:$0xff] %v7236_v51  ;;  %12498 = vst [vmem:[#allocation54_spill] sm:$0xff] %v7255_v3  ;;  %v1747_v31 = vmul.f32 %v6624_v16, %v549_v61  ;;  %v5906_v23 = vpack.c.bf16 %v1211_v57, %v1210_v22  ;;  %v7265_v28 = vsub.s32 32, %v7232_v9  ;;  %vm2986_vm2 = vcmp.gt.s32.totalorder %v2985_v34, 0 }
 0x12f   :  { %5819 = vmatmul.mubr.msk.f32.gmra.mrb[16].mxu0 %vm778_vm0, %v762_v19  ;;  %v7262_v19 = vshll.u32 %v12471_v60, %v7172_v53  ;;  %v5472_v52 = vadd.s32 4294967169, %v2875_v44  ;;  %v3187_v3 = vshrl.u32 %v3186_v1, 23  ;;  %v622_v32 = vmul.f32 %v6511_v42, %v549_v61 }
 0x130   :  { %12499 = vst [vmem:[#allocation55_spill] sm:$0xff] %v7265_v28  ;;  %5922 = vmatprep.subr.bf16.mxu1 %v5906_v23  ;;  %5907 = vmatprep.subr.bf16.mxu0 %v5906_v23  ;;  %v7272_v22 = vsel %vm2594_vm1, %v2590_v63, 1326507024  ;;  %v7274_v57 = vor.u32 %v2690_v45, %v2689_v33  ;;  %v3083_v50 = vshrl.u32 %v3082_v0, 23  ;;  %v2793_v44 = vshll.u32 %v12470_v11, %v7232_v9  ;;  %v1212_v63 = vld [vmem:[%s12106_s7 + $0x10] sm:$0xff]  ;;  %v1213_v0 = vld [vmem:[%s12106_s7 + $0x18] sm:$0xff] }
 0x131   :  { %v353_v24 = vpop.permute.xlu1 %352  ;;  %12500 = vst [vmem:[#allocation56_spill] sm:$0xff] %v7272_v22  ;;  %v2694_v53 = vor.u32 %v7242_v38, %v7262_v19  ;;  %5926 = vmatpush3.bf16.msra.mxu1 %v5906_v23  ;;  %5909 = vmatpush3.bf16.msra.mxu0 %v5906_v23  ;;  %v425_v1 = vmul.f32 %v6501_v35, %v7224_v62  ;;  %v2987_v38 = vsel %vm2986_vm2, %v2985_v34, 0  ;;  %vm2698_vm4 = vcmp.lt.s32.totalorder %v7236_v51, 4 }
 0x132   :  { %v426_v47 = vmul.f32 %v6501_v35, %v353_v24  ;;  %v1708_v30 = vmul.f32 %v6631_v48, %v353_v24  ;;  %12501 = vst [vmem:[#allocation57_spill] sm:$0xff] %v7274_v57  ;;  %v2794_v45 = vshrl.u32 %v12471_v60, %v7265_v28  ;;  %v7296_v33 = vadd.f32 %v6665_v43, %v7017_v26 }
 0x133   :  { %v261_v23 = vmul.f32 %v6503_v37, %v7175_v5  ;;  %v5480_v22 = vadd.s32 4294967169, %v3083_v50  ;;  %v7302_v58 = vadd.f32 %v6665_v43, %v7029_v21  ;;  %v7307_v26 = vshrl.u32 %v7190_v41, 5  ;;  %v1214_v43 = vld [vmem:[%s12106_s7 + $0x20] sm:$0xff] }
 0x134   :  { %v458_v61 = vadd.f32 %v426_v47, %v6839_v25  ;;  %v7283_v24 = vadd.f32 %v1747_v31, %v1708_v30  ;;  %12502 = vst [vmem:[#allocation58_spill] sm:$0xff] %v7296_v33  ;;  %v5910_v47 = vpack.c.bf16 %v1213_v0, %v1212_v63  ;;  %v2881_v30 = vadd.s32 1, %v5472_v52 }
 0x135   :  { %v5484_v31 = vadd.s32 4294967169, %v3187_v3  ;;  %12503 = vst [vmem:[#allocation59_spill] sm:$0xff] %v7302_v58  ;;  %12504 = vst [vmem:[#allocation60_spill] sm:$0xff] %v7307_v26  ;;  %v2797_v52 = vshrl.u32 %v12465_v49, %v7265_v28  ;;  %v457_v3 = vadd.f32 %v425_v1, %v261_v23  ;;  %v1707_v5 = vmul.f32 %v6631_v48, %v7224_v62  ;;  %v7327_v48 = vld [vmem:[%s12101_s2] ss:$0 sm:$0xff] }
 0x136   :  { %v545_v25 = vpop.permute.xlu1 %544  ;;  %v654_v19 = vadd.f32 %v622_v32, %v458_v61  ;;  %5923 = vmatprep.subr.bf16.mxu1 %v5910_v47  ;;  %5911 = vmatprep.subr.bf16.mxu0 %v5910_v47  ;;  %v2796_v21 = vshll.u32 %v12471_v60, %v7232_v9  ;;  %v7321_v41 = vand.u32 31, %v2987_v38  ;;  %v3394_v50 = vand.u32 2139095040, %v7296_v33 }
 0x137   :  { %v621_v14 = vmul.f32 %v6511_v42, %v545_v25  ;;  %v1746_v34 = vmul.f32 %v6624_v16, %v545_v25  ;;  %5927 = vmatpush3.bf16.msra.mxu1 %v5910_v47  ;;  %v1215_v16 = vld [vmem:[%s12106_s7 + $0x28] sm:$0xff]  ;;  %5913 = vmatpush3.bf16.msra.mxu0 %v5910_v47  ;;  %v7330_v32 = vor.u32 %v2794_v45, %v2793_v44  ;;  %vm2882_vm3 = vcmp.gt.s32.totalorder %v2881_v30, 0 }
 0x138   :  { %12505 = vst [vmem:[#allocation61_spill] sm:$0xff] %v7321_v41  ;;  %v693_v62 = vmul.f32 %v7327_v48, %v654_v19  ;;  %v3193_v0 = vadd.s32 1, %v5484_v31  ;;  %v3089_v25 = vadd.s32 1, %v5480_v22  ;;  %v3290_v23 = vand.u32 2139095040, %v7302_v58  ;;  %v7346_v31 = vld [vmem:[%s12102_s3] ss:$0 sm:$0xff] }
 0x139   :  { %12506 = vst [vmem:[#allocation62_spill] sm:$0xff] %v7330_v32  ;;  %v653_v1 = vadd.f32 %v621_v14, %v457_v3  ;;  %v7332_v61 = vadd.f32 %v1746_v34, %v1707_v5  ;;  %v5914_v33 = vpack.c.bf16 %v1215_v16, %v1214_v43  ;;  %v2798_v9 = vor.u32 %v2797_v52, %v2796_v21  ;;  %v557_v16 = vpop.permute.xlu0 %556 }
 0x13a   :  { %vm2802_vm5 = vcmp.lt.s32.totalorder %v7307_v26, 4  ;;  %v7341_v44 = vsub.s32 32, %v7321_v41  ;;  %v2883_v14 = vsel %vm2882_vm3, %v2881_v30, 0  ;;  %v3395_v45 = vshrl.u32 %v3394_v50, 23 }
 0x13b   :  { %v7334_v63 = vpop.permute.xlu1 %181  ;;  %v692_v47 = vmul.f32 %v7327_v48, %v653_v1  ;;  %v732_v22 = vadd.f32 %v7346_v31, %v693_v62  ;;  %5924 = vmatprep.subr.bf16.mxu1 %v5914_v33  ;;  %5915 = vmatprep.subr.bf16.mxu0 %v5914_v33  ;;  %v7352_v19 = vsel %vm2698_vm4, %v7274_v57, 920167782  ;;  %v7356_v34 = vsel %vm2698_vm4, %v2694_v53, 1326507024 }
 0x13c   :  { %12507 = vst [vmem:[#allocation63_spill] sm:$0xff] %v7341_v44  ;;  %12508 = vst [vmem:[#allocation64_spill] sm:$0xff] %v7352_v19  ;;  %v7361_v30 = vsel %vm2802_vm5, %v7330_v32, 920167782  ;;  %5928 = vmatpush3.bf16.msra.mxu1 %v5914_v33  ;;  %5917 = vmatpush3.bf16.msra.mxu0 %v5914_v33  ;;  %v7364_v3 = vshrl.u32 %v2987_v38, 5  ;;  %vm3194_vm6 = vcmp.gt.s32.totalorder %v3193_v0, 0  ;;  %v3001_v21 = vshll.u32 %v12470_v11, %v7321_v41 }
 0x13d   :  { %12509 = vst [vmem:[#allocation65_spill] sm:$0xff] %v7356_v34  ;;  %12510 = vst [vmem:[#allocation66_spill] sm:$0xff] %v7361_v30  ;;  %v731_v52 = vadd.f32 %v7346_v31, %v692_v47  ;;  %vm3090_vm8 = vcmp.gt.s32.totalorder %v3089_v25, 0  ;;  %v3291_v5 = vshrl.u32 %v3290_v23, 23  ;;  %v7368_v53 = vsel %vm2802_vm5, %v2798_v9, 1326507024 }
 0x13e   :  { %12511 = vst [vmem:[#allocation67_spill] sm:$0xff] %v7364_v3  ;;  %12512 = vst [vmem:[#allocation68_spill] sm:$0xff] %v7368_v53  ;;  %v7372_v50 = vand.u32 31, %v2883_v14  ;;  %v3002_v33 = vshrl.u32 %v12471_v60, %v7341_v44  ;;  %v3004_v38 = vshll.u32 %v12471_v60, %v7321_v41  ;;  %v5492_v1 = vadd.s32 4294967169, %v3395_v45  ;;  %v1216_v47 = vld [vmem:[%s12106_s7 + $0x30] sm:$0xff]  ;;  %v1217_v9 = vld [vmem:[%s12106_s7 + $0x38] sm:$0xff] }
 0x13f   :  { %v763_v62 = vmax.f32 %v731_v52, 0.0  ;;  %v764_v23 = vmax.f32 %v732_v22, 0.0  ;;  %v3195_v58 = vsel %vm3194_vm6, %v3193_v0, 0  ;;  %v7384_v57 = vsel %vm3090_vm8, %v3089_v25, 0  ;;  %v7390_v52 = vld [vmem:[%s12103_s11] ss:$0 sm:$0xff] }
 0x140   :  { %v357_v43 = vpop.permute.xlu1 %356  ;;  %12513 = vst [vmem:[#allocation69_spill] sm:$0xff] %v7372_v50  ;;  %v1749_v45 = vmul.f32 %v7390_v52, %v557_v16  ;;  %v5918_v22 = vpack.c.bf16 %v1217_v9, %v1216_v47  ;;  %v3005_v41 = vshrl.u32 %v12465_v49, %v7341_v44  ;;  %vm3010_vm11 = vcmp.lt.s32.totalorder %v7364_v3, 4  ;;  %v7406_v47 = vld [vmem:[%s12104_s10] ss:$0 sm:$0xff] }
 0x141   :  { %5821 = vmatprep.mubr.msk.f32.mxu0 %vm778_vm0, %v763_v62  ;;  %v7396_v34 = vshrl.u32 %v2883_v14, 5  ;;  %v5488_v0 = vadd.s32 4294967169, %v3291_v5  ;;  %v7400_v62 = vsub.s32 32, %v7372_v50  ;;  %v624_v44 = vmul.f32 %v6511_v42, %v557_v16  ;;  %v7420_v32 = vld [vmem:[%s12105_s12] ss:$0 sm:$0xff] }
 0x142   :  { %5822 = vmatmul.mubr.msk.f32.gmra.mrb[18].mxu0 %vm778_vm0, %v764_v23  ;;  %5925 = vmatprep.subr.bf16.mxu1 %v5918_v22  ;;  %v7410_v14 = vor.u32 %v3002_v33, %v3001_v21  ;;  %v7412_v5 = vand.u32 31, %v3195_v58  ;;  %v7415_v23 = vand.u32 31, %v7384_v57  ;;  %v3401_v51 = vadd.s32 1, %v5492_v1 }
 0x143   :  { %12514 = vst [vmem:[#allocation70_spill] sm:$0xff] %v7396_v34  ;;  %12515 = vst [vmem:[#allocation71_spill] sm:$0xff] %v7400_v62  ;;  %5919 = vmatprep.subr.bf16.mxu0 %v5918_v22  ;;  %5929 = vmatpush3.bf16.msra.mxu1 %v5918_v22  ;;  %v7424_v16 = vadd.f32 %v7420_v32, %v7142_v18  ;;  %v427_v21 = vmul.f32 %v6501_v35, %v357_v43  ;;  %v3297_v30 = vadd.s32 1, %v5488_v0 }
 0x144   :  { %v361_v25 = vpop.permute.xlu1 %360  ;;  %12516 = vst [vmem:[#allocation72_spill] sm:$0xff] %v7410_v14  ;;  %12517 = vst [vmem:[#allocation73_spill] sm:$0xff] %v7412_v5  ;;  %5921 = vmatpush3.bf16.msra.mxu0 %v5918_v22  ;;  %v3006_v53 = vor.u32 %v3005_v41, %v3004_v38  ;;  %v2897_v1 = vshll.u32 %v12470_v11, %v7372_v50  ;;  %v2900_v22 = vshll.u32 %v12471_v60, %v7372_v50 }
 0x145   :  { %v428_v19 = vmul.f32 %v6501_v35, %v361_v25  ;;  %v1710_v9 = vmul.f32 %v7406_v47, %v361_v25  ;;  %12518 = vst [vmem:[#allocation74_spill] sm:$0xff] %v7415_v23  ;;  %12519 = vst [vmem:[#allocation75_spill] sm:$0xff] %v7424_v16  ;;  %v2898_v26 = vshrl.u32 %v12471_v60, %v7400_v62  ;;  %v7441_v41 = vsub.s32 32, %v7412_v5 }
 0x146   :  { %v2901_v18 = vshrl.u32 %v12465_v49, %v7400_v62  ;;  %v263_v28 = vmul.f32 %v6503_v37, %v7334_v63  ;;  %vm3402_vm12 = vcmp.gt.s32.totalorder %v3401_v51, 0  ;;  %vm2906_vm14 = vcmp.lt.s32.totalorder %v7396_v34, 4 }
 0x147   :  { %v460_v33 = vadd.f32 %v428_v19, %v6863_v17  ;;  %v7428_v25 = vadd.f32 %v1749_v45, %v1710_v9  ;;  %12520 = vst [vmem:[#allocation76_spill] sm:$0xff] %v7441_v41  ;;  %v7447_v0 = vsub.s32 32, %v7415_v23  ;;  %v3602_v9 = vand.u32 2139095040, %v7424_v16 }
 0x148   :  { %v459_v50 = vadd.f32 %v427_v21, %v263_v28  ;;  %v1709_v63 = vmul.f32 %v7406_v47, %v357_v43  ;;  %vm3298_vm2 = vcmp.gt.s32.totalorder %v3297_v30, 0  ;;  %v7461_v62 = vor.u32 %v2898_v26, %v2897_v1 }
 0x149   :  { %v656_v17 = vadd.f32 %v624_v44, %v460_v33  ;;  %v553_v19 = vpop.permute.xlu1 %552  ;;  %12521 = vst [vmem:[#allocation77_spill] sm:$0xff] %v7447_v0  ;;  %v7454_v44 = vsel %vm3010_vm11, %v7410_v14, 920167782  ;;  %v7458_v33 = vsel %vm3010_vm11, %v3006_v53, 1326507024  ;;  %v3403_v46 = vsel %vm3402_vm12, %v3401_v51, 0 }
 0x14a   :  { %v623_v38 = vmul.f32 %v6511_v42, %v553_v19  ;;  %v1748_v45 = vmul.f32 %v7390_v52, %v553_v19  ;;  %12522 = vst [vmem:[#allocation78_spill] sm:$0xff] %v7454_v44  ;;  %12523 = vst [vmem:[#allocation79_spill] sm:$0xff] %v7458_v33  ;;  %v2902_v28 = vor.u32 %v2901_v18, %v2900_v22  ;;  %v7465_v43 = vshrl.u32 %v3195_v58, 5  ;;  %v565_v33 = vpop.permute.xlu0 %564 }
 0x14b   :  { %v695_v19 = vmul.f32 %v7327_v48, %v656_v17  ;;  %12524 = vst [vmem:[#allocation80_spill] sm:$0xff] %v7461_v62  ;;  %v3210_v21 = vshrl.u32 %v12471_v60, %v7441_v41  ;;  %v3213_v14 = vshrl.u32 %v12465_v49, %v7441_v41  ;;  %v3106_v26 = vshrl.u32 %v12471_v60, %v7447_v0 }
 0x14c   :  { %v655_v20 = vadd.f32 %v623_v38, %v459_v50  ;;  %v7463_v16 = vadd.f32 %v1748_v45, %v1709_v63  ;;  %12525 = vst [vmem:[#allocation81_spill] sm:$0xff] %v7465_v43  ;;  %v3299_v1 = vsel %vm3298_vm2, %v3297_v30, 0  ;;  %v3603_v51 = vshrl.u32 %v3602_v9, 23 }
 0x14d   :  { %v3209_v58 = vshll.u32 %v12470_v11, %v7412_v5  ;;  %v3109_v22 = vshrl.u32 %v12465_v49, %v7447_v0  ;;  %v7480_v18 = vand.u32 31, %v3403_v46  ;;  %v734_v17 = vadd.f32 %v7346_v31, %v695_v19 }
 0x14e   :  { %v7471_v53 = vpop.permute.xlu1 %191  ;;  %v694_v50 = vmul.f32 %v7327_v48, %v655_v20  ;;  %v3212_v38 = vshll.u32 %v12471_v60, %v7412_v5  ;;  %v3105_v45 = vshll.u32 %v12470_v11, %v7415_v23  ;;  %v7489_v30 = vadd.f32 %v7420_v32, %v7182_v56  ;;  %v7501_v5 = vpop.permute.xlu0 %572 }
 0x14f   :  { %12526 = vst [vmem:[#allocation82_spill] sm:$0xff] %v7480_v18  ;;  %v7492_v9 = vor.u32 %v3210_v21, %v3209_v58  ;;  %v7495_v63 = vshrl.u32 %v7384_v57, 5  ;;  %v3108_v19 = vshll.u32 %v12471_v60, %v7415_v23  ;;  %v7499_v0 = vand.u32 31, %v3299_v1 }
 0x150   :  { %12527 = vst [vmem:[#allocation83_spill] sm:$0xff] %v7489_v30  ;;  %v733_v20 = vadd.f32 %v7346_v31, %v694_v50  ;;  %v3214_v41 = vor.u32 %v3213_v14, %v3212_v38  ;;  %v7503_v44 = vor.u32 %v3106_v26, %v3105_v45  ;;  %v5500_v3 = vadd.s32 4294967169, %v3603_v51 }
 0x151   :  { %12528 = vst [vmem:[#allocation84_spill] sm:$0xff] %v7492_v9  ;;  %12529 = vst [vmem:[#allocation85_spill] sm:$0xff] %v7495_v63  ;;  %v7508_v21 = vsel %vm2906_vm14, %v7461_v62, 920167782  ;;  %v3110_v57 = vor.u32 %v3109_v22, %v3108_v19  ;;  %v7511_v50 = vsub.s32 32, %v7480_v18  ;;  %v766_v58 = vmax.f32 %v734_v17, 0.0 }
 0x152   :  { %12530 = vst [vmem:[#allocation86_spill] sm:$0xff] %v7499_v0  ;;  %12531 = vst [vmem:[#allocation87_spill] sm:$0xff] %v7503_v44  ;;  %v765_v15 = vmax.f32 %v733_v20, 0.0  ;;  %v7515_v23 = vsel %vm2906_vm14, %v2902_v28, 1326507024  ;;  %vm12276_vm3 = vcmp.lt.s32.totalorder %v7465_v43, 4  ;;  %v7521_v26 = vadd.f32 %v7420_v32, %v7283_v24 }
 0x153   :  { %v365_v56 = vpop.permute.xlu1 %364  ;;  %12532 = vst [vmem:[#allocation88_spill] sm:$0xff] %v7508_v21  ;;  %12533 = vst [vmem:[#allocation89_spill] sm:$0xff] %v7511_v50  ;;  %v3498_v14 = vand.u32 2139095040, %v7489_v30  ;;  %v7527_v51 = vsel %vm12276_vm3, %v7492_v9, 920167782  ;;  %vm12275_vm6 = vcmp.lt.s32.totalorder %v7495_v63, 4  ;;  %v1751_v45 = vmul.f32 %v7390_v52, %v565_v33 }
 0x154   :  { %12534 = vst [vmem:[#allocation90_spill] sm:$0xff] %v7515_v23  ;;  %12535 = vst [vmem:[#allocation91_spill] sm:$0xff] %v7521_v26  ;;  %5824 = vmatprep.mubr.msk.f32.mxu0 %vm778_vm0, %v765_v15  ;;  %v7530_v22 = vshrl.u32 %v3403_v46, 5  ;;  %v7533_v28 = vsub.s32 32, %v7499_v0  ;;  %v7538_v24 = vsel %vm12276_vm3, %v3214_v41, 1326507024  ;;  %v3417_v20 = vshll.u32 %v12470_v11, %v7480_v18 }
 0x155   :  { %12536 = vst [vmem:[#allocation92_spill] sm:$0xff] %v7527_v51  ;;  %5825 = vmatmul.mubr.msk.f32.gmra.mrb[20].mxu0 %vm778_vm0, %v766_v58  ;;  %12539 = vst [vmem:[#allocation95_spill] sm:$0xff] %v7538_v24  ;;  %v7543_v15 = vsel %vm12275_vm6, %v7503_v44, 920167782  ;;  %v3609_v17 = vadd.s32 1, %v5500_v3  ;;  %v3418_v41 = vshrl.u32 %v12471_v60, %v7511_v50  ;;  %v3421_v19 = vshrl.u32 %v12465_v49, %v7511_v50  ;;  %v581_v58 = vpop.permute.xlu0 %580 }
 0x156   :  { %12537 = vst [vmem:[#allocation93_spill] sm:$0xff] %v7530_v22  ;;  %12538 = vst [vmem:[#allocation94_spill] sm:$0xff] %v7533_v28  ;;  %v7548_v46 = vsel %vm12275_vm6, %v3110_v57, 1326507024  ;;  %v3499_v30 = vshrl.u32 %v3498_v14, 23  ;;  %v3810_v3 = vand.u32 2139095040, %v7521_v26  ;;  %v3420_v57 = vshll.u32 %v12471_v60, %v7480_v18 }
 0x157   :  { %12540 = vst [vmem:[#allocation96_spill] sm:$0xff] %v7543_v15  ;;  %v369_v38 = vpop.permute.xlu1 %368  ;;  %12541 = vst [vmem:[#allocation97_spill] sm:$0xff] %v7548_v46  ;;  %vm12274_vm8 = vcmp.lt.s32.totalorder %v7530_v22, 4  ;;  %v3314_v46 = vshrl.u32 %v12471_v60, %v7533_v28  ;;  %v626_v63 = vmul.f32 %v6511_v42, %v565_v33  ;;  %vm3610_vm12 = vcmp.gt.s32.totalorder %v3609_v17, 0 }
 0x158   :  { %v430_v44 = vmul.f32 %v6501_v35, %v369_v38  ;;  %v1712_v15 = vmul.f32 %v7406_v47, %v369_v38  ;;  %v429_v50 = vmul.f32 %v6501_v35, %v365_v56  ;;  %v7569_v9 = vor.u32 %v3418_v41, %v3417_v20 }
 0x159   :  { %v7571_v38 = vshrl.u32 %v3299_v1, 5  ;;  %v3313_v18 = vshll.u32 %v12470_v11, %v7499_v0  ;;  %v3317_v24 = vshrl.u32 %v12465_v49, %v7533_v28  ;;  %v3422_v43 = vor.u32 %v3421_v19, %v3420_v57 }
 0x15a   :  { %v462_v14 = vadd.f32 %v430_v44, %v6869_v54  ;;  %v7567_v26 = vadd.f32 %v1751_v45, %v1712_v15  ;;  %12542 = vst [vmem:[#allocation98_spill] sm:$0xff] %v7569_v9  ;;  %v5496_v33 = vadd.s32 4294967169, %v3499_v30  ;;  %v3811_v62 = vshrl.u32 %v3810_v3, 23  ;;  %v589_v45 = vpop.permute.xlu0 %588 }
 0x15b   :  { %12543 = vst [vmem:[#allocation99_spill] sm:$0xff] %v7571_v38  ;;  %v265_v23 = vmul.f32 %v6503_v37, %v7471_v53  ;;  %v7579_v54 = vor.u32 %v3314_v46, %v3313_v18  ;;  %v3316_v44 = vshll.u32 %v12471_v60, %v7499_v0  ;;  %v3611_v1 = vsel %vm3610_vm12, %v3609_v17, 0 }
 0x15c   :  { %v561_v51 = vpop.permute.xlu1 %560  ;;  %v658_v15 = vadd.f32 %v626_v63, %v462_v14  ;;  %v1711_v41 = vmul.f32 %v7406_v47, %v365_v56  ;;  %v7588_v3 = vadd.f32 %v7420_v32, %v7332_v61  ;;  %v12256_v18 = vand.u32 2147483647, %v6843_v6 }
 0x15d   :  { %12544 = vst [vmem:[#allocation100_spill] sm:$0xff] %v7579_v54  ;;  %v461_v20 = vadd.f32 %v429_v50, %v265_v23  ;;  %v625_v28 = vmul.f32 %v6511_v42, %v561_v51  ;;  %v1750_v19 = vmul.f32 %v7390_v52, %v561_v51  ;;  %v3318_v30 = vor.u32 %v3317_v24, %v3316_v44 }
 0x15e   :  { %12545 = vst [vmem:[#allocation101_spill] sm:$0xff] %v7588_v3  ;;  %v697_v53 = vmul.f32 %v7327_v48, %v658_v15  ;;  %v3505_v46 = vadd.s32 1, %v5496_v33  ;;  %v5508_v17 = vadd.s32 4294967169, %v3811_v62  ;;  %v7597_v56 = vsel %vm12274_vm8, %v7569_v9, 920167782  ;;  %v597_v15 = vpop.permute.xlu0 %596 }
 0x15f   :  { %v657_v63 = vadd.f32 %v625_v28, %v461_v20  ;;  %v7592_v57 = vadd.f32 %v1750_v19, %v1711_v41  ;;  %12546 = vst [vmem:[#allocation102_spill] sm:$0xff] %v7597_v56  ;;  %v7601_v50 = vsel %vm12274_vm8, %v3422_v43, 1326507024  ;;  %vm12261_vm2 = vcmp.lt.s32.totalorder %v7571_v38, 4 }
 0x160   :  { %12547 = vst [vmem:[#allocation103_spill] sm:$0xff] %v7601_v50  ;;  %v7604_v61 = vand.u32 31, %v3611_v1  ;;  %v7609_v62 = vsel %vm12261_vm2, %v7579_v54, 920167782  ;;  %v628_v28 = vmul.f32 %v6511_v42, %v7501_v5  ;;  %v1753_v24 = vmul.f32 %v7390_v52, %v7501_v5 }
 0x161   :  { %v202_v23 = vpop.permute.xlu1 %201  ;;  %12549 = vst [vmem:[#allocation105_spill] sm:$0xff] %v7609_v62  ;;  %v696_v51 = vmul.f32 %v7327_v48, %v657_v63  ;;  %v7618_v43 = vsel %vm12261_vm2, %v3318_v30, 1326507024  ;;  %v3706_v14 = vand.u32 2139095040, %v7588_v3  ;;  %v736_v33 = vadd.f32 %v7346_v31, %v697_v53 }
 0x162   :  { %12548 = vst [vmem:[#allocation104_spill] sm:$0xff] %v7604_v61  ;;  %12550 = vst [vmem:[#allocation106_spill] sm:$0xff] %v7618_v43  ;;  %v7623_v44 = vmul.f32 %v6511_v42, %v581_v58  ;;  %vm3506_vm12 = vcmp.gt.s32.totalorder %v3505_v46, 0  ;;  %v3817_v20 = vadd.s32 1, %v5508_v17  ;;  %v7628_v19 = vand.u32 8388607, %v12256_v18 }
 0x163   :  { %v735_v41 = vadd.f32 %v7346_v31, %v696_v51  ;;  %v7631_v5 = vsub.s32 32, %v7604_v61  ;;  %v7634_v30 = vmul.f32 %v7390_v52, %v581_v58  ;;  %v7637_v53 = vmul.f32 %v6511_v42, %v589_v45 }
 0x164   :  { %v7640_v3 = vmul.f32 %v7390_v52, %v589_v45  ;;  %v7642_v17 = vshrl.u32 %v3611_v1, 5  ;;  %v7645_v54 = vmul.f32 %v6511_v42, %v597_v15  ;;  %v7648_v18 = vmul.f32 %v7390_v52, %v597_v15 }
 0x165   :  { %12551 = vst [vmem:[#allocation107_spill] sm:$0xff] %v7637_v53  ;;  %v767_v51 = vmax.f32 %v735_v41, 0.0  ;;  %v3625_v58 = vshll.u32 %v12470_v11, %v7604_v61  ;;  %v3507_v43 = vsel %vm3506_vm12, %v3505_v46, 0  ;;  %v3707_v62 = vshrl.u32 %v3706_v14, 23 }
 0x166   :  { %v373_v63 = vpop.permute.xlu1 %372  ;;  %12552 = vst [vmem:[#allocation108_spill] sm:$0xff] %v7642_v17  ;;  %12553 = vst [vmem:[#allocation109_spill] sm:$0xff] %v7645_v54  ;;  %v768_v38 = vmax.f32 %v736_v33, 0.0  ;;  %v7654_v0 = vshll.u32 %v12471_v60, %v7604_v61  ;;  %vm3818_vm2 = vcmp.gt.s32.totalorder %v3817_v20, 0  ;;  %v7658_v1 = vadd.f32 %v7420_v32, %v7428_v25 }
 0x167   :  { %12554 = vst [vmem:[#allocation110_spill] sm:$0xff] %v7648_v18  ;;  %5827 = vmatprep.mubr.msk.f32.mxu0 %vm778_vm0, %v767_v51  ;;  %v2151_v45 = vor.u32 8388608, %v7628_v19  ;;  %v3626_v15 = vshrl.u32 %v12471_v60, %v7631_v5  ;;  %v12556_v14 = vmov 2475754826   ;;  %v12557_v41 = vmov 2131351028  }
 0x168   :  { %12555 = vst [vmem:[#allocation111_spill] sm:$0xff] %v7658_v1  ;;  %5828 = vmatmul.mubr.msk.f32.gmra.mrb[22].mxu0 %vm778_vm0, %v768_v38  ;;  %v2161_v33 = vshrl.u32 %v12556_v14, %v7068_v39  ;;  %v2164_v61 = vshrl.u32 %v12557_v41, %v7068_v39  ;;  %v2167_v25 = vshrl.u32 %v12470_v11, %v7068_v39  ;;  %v7671_v56 = vand.u32 31, %v3507_v43 }
 0x169   :  { %v2160_v9 = vshll.u32 %v12461_v2, %v7038_v4  ;;  %v7677_v38 = vsel %vm3818_vm2, %v3817_v20, 0  ;;  %v5504_v50 = vadd.s32 4294967169, %v3707_v62  ;;  %v2163_v22 = vshll.u32 %v12556_v14, %v7038_v4 }
 0x16a   :  { %v377_v46 = vpop.permute.xlu1 %376  ;;  %12558 = vst [vmem:[#allocation112_spill] sm:$0xff] %v7671_v56  ;;  %v2166_v21 = vshll.u32 %v12557_v41, %v7038_v4  ;;  %v4018_v34 = vand.u32 2139095040, %v7658_v1  ;;  %v431_v54 = vmul.f32 %v6501_v35, %v373_v63  ;;  %v7697_v14 = vsub.s32 32, %v7671_v56 }
 0x16b   :  { %v432_v51 = vmul.f32 %v6501_v35, %v377_v46  ;;  %v1714_v19 = vmul.f32 %v7406_v47, %v377_v46  ;;  %v3629_v46 = vshrl.u32 %v12465_v49, %v7631_v5  ;;  %v7690_v20 = vor.u32 %v2161_v33, %v2160_v9 }
 0x16c   :  { %v7692_v62 = vor.u32 %v2164_v61, %v2163_v22  ;;  %v7694_v53 = vor.u32 %v2167_v25, %v2166_v21  ;;  %12559 = vst [vmem:[#allocation113_spill] sm:$0xff] %v7697_v14  ;;  %v7700_v4 = vand.u32 31, %v7677_v38  ;;  %v267_v1 = vmul.f32 %v6503_v37, %v202_v23 }
 0x16d   :  { %v464_v18 = vadd.f32 %v432_v51, %v6873_v59  ;;  %v7686_v6 = vadd.f32 %v1753_v24, %v1714_v19  ;;  %v3713_v51 = vadd.s32 1, %v5504_v50  ;;  %vm2175_vm2 = vcmp.lt.s32.totalorder %v7091_v29, 1 }
 0x16e   :  { %12560 = vst [vmem:[#allocation114_spill] sm:$0xff] %v7700_v4  ;;  %v4019_v22 = vshrl.u32 %v4018_v34, 23  ;;  %v463_v21 = vadd.f32 %v431_v54, %v267_v1  ;;  %v1713_v61 = vmul.f32 %v7406_v47, %v373_v63  ;;  %vm2177_vm12 = vcmp.lt.s32.totalorder %v7091_v29, 3 }
 0x16f   :  { %v660_v59 = vadd.f32 %v628_v28, %v464_v18  ;;  %v569_v24 = vpop.permute.xlu1 %568  ;;  %vm12281_vm8 = vcmp.lt.s32.totalorder %v7642_v17, 4  ;;  %v7711_v23 = vadd.f32 %v7420_v32, %v7463_v16  ;;  %v2183_v50 = vsel %vm2175_vm2, %v7690_v20, %v7692_v62 }
 0x170   :  { %v627_v19 = vmul.f32 %v6511_v42, %v569_v24  ;;  %v1752_v9 = vmul.f32 %v7390_v52, %v569_v24  ;;  %v2185_v34 = vsel %vm2177_vm12, %v7694_v53, %v7202_v13  ;;  %v2187_v16 = vsel %vm2175_vm2, %v7692_v62, %v7694_v53 }
 0x171   :  { %12561 = vst [vmem:[#allocation115_spill] sm:$0xff] %v7711_v23  ;;  %v699_v18 = vmul.f32 %v7327_v48, %v660_v59  ;;  %v2189_v63 = vsel %vm2177_vm12, %v7134_v55, %v7206_v40  ;;  %v7732_v1 = vor.u32 %v3626_v15, %v3625_v58  ;;  %v7734_v33 = vshrl.u32 %v3507_v43, 5 }
 0x172   :  { %v659_v54 = vadd.f32 %v627_v19, %v463_v21  ;;  %v7722_v28 = vadd.f32 %v1752_v9, %v1713_v61  ;;  %v7737_v25 = vsub.s32 32, %v7700_v4  ;;  %vm2176_vm6 = vcmp.lt.s32.totalorder %v7091_v29, 2 }
 0x173   :  { %12562 = vst [vmem:[#allocation116_spill] sm:$0xff] %v7732_v1  ;;  %12563 = vst [vmem:[#allocation117_spill] sm:$0xff] %v7734_v33  ;;  %vm3714_vm3 = vcmp.gt.s32.totalorder %v3713_v51, 0  ;;  %v5516_v59 = vadd.s32 4294967169, %v4019_v22  ;;  %v2186_v19 = vsel %vm2176_vm6, %v2183_v50, %v2185_v34  ;;  %v3914_v55 = vand.u32 2139095040, %v7711_v23 }
 0x174   :  { %12564 = vst [vmem:[#allocation118_spill] sm:$0xff] %v7737_v25  ;;  %v7739_v13 = vpop.permute.xlu1 %211  ;;  %v698_v24 = vmul.f32 %v7327_v48, %v659_v54  ;;  %v738_v40 = vadd.f32 %v7346_v31, %v699_v18  ;;  %v2190_v43 = vsel %vm2176_vm6, %v2187_v16, %v2189_v63  ;;  %v7749_v58 = vshll.u32 %v2151_v45, 8 }
 0x175   :  { %v3630_v15 = vor.u32 %v3629_v46, %v7654_v0  ;;  %v3521_v9 = vshll.u32 %v12470_v11, %v7671_v56  ;;  %v3522_v22 = vshrl.u32 %v12471_v60, %v7697_v14  ;;  %v7759_v61 = vshrl.u32 %v12465_v49, %v7697_v14 }
 0x176   :  { %v737_v21 = vadd.f32 %v7346_v31, %v698_v24  ;;  %v3715_v18 = vsel %vm3714_vm3, %v3713_v51, 0  ;;  %v7762_v50 = vmul.u32.u64.low %v7749_v58, %v2186_v19  ;;  %v7763_v34 = vmul.u32.u64.high %v7749_v58, %v2186_v19, %v7762_v50 }
 0x177   :  { %v4025_v45 = vadd.s32 1, %v5516_v59  ;;  %v7767_v54 = vmul.u32.u64.low %v7749_v58, %v2190_v43  ;;  %v7768_v16 = vmul.u32.u64.high %v7749_v58, %v2190_v43, %v7767_v54  ;;  %v7772_v63 = vshll.u32 %v12471_v60, %v7671_v56 }
 0x178   :  { %v769_v46 = vmax.f32 %v737_v21, 0.0  ;;  %v3834_v24 = vshrl.u32 %v12471_v60, %v7737_v25  ;;  %v3915_v51 = vshrl.u32 %v3914_v55, 23  ;;  %v770_v23 = vmax.f32 %v738_v40, 0.0 }
 0x179   :  { %v381_v0 = vpop.permute.xlu1 %380  ;;  %v7779_v19 = vsel %vm12281_vm8, %v7732_v1, 920167782  ;;  %v7783_v59 = vsel %vm12281_vm8, %v3630_v15, 1326507024  ;;  %v7785_v43 = vand.u32 31, %v3715_v18  ;;  %v7789_v21 = vadd.f32 %v7420_v32, %v7567_v26 }
 0x17a   :  { %12565 = vst [vmem:[#allocation119_spill] sm:$0xff] %v7779_v19  ;;  %12566 = vst [vmem:[#allocation120_spill] sm:$0xff] %v7783_v59  ;;  %5830 = vmatprep.mubr.msk.f32.mxu0 %vm778_vm0, %v769_v46  ;;  %v7792_v54 = vor.u32 %v3522_v22, %v3521_v9  ;;  %v3526_v55 = vor.u32 %v7759_v61, %v7772_v63  ;;  %v3833_v40 = vshll.u32 %v12470_v11, %v7700_v4 }
 0x17b   :  { %12567 = vst [vmem:[#allocation121_spill] sm:$0xff] %v7785_v43  ;;  %12568 = vst [vmem:[#allocation122_spill] sm:$0xff] %v7789_v21  ;;  %5831 = vmatmul.mubr.msk.f32.gmra.mrb[24].mxu0 %vm778_vm0, %v770_v23  ;;  %v2159_v15 = vshrl.u32 %v12461_v2, %v7068_v39  ;;  %v7802_v56 = vshrl.u32 %v7677_v38, 5  ;;  %v7806_v26 = vshll.u32 %v12471_v60, %v7700_v4  ;;  %vm4026_vm3 = vcmp.gt.s32.totalorder %v4025_v45, 0 }
 0x17c   :  { %12569 = vst [vmem:[#allocation123_spill] sm:$0xff] %v7792_v54  ;;  %v2180_v22 = vsel %vm2178_vm13, %v7694_v53, 2102212464  ;;  %v7811_v61 = vor.u32 %v3834_v24, %v3833_v40  ;;  %v3837_v23 = vshrl.u32 %v12465_v49, %v7737_v25  ;;  %v7815_v46 = vshrl.u32 %v3715_v18, 5 }
 0x17d   :  { %12570 = vst [vmem:[#allocation124_spill] sm:$0xff] %v7802_v56  ;;  %v385_v9 = vpop.permute.xlu1 %384  ;;  %v5512_v39 = vadd.s32 4294967169, %v3915_v51  ;;  %vm12328_vm8 = vcmp.lt.s32.totalorder %v7734_v33, 4  ;;  %v7819_v38 = vsub.s32 32, %v7785_v43  ;;  %v4226_v63 = vand.u32 2139095040, %v7789_v21 }
 0x17e   :  { %12571 = vst [vmem:[#allocation125_spill] sm:$0xff] %v7811_v61  ;;  %12572 = vst [vmem:[#allocation126_spill] sm:$0xff] %v7815_v46  ;;  %v434_v4 = vmul.f32 %v6501_v35, %v385_v9  ;;  %v1716_v14 = vmul.f32 %v7406_v47, %v385_v9  ;;  %v7824_v53 = vsel %vm4026_vm3, %v4025_v45, 0  ;;  %v2179_v24 = vsel %vm2175_vm2, %v2159_v15, %v7690_v20 }
 0x17f   :  { %12573 = vst [vmem:[#allocation127_spill] sm:$0xff] %v7819_v38  ;;  %v2181_v18 = vsel %vm2177_vm12, %v7692_v62, %v2180_v22  ;;  %v2201_v51 = vadd.s32 1, %v7763_v34  ;;  %v433_v40 = vmul.f32 %v6501_v35, %v381_v0  ;;  %vm2200_vm13 = vc.u32 %v7768_v16, %v7762_v50 }
 0x180   :  { %v466_v21 = vadd.f32 %v434_v4, %v6877_v8  ;;  %v7836_v25 = vadd.f32 %v7634_v30, %v1716_v14  ;;  %v3838_v45 = vor.u32 %v3837_v23, %v7806_v26  ;;  %v3729_v20 = vshll.u32 %v12470_v11, %v7785_v43 }
 0x181   :  { %v3921_v15 = vadd.s32 1, %v5512_v39  ;;  %v7845_v62 = vadd.f32 %v7420_v32, %v7592_v57  ;;  %v3730_v8 = vshrl.u32 %v12471_v60, %v7819_v38  ;;  %v4227_v4 = vshrl.u32 %v4226_v63, 23 }
 0x182   :  { %v577_v9 = vpop.permute.xlu1 %576  ;;  %v269_v30 = vmul.f32 %v6503_v37, %v7739_v13  ;;  %v2182_v14 = vsel %vm2176_vm6, %v2179_v24, %v2181_v18  ;;  %v3733_v26 = vshrl.u32 %v12465_v49, %v7819_v38  ;;  %v7856_v22 = vand.u32 31, %v7824_v53  ;;  %v12595_v38 = vld [vmem:[#allocation107_spill] sm:$0xff] }
 0x183   :  { %12574 = vst [vmem:[#allocation128_spill] sm:$0xff] %v7845_v62  ;;  %v662_v57 = vadd.f32 %v7623_v44, %v466_v21  ;;  %v2202_v23 = vsel %vm2200_vm13, %v2201_v51, %v7763_v34  ;;  %v1715_v19 = vmul.f32 %v7406_v47, %v381_v0  ;;  %v629_v63 = vmul.f32 %v6511_v42, %v577_v9 }
 0x184   :  { %12575 = vst [vmem:[#allocation129_spill] sm:$0xff] %v7856_v22  ;;  %v465_v39 = vadd.f32 %v433_v40, %v269_v30  ;;  %v1754_v13 = vmul.f32 %v7390_v52, %v577_v9  ;;  %vm2074_vm2 = vcmp.lt.s32.totalorder %v6854_v7, 4  ;;  %vm3922_vm6 = vcmp.gt.s32.totalorder %v3921_v15, 0 }
 0x185   :  { %v4122_v29 = vand.u32 2139095040, %v7845_v62  ;;  %v701_v24 = vmul.f32 %v7327_v48, %v662_v57  ;;  %v2198_v18 = vmul.u32 %v7749_v58, %v2182_v14  ;;  %v3732_v44 = vshll.u32 %v12471_v60, %v7785_v43 }
 0x186   :  { %v5524_v34 = vadd.s32 4294967169, %v4227_v4  ;;  %v661_v21 = vadd.f32 %v629_v63, %v465_v39  ;;  %v7869_v51 = vadd.f32 %v1754_v13, %v1715_v19  ;;  %v7874_v40 = vsel %vm12328_vm8, %v7792_v54, 920167782 }
 0x187   :  { %v222_v0 = vpop.permute.xlu1 %221  ;;  %12576 = vst [vmem:[#allocation130_spill] sm:$0xff] %v7874_v40  ;;  %v7878_v9 = vsel %vm12328_vm8, %v3526_v55, 1326507024  ;;  %v7881_v30 = vsub.s32 32, %v7856_v22  ;;  %v7883_v58 = vadd.s32 %v2202_v23, %v2198_v18  ;;  %vm2073_vm12 = vcmp.lt.s32.totalorder %v6854_v7, 3 }
 0x188   :  { %12577 = vst [vmem:[#allocation131_spill] sm:$0xff] %v7878_v9  ;;  %v7886_v4 = vor.u32 %v3730_v8, %v3729_v20  ;;  %v3734_v19 = vor.u32 %v3733_v26, %v3732_v44  ;;  %v3923_v14 = vsel %vm3922_vm6, %v3921_v15, 0  ;;  %v700_v57 = vmul.f32 %v7327_v48, %v661_v21 }
 0x189   :  { %12578 = vst [vmem:[#allocation132_spill] sm:$0xff] %v7881_v30  ;;  %vm12298_vm3 = vcmp.lt.s32.totalorder %v7802_v56, 4  ;;  %vm12295_vm13 = vcmp.lt.s32.totalorder %v7815_v46, 4  ;;  %v4123_v55 = vshrl.u32 %v4122_v29, 23  ;;  %v740_v39 = vadd.f32 %v7346_v31, %v701_v24 }
 0x18a   :  { %12579 = vst [vmem:[#allocation133_spill] sm:$0xff] %v7886_v4  ;;  %v7896_v23 = vsel %vm12298_vm3, %v7811_v61, 920167782  ;;  %v7900_v20 = vsel %vm12298_vm3, %v3838_v45, 1326507024  ;;  %v4233_v8 = vadd.s32 1, %v5524_v34  ;;  %v739_v15 = vadd.f32 %v7346_v31, %v700_v57 }
 0x18b   :  { %12580 = vst [vmem:[#allocation134_spill] sm:$0xff] %v7896_v23  ;;  %12581 = vst [vmem:[#allocation135_spill] sm:$0xff] %v7900_v20  ;;  %vm2072_vm6 = vcmp.lt.s32.totalorder %v6854_v7, 2  ;;  %v4042_v26 = vshrl.u32 %v12471_v60, %v7881_v30  ;;  %v7908_v63 = vshrl.u32 %v12465_v49, %v7881_v30  ;;  %v7910_v13 = vand.u32 31, %v3923_v14  ;;  %v12597_v23 = vld [vmem:[#allocation11_spill] sm:$0xff] }
 0x18c   :  { %v389_v29 = vpop.permute.xlu1 %388  ;;  %v2204_v24 = vadd.s32 536870912, %v7883_v58  ;;  %v7916_v45 = vsel %vm12295_vm13, %v7886_v4, 920167782  ;;  %v7920_v18 = vsel %vm12295_vm13, %v3734_v19, 1326507024  ;;  %v4041_v44 = vshll.u32 %v12470_v11, %v7856_v22 }
 0x18d   :  { %12582 = vst [vmem:[#allocation136_spill] sm:$0xff] %v7910_v13  ;;  %12583 = vst [vmem:[#allocation137_spill] sm:$0xff] %v7916_v45  ;;  %v771_v34 = vmax.f32 %v739_v15, 0.0  ;;  %v7926_v21 = vshll.u32 %v12471_v60, %v7856_v22  ;;  %v5520_v57 = vadd.s32 4294967169, %v4123_v55  ;;  %v772_v62 = vmax.f32 %v740_v39, 0.0 }
 0x18e   :  { %12584 = vst [vmem:[#allocation138_spill] sm:$0xff] %v7920_v18  ;;  %v2080_v30 = vsel %vm2074_vm2, %v6986_v10, 920167782  ;;  %v7932_v4 = vshrl.u32 %v7824_v53, 5  ;;  %v7934_v45 = vshrl.u32 %v3923_v14, 5  ;;  %vm4234_vm13 = vcmp.gt.s32.totalorder %v4233_v8, 0 }
 0x18f   :  { %5833 = vmatprep.mubr.msk.f32.mxu0 %vm778_vm0, %v771_v34  ;;  %v12587_v19 = vor.u32 %v6962_v12, %v6972_v36  ;;  %v7942_v55 = vor.u32 %v4042_v26, %v4041_v44  ;;  %v4046_v39 = vor.u32 %v7908_v63, %v7926_v21  ;;  %v7947_v22 = vsub.s32 32, %v7910_v13  ;;  %v12590_v12 = vld [vmem:[#allocation21_spill] sm:$0xff]  ;;  %v12591_v44 = vld [vmem:[#allocation22_spill] sm:$0xff] }
 0x190   :  { %12585 = vst [vmem:[#allocation139_spill] sm:$0xff] %v7932_v4  ;;  %12586 = vst [vmem:[#allocation140_spill] sm:$0xff] %v7934_v45  ;;  %5834 = vmatmul.mubr.msk.f32.gmra.mrb[26].mxu0 %vm778_vm0, %v772_v62  ;;  %v393_v53 = vpop.permute.xlu1 %392  ;;  %v7950_v14 = vshrl.u32 %v2204_v24, 30  ;;  %v2079_v26 = vsel %vm2071_vm7, %v12590_v12, %v6981_v27  ;;  %v2081_v63 = vsel %vm2073_vm12, %v12591_v44, %v2080_v30  ;;  %v4235_v21 = vsel %vm4234_vm13, %v4233_v8, 0  ;;  %v12593_v30 = vld [vmem:[#allocation12_spill] sm:$0xff] }
 0x191   :  { %v2084_v15 = vsel %vm2074_vm2, %v12587_v19, 1326507024  ;;  %12588 = vst [vmem:[#allocation141_spill] sm:$0xff] %v7942_v55  ;;  %12589 = vst [vmem:[#allocation142_spill] sm:$0xff] %v7947_v22  ;;  %v436_v34 = vmul.f32 %v6501_v35, %v393_v53  ;;  %v1718_v36 = vmul.f32 %v7406_v47, %v393_v53  ;;  %v4129_v19 = vadd.s32 1, %v5520_v57 }
 0x192   :  { %v2083_v62 = vsel %vm2071_vm7, %v6981_v27, %v12591_v44  ;;  %v2085_v24 = vsel %vm2073_vm12, %v6986_v10, %v2084_v15  ;;  %vm12321_vm3 = vcmp.lt.s32.totalorder %v7932_v4, 4  ;;  %v7971_v53 = vadd.f32 %v7420_v32, %v7686_v6 }
 0x193   :  { %v435_v12 = vmul.f32 %v6501_v35, %v389_v29  ;;  %v468_v8 = vadd.f32 %v436_v34, %v12593_v30  ;;  %v7976_v57 = vadd.f32 %v7640_v3, %v1718_v36  ;;  %v3937_v18 = vshll.u32 %v12470_v11, %v7910_v13 }
 0x194   :  { %12592 = vst [vmem:[#allocation21_spill] sm:$0xff] %v7971_v53  ;;  %v3938_v46 = vshrl.u32 %v12471_v60, %v7947_v22  ;;  %v2206_v10 = vshll.u32 %v7950_v14, 30  ;;  %v2082_v15 = vsel %vm2072_vm6, %v2079_v26, %v2081_v63  ;;  %v7985_v6 = vand.u32 31, %v4235_v21 }
 0x195   :  { %v271_v43 = vmul.f32 %v6503_v37, %v222_v0  ;;  %v664_v34 = vadd.f32 %v12595_v38, %v468_v8  ;;  %v585_v30 = vpop.permute.xlu1 %584  ;;  %v2086_v3 = vsel %vm2072_vm6, %v2083_v62, %v2085_v24  ;;  %v7993_v36 = vadd.f32 %v7420_v32, %v7722_v28 }
 0x196   :  { %12594 = vst [vmem:[#allocation22_spill] sm:$0xff] %v7985_v6  ;;  %v631_v61 = vmul.f32 %v6511_v42, %v585_v30  ;;  %v1756_v20 = vmul.f32 %v7390_v52, %v585_v30  ;;  %v12598_v26 = vor.u32 8388608, %v12597_v23  ;;  %vm4130_vm7 = vcmp.gt.s32.totalorder %v4129_v19, 0 }
 0x197   :  { %12596 = vst [vmem:[#allocation12_spill] sm:$0xff] %v7993_v36  ;;  %v4434_v0 = vand.u32 2139095040, %v7971_v53  ;;  %v467_v38 = vadd.f32 %v435_v12, %v271_v43  ;;  %v1717_v8 = vmul.f32 %v7406_v47, %v389_v29  ;;  %v703_v62 = vmul.f32 %v7327_v48, %v664_v34 }
 0x198   :  { %v7999_v63 = vshll.u32 %v12598_v26, 8  ;;  %v8005_v24 = vsub.s32 %v7883_v58, %v2206_v10  ;;  %v3940_v43 = vshll.u32 %v12471_v60, %v7910_v13  ;;  %v3941_v29 = vshrl.u32 %v12465_v49, %v7947_v22 }
 0x199   :  { %v663_v30 = vadd.f32 %v631_v61, %v467_v38  ;;  %v8012_v23 = vadd.f32 %v1756_v20, %v1717_v8  ;;  %v4330_v58 = vand.u32 2139095040, %v7993_v36  ;;  %v2076_v61 = vsel %vm2074_vm2, %v12591_v44, 2102212464  ;;  %v12607_v36 = vld [vmem:[#allocation30_spill] sm:$0xff] }
 0x19a   :  { %v8008_v28 = vmul.u32.u64.low %v7999_v63, %v2082_v15  ;;  %v8009_v56 = vmul.u32.u64.high %v7999_v63, %v2082_v15, %v8008_v28  ;;  %v8015_v26 = vmul.u32.u64.low %v7999_v63, %v2086_v3  ;;  %v8016_v54 = vmul.u32.u64.high %v7999_v63, %v2086_v3, %v8015_v26  ;;  %v8023_v12 = vpop.permute.xlu1 %231 }
 0x19b   :  { %v8028_v20 = vor.u32 %v3938_v46, %v3937_v18  ;;  %v8031_v10 = vsub.s32 32, %v7985_v6  ;;  %v4131_v15 = vsel %vm4130_vm7, %v4129_v19, 0  ;;  %v702_v34 = vmul.f32 %v7327_v48, %v663_v30 }
 0x19c   :  { %v8038_v3 = vsel %vm12321_vm3, %v7942_v55, 920167782  ;;  %vm12320_vm13 = vcmp.lt.s32.totalorder %v7934_v45, 4  ;;  %v4435_v38 = vshrl.u32 %v4434_v0, 23  ;;  %v742_v8 = vadd.f32 %v7346_v31, %v703_v62 }
 0x19d   :  { %12599 = vst [vmem:[#allocation107_spill] sm:$0xff] %v8028_v20  ;;  %12600 = vst [vmem:[#allocation11_spill] sm:$0xff] %v8031_v10  ;;  %v8044_v46 = vsel %vm12321_vm3, %v4046_v39, 1326507024  ;;  %v741_v18 = vadd.f32 %v7346_v31, %v702_v34  ;;  %v8049_v44 = vadd.s32 %v7762_v50, %v7768_v16  ;;  %v2209_v48 = vsub.s32 0, %v8005_v24 }
 0x19e   :  { %12601 = vst [vmem:[#allocation143_spill] sm:$0xff] %v8038_v3  ;;  %12602 = vst [vmem:[#allocation144_spill] sm:$0xff] %v8044_v46  ;;  %v3942_v19 = vor.u32 %v3941_v29, %v3940_v43  ;;  %v8052_v30 = vand.u32 31, %v4131_v15  ;;  %v4331_v26 = vshrl.u32 %v4330_v58, 23  ;;  %v2077_v0 = vsel %vm2073_vm12, %v6981_v27, %v2076_v61  ;;  %v12606_v43 = vld [vmem:[#allocation10_spill] sm:$0xff] }
 0x19f   :  { %v8060_v39 = vsel %vm12320_vm13, %v8028_v20, 920167782  ;;  %v8062_v31 = vshrl.u32 %v4235_v21, 5  ;;  %v4250_v50 = vshrl.u32 %v12471_v60, %v8031_v10  ;;  %v397_v16 = vpop.permute.xlu1 %396  ;;  %v773_v62 = vmax.f32 %v741_v18, 0.0 }
 0x1a0   :  { %12603 = vst [vmem:[#allocation145_spill] sm:$0xff] %v8052_v30  ;;  %12604 = vst [vmem:[#allocation146_spill] sm:$0xff] %v8060_v39  ;;  %vm2145_vm2 = vcmp.lt.s32.totalorder %v12606_v43, 0  ;;  %v8069_v29 = vshrl.u32 %v12465_v49, %v8031_v10  ;;  %v5532_v58 = vadd.s32 4294967169, %v4435_v38  ;;  %v774_v27 = vmax.f32 %v742_v8, 0.0 }
 0x1a1   :  { %12605 = vst [vmem:[#allocation147_spill] sm:$0xff] %v8062_v31  ;;  %v2097_v61 = vadd.s32 1, %v8009_v56  ;;  %v4249_v34 = vshll.u32 %v12470_v11, %v7985_v6  ;;  %5836 = vmatprep.mubr.msk.f32.mxu0 %vm778_vm0, %v773_v62  ;;  %v5445_v21 = vmin.u32 %v2209_v48, %v8005_v24  ;;  %v2078_v18 = vsel %vm2072_vm6, %v12607_v36, %v2077_v0 }
 0x1a2   :  { %vm2096_vm12 = vc.u32 %v8016_v54, %v8008_v28  ;;  %v8083_v38 = vshll.u32 %v12471_v60, %v7985_v6  ;;  %v8086_v8 = vsub.s32 32, %v8052_v30  ;;  %v5528_v53 = vadd.s32 4294967169, %v4331_v26  ;;  %5837 = vmatmul.mubr.msk.f32.gmra.mrb[28].mxu0 %vm778_vm0, %v774_v27 }
 0x1a3   :  { %v8090_v62 = vadd.f32 %v7420_v32, %v7836_v25  ;;  %v12610_v7 = vand.u32 2147483647, %v12606_v43  ;;  %v8101_v48 = vsel %vm12320_vm13, %v3942_v19, 1326507024  ;;  %vm12366_vm7 = vcmp.lt.s32.totalorder %v8062_v31, 4  ;;  %v401_v26 = vpop.permute.xlu1 %400 }
 0x1a4   :  { %12608 = vst [vmem:[#allocation10_spill] sm:$0xff] %v8086_v8  ;;  %12613 = vst [vmem:[#allocation148_spill] sm:$0xff] %v8101_v48  ;;  %v8104_v0 = vshrl.u32 %v4131_v15, 5  ;;  %v2229_v25 = vsub.s32 4, %v7950_v14  ;;  %v8107_v6 = vor.u32 %v4250_v50, %v4249_v34  ;;  %v4254_v27 = vor.u32 %v8069_v29, %v8083_v38  ;;  %v12618_v38 = vld [vmem:[#allocation110_spill] sm:$0xff] }
 0x1a5   :  { %12609 = vst [vmem:[#allocation30_spill] sm:$0xff] %v8090_v62  ;;  %vm8095_vm6 = vcmp.le.f32.partialorder %v12610_v7, 0.7853982  ;;  %v4441_v7 = vadd.s32 1, %v5532_v58  ;;  %v2098_v10 = vsel %vm2096_vm12, %v2097_v61, %v8009_v56  ;;  %v438_v20 = vmul.f32 %v6501_v35, %v401_v26  ;;  %v5796_v29 = vpop.f32.mrb[0].mxu0  ;;  %v12617_v58 = vld [vmem:[#allocation15_spill] sm:$0xff] }
 0x1a6   :  { %12614 = vst [vmem:[#allocation149_spill] sm:$0xff] %v8104_v0  ;;  %12615 = vst [vmem:[#allocation150_spill] sm:$0xff] %v8107_v6  ;;  %v1720_v19 = vmul.f32 %v7406_v47, %v401_v26  ;;  %v2211_v48 = vclz %v5445_v21  ;;  %v2094_v39 = vmul.u32 %v7999_v63, %v2078_v18  ;;  %v4145_v15 = vshll.u32 %v12470_v11, %v8052_v30  ;;  %v941_v63 = vpop.f32.mrb[1].mxu0 }
 0x1a7   :  { %v4146_v50 = vshrl.u32 %v12471_v60, %v8086_v8  ;;  %v4337_v34 = vadd.s32 1, %v5528_v53  ;;  %v4642_v45 = vand.u32 2139095040, %v8090_v62  ;;  %v8122_v56 = vadd.f32 %v7420_v32, %v7869_v51 }
 0x1a8   :  { %v470_v61 = vadd.f32 %v438_v20, %v12617_v58  ;;  %v8126_v21 = vadd.f32 %v12618_v38, %v1720_v19  ;;  %v8128_v18 = vadd.s32 %v2098_v10, %v2094_v39  ;;  %v8132_v26 = vshll.u32 %v12471_v60, %v8052_v30  ;;  %v593_v39 = vpop.permute.xlu1 %592  ;;  %v12620_v38 = vld [vmem:[#allocation109_spill] sm:$0xff]  ;;  %v8157_v30 = vld [vmem:[%s12107_s5] ss:$0 sm:$0xff] }
 0x1a9   :  { %12616 = vst [vmem:[#allocation151_spill] sm:$0xff] %v8122_v56  ;;  %vm12365_vm12 = vcmp.lt.s32.totalorder %v8104_v0, 4  ;;  %v437_v53 = vmul.f32 %v6501_v35, %v397_v16  ;;  %v2230_v51 = vsel %vm2145_vm2, %v2229_v25, %v7950_v14  ;;  %v8142_v20 = vsel %vm12366_vm7, %v8107_v6, 920167782 }
 0x1aa   :  { %12619 = vst [vmem:[#allocation15_spill] sm:$0xff] %v8142_v20  ;;  %v8146_v10 = vshrl.u32 %v12465_v49, %v8086_v8  ;;  %vm4442_vm13 = vcmp.gt.s32.totalorder %v4441_v7, 0  ;;  %v5446_v19 = vadd.s32 4294967294, %v2211_v48  ;;  %vm4338_vm3 = vcmp.gt.s32.totalorder %v4337_v34, 0 }
 0x1ab   :  { %v4643_v58 = vshrl.u32 %v4642_v45, 23  ;;  %v273_v35 = vmul.f32 %v6503_v37, %v8023_v12  ;;  %v666_v62 = vadd.f32 %v12620_v38, %v470_v61  ;;  %v8151_v14 = vor.u32 %v4146_v50, %v4145_v15  ;;  %v6252_v61 = vld [vmem:[%s12101_s2] ss:$0 sm:$0xff] }
 0x1ac   :  { %v4538_v25 = vand.u32 2139095040, %v8122_v56  ;;  %v2232_v8 = vsel %vm8095_vm6, 0, %v2230_v51  ;;  %v2100_v48 = vadd.s32 536870912, %v8128_v18  ;;  %v1719_v20 = vmul.f32 %v7406_v47, %v397_v16  ;;  %v8181_v16 = vld [vmem:[%s12108_s6] ss:$0 sm:$0xff] }
 0x1ad   :  { %12621 = vst [vmem:[#allocation110_spill] sm:$0xff] %v8151_v14  ;;  %v469_v45 = vadd.f32 %v437_v53, %v273_v35  ;;  %v633_v37 = vmul.f32 %v6511_v42, %v593_v39  ;;  %v1758_v12 = vmul.f32 %v7390_v52, %v593_v39  ;;  %v4443_v15 = vsel %vm4442_vm13, %v4441_v7, 0 }
 0x1ae   :  { %v4339_v50 = vsel %vm4338_vm3, %v4337_v34, 0  ;;  %v705_v38 = vmul.f32 %v6252_v61, %v666_v62  ;;  %vm5447_vm8 = vcmp.lt.s32.totalorder %v5446_v19, 0  ;;  %v5540_v56 = vadd.s32 4294967169, %v4643_v58  ;;  %v6253_v58 = vld [vmem:[%s12102_s3] ss:$0 sm:$0xff] }
 0x1af   :  { %v1107_v51 = vmul.f32 %v8157_v30, %v941_v63  ;;  %v665_v6 = vadd.f32 %v633_v37, %v469_v45  ;;  %v8170_v53 = vadd.f32 %v1758_v12, %v1719_v20  ;;  %v8174_v42 = vsel %vm12366_vm7, %v4254_v27, 1326507024 }
 0x1b0   :  { %12622 = vst [vmem:[#allocation109_spill] sm:$0xff] %v8174_v42  ;;  %v4539_v47 = vshrl.u32 %v4538_v25, 23  ;;  %vm1218_vm3 = vcmask 523264   ;;  %v8183_v62 = vshrl.u32 %v2100_v48, 30  ;;  %v8188_v7 = vsel %vm12365_vm12, %v8151_v14, 920167782 }
 0x1b1   :  { %12623 = vst [vmem:[#allocation152_spill] sm:$0xff] %v8188_v7  ;;  %v8190_v34 = vand.u32 31, %v4443_v15  ;;  %v704_v27 = vmul.f32 %v6252_v61, %v665_v6  ;;  %v8192_v63 = vsel %vm5447_vm8, 0, %v5446_v19  ;;  %v8194_v20 = vand.u32 31, %v4339_v50 }
 0x1b2   :  { %v1108_v39 = vmul.f32 %v5796_v29, %v8157_v30  ;;  %v744_v35 = vadd.f32 %v6253_v58, %v705_v38  ;;  %v8200_v25 = vadd.s32 3, %v2232_v8  ;;  %v4649_v48 = vadd.s32 1, %v5540_v56  ;;  %v5799_v38 = vpop.f32.mrb[2].mxu0 }
 0x1b3   :  { %12624 = vst [vmem:[#allocation153_spill] sm:$0xff] %v8190_v34  ;;  %12625 = vst [vmem:[#allocation154_spill] sm:$0xff] %v8194_v20  ;;  %v8204_v45 = vadd.f32 %v7420_v32, %v7976_v57  ;;  %v1146_v6 = vadd.f32 %v8181_v16, %v1107_v51  ;;  %v743_v19 = vadd.f32 %v6253_v58, %v704_v27  ;;  %v8207_v37 = vshrl.u32 %v4443_v15, 5 }
 0x1b4   :  { %v5536_v12 = vadd.s32 4294967169, %v4539_v47  ;;  %v2219_v29 = vsub.s32 4294967266, %v8192_v63  ;;  %v2102_v61 = vshll.u32 %v8183_v62, 30  ;;  %v8212_v52 = vsub.s32 32, %v8190_v34  ;;  %v951_v47 = vpop.f32.mrb[3].mxu0 }
 0x1b5   :  { %12626 = vst [vmem:[#allocation155_spill] sm:$0xff] %v8204_v45  ;;  %12627 = vst [vmem:[#allocation156_spill] sm:$0xff] %v8207_v37  ;;  %v4457_v8 = vshll.u32 %v12470_v11, %v8190_v34  ;;  %v775_v56 = vmax.f32 %v743_v19, 0.0  ;;  %v2215_v32 = vsub.s32 32, %v8192_v63  ;;  %v8218_v57 = vsub.s32 32, %v8194_v20 }
 0x1b6   :  { %12628 = vst [vmem:[#allocation157_spill] sm:$0xff] %v8212_v52  ;;  %v1147_v15 = vadd.f32 %v8181_v16, %v1108_v39  ;;  %v1110_v51 = vmul.f32 %v5799_v38, %v8157_v30  ;;  %v776_v27 = vmax.f32 %v744_v35, 0.0  ;;  %vm4650_vm8 = vcmp.gt.s32.totalorder %v4649_v48, 0 }
 0x1b7   :  { %12629 = vst [vmem:[#allocation158_spill] sm:$0xff] %v8218_v57  ;;  %v4850_v58 = vand.u32 2139095040, %v8204_v45  ;;  %v1178_v7 = vmax.f32 %v1146_v6, 0.0  ;;  %v1109_v14 = vmul.f32 %v8157_v30, %v951_v47  ;;  %5839 = vmatprep.mubr.msk.f32.mxu0 %vm778_vm0, %v775_v56  ;;  %v4460_v19 = vshll.u32 %v12471_v60, %v8190_v34 }
 0x1b8   :  { %v4545_v42 = vadd.s32 1, %v5536_v12  ;;  %5840 = vmatmul.mubr.msk.f32.gmra.mrb[30].mxu0 %vm778_vm0, %v776_v27  ;;  %v2220_v31 = vadd.s32 127, %v2219_v29  ;;  %v8229_v39 = vsub.s32 %v8128_v18, %v2102_v61  ;;  %v4458_v35 = vshrl.u32 %v12471_v60, %v8212_v52 }
 0x1b9   :  { %v4461_v6 = vshrl.u32 %v12465_v49, %v8212_v52  ;;  %v8235_v38 = vshrl.u32 %v4339_v50, 5  ;;  %v1149_v56 = vadd.f32 %v8181_v16, %v1110_v51  ;;  %5858 = vmatprep.mubr.msk.f32.mxu0 %vm1218_vm3, %v1178_v7  ;;  %v4353_v12 = vshll.u32 %v12470_v11, %v8194_v20 }
 0x1ba   :  { %v4651_v29 = vsel %vm4650_vm8, %v4649_v48, 0  ;;  %v1179_v47 = vmax.f32 %v1147_v15, 0.0  ;;  %v1148_v18 = vadd.f32 %v8181_v16, %v1109_v14  ;;  %v4354_v61 = vshrl.u32 %v12471_v60, %v8218_v57  ;;  %v8257_v15 = vld [vmem:[%s12105_s12] ss:$0 sm:$0xff] }
 0x1bb   :  { %12630 = vst [vmem:[#allocation159_spill] sm:$0xff] %v8235_v38  ;;  %v4357_v27 = vshrl.u32 %v12465_v49, %v8218_v57  ;;  %v4851_v50 = vshrl.u32 %v4850_v58, 23  ;;  %v2217_v45 = vshrl.u32 %v8049_v44, %v2215_v32  ;;  %vm4546_vm0 = vcmp.gt.s32.totalorder %v4545_v42, 0 }
 0x1bc   :  { %v1180_v51 = vmax.f32 %v1148_v18, 0.0  ;;  %5859 = vmatmul.mubr.msk.f32.vlgmr.msra.gmra.mrb[32].mxu0 %vm1218_vm3, %v1179_v47  ;;  %v2221_v7 = vshll.u32 %v2220_v31, 23  ;;  %v2105_v52 = vsub.s32 0, %v8229_v39  ;;  %v4356_v48 = vshll.u32 %v12471_v60, %v8194_v20  ;;  %v5802_v20 = vpop.f32.mrb[4].mxu0 }
 0x1bd   :  { %v8252_v14 = vand.u32 31, %v4651_v29  ;;  %v8261_v44 = vadd.f32 %v8257_v15, %v8012_v23  ;;  %v1181_v32 = vmax.f32 %v1149_v56, 0.0  ;;  %v12633_v31 = vor.u32 %v8146_v10, %v8132_v26  ;;  %v961_v26 = vpop.f32.mrb[5].mxu0 }
 0x1be   :  { %v8270_v47 = vor.u32 %v4458_v35, %v4457_v8  ;;  %v4462_v18 = vor.u32 %v4461_v6, %v4460_v19  ;;  %5861 = vmatprep.mubr.msk.f32.mxu1 %vm1218_vm3, %v1180_v51  ;;  %v2216_v57 = vshll.u32 %v8005_v24, %v8192_v63  ;;  %v8275_v34 = vor.u32 %v4354_v61, %v4353_v12 }
 0x1bf   :  { %12631 = vst [vmem:[#allocation160_spill] sm:$0xff] %v8252_v14  ;;  %12632 = vst [vmem:[#allocation161_spill] sm:$0xff] %v8261_v44  ;;  %v8268_v58 = vsel %vm12365_vm12, %v12633_v31, 1326507024  ;;  %v4358_v23 = vor.u32 %v4357_v27, %v4356_v48  ;;  %v4547_v56 = vsel %vm4546_vm0, %v4545_v42, 0  ;;  %v5548_v13 = vadd.s32 4294967169, %v4851_v50  ;;  %5862 = vmatmul.mubr.msk.f32.vlgmr.msra.gmra.mrb[0].mxu1 %vm1218_vm3, %v1181_v32 }
 0x1c0   :  { %12634 = vst [vmem:[#allocation162_spill] sm:$0xff] %v8268_v58  ;;  %12635 = vst [vmem:[#allocation163_spill] sm:$0xff] %v8270_v47  ;;  %v2218_v10 = vor.u32 %v2217_v45, %v2216_v57  ;;  %v2222_v31 = vor.u32 4788187, %v2221_v7  ;;  %v8280_v8 = vand.u32 3, %v8200_v25  ;;  %v5441_v19 = vmin.u32 %v2105_v52, %v8229_v39  ;;  %v5805_v52 = vpop.f32.mrb[6].mxu0 }
 0x1c1   :  { %12636 = vst [vmem:[#allocation164_spill] sm:$0xff] %v8275_v34  ;;  %vm12364_vm13 = vcmp.lt.s32.totalorder %v8207_v37, 4  ;;  %vm12356_vm8 = vcmp.lt.s32.totalorder %v8235_v38, 4  ;;  %v8286_v24 = vsub.s32 32, %v8252_v14  ;;  %v4746_v42 = vand.u32 2139095040, %v8261_v44  ;;  %v971_v12 = vpop.f32.mrb[7].mxu0 }
 0x1c2   :  { %v8292_v63 = vsel %vm12364_vm13, %v8270_v47, 920167782  ;;  %v8296_v25 = vsel %vm12364_vm13, %v4462_v18, 1326507024  ;;  %v8298_v45 = vand.u32 31, %v4547_v56  ;;  %v4857_v6 = vadd.s32 1, %v5548_v13 }
 0x1c3   :  { %12637 = vst [vmem:[#allocation165_spill] sm:$0xff] %v8286_v24  ;;  %12638 = vst [vmem:[#allocation166_spill] sm:$0xff] %v8292_v63  ;;  %v8303_v57 = vsel %vm12356_vm8, %v8275_v34, 920167782  ;;  %v8307_v35 = vsel %vm12356_vm8, %v4358_v23, 1326507024  ;;  %v1112_v61 = vmul.f32 %v5802_v20, %v8157_v30  ;;  %v2225_v50 = vcvt.s32.f32 %v2218_v10 }
 0x1c4   :  { %12639 = vst [vmem:[#allocation167_spill] sm:$0xff] %v8296_v25  ;;  %12640 = vst [vmem:[#allocation168_spill] sm:$0xff] %v8298_v45  ;;  %v2223_v27 = vand.u32 2147483647, %v2222_v31  ;;  %v2107_v51 = vclz %v5441_v19  ;;  %v4666_v7 = vshrl.u32 %v12471_v60, %v8286_v24  ;;  %v8314_v48 = vshrl.u32 %v12465_v49, %v8286_v24  ;;  %v5808_v23 = vpop.f32.mrb[8].mxu0  ;;  %v12645_v10 = vld [vmem:[#allocation16_spill] sm:$0xff] }
 0x1c5   :  { %12641 = vst [vmem:[#allocation169_spill] sm:$0xff] %v8303_v57  ;;  %12642 = vst [vmem:[#allocation170_spill] sm:$0xff] %v8307_v35  ;;  %v4747_v32 = vshrl.u32 %v4746_v42, 23  ;;  %v1111_v18 = vmul.f32 %v8157_v30, %v961_v26  ;;  %v8317_v44 = vshrl.u32 %v4651_v29, 5  ;;  %v8320_v13 = vsub.s32 32, %v8298_v45  ;;  %v981_v26 = vpop.f32.mrb[9].mxu0 }
 0x1c6   :  { %v8324_v20 = vadd.s32 %v8008_v28, %v8016_v54  ;;  %v4665_v19 = vshll.u32 %v12470_v11, %v8252_v14  ;;  %v8331_v42 = vshll.u32 %v12471_v60, %v8252_v14  ;;  %vm4858_vm0 = vcmp.gt.s32.totalorder %v4857_v6, 0 }
 0x1c7   :  { %12643 = vst [vmem:[#allocation171_spill] sm:$0xff] %v8317_v44  ;;  %12644 = vst [vmem:[#allocation172_spill] sm:$0xff] %v8320_v13  ;;  %v1114_v29 = vmul.f32 %v5805_v52, %v8157_v30  ;;  %v1151_v24 = vadd.f32 %v8181_v16, %v1112_v61  ;;  %v1150_v34 = vadd.f32 %v8181_v16, %v1111_v18  ;;  %v5442_v54 = vadd.s32 4294967294, %v2107_v51 }
 0x1c8   :  { %v2226_v35 = vmul.f32 %v2225_v50, %v2223_v27  ;;  %v8336_v28 = vor.u32 %v4666_v7, %v4665_v19  ;;  %v8340_v57 = vshrl.u32 %v4547_v56, 5  ;;  %v5544_v38 = vadd.s32 4294967169, %v4747_v32 }
 0x1c9   :  { %v4561_v14 = vshll.u32 %v12470_v11, %v8298_v45  ;;  %v4562_v52 = vshrl.u32 %v12471_v60, %v8320_v13  ;;  %v8348_v61 = vshll.u32 %v12471_v60, %v8298_v45  ;;  %v8350_v27 = vsel %vm4858_vm0, %v4857_v6, 0  ;;  %v12648_v6 = vld [vmem:[#allocation37_spill] sm:$0xff] }
 0x1ca   :  { %12646 = vst [vmem:[#allocation16_spill] sm:$0xff] %v8336_v28  ;;  %12647 = vst [vmem:[#allocation173_spill] sm:$0xff] %v8340_v57  ;;  %v1182_v50 = vmax.f32 %v1150_v34, 0.0  ;;  %v1153_v51 = vadd.f32 %v8181_v16, %v1114_v29  ;;  %v1113_v7 = vmul.f32 %v8157_v30, %v971_v12  ;;  %v1116_v56 = vmul.f32 %v5808_v23, %v8157_v30 }
 0x1cb   :  { %v8357_v32 = vshrl.u32 %v12465_v49, %v8320_v13  ;;  %v1183_v18 = vmax.f32 %v1151_v24, 0.0  ;;  %v1115_v19 = vmul.f32 %v8157_v30, %v981_v26  ;;  %vm5443_vm8 = vcmp.lt.s32.totalorder %v5442_v54, 0  ;;  %v12652_v13 = vld [vmem:[#allocation34_spill] sm:$0xff] }
 0x1cc   :  { %v4753_v31 = vadd.s32 1, %v5544_v38  ;;  %v1152_v45 = vadd.f32 %v8181_v16, %v1113_v7  ;;  %5864 = vmatprep.mubr.msk.f32.mxu1 %vm1218_vm3, %v1182_v50  ;;  %v2227_v34 = vxor.u32 2147483648, %v2226_v35  ;;  %v12649_v29 = vmov 2475754826  }
 0x1cd   :  { %v2369_v47 = vshrl.u32 %v12649_v29, %v12648_v6  ;;  %v8365_v12 = vand.u32 31, %v8350_v27  ;;  %5865 = vmatmul.mubr.msk.f32.gmra.mrb[2].mxu1 %vm1218_vm3, %v1183_v18  ;;  %v1154_v23 = vadd.f32 %v8181_v16, %v1115_v19  ;;  %v12651_v24 = vand.u32 2147483647, %v12645_v10 }
 0x1ce   :  { %v2368_v38 = vshll.u32 %v12461_v2, %v12652_v13  ;;  %v1185_v7 = vmax.f32 %v1153_v51, 0.0  ;;  %v1184_v25 = vmax.f32 %v1152_v45, 0.0  ;;  %v1155_v50 = vadd.f32 %v8181_v16, %v1116_v56 }
 0x1cf   :  { %12650 = vst [vmem:[#allocation37_spill] sm:$0xff] %v8365_v12  ;;  %v2358_v26 = vand.u32 8388607, %v12651_v24  ;;  %v8374_v63 = vsel %vm5443_vm8, 0, %v5442_v54  ;;  %vm12391_vm0 = vcmp.lt.s32.totalorder %v8317_v44, 4  ;;  %v1186_v37 = vmax.f32 %v1154_v23, 0.0 }
 0x1d0   :  { %v2370_v58 = vor.u32 %v2369_v47, %v2368_v38  ;;  %v2371_v18 = vshll.u32 %v12649_v29, %v12652_v13  ;;  %v2372_v19 = vshrl.u32 %v12557_v41, %v12648_v6  ;;  %v8381_v24 = vor.u32 %v4562_v52, %v4561_v14  ;;  %5867 = vmatprep.mubr.msk.f32.mxu1 %vm1218_vm3, %v1184_v25  ;;  %v12655_v23 = vld [vmem:[#allocation40_spill] sm:$0xff] }
 0x1d1   :  { %vm12390_vm13 = vcmp.lt.s32.totalorder %v8340_v57, 4  ;;  %vm4754_vm12 = vcmp.gt.s32.totalorder %v4753_v31, 0  ;;  %v2374_v45 = vshll.u32 %v12557_v41, %v12652_v13  ;;  %v2375_v54 = vshrl.u32 %v12470_v11, %v12648_v6  ;;  %5868 = vmatmul.mubr.msk.f32.gmra.mrb[4].mxu1 %vm1218_vm3, %v1185_v7 }
 0x1d2   :  { %12653 = vst [vmem:[#allocation34_spill] sm:$0xff] %v8381_v24  ;;  %v2228_v47 = vsel %vm2145_vm2, %v2227_v34, %v2226_v35  ;;  %v2359_v51 = vor.u32 8388608, %v2358_v26  ;;  %v2367_v14 = vshrl.u32 %v12461_v2, %v12648_v6  ;;  %v2373_v52 = vor.u32 %v2372_v19, %v2371_v18  ;;  %5870 = vmatprep.mubr.msk.f32.mxu1 %vm1218_vm3, %v1186_v37  ;;  %v12656_v6 = vld [vmem:[#allocation49_spill] sm:$0xff]  ;;  %v12657_v26 = vld [vmem:[#allocation51_spill] sm:$0xff] }
 0x1d3   :  { %v8395_v56 = vsub.s32 32, %v8365_v12  ;;  %v2115_v25 = vsub.s32 4294967266, %v8374_v63  ;;  %v2376_v13 = vor.u32 %v2375_v54, %v2374_v45  ;;  %vm2383_vm8 = vcmp.lt.s32.totalorder %v12655_v23, 1  ;;  %v12658_v18 = vld [vmem:[#allocation43_spill] sm:$0xff] }
 0x1d4   :  { %v8400_v38 = vsel %vm4754_vm12, %v4753_v31, 0  ;;  %v1187_v7 = vmax.f32 %v1155_v50, 0.0  ;;  %vm2385_vm2 = vcmp.lt.s32.totalorder %v12655_v23, 3  ;;  %v2391_v35 = vsel %vm2383_vm8, %v2370_v58, %v2373_v52  ;;  %v5811_v50 = vpop.f32.mrb[10].mxu0 }
 0x1d5   :  { %12654 = vst [vmem:[#allocation174_spill] sm:$0xff] %v8395_v56  ;;  %vm2384_vm7 = vcmp.lt.s32.totalorder %v12655_v23, 2  ;;  %v2388_v34 = vsel %vm2386_vm15, %v2376_v13, 2102212464  ;;  %v2393_v37 = vsel %vm2385_vm2, %v2376_v13, %v12656_v6  ;;  %v2397_v31 = vsel %vm2385_vm2, %v12658_v18, %v12657_v26  ;;  %v991_v6 = vpop.f32.mrb[11].mxu0  ;;  %v12659_v18 = vld [vmem:[#allocation3_spill] sm:$0xff] }
 0x1d6   :  { %5871 = vmatmul.mubr.msk.f32.gmra.mrb[6].mxu1 %vm1218_vm3, %v1187_v7  ;;  %v2111_v19 = vsub.s32 32, %v8374_v63  ;;  %v2394_v45 = vsel %vm2384_vm7, %v2391_v35, %v2393_v37  ;;  %v2395_v54 = vsel %vm2383_vm8, %v2373_v52, %v2376_v13  ;;  %v2399_v0 = vshll.u32 %v2359_v51, 8 }
 0x1d7   :  { %v1118_v22 = vmul.f32 %v5811_v50, %v8157_v30  ;;  %v2116_v3 = vadd.s32 127, %v2115_v25  ;;  %v2387_v55 = vsel %vm2383_vm8, %v2367_v14, %v2370_v58  ;;  %v2389_v7 = vsel %vm2385_vm2, %v2373_v52, %v2388_v34 }
 0x1d8   :  { %v1117_v26 = vmul.f32 %v8157_v30, %v991_v6  ;;  %vm2041_vm15 = vcmp.lt.s32.totalorder %v12659_v18, 0  ;;  %v2398_v35 = vsel %vm2384_vm7, %v2395_v54, %v2397_v31  ;;  %v8437_v51 = vsel %vm12391_vm0, %v8336_v28, 920167782 }
 0x1d9   :  { %v8430_v37 = vmul.u32.u64.low %v2399_v0, %v2394_v45  ;;  %v8431_v13 = vmul.u32.u64.high %v2399_v0, %v2394_v45, %v8430_v37  ;;  %12660 = vst [vmem:[#allocation40_spill] sm:$0xff] %v8437_v51  ;;  %v12661_v58 = vor.u32 %v8314_v48, %v8331_v42  ;;  %v4566_v52 = vor.u32 %v8357_v32, %v8348_v61 }
 0x1da   :  { %v1157_v25 = vadd.f32 %v8181_v16, %v1118_v22  ;;  %v8452_v34 = vsel %vm12390_vm13, %v8381_v24, 920167782  ;;  %v1156_v31 = vadd.f32 %v8181_v16, %v1117_v26  ;;  %v4874_v48 = vshrl.u32 %v12471_v60, %v8395_v56 }
 0x1db   :  { %v8444_v14 = vsel %vm12391_vm0, %v12661_v58, 1326507024  ;;  %12663 = vst [vmem:[#allocation51_spill] sm:$0xff] %v8452_v34  ;;  %v8455_v50 = vmul.u32.u64.low %v2399_v0, %v2398_v35  ;;  %v8456_v45 = vmul.u32.u64.high %v2399_v0, %v2398_v35, %v8455_v50  ;;  %v8461_v42 = vand.u32 31, %v8400_v38 }
 0x1dc   :  { %12662 = vst [vmem:[#allocation49_spill] sm:$0xff] %v8444_v14  ;;  %v2231_v22 = vsel %vm8095_vm6, %v12606_v43, %v2228_v47  ;;  %v2390_v61 = vsel %vm2384_vm7, %v2387_v55, %v2389_v7  ;;  %v1188_v32 = vmax.f32 %v1156_v31, 0.0  ;;  %v2113_v54 = vshrl.u32 %v8324_v20, %v2111_v19 }
 0x1dd   :  { %12664 = vst [vmem:[#allocation43_spill] sm:$0xff] %v8461_v42  ;;  %v2117_v6 = vshll.u32 %v2116_v3, 23  ;;  %v2409_v26 = vadd.s32 1, %v8431_v13  ;;  %v8471_v35 = vshrl.u32 %v8350_v27, 5  ;;  %v4873_v58 = vshll.u32 %v12470_v11, %v8365_v12 }
 0x1de   :  { %v1189_v50 = vmax.f32 %v1157_v25, 0.0  ;;  %v2125_v24 = vsub.s32 4, %v8183_v62  ;;  %v8478_v36 = vshrl.u32 %v12465_v49, %v8395_v56  ;;  %5873 = vmatprep.mubr.msk.f32.mxu1 %vm1218_vm3, %v1188_v32  ;;  %v2112_v55 = vshll.u32 %v8229_v39, %v8374_v63 }
 0x1df   :  { %12665 = vst [vmem:[#allocation3_spill] sm:$0xff] %v8471_v35  ;;  %v2406_v3 = vmul.u32 %v2399_v0, %v2390_v61  ;;  %vm2408_vm6 = vc.u32 %v8456_v45, %v8430_v37  ;;  %v8485_v20 = vor.u32 %v4874_v48, %v4873_v58  ;;  %v8488_v27 = vsub.s32 32, %v8461_v42  ;;  %v5814_v61 = vpop.f32.mrb[12].mxu0 }
 0x1e0   :  { %5874 = vmatmul.mubr.msk.f32.gmra.mrb[8].mxu1 %vm1218_vm3, %v1189_v50  ;;  %6118 = vcosq.f32 %v2231_v22  ;;  %v2410_v47 = vsel %vm2408_vm6, %v2409_v26, %v8431_v13  ;;  %v4876_v23 = vshll.u32 %v12471_v60, %v8365_v12  ;;  %v2114_v19 = vor.u32 %v2113_v54, %v2112_v55  ;;  %v1001_v58 = vpop.f32.mrb[13].mxu0  ;;  %v12674_v50 = vld [vmem:[#allocation4_spill] sm:$0xff]  ;;  %v12675_v55 = vld [vmem:[#allocation17_spill] sm:$0xff] }
 0x1e1   :  { %12666 = vst [vmem:[#allocation175_spill] sm:$0xff] %v8485_v20  ;;  %12667 = vst [vmem:[#allocation176_spill] sm:$0xff] %v8488_v27  ;;  %v2118_v7 = vor.u32 4788187, %v2117_v6  ;;  %v2411_v39 = vadd.s32 %v2410_v47, %v2406_v3  ;;  %v8496_v0 = vsel %vm12390_vm13, %v4566_v52, 1326507024  ;;  %6120 = vsinq.f32 %v2231_v22 }
 0x1e2   :  { %12668 = vst [vmem:[#allocation177_spill] sm:$0xff] %v8496_v0  ;;  %vm12389_vm7 = vcmp.lt.s32.totalorder %v8471_v35, 4  ;;  %v8502_v63 = vsel %vm2041_vm15, %v2125_v24, %v8183_v62  ;;  %v4878_v13 = vor.u32 %v8478_v36, %v4876_v23  ;;  %v8506_v25 = vshrl.u32 %v8400_v38, 5  ;;  %v12676_v36 = vld [vmem:[#allocation14_spill] sm:$0xff] }
 0x1e3   :  { %v4769_v31 = vshll.u32 %v12470_v11, %v8461_v42  ;;  %v2412_v48 = vadd.s32 536870912, %v2411_v39  ;;  %v8513_v52 = vsel %vm12389_vm7, %v8485_v20, 920167782  ;;  %v4770_v22 = vshrl.u32 %v12471_v60, %v8488_v27 }
 0x1e4   :  { %12669 = vst [vmem:[#allocation178_spill] sm:$0xff] %v8506_v25  ;;  %12670 = vst [vmem:[#allocation179_spill] sm:$0xff] %v8513_v52  ;;  %v8519_v62 = vshll.u32 %v12471_v60, %v8461_v42  ;;  %v8523_v24 = vadd.f32 %v8257_v15, %v8126_v21  ;;  %v8527_v38 = vshrl.u32 %v12465_v49, %v8488_v27  ;;  %v2119_v32 = vand.u32 2147483647, %v2118_v7 }
 0x1e5   :  { %v2121_v54 = vcvt.s32.f32 %v2114_v19  ;;  %v8529_v6 = vshrl.u32 %v2412_v48, 30  ;;  %v1120_v26 = vmul.f32 %v5814_v61, %v8157_v30  ;;  %v2268_v3 = vshrl.u32 %v12557_v41, %v12675_v55 }
 0x1e6   :  { %12671 = vst [vmem:[#allocation180_spill] sm:$0xff] %v8519_v62  ;;  %12672 = vst [vmem:[#allocation181_spill] sm:$0xff] %v8523_v24  ;;  %v2271_v21 = vshrl.u32 %v12470_v11, %v12675_v55  ;;  %v1119_v47 = vmul.f32 %v8157_v30, %v1001_v58  ;;  %v2274_v19 = vshrl.u32 %v12471_v60, %v12675_v55  ;;  %vm12392_vm12 = vcmp.lt.s32.totalorder %v8506_v25, 4 }
 0x1e7   :  { %12673 = vst [vmem:[#allocation182_spill] sm:$0xff] %v8527_v38  ;;  %v2414_v23 = vshll.u32 %v8529_v6, 30  ;;  %v2277_v7 = vshrl.u32 %v12465_v49, %v12675_v55  ;;  %v1159_v48 = vadd.f32 %v8181_v16, %v1120_v26  ;;  %v2265_v61 = vshrl.u32 %v12649_v29, %v12675_v55 }
 0x1e8   :  { %v2267_v42 = vshll.u32 %v12649_v29, %v12676_v36  ;;  %v2270_v27 = vshll.u32 %v12557_v41, %v12676_v36  ;;  %v1158_v58 = vadd.f32 %v8181_v16, %v1119_v47  ;;  %v2273_v52 = vshll.u32 %v12470_v11, %v12676_v36 }
 0x1e9   :  { %v8552_v20 = vsub.s32 %v2411_v39, %v2414_v23  ;;  %v2276_v26 = vshll.u32 %v12471_v60, %v12676_v36  ;;  %v12677_v56 = vand.u32 2147483647, %v12674_v50  ;;  %v2264_v34 = vshll.u32 %v12461_v2, %v12676_v36 }
 0x1ea   :  { %v8558_v12 = vpop.eup %6118  ;;  %v2269_v57 = vor.u32 %v2268_v3, %v2267_v42  ;;  %v2272_v51 = vor.u32 %v2271_v21, %v2270_v27  ;;  %v1190_v28 = vmax.f32 %v1158_v58, 0.0  ;;  %v2275_v47 = vor.u32 %v2274_v19, %v2273_v52 }
 0x1eb   :  { %v2254_v0 = vand.u32 8388607, %v12677_v56  ;;  %v2417_v39 = vsub.s32 0, %v8552_v20  ;;  %v2278_v23 = vor.u32 %v2277_v7, %v2276_v26  ;;  %v8565_v14 = vpop.eup %6120  ;;  %v5058_v44 = vand.u32 2139095040, %v8523_v24 }
 0x1ec   :  { %v1191_v46 = vmax.f32 %v1159_v48, 0.0  ;;  %v2122_v4 = vmul.f32 %v2121_v54, %v2119_v32  ;;  %v2266_v9 = vor.u32 %v2265_v61, %v2264_v34  ;;  %v8570_v56 = vsel %vm12389_vm7, %v4878_v13, 1326507024  ;;  %5876 = vmatprep.mubr.msk.f32.mxu1 %vm1218_vm3, %v1190_v28  ;;  %v12681_v32 = vld [vmem:[#allocation13_spill] sm:$0xff] }
 0x1ed   :  { %12678 = vst [vmem:[#allocation4_spill] sm:$0xff] %v8570_v56  ;;  %v8572_v40 = vor.u32 %v4770_v22, %v4769_v31  ;;  %v5453_v27 = vmin.u32 %v2417_v39, %v8552_v20  ;;  %v8580_v52 = vadd.f32 %v8257_v15, %v8170_v53  ;;  %v2255_v34 = vor.u32 8388608, %v2254_v0 }
 0x1ee   :  { %5877 = vmatmul.mubr.msk.f32.gmra.mrb[10].mxu1 %vm1218_vm3, %v1191_v46  ;;  %vm2279_vm8 = vcmp.lt.s32.totalorder %v12681_v32, 1  ;;  %vm2282_vm2 = vcmp.lt.s32.totalorder %v12681_v32, 4  ;;  %v12682_v13 = vand.u32 2147483647, %v12659_v18  ;;  %v8593_v15 = vshrl.u32 %v5058_v44, 23 }
 0x1ef   :  { %12679 = vst [vmem:[#allocation17_spill] sm:$0xff] %v8572_v40  ;;  %12680 = vst [vmem:[#allocation14_spill] sm:$0xff] %v8580_v52  ;;  %v2419_v28 = vclz %v5453_v27  ;;  %v2288_v22 = vsel %vm2282_vm2, %v2275_v47, 920167782  ;;  %v2291_v54 = vsel %vm2279_vm8, %v2269_v57, %v2272_v51  ;;  %v2292_v53 = vsel %vm2282_vm2, %v2278_v23, 1326507024 }
 0x1f0   :  { %vm8587_vm6 = vcmp.le.f32.partialorder %v12682_v13, 0.7853982  ;;  %v2123_v46 = vxor.u32 2147483648, %v2122_v4  ;;  %vm2281_vm7 = vcmp.lt.s32.totalorder %v12681_v32, 3  ;;  %v2287_v0 = vsel %vm2279_vm8, %v2266_v9, %v2269_v57 }
 0x1f1   :  { %v5454_v36 = vadd.s32 4294967294, %v2419_v28  ;;  %vm2280_vm13 = vcmp.lt.s32.totalorder %v12681_v32, 2  ;;  %v2289_v3 = vsel %vm2281_vm7, %v2272_v51, %v2288_v22  ;;  %v2293_v21 = vsel %vm2281_vm7, %v2275_v47, %v2292_v53 }
 0x1f2   :  { %v8606_v44 = vsel %vm12392_vm12, %v8572_v40, 920167782  ;;  %v2284_v19 = vsel %vm2282_vm2, %v2272_v51, 2102212464  ;;  %v2294_v7 = vsel %vm2280_vm13, %v2291_v54, %v2293_v21  ;;  %v2295_v48 = vshll.u32 %v2255_v34, 8  ;;  %v5817_v51 = vpop.f32.mrb[14].mxu0 }
 0x1f3   :  { %12685 = vst [vmem:[#allocation13_spill] sm:$0xff] %v8606_v44  ;;  %v4954_v61 = vand.u32 2139095040, %v8580_v52  ;;  %vm5455_vm0 = vcmp.lt.s32.totalorder %v5454_v36, 0  ;;  %v2263_v58 = vshrl.u32 %v12461_v2, %v12675_v55  ;;  %v2290_v26 = vsel %vm2280_vm13, %v2287_v0, %v2289_v3  ;;  %v1011_v54 = vpop.f32.mrb[15].mxu0 }
 0x1f4   :  { %v2124_v39 = vsel %vm2041_vm15, %v2123_v46, %v2122_v4  ;;  %v2422_v47 = vsel %vm5455_vm0, 0, %v5454_v36  ;;  %v8617_v23 = vmul.u32.u64.low %v2295_v48, %v2294_v7  ;;  %v8618_v27 = vmul.u32.u64.high %v2295_v48, %v2294_v7, %v8617_v23  ;;  %v12686_v4 = vld [vmem:[#allocation7_spill] sm:$0xff] }
 0x1f5   :  { %v2423_v13 = vsub.s32 32, %v2422_v47  ;;  %v2427_v28 = vsub.s32 4294967266, %v2422_v47  ;;  %v2283_v34 = vsel %vm2279_vm8, %v2263_v58, %v2266_v9  ;;  %v2285_v22 = vsel %vm2281_vm7, %v2269_v57, %v2284_v19 }
 0x1f6   :  { %v1122_v55 = vmul.f32 %v5817_v51, %v8157_v30  ;;  %v8625_v53 = vmul.u32.u64.low %v2295_v48, %v2290_v26  ;;  %v8626_v0 = vmul.u32.u64.high %v2295_v48, %v2290_v26, %v8625_v53  ;;  %v12394_v46 = vand.u32 2147483647, %v12686_v4  ;;  %v12687_v51 = vld [vmem:[#allocation24_spill] sm:$0xff] }
 0x1f7   :  { %v4955_v36 = vshrl.u32 %v4954_v61, 23  ;;  %v1121_v3 = vmul.f32 %v8157_v30, %v1011_v54  ;;  %v2407_v21 = vadd.s32 %v8430_v37, %v8456_v45  ;;  %v2428_v7 = vadd.s32 127, %v2427_v28  ;;  %v12688_v28 = vld [vmem:[#allocation27_spill] sm:$0xff] }
 0x1f8   :  { %v1161_v9 = vadd.f32 %v8181_v16, %v1122_v55  ;;  %v2127_v57 = vsel %vm8587_vm6, %v12659_v18, %v2124_v39  ;;  %v2424_v19 = vshll.u32 %v8552_v20, %v2422_v47  ;;  %v2286_v58 = vsel %vm2280_vm13, %v2283_v34, %v2285_v22 }
 0x1f9   :  { %v1160_v26 = vadd.f32 %v8181_v16, %v1121_v3  ;;  %v2425_v61 = vshrl.u32 %v2407_v21, %v2423_v13  ;;  %v2429_v23 = vshll.u32 %v2428_v7, 23  ;;  %vm2304_vm0 = vc.u32 %v8618_v27, %v8625_v53 }
 0x1fa   :  { %v2305_v37 = vadd.s32 1, %v8626_v0  ;;  %v1942_v45 = vand.u32 8388607, %v12394_v46  ;;  %v1952_v39 = vshll.u32 %v12461_v2, %v12687_v51  ;;  %v1953_v20 = vshrl.u32 %v12649_v29, %v12688_v28 }
 0x1fb   :  { %v1193_v32 = vmax.f32 %v1161_v9, 0.0  ;;  %v1192_v47 = vmax.f32 %v1160_v26, 0.0  ;;  %v2430_v34 = vor.u32 4788187, %v2429_v23  ;;  %v2302_v22 = vmul.u32 %v2295_v48, %v2286_v58 }
 0x1fc   :  { %v2306_v13 = vsel %vm2304_vm0, %v2305_v37, %v8626_v0  ;;  %v1954_v55 = vor.u32 %v1953_v20, %v1952_v39  ;;  %v1955_v54 = vshll.u32 %v12649_v29, %v12687_v51  ;;  %v1956_v3 = vshrl.u32 %v12557_v41, %v12688_v28 }
 0x1fd   :  { %5879 = vmatprep.mubr.msk.f32.mxu1 %vm1218_vm3, %v1192_v47  ;;  %v2426_v21 = vor.u32 %v2425_v61, %v2424_v19  ;;  %v2307_v7 = vadd.s32 %v2306_v13, %v2302_v22  ;;  %v1958_v42 = vshll.u32 %v12557_v41, %v12687_v51  ;;  %v1959_v9 = vshrl.u32 %v12470_v11, %v12688_v28  ;;  %v12689_v19 = vld [vmem:[#allocation28_spill] sm:$0xff]  ;;  %v12692_v47 = vld [vmem:[#allocation33_spill] sm:$0xff] }
 0x1fe   :  { %v5552_v48 = vadd.s32 4294967169, %v4955_v36  ;;  %5880 = vmatmul.mubr.msk.f32.gmra.mrb[12].mxu1 %vm1218_vm3, %v1193_v32  ;;  %vm2239_vm13 = vcmp.eq.s32.totalorder %v8280_v8, 0  ;;  %v2240_v0 = vxor.u32 2147483648, %v8565_v14  ;;  %v1943_v58 = vor.u32 8388608, %v1942_v45  ;;  %v12690_v45 = vld [vmem:[#allocation36_spill] sm:$0xff]  ;;  %v12691_v32 = vld [vmem:[#allocation38_spill] sm:$0xff] }
 0x1ff   :  { %v1957_v26 = vor.u32 %v1956_v3, %v1955_v54  ;;  %6122 = vcosq.f32 %v2127_v57  ;;  %v2308_v23 = vadd.s32 536870912, %v2307_v7  ;;  %v1960_v37 = vor.u32 %v1959_v9, %v1958_v42 }
 0x200   :  { %vm1967_vm15 = vcmp.lt.s32.totalorder %v12689_v19, 1  ;;  %6124 = vsinq.f32 %v2127_v57  ;;  %v2431_v61 = vand.u32 2147483647, %v2430_v34  ;;  %vm1969_vm7 = vcmp.lt.s32.totalorder %v12689_v19, 3 }
 0x201   :  { %v1975_v36 = vsel %vm1967_vm15, %v1954_v55, %v1957_v26  ;;  %vm2242_vm8 = vcmp.eq.s32.totalorder %v8280_v8, 2  ;;  %v2433_v51 = vcvt.s32.f32 %v2426_v21  ;;  %v8668_v39 = vshrl.u32 %v2308_v23, 30 }
 0x202   :  { %vm1968_vm2 = vcmp.lt.s32.totalorder %v12689_v19, 2  ;;  %v1977_v42 = vsel %vm1969_vm7, %v1960_v37, %v12690_v45  ;;  %v1979_v20 = vsel %vm1967_vm15, %v1957_v26, %v1960_v37  ;;  %v1981_v34 = vsel %vm1969_vm7, %v12692_v47, %v12691_v32 }
 0x203   :  { %v1978_v57 = vsel %vm1968_vm2, %v1975_v36, %v1977_v42  ;;  %v1983_v22 = vshll.u32 %v1943_v58, 8  ;;  %v4961_v13 = vadd.s32 1, %v5552_v48  ;;  %v2128_v54 = vsel %vm8587_vm6, 0, %v8502_v63  ;;  %v5820_v58 = vpop.f32.mrb[16].mxu0 }
 0x204   :  { %vm2353_vm0 = vcmp.lt.s32.totalorder %v12645_v10, 0  ;;  %v2310_v3 = vshll.u32 %v8668_v39, 30  ;;  %v1972_v21 = vsel %vm1970_vm10, %v1960_v37, 2102212464  ;;  %v2434_v9 = vmul.f32 %v2433_v51, %v2431_v61  ;;  %v1021_v51 = vpop.f32.mrb[17].mxu0 }
 0x205   :  { %v1951_v23 = vshrl.u32 %v12461_v2, %v12688_v28  ;;  %v8691_v36 = vmul.u32.u64.low %v1983_v22, %v1978_v57  ;;  %v8692_v45 = vmul.u32.u64.high %v1983_v22, %v1978_v57, %v8691_v36  ;;  %v5556_v48 = vadd.s32 4294967169, %v8593_v15 }
 0x206   :  { %vm2238_vm6 = vcmp.lt.s32.totalorder %v8280_v8, 2  ;;  %v2243_v63 = vxor.u32 2147483648, %v8558_v12  ;;  %v8698_v31 = vsub.s32 %v2307_v7, %v2310_v3  ;;  %v1982_v37 = vsel %vm1968_vm2, %v1979_v20, %v1981_v34 }
 0x207   :  { %v1124_v61 = vmul.f32 %v5820_v58, %v8157_v30  ;;  %v2132_v28 = vadd.s32 3, %v2128_v54  ;;  %v12693_v42 = vand.u32 2147483647, %v12645_v10  ;;  %v1971_v15 = vsel %vm1967_vm15, %v1951_v23, %v1954_v55 }
 0x208   :  { %v1973_v7 = vsel %vm1969_vm7, %v1957_v26, %v1972_v21  ;;  %vm4962_vm12 = vcmp.gt.s32.totalorder %v4961_v13, 0  ;;  %v1123_v32 = vmul.f32 %v8157_v30, %v1021_v51  ;;  %v2241_v20 = vsel %vm2239_vm13, %v8558_v12, %v2240_v0 }
 0x209   :  { %vm8705_vm10 = vcmp.le.f32.partialorder %v12693_v42, 0.7853982  ;;  %v2313_v47 = vsub.s32 0, %v8698_v31  ;;  %v1163_v34 = vadd.f32 %v8181_v16, %v1124_v61  ;;  %v2435_v54 = vxor.u32 2147483648, %v2434_v9  ;;  %v6123_v42 = vpop.eup %6122 }
 0x20a   :  { %v8719_v3 = vmul.u32.u64.low %v1983_v22, %v1982_v37  ;;  %v8720_v58 = vmul.u32.u64.high %v1983_v22, %v1982_v37, %v8719_v3  ;;  %v1162_v55 = vadd.f32 %v8181_v16, %v1123_v32  ;;  %v1974_v21 = vsel %vm1968_vm2, %v1971_v15, %v1973_v7  ;;  %v6125_v51 = vpop.eup %6124 }
 0x20b   :  { %v5449_v26 = vmin.u32 %v2313_v47, %v8698_v31  ;;  %v1993_v23 = vadd.s32 1, %v8692_v45  ;;  %v8727_v12 = vadd.s32 1, %v5556_v48  ;;  %v12393_v0 = vand.u32 2147483647, %v8580_v52 }
 0x20c   :  { %v2244_v37 = vsel %vm2242_vm8, %v2243_v63, %v8565_v14  ;;  %v8733_v61 = vand.u32 3, %v2132_v28  ;;  %v8736_v32 = vsel %vm4962_vm12, %v4961_v13, 0  ;;  %v1194_v47 = vmax.f32 %v1162_v55, 0.0 }
 0x20d   :  { %12696 = vst [vmem:[#allocation7_spill] sm:$0xff] %v8727_v12  ;;  %v2437_v19 = vsub.s32 4, %v8529_v6  ;;  %v2315_v15 = vclz %v5449_v26  ;;  %v1195_v7 = vmax.f32 %v1163_v34, 0.0  ;;  %v2436_v48 = vsel %vm2353_vm0, %v2435_v54, %v2434_v9  ;;  %v12698_v26 = vld [vmem:[#allocation2_spill] sm:$0xff] }
 0x20e   :  { %v1990_v3 = vmul.u32 %v1983_v22, %v1974_v21  ;;  %vm1992_vm13 = vc.u32 %v8720_v58, %v8691_v36  ;;  %5882 = vmatprep.mubr.msk.f32.mxu1 %vm1218_vm3, %v1194_v47  ;;  %v2136_v14 = vxor.u32 2147483648, %v6125_v51  ;;  %v2139_v63 = vxor.u32 2147483648, %v6123_v42 }
 0x20f   :  { %v5450_v28 = vadd.s32 4294967294, %v2315_v15  ;;  %v1994_v13 = vsel %vm1992_vm13, %v1993_v23, %v8692_v45  ;;  %v8747_v55 = vand.u32 8388607, %v12393_v0  ;;  %5883 = vmatmul.mubr.msk.f32.gmra.mrb[14].mxu1 %vm1218_vm3, %v1195_v7  ;;  %v8752_v9 = vsel %vm2238_vm6, %v2241_v20, %v2244_v37 }
 0x210   :  { %vm2135_vm12 = vcmp.eq.s32.totalorder %v8733_v61, 0  ;;  %v1995_v22 = vadd.s32 %v1994_v13, %v1990_v3  ;;  %v8756_v34 = vand.u32 31, %v8736_v32  ;;  %v8761_v45 = vsel %vm2353_vm0, %v2437_v19, %v8529_v6  ;;  %v12699_v6 = vld [vmem:[#allocation9_spill] sm:$0xff]  ;;  %v12700_v3 = vld [vmem:[#allocation6_spill] sm:$0xff] }
 0x211   :  { %12697 = vst [vmem:[#allocation24_spill] sm:$0xff] %v8747_v55  ;;  %v2439_v54 = vsel %vm8705_vm10, %v12645_v10, %v2436_v48  ;;  %vm5451_vm15 = vcmp.lt.s32.totalorder %v5450_v28, 0  ;;  %vm2138_vm7 = vcmp.eq.s32.totalorder %v8733_v61, 2  ;;  %v12399_v21 = vand.u32 2147483647, %v12698_v26 }
 0x212   :  { %v8767_v8 = vsel %vm5451_vm15, 0, %v5450_v28  ;;  %v1996_v20 = vadd.s32 536870912, %v1995_v22  ;;  %v8770_v23 = vsel %vm2135_vm12, %v6123_v42, %v2136_v14  ;;  %v8772_v37 = vsel %vm2138_vm7, %v2139_v63, %v6125_v51 }
 0x213   :  { %v2323_v47 = vsub.s32 4294967266, %v8767_v8  ;;  %v1858_v19 = vshrl.u32 %v12471_v60, %v12699_v6  ;;  %6126 = vcosq.f32 %v2439_v54  ;;  %v1849_v48 = vshrl.u32 %v12649_v29, %v12699_v6 }
 0x214   :  { %v8780_v7 = vshrl.u32 %v1996_v20, 30  ;;  %v1852_v42 = vshrl.u32 %v12557_v41, %v12699_v6  ;;  %v1855_v51 = vshrl.u32 %v12470_v11, %v12699_v6  ;;  %v1857_v14 = vshll.u32 %v12470_v11, %v12700_v3 }
 0x215   :  { %v1861_v63 = vshrl.u32 %v12465_v49, %v12699_v6  ;;  %v1838_v13 = vand.u32 8388607, %v12399_v21  ;;  %v1848_v20 = vshll.u32 %v12461_v2, %v12700_v3  ;;  %v1851_v0 = vshll.u32 %v12649_v29, %v12700_v3 }
 0x216   :  { %v1998_v28 = vshll.u32 %v8780_v7, 30  ;;  %v2324_v46 = vadd.s32 127, %v2323_v47  ;;  %v1854_v15 = vshll.u32 %v12557_v41, %v12700_v3  ;;  %v1859_v52 = vor.u32 %v1858_v19, %v1857_v14  ;;  %v5823_v14 = vpop.f32.mrb[18].mxu0 }
 0x217   :  { %v1860_v24 = vshll.u32 %v12471_v60, %v12700_v3  ;;  %6128 = vsinq.f32 %v2439_v54  ;;  %v2303_v44 = vadd.s32 %v8625_v53, %v8618_v27  ;;  %v2333_v21 = vsub.s32 4, %v8668_v39  ;;  %v12701_v54 = vld [vmem:[#allocation8_spill] sm:$0xff] }
 0x218   :  { %v8806_v40 = vsub.s32 %v1995_v22, %v1998_v28  ;;  %v1850_v56 = vor.u32 %v1849_v48, %v1848_v20  ;;  %v1853_v35 = vor.u32 %v1852_v42, %v1851_v0  ;;  %v1856_v25 = vor.u32 %v1855_v51, %v1854_v15  ;;  %v1031_v15 = vpop.f32.mrb[19].mxu0 }
 0x219   :  { %v1862_v62 = vor.u32 %v1861_v63, %v1860_v24  ;;  %vm2235_vm8 = vweird.f32 %v12606_v43  ;;  %v1839_v19 = vor.u32 8388608, %v1838_v13  ;;  %v1847_v3 = vshrl.u32 %v12461_v2, %v12699_v6 }
 0x21a   :  { %v2001_v47 = vsub.s32 0, %v8806_v40  ;;  %vm1866_vm2 = vcmp.lt.s32.totalorder %v12701_v54, 4  ;;  %v2319_v27 = vsub.s32 32, %v8767_v8  ;;  %v2320_v53 = vshll.u32 %v8698_v31, %v8767_v8 }
 0x21b   :  { %v2325_v22 = vshll.u32 %v2324_v46, 23  ;;  %v1872_v24 = vsel %vm1866_vm2, %v1859_v52, 920167782  ;;  %v1126_v0 = vmul.f32 %v5823_v14, %v8157_v30  ;;  %vm1863_vm0 = vcmp.lt.s32.totalorder %v12701_v54, 1 }
 0x21c   :  { %v5437_v48 = vmin.u32 %v2001_v47, %v8806_v40  ;;  %vm1865_vm6 = vcmp.lt.s32.totalorder %v12701_v54, 3  ;;  %v1125_v6 = vmul.f32 %v8157_v30, %v1031_v15  ;;  %v1871_v42 = vsel %vm1863_vm0, %v1850_v56, %v1853_v35 }
 0x21d   :  { %v1873_v46 = vsel %vm1865_vm6, %v1856_v25, %v1872_v24  ;;  %v1876_v31 = vsel %vm1866_vm2, %v1862_v62, 1326507024  ;;  %v8829_v8 = vpop.eup %6126  ;;  %v1165_v51 = vadd.f32 %v8181_v16, %v1126_v0  ;;  %v1868_v28 = vsel %vm1866_vm2, %v1856_v25, 2102212464 }
 0x21e   :  { %v2003_v63 = vclz %v5437_v48  ;;  %v1875_v30 = vsel %vm1863_vm0, %v1853_v35, %v1856_v25  ;;  %v1164_v13 = vadd.f32 %v8181_v16, %v1125_v6  ;;  %vm2131_vm13 = vweird.f32 %v12659_v18 }
 0x21f   :  { %v2321_v20 = vshrl.u32 %v2303_v44, %v2319_v27  ;;  %v2326_v47 = vor.u32 4788187, %v2325_v22  ;;  %vm1864_vm12 = vcmp.lt.s32.totalorder %v12701_v54, 2  ;;  %v1877_v24 = vsel %vm1865_vm6, %v1859_v52, %v1876_v31 }
 0x220   :  { %v5438_v62 = vadd.s32 4294967294, %v2003_v63  ;;  %v1874_v14 = vsel %vm1864_vm12, %v1871_v42, %v1873_v46  ;;  %v1879_v0 = vshll.u32 %v1839_v19, 8  ;;  %v1196_v15 = vmax.f32 %v1164_v13, 0.0 }
 0x221   :  { %v1867_v25 = vsel %vm1863_vm0, %v1847_v3, %v1850_v56  ;;  %v1869_v16 = vsel %vm1865_vm6, %v1853_v35, %v1868_v28  ;;  %v1878_v44 = vsel %vm1864_vm12, %v1875_v30, %v1877_v24  ;;  %v8849_v27 = vpop.eup %6128  ;;  %v1197_v22 = vmax.f32 %v1165_v51, 0.0  ;;  %v12706_v28 = vld [vmem:[#allocation19_spill] sm:$0xff] }
 0x222   :  { %vm5439_vm15 = vcmp.lt.s32.totalorder %v5438_v62, 0  ;;  %v8851_v48 = vmul.u32.u64.low %v1879_v0, %v1878_v44  ;;  %v8852_v6 = vmul.u32.u64.high %v1879_v0, %v1878_v44, %v8851_v48  ;;  %5885 = vmatprep.mubr.msk.f32.mxu1 %vm1218_vm3, %v1196_v15  ;;  %v8859_v56 = vsel %vm2235_vm8, nan, %v8752_v9  ;;  %v12708_v44 = vld [vmem:[#allocation39_spill] sm:$0xff] }
 0x223   :  { %v8861_v35 = vmul.u32.u64.low %v1879_v0, %v1874_v14  ;;  %v8862_v19 = vmul.u32.u64.high %v1879_v0, %v1874_v14, %v8861_v35  ;;  %v8866_v3 = vshrl.u32 %v8736_v32, 5  ;;  %5886 = vmatmul.mubr.msk.f32.gmra.mrb[16].mxu1 %vm1218_vm3, %v1197_v22  ;;  %vm2134_vm7 = vcmp.lt.s32.totalorder %v8733_v61, 2 }
 0x224   :  { %v2322_v42 = vor.u32 %v2321_v20, %v2320_v53  ;;  %v8870_v46 = vsel %vm5439_vm15, 0, %v5438_v62  ;;  %v2141_v31 = vsel %vm2134_vm7, %v8770_v23, %v8772_v37  ;;  %v12702_v43 = vsel %vm8705_vm10, 0, %v8761_v45  ;;  %v12707_v62 = vld [vmem:[#allocation41_spill] sm:$0xff] }
 0x225   :  { %v2444_v9 = vadd.s32 3, %v12702_v43  ;;  %vm2249_vm8 = vcmp.lt.s32.totalorder %v12674_v50, 0  ;;  %v1870_v32 = vsel %vm1864_vm12, %v1867_v25, %v1869_v16  ;;  %v8882_v51 = vsub.s32 32, %v8756_v34 }
 0x226   :  { %v2327_v61 = vand.u32 2147483647, %v2326_v47  ;;  %v8889_v23 = vsel %vm2249_vm8, %v2333_v21, %v8668_v39  ;;  %vm1888_vm10 = vc.u32 %v8852_v6, %v8861_v35  ;;  %v8895_v57 = vshll.u32 %v12461_v2, %v8756_v34 }
 0x227   :  { %v12703_v45 = vand.u32 2147483647, %v12674_v50  ;;  %v2011_v54 = vsub.s32 4294967266, %v8870_v46  ;;  %v1889_v53 = vadd.s32 1, %v8862_v19  ;;  %v8907_v39 = vsel %vm2131_vm13, nan, %v2141_v31 }
 0x228   :  { %v2329_v21 = vcvt.s32.f32 %v2322_v42  ;;  %v1886_v63 = vmul.u32 %v1879_v0, %v1870_v32  ;;  %v12406_v30 = vand.u32 2147483647, %v12706_v28  ;;  %v8910_v13 = vand.u32 3, %v2444_v9  ;;  %v5826_v31 = vpop.f32.mrb[20].mxu0 }
 0x229   :  { %vm8899_vm2 = vcmp.le.f32.partialorder %v12703_v45, 0.7853982  ;;  %v1890_v47 = vsel %vm1888_vm10, %v1889_v53, %v8862_v19  ;;  %v2577_v14 = vshrl.u32 %v12649_v29, %v12707_v62  ;;  %v1991_v18 = vadd.s32 %v8691_v36, %v8720_v58  ;;  %v8941_v45 = vld [vmem:[%s12107_s5] ss:$0 sm:$0xff]  ;;  %v1041_v53 = vpop.f32.mrb[21].mxu0 }
 0x22a   :  { %v8918_v24 = vmul.f32 %v2329_v21, %v2327_v61  ;;  %v1891_v15 = vadd.s32 %v1890_v47, %v1886_v63  ;;  %v2580_v0 = vshrl.u32 %v12557_v41, %v12707_v62  ;;  %v2007_v25 = vsub.s32 32, %v8870_v46 }
 0x22b   :  { %v2012_v16 = vadd.s32 127, %v2011_v54  ;;  %v2576_v22 = vshll.u32 %v12461_v2, %v12708_v44  ;;  %v2583_v48 = vshrl.u32 %v12470_v11, %v12707_v62  ;;  %v2566_v42 = vand.u32 8388607, %v12406_v30 }
 0x22c   :  { %v1892_v19 = vadd.s32 536870912, %v1891_v15  ;;  %v2579_v36 = vshll.u32 %v12649_v29, %v12708_v44  ;;  %v2582_v58 = vshll.u32 %v12557_v41, %v12708_v44  ;;  %v2448_v43 = vxor.u32 2147483648, %v8849_v27 }
 0x22d   :  { %v2451_v9 = vxor.u32 2147483648, %v8829_v8  ;;  %v2021_v32 = vsub.s32 4, %v8780_v7  ;;  %v2578_v61 = vor.u32 %v2577_v14, %v2576_v22  ;;  %v1128_v54 = vmul.f32 %v8941_v45, %v5826_v31  ;;  %v8951_v14 = vld [vmem:[%s12108_s6] ss:$0 sm:$0xff] }
 0x22e   :  { %v8944_v21 = vshrl.u32 %v1892_v19, 30  ;;  %v2581_v63 = vor.u32 %v2580_v0, %v2579_v36  ;;  %v2584_v47 = vor.u32 %v2583_v48, %v2582_v58  ;;  %v1127_v44 = vmul.f32 %v8941_v45, %v1041_v53  ;;  %v12711_v53 = vld [vmem:[#allocation56_spill] sm:$0xff] }
 0x22f   :  { %v2331_v52 = vxor.u32 2147483648, %v8918_v24  ;;  %v2009_v30 = vshrl.u32 %v1991_v18, %v2007_v25  ;;  %v2013_v20 = vshll.u32 %v2012_v16, 23  ;;  %v1167_v22 = vadd.f32 %v8951_v14, %v1128_v54  ;;  %v12709_v25 = vld [vmem:[#allocation45_spill] sm:$0xff] }
 0x230   :  { %vm2447_vm0 = vcmp.eq.s32.totalorder %v8910_v13, 0  ;;  %v2008_v19 = vshll.u32 %v8806_v40, %v8870_v46  ;;  %v1894_v0 = vshll.u32 %v8944_v21, 30  ;;  %v2567_v48 = vor.u32 8388608, %v2566_v42  ;;  %v12710_v46 = vld [vmem:[#allocation54_spill] sm:$0xff] }
 0x231   :  { %v1166_v36 = vadd.f32 %v8951_v14, %v1127_v44  ;;  %v2575_v18 = vshrl.u32 %v12461_v2, %v12707_v62  ;;  %vm2591_vm6 = vcmp.lt.s32.totalorder %v12709_v25, 1  ;;  %vm2593_vm13 = vcmp.lt.s32.totalorder %v12709_v25, 3  ;;  %v12712_v44 = vld [vmem:[#allocation50_spill] sm:$0xff] }
 0x232   :  { %v8963_v16 = vsub.s32 %v1891_v15, %v1894_v0  ;;  %v2596_v58 = vsel %vm2594_vm1, %v2584_v47, 2102212464  ;;  %v2599_v40 = vsel %vm2591_vm6, %v2578_v61, %v2581_v63  ;;  %v2601_v42 = vsel %vm2593_vm13, %v2584_v47, %v12710_v46 }
 0x233   :  { %v1198_v31 = vmax.f32 %v1166_v36, 0.0  ;;  %vm2446_vm12 = vcmp.lt.s32.totalorder %v8910_v13, 2  ;;  %v2010_v62 = vor.u32 %v2009_v30, %v2008_v19  ;;  %v2014_v54 = vor.u32 4788187, %v2013_v20 }
 0x234   :  { %v2605_v15 = vsel %vm2593_vm13, %v12712_v44, %v12711_v53  ;;  %v1199_v0 = vmax.f32 %v1167_v22, 0.0  ;;  %v1897_v38 = vsub.s32 0, %v8963_v16  ;;  %vm2592_vm1 = vcmp.lt.s32.totalorder %v12709_v25, 2 }
 0x235   :  { %v2607_v12 = vshll.u32 %v2567_v48, 8  ;;  %5888 = vmatprep.mubr.msk.f32.mxu1 %vm1218_vm3, %v1198_v31  ;;  %v2595_v36 = vsel %vm2591_vm6, %v2575_v18, %v2578_v61  ;;  %v2597_v30 = vsel %vm2593_vm13, %v2581_v63, %v2596_v58  ;;  %v2602_v20 = vsel %vm2592_vm1, %v2599_v40, %v2601_v42 }
 0x236   :  { %v2603_v19 = vsel %vm2591_vm6, %v2581_v63, %v2584_v47  ;;  %5889 = vmatmul.mubr.msk.f32.gmra.mrb[18].mxu1 %vm1218_vm3, %v1199_v0  ;;  %v5433_v22 = vmin.u32 %v1897_v38, %v8963_v16  ;;  %vm2450_vm15 = vcmp.eq.s32.totalorder %v8910_v13, 2  ;;  %v2015_v61 = vand.u32 2147483647, %v2014_v54 }
 0x237   :  { %v2606_v48 = vsel %vm2592_vm1, %v2603_v19, %v2605_v15  ;;  %v8992_v46 = vmul.u32.u64.low %v2607_v12, %v2602_v20  ;;  %v8993_v31 = vmul.u32.u64.high %v2607_v12, %v2602_v20, %v8992_v46  ;;  %v2332_v63 = vsel %vm2249_vm8, %v2331_v52, %v8918_v24 }
 0x238   :  { %v8997_v18 = vmul.u32.u64.low %v2607_v12, %v2606_v48  ;;  %v8998_v58 = vmul.u32.u64.high %v2607_v12, %v2606_v48, %v8997_v18  ;;  %v12713_v38 = vsel %vm8899_vm2, 0, %v8889_v23  ;;  %v1899_v40 = vclz %v5433_v22  ;;  %v12718_v48 = vld [vmem:[#allocation20_spill] sm:$0xff] }
 0x239   :  { %v2340_v47 = vadd.s32 3, %v12713_v38  ;;  %v2598_v42 = vsel %vm2592_vm1, %v2595_v36, %v2597_v30  ;;  %v2449_v54 = vsel %vm2447_vm0, %v8829_v8, %v2448_v43  ;;  %v2452_v53 = vsel %vm2450_vm15, %v2451_v9, %v8849_v27  ;;  %v12717_v36 = vld [vmem:[#allocation5_spill] sm:$0xff] }
 0x23a   :  { %vm1937_vm7 = vcmp.lt.s32.totalorder %v12686_v4, 0  ;;  %v2017_v44 = vcvt.s32.f32 %v2010_v62  ;;  %v12714_v52 = vand.u32 2147483647, %v12686_v4  ;;  %v5434_v25 = vadd.s32 4294967294, %v1899_v40 }
 0x23b   :  { %v2022_v23 = vsel %vm1937_vm7, %v2021_v32, %v8780_v7  ;;  %v2617_v15 = vadd.s32 1, %v8993_v31  ;;  %v2335_v8 = vsel %vm8899_vm2, %v12674_v50, %v2332_v63  ;;  %v2614_v43 = vmul.u32 %v2607_v12, %v2598_v42  ;;  %v5829_v40 = vpop.f32.mrb[22].mxu0 }
 0x23c   :  { %vm9016_vm8 = vcmp.le.f32.partialorder %v12714_v52, 0.7853982  ;;  %v2018_v27 = vmul.f32 %v2017_v44, %v2015_v61  ;;  %vm2616_vm10 = vc.u32 %v8998_v58, %v8992_v46  ;;  %v9031_v9 = vsel %vm2446_vm12, %v2449_v54, %v2452_v53 }
 0x23d   :  { %v9033_v62 = vand.u32 3, %v2340_v47  ;;  %vm5435_vm0 = vcmp.lt.s32.totalorder %v5434_v25, 0  ;;  %v2618_v7 = vsel %vm2616_vm10, %v2617_v15, %v8993_v31  ;;  %v2024_v32 = vsel %vm9016_vm8, 0, %v2022_v23 }
 0x23e   :  { %v1902_v0 = vsel %vm5435_vm0, 0, %v5434_v25  ;;  %v2619_v37 = vadd.s32 %v2618_v7, %v2614_v43  ;;  %v12409_v30 = vand.u32 2147483647, %v12717_v36  ;;  %6130 = vcosq.f32 %v2335_v8 }
 0x23f   :  { %v1887_v12 = vadd.s32 %v8861_v35, %v8852_v6  ;;  %v1903_v20 = vsub.s32 32, %v1902_v0  ;;  %v1907_v13 = vsub.s32 4294967266, %v1902_v0  ;;  %v2019_v19 = vxor.u32 2147483648, %v2018_v27  ;;  %v12719_v35 = vld [vmem:[#allocation18_spill] sm:$0xff] }
 0x240   :  { %v2620_v22 = vadd.s32 536870912, %v2619_v37  ;;  %v2473_v61 = vshrl.u32 %v12649_v29, %v12718_v48  ;;  %v2476_v31 = vshrl.u32 %v12557_v41, %v12718_v48  ;;  %v1904_v18 = vshll.u32 %v8963_v16, %v1902_v0  ;;  %v1051_v16 = vpop.f32.mrb[23].mxu0 }
 0x241   :  { %v1905_v63 = vshrl.u32 %v1887_v12, %v1903_v20  ;;  %v1908_v38 = vadd.s32 127, %v1907_v13  ;;  %v2479_v47 = vshrl.u32 %v12470_v11, %v12718_v48  ;;  %v2462_v6 = vand.u32 8388607, %v12409_v30 }
 0x242   :  { %v9048_v42 = vshrl.u32 %v2620_v22, 30  ;;  %v2472_v54 = vshll.u32 %v12461_v2, %v12719_v35  ;;  %v2475_v53 = vshll.u32 %v12649_v29, %v12719_v35  ;;  %v1130_v44 = vmul.f32 %v8941_v45, %v5829_v40 }
 0x243   :  { %v1906_v52 = vor.u32 %v1905_v63, %v1904_v18  ;;  %v1909_v23 = vshll.u32 %v1908_v38, 23  ;;  %v2478_v25 = vshll.u32 %v12557_v41, %v12719_v35  ;;  %v1129_v15 = vmul.f32 %v8941_v45, %v1051_v16  ;;  %v12720_v16 = vld [vmem:[#allocation26_spill] sm:$0xff] }
 0x244   :  { %6132 = vsinq.f32 %v2335_v8  ;;  %v2622_v43 = vshll.u32 %v9048_v42, 30  ;;  %v2474_v7 = vor.u32 %v2473_v61, %v2472_v54  ;;  %v1169_v0 = vadd.f32 %v8951_v14, %v1130_v44 }
 0x245   :  { %v1910_v12 = vor.u32 4788187, %v1909_v23  ;;  %v2477_v20 = vor.u32 %v2476_v31, %v2475_v53  ;;  %v2480_v13 = vor.u32 %v2479_v47, %v2478_v25  ;;  %v1168_v22 = vadd.f32 %v8951_v14, %v1129_v15 }
 0x246   :  { %v2020_v18 = vsel %vm1937_vm7, %v2019_v19, %v2018_v27  ;;  %v2028_v63 = vadd.s32 3, %v2024_v32  ;;  %v9065_v38 = vsub.s32 %v2619_v37, %v2622_v43  ;;  %vm2443_vm2 = vweird.f32 %v12645_v10  ;;  %v12721_v19 = vld [vmem:[#allocation31_spill] sm:$0xff] }
 0x247   :  { %v1911_v40 = vand.u32 2147483647, %v1910_v12  ;;  %v1913_v8 = vcvt.s32.f32 %v1906_v52  ;;  %v2463_v35 = vor.u32 8388608, %v2462_v6  ;;  %vm2487_vm6 = vcmp.lt.s32.totalorder %v12720_v16, 1  ;;  %v12726_v12 = vld [vmem:[#allocation29_spill] sm:$0xff] }
 0x248   :  { %v1200_v61 = vmax.f32 %v1168_v22, 0.0  ;;  %v2625_v54 = vsub.s32 0, %v9065_v38  ;;  %vm2488_vm13 = vcmp.lt.s32.totalorder %v12720_v16, 2  ;;  %vm2489_vm12 = vcmp.lt.s32.totalorder %v12720_v16, 3  ;;  %v9072_v31 = vpop.eup %6130 }
 0x249   :  { %v1201_v27 = vmax.f32 %v1169_v0, 0.0  ;;  %v1914_v32 = vmul.f32 %v1913_v8, %v1911_v40  ;;  %v2495_v37 = vsel %vm2487_vm6, %v2474_v7, %v2477_v20  ;;  %v2497_v47 = vsel %vm2489_vm12, %v2480_v13, %v12721_v19  ;;  %v12725_v0 = vld [vmem:[#allocation32_spill] sm:$0xff] }
 0x24a   :  { %5891 = vmatprep.mubr.msk.f32.mxu1 %vm1218_vm3, %v1200_v61  ;;  %v12722_v6 = vand.u32 2147483647, %v12698_v26  ;;  %v5461_v44 = vmin.u32 %v2625_v54, %v9065_v38  ;;  %v2471_v52 = vshrl.u32 %v12461_v2, %v12718_v48  ;;  %v2492_v23 = vsel %vm2490_vm9, %v2480_v13, 2102212464 }
 0x24b   :  { %v2498_v25 = vsel %vm2488_vm13, %v2495_v37, %v2497_v47  ;;  %5892 = vmatmul.mubr.msk.f32.gmra.mrb[20].mxu1 %vm1218_vm3, %v1201_v27  ;;  %v2023_v15 = vsel %vm9016_vm8, %v12686_v4, %v2020_v18  ;;  %v2499_v43 = vsel %vm2487_vm6, %v2477_v20, %v2480_v13  ;;  %v2501_v48 = vsel %vm2489_vm12, %v12726_v12, %v12725_v0 }
 0x24c   :  { %vm9082_vm1 = vcmp.le.f32.partialorder %v12722_v6, 0.7853982  ;;  %v2503_v22 = vshll.u32 %v2463_v35, 8  ;;  %v2347_v40 = vxor.u32 2147483648, %v9072_v31  ;;  %v1915_v8 = vxor.u32 2147483648, %v1914_v32 }
 0x24d   :  { %v2627_v61 = vclz %v5461_v44  ;;  %v2491_v54 = vsel %vm2487_vm6, %v2471_v52, %v2474_v7  ;;  %v2493_v24 = vsel %vm2489_vm12, %v2477_v20, %v2492_v23  ;;  %v2502_v18 = vsel %vm2488_vm13, %v2499_v43, %v2501_v48 }
 0x24e   :  { %v9110_v13 = vmul.u32.u64.low %v2503_v22, %v2498_v25  ;;  %v9111_v27 = vmul.u32.u64.high %v2503_v22, %v2498_v25, %v9110_v13  ;;  %v9114_v37 = vpop.eup %6132  ;;  %6134 = vcosq.f32 %v2023_v15  ;;  %vm2346_vm9 = vcmp.eq.s32.totalorder %v9033_v62, 2  ;;  %v5832_v12 = vpop.f32.mrb[24].mxu0 }
 0x24f   :  { %v5462_v35 = vadd.s32 4294967294, %v2627_v61  ;;  %v9116_v19 = vmul.u32.u64.low %v2503_v22, %v2502_v18  ;;  %v9117_v47 = vmul.u32.u64.high %v2503_v22, %v2502_v18, %v9116_v19  ;;  %6136 = vsinq.f32 %v2023_v15  ;;  %v12728_v18 = vld [vmem:[#allocation55_spill] sm:$0xff] }
 0x250   :  { %vm1833_vm15 = vcmp.lt.s32.totalorder %v12698_v26, 0  ;;  %v1917_v7 = vsub.s32 4, %v8944_v21  ;;  %v9125_v20 = vsel %vm2443_vm2, nan, %v9031_v9  ;;  %v2494_v44 = vsel %vm2488_vm13, %v2491_v54, %v2493_v24  ;;  %v12727_v54 = vld [vmem:[#allocation25_spill] sm:$0xff] }
 0x251   :  { %v1916_v6 = vsel %vm1833_vm15, %v1915_v8, %v1914_v32  ;;  %vm5463_vm7 = vcmp.lt.s32.totalorder %v5462_v35, 0  ;;  %v9132_v23 = vand.u32 3, %v2028_v63  ;;  %v2513_v15 = vadd.s32 1, %v9111_v27  ;;  %v1061_v8 = vpop.f32.mrb[25].mxu0 }
 0x252   :  { %v2630_v25 = vsel %vm5463_vm7, 0, %v5462_v35  ;;  %v9136_v43 = vsel %vm2346_vm9, %v2347_v40, %v9114_v37  ;;  %v2615_v10 = vadd.s32 %v8992_v46, %v8998_v58  ;;  %v9143_v16 = vsel %vm1833_vm15, %v1917_v7, %v8944_v21 }
 0x253   :  { %v2631_v9 = vsub.s32 32, %v2630_v25  ;;  %v2635_v0 = vsub.s32 4294967266, %v2630_v25  ;;  %v9148_v63 = vsel %vm9082_vm1, %v12698_v26, %v1916_v6  ;;  %v2510_v32 = vmul.u32 %v2503_v22, %v2494_v44 }
 0x254   :  { %vm2512_vm8 = vc.u32 %v9117_v47, %v9110_v13  ;;  %vm2561_vm10 = vcmp.lt.s32.totalorder %v12706_v28, 0  ;;  %v2632_v46 = vshll.u32 %v9065_v38, %v2630_v25  ;;  %v1132_v21 = vmul.f32 %v8941_v45, %v5832_v12 }
 0x255   :  { %v2633_v58 = vshrl.u32 %v2615_v10, %v2631_v9  ;;  %v2636_v48 = vadd.s32 127, %v2635_v0  ;;  %v2514_v40 = vsel %vm2512_vm8, %v2513_v15, %v9111_v27  ;;  %v12413_v24 = vand.u32 2147483647, %v12727_v54  ;;  %v12729_v27 = vld [vmem:[#allocation52_spill] sm:$0xff] }
 0x256   :  { %v2515_v61 = vadd.s32 %v2514_v40, %v2510_v32  ;;  %v2785_v22 = vshrl.u32 %v12649_v29, %v12728_v18  ;;  %v1131_v35 = vmul.f32 %v8941_v45, %v1061_v8  ;;  %v2788_v38 = vshrl.u32 %v12557_v41, %v12728_v18 }
 0x257   :  { %v2634_v19 = vor.u32 %v2633_v58, %v2632_v46  ;;  %v2637_v7 = vshll.u32 %v2636_v48, 23  ;;  %v1171_v6 = vadd.f32 %v8951_v14, %v1132_v21  ;;  %v2790_v25 = vshll.u32 %v12557_v41, %v12729_v27 }
 0x258   :  { %v2516_v44 = vadd.s32 536870912, %v2515_v61  ;;  %v2791_v15 = vshrl.u32 %v12470_v11, %v12728_v18  ;;  %v6135_v10 = vpop.eup %6134  ;;  %v1170_v9 = vadd.f32 %v8951_v14, %v1131_v35  ;;  %vm2343_vm0 = vcmp.eq.s32.totalorder %v9033_v62, 0 }
 0x259   :  { %6138 = vcosq.f32 %v9148_v63  ;;  %v2638_v0 = vor.u32 4788187, %v2637_v7  ;;  %v2645_v32 = vsub.s32 4, %v9048_v42  ;;  %v6137_v12 = vpop.eup %6136  ;;  %vm2034_vm2 = vcmp.eq.s32.totalorder %v9132_v23, 2 }
 0x25a   :  { %v9172_v46 = vshrl.u32 %v2516_v44, 30  ;;  %v2784_v58 = vshll.u32 %v12461_v2, %v12729_v27  ;;  %v2787_v48 = vshll.u32 %v12649_v29, %v12729_v27  ;;  %v2792_v40 = vor.u32 %v2791_v15, %v2790_v25 }
 0x25b   :  { %v1202_v21 = vmax.f32 %v1170_v9, 0.0  ;;  %vm2031_vm6 = vcmp.eq.s32.totalorder %v9132_v23, 0  ;;  %v12730_v8 = vand.u32 2147483647, %v12706_v28  ;;  %v2639_v7 = vand.u32 2147483647, %v2638_v0 }
 0x25c   :  { %v2641_v30 = vcvt.s32.f32 %v2634_v19  ;;  %v2774_v44 = vand.u32 8388607, %v12413_v24  ;;  %v1203_v52 = vmax.f32 %v1171_v6, 0.0  ;;  %v2518_v55 = vshll.u32 %v9172_v46, 30  ;;  %v12733_v6 = vld [vmem:[#allocation60_spill] sm:$0xff] }
 0x25d   :  { %vm9181_vm13 = vcmp.le.f32.partialorder %v12730_v8, 0.7853982  ;;  %v2786_v33 = vor.u32 %v2785_v22, %v2784_v58  ;;  %v2789_v27 = vor.u32 %v2788_v38, %v2787_v48  ;;  %5894 = vmatprep.mubr.msk.f32.mxu1 %vm1218_vm3, %v1202_v21  ;;  %vm2342_vm12 = vcmp.lt.s32.totalorder %v9033_v62, 2  ;;  %v12736_v21 = vld [vmem:[#allocation62_spill] sm:$0xff] }
 0x25e   :  { %v2032_v25 = vxor.u32 2147483648, %v6137_v12  ;;  %v2035_v15 = vxor.u32 2147483648, %v6135_v10  ;;  %v1920_v9 = vsel %vm9082_vm1, 0, %v9143_v16  ;;  %v2642_v0 = vmul.f32 %v2641_v30, %v2639_v7  ;;  %5895 = vmatmul.mubr.msk.f32.gmra.mrb[22].mxu1 %vm1218_vm3, %v1203_v52 }
 0x25f   :  { %vm2030_vm9 = vcmp.lt.s32.totalorder %v9132_v23, 2  ;;  %v2646_v22 = vsel %vm2561_vm10, %v2645_v32, %v9048_v42  ;;  %v9198_v19 = vsub.s32 %v2515_v61, %v2518_v55  ;;  %v2783_v38 = vshrl.u32 %v12461_v2, %v12728_v18  ;;  %v12734_v42 = vld [vmem:[#allocation66_spill] sm:$0xff]  ;;  %v12735_v18 = vld [vmem:[#allocation68_spill] sm:$0xff] }
 0x260   :  { %v2804_v58 = vsel %vm2802_vm5, %v2792_v40, 2102212464  ;;  %v2775_v48 = vor.u32 8388608, %v2774_v44  ;;  %vm2799_vm1 = vcmp.lt.s32.totalorder %v12733_v6, 1  ;;  %vm2800_vm15 = vcmp.lt.s32.totalorder %v12733_v6, 2 }
 0x261   :  { %vm2801_vm7 = vcmp.lt.s32.totalorder %v12733_v6, 3  ;;  %v2521_v30 = vsub.s32 0, %v9198_v19  ;;  %v2803_v53 = vsel %vm2799_vm1, %v2783_v38, %v2786_v33  ;;  %v2807_v52 = vsel %vm2799_vm1, %v2786_v33, %v2789_v27 }
 0x262   :  { %v2809_v55 = vsel %vm2801_vm7, %v2792_v40, %v12734_v42  ;;  %v2643_v16 = vxor.u32 2147483648, %v2642_v0  ;;  %v2805_v61 = vsel %vm2801_vm7, %v2789_v27, %v2804_v58  ;;  %v2811_v32 = vsel %vm2799_vm1, %v2789_v27, %v2792_v40 }
 0x263   :  { %v2813_v8 = vsel %vm2801_vm7, %v12736_v21, %v12735_v18  ;;  %v12737_v7 = vxor.u32 2147483648, %v9114_v37  ;;  %v1924_v24 = vadd.s32 3, %v1920_v9  ;;  %v5457_v1 = vmin.u32 %v2521_v30, %v9198_v19  ;;  %v9219_v38 = vpop.eup %6138 }
 0x264   :  { %v2814_v33 = vsel %vm2800_vm15, %v2811_v32, %v2813_v8  ;;  %v2036_v40 = vsel %vm2034_vm2, %v2035_v15, %v6137_v12  ;;  %6140 = vsinq.f32 %v9148_v63  ;;  %v2810_v37 = vsel %vm2800_vm15, %v2807_v52, %v2809_v55  ;;  %v12738_v63 = vld [vmem:[#allocation23_spill] sm:$0xff]  ;;  %v5835_v55 = vpop.f32.mrb[26].mxu0 }
 0x265   :  { %v2345_v44 = vsel %vm2343_vm0, %v9072_v31, %v12737_v7  ;;  %v2815_v27 = vshll.u32 %v2775_v48, 8  ;;  %v2033_v31 = vsel %vm2031_vm6, %v6135_v10, %v2032_v25  ;;  %v2648_v9 = vsel %vm9181_vm13, 0, %v2646_v22 }
 0x266   :  { %v2523_v58 = vclz %v5457_v1  ;;  %v2806_v30 = vsel %vm2800_vm15, %v2803_v53, %v2805_v61  ;;  %v2644_v42 = vsel %vm2561_vm10, %v2643_v16, %v2642_v0  ;;  %v12415_v32 = vand.u32 2147483647, %v12738_v63 }
 0x267   :  { %v9234_v12 = vmul.u32.u64.low %v2815_v27, %v2814_v33  ;;  %v9235_v15 = vmul.u32.u64.high %v2815_v27, %v2814_v33, %v9234_v12  ;;  %v9241_v48 = vsel %vm2342_vm12, %v2345_v44, %v9136_v43  ;;  %v9249_v1 = vsel %vm2030_vm9, %v2033_v31, %v2036_v40  ;;  %v12740_v44 = vld [vmem:[#allocation44_spill] sm:$0xff] }
 0x268   :  { %v5458_v10 = vadd.s32 4294967294, %v2523_v58  ;;  %v9243_v25 = vmul.u32.u64.low %v2815_v27, %v2810_v37  ;;  %v9244_v22 = vmul.u32.u64.high %v2815_v27, %v2810_v37, %v9243_v25  ;;  %v9251_v0 = vand.u32 3, %v1924_v24  ;;  %v12739_v24 = vld [vmem:[#allocation47_spill] sm:$0xff] }
 0x269   :  { %v9253_v6 = vadd.s32 3, %v2648_v9  ;;  %v2511_v53 = vadd.s32 %v9110_v13, %v9117_v47  ;;  %v1931_v62 = vxor.u32 2147483648, %v9219_v38  ;;  %v2647_v43 = vsel %vm9181_vm13, %v12706_v28, %v2644_v42  ;;  %v1071_v47 = vpop.f32.mrb[27].mxu0 }
 0x26a   :  { %vm5459_vm5 = vcmp.lt.s32.totalorder %v5458_v10, 0  ;;  %v2822_v52 = vmul.u32 %v2815_v27, %v2806_v30  ;;  %v2670_v23 = vand.u32 8388607, %v12415_v32  ;;  %v2681_v61 = vshrl.u32 %v12649_v29, %v12739_v24 }
 0x26b   :  { %v2526_v16 = vsel %vm5459_vm5, 0, %v5458_v10  ;;  %v2684_v18 = vshrl.u32 %v12557_v41, %v12739_v24  ;;  %v1134_v13 = vmul.f32 %v8941_v45, %v5835_v55  ;;  %vm2457_vm8 = vcmp.lt.s32.totalorder %v12717_v36, 0 }
 0x26c   :  { %v2527_v35 = vsub.s32 32, %v2526_v16  ;;  %v2531_v21 = vsub.s32 4294967266, %v2526_v16  ;;  %vm2824_vm10 = vc.u32 %v9235_v15, %v9243_v25  ;;  %v1133_v8 = vmul.f32 %v8941_v45, %v1071_v47 }
 0x26d   :  { %v2825_v7 = vadd.s32 1, %v9244_v22  ;;  %v2680_v33 = vshll.u32 %v12461_v2, %v12740_v44  ;;  %v2683_v40 = vshll.u32 %v12649_v29, %v12740_v44  ;;  %v1173_v37 = vadd.f32 %v8951_v14, %v1134_v13 }
 0x26e   :  { %v2528_v27 = vshll.u32 %v9198_v19, %v2526_v16  ;;  %v2529_v31 = vshrl.u32 %v2511_v53, %v2527_v35  ;;  %v2532_v9 = vadd.s32 127, %v2531_v21  ;;  %v6141_v58 = vpop.eup %6140  ;;  %v1172_v30 = vadd.f32 %v8951_v14, %v1133_v8 }
 0x26f   :  { %vm1930_vm0 = vcmp.eq.s32.totalorder %v9251_v0, 2  ;;  %v2826_v42 = vsel %vm2824_vm10, %v2825_v7, %v9244_v22  ;;  %v2686_v12 = vshll.u32 %v12557_v41, %v12740_v44  ;;  %v2687_v10 = vshrl.u32 %v12470_v11, %v12739_v24 }
 0x270   :  { %v2530_v55 = vor.u32 %v2529_v31, %v2528_v27  ;;  %v2533_v47 = vshll.u32 %v2532_v9, 23  ;;  %v2682_v13 = vor.u32 %v2681_v61, %v2680_v33  ;;  %v2685_v32 = vor.u32 %v2684_v18, %v2683_v40  ;;  %v12744_v33 = vld [vmem:[#allocation53_spill] sm:$0xff] }
 0x271   :  { %v1204_v19 = vmax.f32 %v1172_v30, 0.0  ;;  %vm1927_vm2 = vcmp.eq.s32.totalorder %v9251_v0, 0  ;;  %v12741_v53 = vand.u32 2147483647, %v12717_v36  ;;  %v2541_v22 = vsub.s32 4, %v9172_v46 }
 0x272   :  { %v2827_v35 = vadd.s32 %v2826_v42, %v2822_v52  ;;  %v2688_v21 = vor.u32 %v2687_v10, %v2686_v12  ;;  %v1205_v8 = vmax.f32 %v1173_v37, 0.0  ;;  %vm2339_vm13 = vweird.f32 %v12674_v50 }
 0x273   :  { %vm9289_vm6 = vcmp.le.f32.partialorder %v12741_v53, 0.7853982  ;;  %v1928_v7 = vxor.u32 2147483648, %v6141_v58  ;;  %6142 = vcosq.f32 %v2647_v43  ;;  %v2534_v61 = vor.u32 4788187, %v2533_v47  ;;  %5897 = vmatprep.mubr.msk.f32.mxu1 %vm1218_vm3, %v1204_v19  ;;  %v12747_v47 = vld [vmem:[#allocation57_spill] sm:$0xff] }
 0x274   :  { %vm2027_vm12 = vweird.f32 %v12686_v4  ;;  %6144 = vsinq.f32 %v2647_v43  ;;  %v2828_v18 = vadd.s32 536870912, %v2827_v35  ;;  %v2671_v44 = vor.u32 8388608, %v2670_v23  ;;  %5898 = vmatmul.mubr.msk.f32.gmra.mrb[24].mxu1 %vm1218_vm3, %v1205_v8  ;;  %v12745_v23 = vld [vmem:[#allocation64_spill] sm:$0xff] }
 0x275   :  { %vm2695_vm9 = vcmp.lt.s32.totalorder %v12744_v33, 1  ;;  %v2535_v40 = vand.u32 2147483647, %v2534_v61  ;;  %v2537_v52 = vcvt.s32.f32 %v2530_v55  ;;  %vm2697_vm1 = vcmp.lt.s32.totalorder %v12744_v33, 3  ;;  %v12746_v55 = vld [vmem:[#allocation65_spill] sm:$0xff] }
 0x276   :  { %v2703_v37 = vsel %vm2695_vm9, %v2682_v13, %v2685_v32  ;;  %v2542_v27 = vsel %vm2457_vm8, %v2541_v22, %v9172_v46  ;;  %v2829_v31 = vshrl.u32 %v2828_v18, 30  ;;  %v2679_v43 = vshrl.u32 %v12461_v2, %v12739_v24 }
 0x277   :  { %v2705_v9 = vsel %vm2697_vm1, %v2688_v21, %v12745_v23  ;;  %v2538_v30 = vmul.f32 %v2537_v52, %v2535_v40  ;;  %vm2696_vm15 = vcmp.lt.s32.totalorder %v12744_v33, 2  ;;  %v2700_v42 = vsel %vm2698_vm4, %v2688_v21, 2102212464 }
 0x278   :  { %v2707_v12 = vsel %vm2695_vm9, %v2685_v32, %v2688_v21  ;;  %v2830_v10 = vshll.u32 %v2829_v31, 30  ;;  %v2706_v46 = vsel %vm2696_vm15, %v2703_v37, %v2705_v9  ;;  %v2709_v24 = vsel %vm2697_vm1, %v12747_v47, %v12746_v55 }
 0x279   :  { %v2711_v19 = vshll.u32 %v2671_v44, 8  ;;  %v1932_v53 = vsel %vm1930_vm0, %v1931_v62, %v6141_v58  ;;  %v2539_v22 = vxor.u32 2147483648, %v2538_v30  ;;  %v2699_v8 = vsel %vm2695_vm9, %v2679_v43, %v2682_v13 }
 0x27a   :  { %v2710_v21 = vsel %vm2696_vm15, %v2707_v12, %v2709_v24  ;;  %v9329_v61 = vsub.s32 %v2827_v35, %v2830_v10  ;;  %v2701_v18 = vsel %vm2697_vm1, %v2685_v32, %v2700_v42  ;;  %v1929_v44 = vsel %vm1927_vm2, %v9219_v38, %v1928_v7 }
 0x27b   :  { %v9333_v40 = vmul.u32.u64.low %v2711_v19, %v2710_v21  ;;  %v9334_v52 = vmul.u32.u64.high %v2711_v19, %v2710_v21, %v9333_v40  ;;  %v2544_v62 = vsel %vm9289_vm6, 0, %v2542_v27  ;;  %v9348_v35 = vsel %vm2339_vm13, nan, %v9241_v48  ;;  %v12751_v21 = vld [vmem:[#allocation35_spill] sm:$0xff] }
 0x27c   :  { %v9341_v58 = vmul.u32.u64.low %v2711_v19, %v2706_v46  ;;  %v9342_v13 = vmul.u32.u64.high %v2711_v19, %v2706_v46, %v9341_v58  ;;  %vm1926_vm4 = vcmp.lt.s32.totalorder %v9251_v0, 2  ;;  %v9352_v32 = vand.u32 3, %v9253_v6  ;;  %v5838_v0 = vpop.f32.mrb[28].mxu0 }
 0x27d   :  { %v2833_v37 = vsub.s32 0, %v9329_v61  ;;  %v9355_v38 = vpop.eup %6142  ;;  %v9360_v7 = vsel %vm2027_vm12, nan, %v9249_v1  ;;  %v2540_v27 = vsel %vm2457_vm8, %v2539_v22, %v2538_v30  ;;  %vm2769_vm7 = vcmp.lt.s32.totalorder %v12727_v54, 0  ;;  %v1081_v9 = vpop.f32.mrb[29].mxu0 }
 0x27e   :  { %v2702_v50 = vsel %vm2696_vm15, %v2699_v8, %v2701_v18  ;;  %v6145_v48 = vpop.eup %6144  ;;  %v1933_v6 = vsel %vm1926_vm4, %v1929_v44, %v1932_v53  ;;  %v9367_v43 = vadd.s32 3, %v2544_v62  ;;  %v2823_v23 = vadd.s32 %v9243_v25, %v9235_v15 }
 0x27f   :  { %v5469_v4 = vmin.u32 %v2833_v37, %v9329_v61  ;;  %v1136_v1 = vmul.f32 %v8941_v45, %v5838_v0  ;;  %v2853_v42 = vsub.s32 4, %v2829_v31  ;;  %vm2720_vm5 = vc.u32 %v9334_v52, %v9341_v58 }
 0x280   :  { %v2721_v33 = vadd.s32 1, %v9342_v13  ;;  %v1135_v30 = vmul.f32 %v8941_v45, %v1081_v9  ;;  %vm2655_vm8 = vcmp.eq.s32.totalorder %v9352_v32, 0  ;;  %vm2658_vm10 = vcmp.eq.s32.totalorder %v9352_v32, 2 }
 0x281   :  { %v2543_v15 = vsel %vm9289_vm6, %v12717_v36, %v2540_v27  ;;  %v12748_v25 = vand.u32 2147483647, %v12727_v54  ;;  %v2835_v10 = vclz %v5469_v4  ;;  %v2718_v46 = vmul.u32 %v2711_v19, %v2702_v50  ;;  %v12752_v19 = vld [vmem:[#allocation63_spill] sm:$0xff]  ;;  %v12753_v27 = vld [vmem:[#allocation61_spill] sm:$0xff] }
 0x282   :  { %v1175_v55 = vadd.f32 %v8951_v14, %v1136_v1  ;;  %v2656_v47 = vxor.u32 2147483648, %v6145_v48  ;;  %v2659_v24 = vxor.u32 2147483648, %v9355_v38  ;;  %v2722_v53 = vsel %vm2720_vm5, %v2721_v33, %v9342_v13 }
 0x283   :  { %vm9384_vm0 = vcmp.le.f32.partialorder %v12748_v25, 0.7853982  ;;  %v1174_v22 = vadd.f32 %v8951_v14, %v1135_v30  ;;  %vm1923_vm2 = vweird.f32 %v12698_v26  ;;  %v5470_v16 = vadd.s32 4294967294, %v2835_v10 }
 0x284   :  { %v2723_v8 = vadd.s32 %v2722_v53, %v2718_v46  ;;  %v2975_v18 = vand.u32 2147483647, %v12751_v21  ;;  %6146 = vcosq.f32 %v2543_v15  ;;  %v2854_v40 = vsel %vm2769_vm7, %v2853_v42, %v2829_v31 }
 0x285   :  { %v2993_v44 = vshrl.u32 %v12649_v29, %v12752_v19  ;;  %v2996_v62 = vshrl.u32 %v12557_v41, %v12752_v19  ;;  %v1206_v37 = vmax.f32 %v1174_v22, 0.0  ;;  %vm5471_vm6 = vcmp.lt.s32.totalorder %v5470_v16, 0 }
 0x286   :  { %v2724_v13 = vadd.s32 536870912, %v2723_v8  ;;  %v2992_v50 = vshll.u32 %v12461_v2, %v12753_v27  ;;  %v1207_v0 = vmax.f32 %v1175_v55, 0.0  ;;  %v2838_v4 = vsel %vm5471_vm6, 0, %v5470_v16 }
 0x287   :  { %v2995_v1 = vshll.u32 %v12649_v29, %v12753_v27  ;;  %v2999_v31 = vshrl.u32 %v12470_v11, %v12752_v19  ;;  %5900 = vmatprep.mubr.msk.f32.mxu1 %vm1218_vm3, %v1206_v37  ;;  %v2839_v9 = vsub.s32 32, %v2838_v4  ;;  %v2843_v42 = vsub.s32 4294967266, %v2838_v4 }
 0x288   :  { %v9407_v33 = vshrl.u32 %v2724_v13, 30  ;;  %v2982_v30 = vand.u32 8388607, %v2975_v18  ;;  %5901 = vmatmul.mubr.msk.f32.gmra.mrb[26].mxu1 %vm1218_vm3, %v1207_v0  ;;  %6148 = vsinq.f32 %v2543_v15  ;;  %v2994_v25 = vor.u32 %v2993_v44, %v2992_v50 }
 0x289   :  { %v2997_v10 = vor.u32 %v2996_v62, %v2995_v1  ;;  %v2998_v46 = vshll.u32 %v12557_v41, %v12753_v27  ;;  %v2840_v55 = vshll.u32 %v9329_v61, %v2838_v4  ;;  %v2841_v53 = vshrl.u32 %v2823_v23, %v2839_v9  ;;  %v12754_v23 = vld [vmem:[#allocation67_spill] sm:$0xff] }
 0x28a   :  { %v2844_v22 = vadd.s32 127, %v2843_v42  ;;  %v2726_v16 = vshll.u32 %v9407_v33, 30  ;;  %vm2651_vm13 = vweird.f32 %v12706_v28  ;;  %v2657_v37 = vsel %vm2655_vm8, %v9355_v38, %v2656_v47 }
 0x28b   :  { %v2660_v15 = vsel %vm2658_vm10, %v2659_v24, %v6145_v48  ;;  %v2856_v44 = vsel %vm9384_vm0, 0, %v2854_v40  ;;  %v3000_v62 = vor.u32 %v2999_v31, %v2998_v46  ;;  %v2842_v13 = vor.u32 %v2841_v53, %v2840_v55  ;;  %v12757_v46 = vld [vmem:[#allocation72_spill] sm:$0xff] }
 0x28c   :  { %v2845_v27 = vshll.u32 %v2844_v22, 23  ;;  %v9424_v61 = vsub.s32 %v2723_v8, %v2726_v16  ;;  %vm3007_vm12 = vcmp.lt.s32.totalorder %v12754_v23, 1  ;;  %v9429_v50 = vsel %vm1923_vm2, nan, %v1933_v6  ;;  %v12755_v6 = vld [vmem:[#allocation78_spill] sm:$0xff] }
 0x28d   :  { %vm2654_vm9 = vcmp.lt.s32.totalorder %v9352_v32, 2  ;;  %v2983_v38 = vor.u32 8388608, %v2982_v30  ;;  %v3015_v48 = vsel %vm3007_vm12, %v2994_v25, %v2997_v10  ;;  %v9435_v47 = vand.u32 3, %v9367_v43  ;;  %v12756_v30 = vld [vmem:[#allocation79_spill] sm:$0xff] }
 0x28e   :  { %v2846_v24 = vor.u32 4788187, %v2845_v27  ;;  %v2729_v40 = vsub.s32 0, %v9424_v61  ;;  %vm3009_vm1 = vcmp.lt.s32.totalorder %v12754_v23, 3  ;;  %v9439_v8 = vpop.eup %6146  ;;  %v2661_v0 = vsel %vm2654_vm9, %v2657_v37, %v2660_v15 }
 0x28f   :  { %v2860_v26 = vadd.s32 3, %v2856_v44  ;;  %vm3008_vm15 = vcmp.lt.s32.totalorder %v12754_v23, 2  ;;  %v3017_v32 = vsel %vm3009_vm1, %v3000_v62, %v12755_v6  ;;  %v2849_v1 = vcvt.s32.f32 %v2842_v13  ;;  %v5841_v6 = vpop.f32.mrb[30].mxu0 }
 0x290   :  { %v2847_v4 = vand.u32 2147483647, %v2846_v24  ;;  %v5465_v43 = vmin.u32 %v2729_v40, %v9424_v61  ;;  %v3018_v31 = vsel %vm3008_vm15, %v3015_v48, %v3017_v32  ;;  %v2991_v9 = vshrl.u32 %v12461_v2, %v12752_v19 }
 0x291   :  { %v3019_v42 = vsel %vm3007_vm12, %v2997_v10, %v3000_v62  ;;  %v3021_v55 = vsel %vm3009_vm1, %v12757_v46, %v12756_v30  ;;  %v9456_v53 = vshll.u32 %v2983_v38, 8  ;;  %v3012_v37 = vsel %vm3010_vm11, %v3000_v62, 2102212464 }
 0x292   :  { %v2850_v22 = vmul.f32 %v2849_v1, %v2847_v4  ;;  %v2731_v16 = vclz %v5465_v43  ;;  %v3022_v15 = vsel %vm3008_vm15, %v3019_v42, %v3021_v55  ;;  %v9462_v44 = vpop.eup %6148  ;;  %v9475_v38 = vsel %vm2651_vm13, nan, %v2661_v0 }
 0x293   :  { %v9465_v19 = vmul.u32.u64.low %v9456_v53, %v3022_v15  ;;  %v9466_v13 = vmul.u32.u64.high %v9456_v53, %v3022_v15, %v9465_v19  ;;  %v9469_v27 = vmul.u32.u64.low %v9456_v53, %v3018_v31  ;;  %v9470_v48 = vmul.u32.u64.high %v9456_v53, %v3018_v31, %v9469_v27 }
 0x294   :  { %v2851_v24 = vxor.u32 2147483648, %v2850_v22  ;;  %v9477_v62 = vand.u32 3, %v2860_v26  ;;  %v5466_v40 = vadd.s32 4294967294, %v2731_v16  ;;  %vm2554_vm11 = vcmp.eq.s32.totalorder %v9435_v47, 2  ;;  %v1091_v26 = vpop.f32.mrb[31].mxu0 }
 0x295   :  { %v2555_v32 = vxor.u32 2147483648, %v9439_v8  ;;  %vm2665_vm4 = vcmp.lt.s32.totalorder %v12738_v63, 0  ;;  %v2719_v4 = vadd.s32 %v9341_v58, %v9334_v52  ;;  %v3011_v1 = vsel %vm3007_vm12, %v2991_v9, %v2994_v25  ;;  %v5860_v55 = vpop.f32.mrb[32].mxu0 }
 0x296   :  { %v3013_v28 = vsel %vm3009_vm1, %v2997_v10, %v3012_v37  ;;  %v1138_v0 = vmul.f32 %v8941_v45, %v5841_v6  ;;  %v2552_v43 = vxor.u32 2147483648, %v9462_v44  ;;  %v2852_v31 = vsel %vm2769_vm7, %v2851_v24, %v2850_v22  ;;  %v1381_v37 = vpop.f32.mrb[33].mxu0  ;;  %v9521_v24 = vld [vmem:[%s12110_s9] ss:$0 sm:$0xff] }
 0x297   :  { %vm5467_vm5 = vcmp.lt.s32.totalorder %v5466_v40, 0  ;;  %v1137_v42 = vmul.f32 %v8941_v45, %v1091_v26  ;;  %vm2551_vm8 = vcmp.eq.s32.totalorder %v9435_v47, 0  ;;  %v2855_v52 = vsel %vm9384_vm0, %v12727_v54, %v2852_v31  ;;  %v9504_v45 = vld [vmem:[%s12109_s8] ss:$0 sm:$0xff] }
 0x298   :  { %v2734_v58 = vsel %vm5467_vm5, 0, %v5466_v40  ;;  %v2749_v25 = vsub.s32 4, %v9407_v33  ;;  %v1177_v10 = vadd.f32 %v8951_v14, %v1138_v0  ;;  %6150 = vcosq.f32 %v2855_v52  ;;  %v5863_v0 = vpop.f32.mrb[0].mxu1 }
 0x299   :  { %v2735_v9 = vsub.s32 32, %v2734_v58  ;;  %v3014_v30 = vsel %vm3008_vm15, %v3011_v1, %v3013_v28  ;;  %v1176_v46 = vadd.f32 %v8951_v14, %v1137_v42  ;;  %6152 = vsinq.f32 %v2855_v52  ;;  %v1391_v52 = vpop.f32.mrb[1].mxu1 }
 0x29a   :  { %v12758_v12 = vand.u32 2147483647, %v12738_v63  ;;  %v2739_v16 = vsub.s32 4294967266, %v2734_v58  ;;  %vm3032_vm10 = vc.u32 %v9466_v13, %v9469_v27  ;;  %v1548_v23 = vmul.f32 %v5860_v55, %v9504_v45 }
 0x29b   :  { %v2736_v15 = vshll.u32 %v9424_v61, %v2734_v58  ;;  %v2737_v19 = vshrl.u32 %v2719_v4, %v2735_v9  ;;  %v3033_v14 = vadd.s32 1, %v9470_v48  ;;  %v1208_v40 = vmax.f32 %v1176_v46, 0.0 }
 0x29c   :  { %vm9509_vm7 = vcmp.le.f32.partialorder %v12758_v12, 0.7853982  ;;  %v1547_v6 = vmul.f32 %v9504_v45, %v1381_v37  ;;  %vm2550_vm0 = vcmp.lt.s32.totalorder %v9435_v47, 2  ;;  %v2740_v1 = vadd.s32 127, %v2739_v16 }
 0x29d   :  { %v3030_v28 = vmul.u32 %v9456_v53, %v3014_v30  ;;  %v1209_v26 = vmax.f32 %v1177_v10, 0.0  ;;  %v1587_v61 = vadd.f32 %v9521_v24, %v1548_v23  ;;  %v2738_v4 = vor.u32 %v2737_v19, %v2736_v15  ;;  %5903 = vmatprep.mubr.msk.f32.mxu1 %vm1218_vm3, %v1208_v40 }
 0x29e   :  { %v3034_v31 = vsel %vm3032_vm10, %v3033_v14, %v9470_v48  ;;  %v1550_v42 = vmul.f32 %v5863_v0, %v9504_v45  ;;  %v1586_v58 = vadd.f32 %v9521_v24, %v1547_v6  ;;  %vm2863_vm2 = vcmp.eq.s32.totalorder %v9477_v62, 0 }
 0x29f   :  { %v2741_v53 = vshll.u32 %v2740_v1, 23  ;;  %v3035_v9 = vadd.s32 %v3034_v31, %v3030_v28  ;;  %v1549_v10 = vmul.f32 %v9504_v45, %v1391_v52  ;;  %v1619_v30 = vmax.f32 %v1587_v61, 0.0  ;;  %5904 = vmatmul.mubr.msk.f32.gmra.mrb[28].mxu1 %vm1218_vm3, %v1209_v26 }
 0x2a0   :  { %v2556_v46 = vsel %vm2554_vm11, %v2555_v32, %v9462_v44  ;;  %v2750_v48 = vsel %vm2665_vm4, %v2749_v25, %v9407_v33  ;;  %v1589_v55 = vadd.f32 %v9521_v24, %v1550_v42  ;;  %v1618_v12 = vmax.f32 %v1586_v58, 0.0  ;;  %v12762_v58 = vld [vmem:[#allocation71_spill] sm:$0xff] }
 0x2a1   :  { %v2742_v16 = vor.u32 4788187, %v2741_v53  ;;  %v3036_v23 = vadd.s32 536870912, %v3035_v9  ;;  %v1588_v37 = vadd.f32 %v9521_v24, %v1549_v10  ;;  %1651 = vst [vmem:[%s12111_s13 + $0x8] sm:$0xff] %v1619_v30  ;;  %v5160_v15 = vadd.f32 %v9360_v7, %v1619_v30 }
 0x2a2   :  { %v2553_v44 = vsel %vm2551_vm8, %v9439_v8, %v2552_v43  ;;  %vm2862_vm3 = vcmp.lt.s32.totalorder %v9477_v62, 2  ;;  %v2745_v33 = vcvt.s32.f32 %v2738_v4  ;;  %v1621_v32 = vmax.f32 %v1589_v55, 0.0  ;;  %1650 = vst [vmem:[%s12111_s13] sm:$0xff] %v1618_v12  ;;  %v6151_v40 = vpop.eup %6150  ;;  %v12761_v8 = vld [vmem:[#allocation42_spill] sm:$0xff] }
 0x2a3   :  { %v5159_v25 = vadd.f32 %v9429_v50, %v1618_v12  ;;  %v2743_v19 = vand.u32 2147483647, %v2742_v16  ;;  %v9557_v14 = vshrl.u32 %v3036_v23, 30  ;;  %v1620_v6 = vmax.f32 %v1588_v37, 0.0  ;;  %v6153_v1 = vpop.eup %6152  ;;  %v12763_v12 = vld [vmem:[#allocation69_spill] sm:$0xff] }
 0x2a4   :  { %vm2547_vm6 = vweird.f32 %v12717_v36  ;;  %vm2866_vm13 = vcmp.eq.s32.totalorder %v9477_v62, 2  ;;  %v2752_v7 = vsel %vm9509_vm7, 0, %v2750_v48  ;;  %v2871_v43 = vand.u32 2147483647, %v12761_v8  ;;  %1653 = vst [vmem:[%s12111_s13 + $0x18] sm:$0xff] %v1621_v32 }
 0x2a5   :  { %v5162_v50 = vadd.f32 %v8859_v56, %v1621_v32  ;;  %v5627_v28 = vpack.c.bf16 %v5160_v15, %v5159_v25  ;;  %vm2859_vm12 = vweird.f32 %v12727_v54  ;;  %v2867_v0 = vxor.u32 2147483648, %v6151_v40  ;;  %1652 = vst [vmem:[%s12111_s13 + $0x10] sm:$0xff] %v1620_v6 }
 0x2a6   :  { %v2746_v26 = vmul.f32 %v2745_v33, %v2743_v19  ;;  %v5161_v61 = vadd.f32 %v8907_v39, %v1620_v6  ;;  %v2557_v4 = vsel %vm2550_vm0, %v2553_v44, %v2556_v46  ;;  %v2864_v31 = vxor.u32 2147483648, %v6153_v1  ;;  %v5866_v6 = vpop.f32.mrb[2].mxu1 }
 0x2a7   :  { %v3038_v42 = vshll.u32 %v9557_v14, 30  ;;  %5628 = vst [vmem:[%s12112_s14] sm:$0xff] %v5627_v28   ;;  %v2756_v52 = vadd.s32 3, %v2752_v7  ;;  %v2889_v53 = vshrl.u32 %v12649_v29, %v12762_v58  ;;  %v2892_v10 = vshrl.u32 %v12557_v41, %v12762_v58 }
 0x2a8   :  { %v2747_v56 = vxor.u32 2147483648, %v2746_v26  ;;  %v5632_v30 = vpack.c.bf16 %v5162_v50, %v5161_v61  ;;  %v2865_v39 = vsel %vm2863_vm2, %v6151_v40, %v2864_v31  ;;  %v2868_v47 = vsel %vm2866_vm13, %v2867_v0, %v6153_v1  ;;  %v1401_v0 = vpop.f32.mrb[3].mxu1  ;;  %v12764_v31 = vld [vmem:[#allocation70_spill] sm:$0xff] }
 0x2a9   :  { %v9587_v46 = vsub.s32 %v3035_v9, %v3038_v42  ;;  %v9593_v55 = vand.u32 8388607, %v2871_v43  ;;  %v2894_v16 = vshll.u32 %v12557_v41, %v12763_v12  ;;  %v2895_v23 = vshrl.u32 %v12470_v11, %v12762_v58  ;;  %v12765_v42 = vld [vmem:[#allocation88_spill] sm:$0xff] }
 0x2aa   :  { %v2748_v48 = vsel %vm2665_vm4, %v2747_v56, %v2746_v26  ;;  %5704 = vst [vmem:[%s12112_s14 + $0x8] sm:$0xff] %v5632_v30   ;;  %v2888_v15 = vshll.u32 %v12461_v2, %v12763_v12  ;;  %v2891_v44 = vshll.u32 %v12649_v29, %v12763_v12  ;;  %v2869_v33 = vsel %vm2862_vm3, %v2865_v39, %v2868_v47  ;;  %v12766_v12 = vld [vmem:[#allocation90_spill] sm:$0xff] }
 0x2ab   :  { %v2751_v9 = vsel %vm9509_vm7, %v12738_v63, %v2748_v48  ;;  %v3041_v37 = vsub.s32 0, %v9587_v46  ;;  %v9612_v32 = vand.u32 3, %v2756_v52  ;;  %v2896_v25 = vor.u32 %v2895_v23, %v2894_v16  ;;  %v12767_v16 = vld [vmem:[#allocation80_spill] sm:$0xff] }
 0x2ac   :  { %6154 = vcosq.f32 %v2751_v9  ;;  %v2890_v22 = vor.u32 %v2889_v53, %v2888_v15  ;;  %v2893_v40 = vor.u32 %v2892_v10, %v2891_v44  ;;  %v9617_v7 = vsel %vm2547_vm6, nan, %v2557_v4 }
 0x2ad   :  { %6156 = vsinq.f32 %v2751_v9  ;;  %v5477_v19 = vmin.u32 %v3041_v37, %v9587_v46  ;;  %v3031_v1 = vadd.s32 %v9469_v27, %v9466_v13  ;;  %v2879_v62 = vor.u32 8388608, %v9593_v55 }
 0x2ae   :  { %v2887_v50 = vshrl.u32 %v12461_v2, %v12762_v58  ;;  %v1552_v28 = vmul.f32 %v5866_v6, %v9504_v45  ;;  %v9627_v26 = vsel %vm2859_vm12, nan, %v2869_v33  ;;  %v2908_v36 = vsel %vm2906_vm14, %v2896_v25, 2102212464  ;;  %v5869_v58 = vpop.f32.mrb[4].mxu1 }
 0x2af   :  { %v3043_v61 = vclz %v5477_v19  ;;  %v1551_v4 = vmul.f32 %v9504_v45, %v1401_v0  ;;  %vm2762_vm9 = vcmp.eq.s32.totalorder %v9612_v32, 2  ;;  %vm2903_vm1 = vcmp.lt.s32.totalorder %v12764_v31, 1  ;;  %v1411_v48 = vpop.f32.mrb[5].mxu1 }
 0x2b0   :  { %vm2904_vm15 = vcmp.lt.s32.totalorder %v12764_v31, 2  ;;  %vm2905_vm11 = vcmp.lt.s32.totalorder %v12764_v31, 3  ;;  %v1591_v13 = vadd.f32 %v9521_v24, %v1552_v28  ;;  %vm2759_vm4 = vcmp.eq.s32.totalorder %v9612_v32, 0  ;;  %v5872_v28 = vpop.f32.mrb[6].mxu1 }
 0x2b1   :  { %v5478_v54 = vadd.s32 4294967294, %v3043_v61  ;;  %v2911_v27 = vsel %vm2903_vm1, %v2890_v22, %v2893_v40  ;;  %v2913_v56 = vsel %vm2905_vm11, %v2896_v25, %v12765_v42  ;;  %v1590_v52 = vadd.f32 %v9521_v24, %v1551_v4 }
 0x2b2   :  { %vm2758_vm14 = vcmp.lt.s32.totalorder %v9612_v32, 2  ;;  %v2907_v53 = vsel %vm2903_vm1, %v2887_v50, %v2890_v22  ;;  %v2909_v10 = vsel %vm2905_vm11, %v2893_v40, %v2908_v36  ;;  %v2915_v30 = vsel %vm2903_vm1, %v2893_v40, %v2896_v25 }
 0x2b3   :  { %v1623_v39 = vmax.f32 %v1591_v13, 0.0  ;;  %v1554_v47 = vmul.f32 %v5869_v58, %v9504_v45  ;;  %vm5479_vm5 = vcmp.lt.s32.totalorder %v5478_v54, 0  ;;  %v2917_v23 = vsel %vm2905_vm11, %v12767_v16, %v12766_v12  ;;  %v1421_v13 = vpop.f32.mrb[7].mxu1 }
 0x2b4   :  { %v1622_v9 = vmax.f32 %v1590_v52, 0.0  ;;  %v1553_v37 = vmul.f32 %v9504_v45, %v1411_v48  ;;  %vm2755_vm8 = vweird.f32 %v12738_v63  ;;  %v3046_v15 = vsel %vm5479_vm5, 0, %v5478_v54 }
 0x2b5   :  { %v2914_v44 = vsel %vm2904_vm15, %v2911_v27, %v2913_v56  ;;  %1655 = vst [vmem:[%s12111_s13 + $0x28] sm:$0xff] %v1623_v39  ;;  %v5164_v33 = vadd.f32 %v9125_v20, %v1623_v39  ;;  %v1593_v25 = vadd.f32 %v9521_v24, %v1554_v47  ;;  %v3047_v19 = vsub.s32 32, %v3046_v15 }
 0x2b6   :  { %v9661_v22 = vsel %vm2904_vm15, %v2907_v53, %v2909_v10  ;;  %v6155_v40 = vpop.eup %6154  ;;  %1654 = vst [vmem:[%s12111_s13 + $0x20] sm:$0xff] %v1622_v9  ;;  %v5163_v6 = vadd.f32 %v9348_v35, %v1622_v9  ;;  %v1592_v50 = vadd.f32 %v9521_v24, %v1553_v37  ;;  %v3051_v0 = vsub.s32 4294967266, %v3046_v15  ;;  %v12768_v37 = vld [vmem:[#allocation46_spill] sm:$0xff] }
 0x2b7   :  { %v2918_v20 = vsel %vm2904_vm15, %v2915_v30, %v2917_v23  ;;  %v6157_v61 = vpop.eup %6156  ;;  %v1625_v36 = vmax.f32 %v1593_v25, 0.0  ;;  %v1556_v4 = vmul.f32 %v5872_v28, %v9504_v45  ;;  %v2763_v54 = vxor.u32 2147483648, %v6155_v40  ;;  %v12769_v28 = vld [vmem:[#allocation76_spill] sm:$0xff] }
 0x2b8   :  { %v3049_v27 = vshrl.u32 %v3031_v1, %v3047_v19  ;;  %v5637_v42 = vpack.c.bf16 %v5164_v33, %v5163_v6  ;;  %v1624_v56 = vmax.f32 %v1592_v50, 0.0  ;;  %v1555_v52 = vmul.f32 %v9504_v45, %v1421_v13  ;;  %v12770_v13 = vld [vmem:[#allocation73_spill] sm:$0xff] }
 0x2b9   :  { %v2760_v58 = vxor.u32 2147483648, %v6157_v61  ;;  %1657 = vst [vmem:[%s12111_s13 + $0x38] sm:$0xff] %v1625_v36  ;;  %v5166_v35 = vadd.f32 %v9475_v38, %v1625_v36  ;;  %v1595_v31 = vadd.f32 %v9521_v24, %v1556_v4  ;;  %v2764_v53 = vsel %vm2762_vm9, %v2763_v54, %v6157_v61 }
 0x2ba   :  { %v3048_v10 = vshll.u32 %v9587_v46, %v3046_v15  ;;  %5705 = vst [vmem:[%s12112_s14 + $0x10] sm:$0xff] %v5637_v42   ;;  %1656 = vst [vmem:[%s12111_s13 + $0x30] sm:$0xff] %v1624_v56  ;;  %v5165_v1 = vadd.f32 %v9617_v7, %v1624_v56  ;;  %v1594_v30 = vadd.f32 %v9521_v24, %v1555_v52  ;;  %v3052_v39 = vadd.s32 127, %v3051_v0 }
 0x2bb   :  { %v2761_v38 = vsel %vm2759_vm4, %v6155_v40, %v2760_v58  ;;  %v1627_v47 = vmax.f32 %v1595_v31, 0.0  ;;  %v2919_v12 = vshll.u32 %v2879_v62, 8  ;;  %v12421_v15 = vand.u32 2147483647, %v12768_v37 }
 0x2bc   :  { %v2765_v46 = vsel %vm2758_vm14, %v2761_v38, %v2764_v53  ;;  %v3050_v48 = vor.u32 %v3049_v27, %v3048_v10  ;;  %v5642_v16 = vpack.c.bf16 %v5166_v35, %v5165_v1  ;;  %v1626_v23 = vmax.f32 %v1594_v30, 0.0 }
 0x2bd   :  { %v3053_v9 = vshll.u32 %v3052_v39, 23  ;;  %1659 = vst [vmem:[%s12111_s13 + $0x48] sm:$0xff] %v1627_v47  ;;  %v5168_v7 = vadd.f32 %v9627_v26, %v1627_v47  ;;  %v2766_v33 = vsel %vm2755_vm8, nan, %v2765_v46  ;;  %v9716_v63 = vshll.u32 %v12649_v29, %v8756_v34  ;;  %v5875_v26 = vpop.f32.mrb[8].mxu1 }
 0x2be   :  { %v9701_v32 = vmul.u32.u64.low %v2919_v12, %v2918_v20  ;;  %v9702_v25 = vmul.u32.u64.high %v2919_v12, %v2918_v20, %v9701_v32  ;;  %5706 = vst [vmem:[%s12112_s14 + $0x18] sm:$0xff] %v5642_v16   ;;  %1658 = vst [vmem:[%s12111_s13 + $0x40] sm:$0xff] %v1626_v23  ;;  %v5167_v55 = vadd.f32 %v2766_v33, %v1626_v23  ;;  %v3057_v6 = vcvt.s32.f32 %v3050_v48  ;;  %v1431_v4 = vpop.f32.mrb[9].mxu1 }
 0x2bf   :  { %v3054_v62 = vor.u32 4788187, %v3053_v9  ;;  %v9710_v19 = vmul.u32.u64.low %v2919_v12, %v2914_v44  ;;  %v9711_v40 = vmul.u32.u64.high %v2919_v12, %v2914_v44, %v9710_v19  ;;  %v2926_v50 = vmul.u32 %v2919_v12, %v9661_v22  ;;  %v12771_v9 = vld [vmem:[#allocation81_spill] sm:$0xff] }
 0x2c0   :  { %v3201_v0 = vshrl.u32 %v12649_v29, %v12769_v28  ;;  %v5647_v20 = vpack.c.bf16 %v5168_v7, %v5167_v55  ;;  %v1558_v61 = vmul.f32 %v5875_v26, %v9504_v45  ;;  %v3200_v44 = vshll.u32 %v12461_v2, %v12770_v13 }
 0x2c1   :  { %v3055_v36 = vand.u32 2147483647, %v3054_v62  ;;  %v1557_v54 = vmul.f32 %v9504_v45, %v1431_v4  ;;  %vm2928_vm7 = vc.u32 %v9702_v25, %v9710_v19  ;;  %v3190_v27 = vand.u32 8388607, %v12421_v15  ;;  %v12773_v62 = vld [vmem:[#allocation92_spill] sm:$0xff] }
 0x2c2   :  { %v3203_v22 = vshll.u32 %v12649_v29, %v12770_v13  ;;  %5707 = vst [vmem:[%s12112_s14 + $0x20] sm:$0xff] %v5647_v20   ;;  %v9735_v42 = vadd.f32 %v9521_v24, %v1558_v61  ;;  %v2929_v52 = vadd.s32 1, %v9711_v40  ;;  %v3202_v58 = vor.u32 %v3201_v0, %v3200_v44  ;;  %v12777_v4 = vld [vmem:[#allocation84_spill] sm:$0xff] }
 0x2c3   :  { %v3058_v56 = vmul.f32 %v3057_v6, %v3055_v36  ;;  %v9739_v35 = vadd.f32 %v9521_v24, %v1557_v54  ;;  %v3204_v31 = vshrl.u32 %v12557_v41, %v12769_v28  ;;  %v3206_v53 = vshll.u32 %v12557_v41, %v12770_v13  ;;  %v12776_v36 = vld [vmem:[#allocation95_spill] sm:$0xff] }
 0x2c4   :  { %v3207_v10 = vshrl.u32 %v12470_v11, %v12769_v28  ;;  %v12420_v1 = vmax.f32 %v9735_v42, 0.0  ;;  %vm2977_vm10 = vcmp.lt.s32.totalorder %v12751_v21, 0  ;;  %v2930_v38 = vsel %vm2928_vm7, %v2929_v52, %v9711_v40 }
 0x2c5   :  { %v3059_v30 = vxor.u32 2147483648, %v3058_v56  ;;  %v12419_v39 = vmax.f32 %v9739_v35, 0.0  ;;  %v2931_v47 = vadd.s32 %v2930_v38, %v2926_v50  ;;  %v3205_v46 = vor.u32 %v3204_v31, %v3203_v22  ;;  %v5878_v38 = vpop.f32.mrb[10].mxu1 }
 0x2c6   :  { %v3208_v48 = vor.u32 %v3207_v10, %v3206_v53  ;;  %1661 = vst [vmem:[%s12111_s13 + $0x58] sm:$0xff] %v12420_v1  ;;  %v3061_v12 = vsub.s32 4, %v9557_v14  ;;  %v3191_v16 = vor.u32 8388608, %v3190_v27  ;;  %v3199_v23 = vshrl.u32 %v12461_v2, %v12769_v28 }
 0x2c7   :  { %vm3215_vm0 = vcmp.lt.s32.totalorder %v12771_v9, 1  ;;  %v3060_v7 = vsel %vm2977_vm10, %v3059_v30, %v3058_v56  ;;  %1660 = vst [vmem:[%s12111_s13 + $0x50] sm:$0xff] %v12419_v39  ;;  %v2932_v33 = vadd.s32 536870912, %v2931_v47  ;;  %vm3217_vm2 = vcmp.lt.s32.totalorder %v12771_v9, 3 }
 0x2c8   :  { %v3223_v32 = vsel %vm3215_vm0, %v3202_v58, %v3205_v46  ;;  %vm3216_vm3 = vcmp.lt.s32.totalorder %v12771_v9, 2  ;;  %vm12772_vm6 = vcmp.lt.s32.totalorder %v12771_v9, 4  ;;  %v3225_v40 = vsel %vm3217_vm2, %v3208_v48, %v12773_v62 }
 0x2c9   :  { %v3220_v55 = vsel %vm12772_vm6, %v3208_v48, 2102212464  ;;  %v3227_v26 = vsel %vm3215_vm0, %v3205_v46, %v3208_v48  ;;  %v9776_v6 = vshll.u32 %v12557_v41, %v8756_v34  ;;  %vm9780_vm13 = vcmp.le.f32.partialorder %v2975_v18, 0.7853982 }
 0x2ca   :  { %v2933_v28 = vshrl.u32 %v2932_v33, 30  ;;  %v3226_v0 = vsel %vm3216_vm3, %v3223_v32, %v3225_v40  ;;  %v3062_v20 = vsel %vm2977_vm10, %v3061_v12, %v9557_v14  ;;  %v3219_v61 = vsel %vm3215_vm0, %v3199_v23, %v3202_v58 }
 0x2cb   :  { %v3229_v13 = vsel %vm3217_vm2, %v12777_v4, %v12776_v36  ;;  %v3231_v44 = vshll.u32 %v3191_v16, 8  ;;  %v3063_v18 = vsel %vm9780_vm13, %v12751_v21, %v3060_v7  ;;  %v3221_v27 = vsel %vm3217_vm2, %v3205_v46, %v3220_v55  ;;  %v1441_v16 = vpop.f32.mrb[11].mxu1 }
 0x2cc   :  { %v2934_v54 = vshll.u32 %v2933_v28, 30  ;;  %v3230_v22 = vsel %vm3216_vm3, %v3227_v26, %v3229_v13  ;;  %v9809_v31 = vshll.u32 %v12470_v11, %v8756_v34  ;;  %v9813_v53 = vshll.u32 %v12471_v60, %v8756_v34  ;;  %v12780_v26 = vld [vmem:[#allocation48_spill] sm:$0xff] }
 0x2cd   :  { %v9800_v56 = vmul.u32.u64.low %v3231_v44, %v3230_v22  ;;  %v9801_v14 = vmul.u32.u64.high %v3231_v44, %v3230_v22, %v9800_v56  ;;  %v9803_v52 = vmul.u32.u64.low %v3231_v44, %v3226_v0  ;;  %v9804_v58 = vmul.u32.u64.high %v3231_v44, %v3226_v0, %v9803_v52 }
 0x2ce   :  { %v3064_v10 = vsel %vm9780_vm13, 0, %v3062_v20  ;;  %v9817_v30 = vsub.s32 %v2931_v47, %v2934_v54  ;;  %v9821_v46 = vshrl.u32 %v12461_v2, %v8882_v51  ;;  %v9825_v48 = vshrl.u32 %v12649_v29, %v8882_v51 }
 0x2cf   :  { %6158 = vcosq.f32 %v3063_v18  ;;  %v1560_v12 = vmul.f32 %v5878_v38, %v9504_v45  ;;  %v3222_v47 = vsel %vm3216_vm3, %v3219_v61, %v3221_v27  ;;  %v1559_v23 = vmul.f32 %v9504_v45, %v1441_v16  ;;  %v12782_v16 = vld [vmem:[#allocation74_spill] sm:$0xff] }
 0x2d0   :  { %6160 = vsinq.f32 %v3063_v18  ;;  %v2937_v34 = vsub.s32 0, %v9817_v30  ;;  %v3068_v7 = vadd.s32 3, %v3064_v10  ;;  %vm3240_vm12 = vc.u32 %v9801_v14, %v9803_v52 }
 0x2d1   :  { %v9833_v33 = vadd.f32 %v9521_v24, %v1560_v12  ;;  %v3241_v32 = vadd.s32 1, %v9804_v58  ;;  %v2957_v62 = vsub.s32 4, %v2933_v28  ;;  %v9840_v40 = vadd.f32 %v9521_v24, %v1559_v23 }
 0x2d2   :  { %v5473_v55 = vmin.u32 %v2937_v34, %v9817_v30  ;;  %v12418_v9 = vand.u32 2147483647, %v12780_v26  ;;  %v9845_v50 = vshrl.u32 %v12557_v41, %v8882_v51  ;;  %v3238_v20 = vmul.u32 %v3231_v44, %v3222_v47 }
 0x2d3   :  { %12778 = vst [vmem:[#allocation27_spill] sm:$0xff] %v9833_v33  ;;  %12779 = vst [vmem:[#allocation28_spill] sm:$0xff] %v9840_v40  ;;  %v12417_v0 = vmax.f32 %v9833_v33, 0.0  ;;  %v3242_v61 = vsel %vm3240_vm12, %v3241_v32, %v9804_v58  ;;  %v9851_v36 = vshrl.u32 %v12470_v11, %v8882_v51  ;;  %v9855_v4 = vshrl.u32 %v12471_v60, %v8882_v51  ;;  %v12781_v58 = vld [vmem:[#allocation77_spill] sm:$0xff] }
 0x2d4   :  { %v9859_v13 = vshrl.u32 %v12465_v49, %v8882_v51  ;;  %v2939_v18 = vclz %v5473_v55  ;;  %v9861_v54 = vand.u32 3, %v3068_v7  ;;  %vm2873_vm9 = vcmp.lt.s32.totalorder %v12761_v8, 0  ;;  %v12785_v49 = vld [vmem:[#allocation85_spill] sm:$0xff] }
 0x2d5   :  { %1663 = vst [vmem:[%s12111_s13 + $0x68] sm:$0xff] %v12417_v0  ;;  %v3243_v44 = vadd.s32 %v3242_v61, %v3238_v20  ;;  %v12416_v27 = vmax.f32 %v9840_v40, 0.0  ;;  %v2958_v56 = vsel %vm2873_vm9, %v2957_v62, %v2933_v28  ;;  %v3086_v51 = vand.u32 8388607, %v12418_v9 }
 0x2d6   :  { %v5474_v22 = vadd.s32 4294967294, %v2939_v18  ;;  %v3097_v10 = vshrl.u32 %v12649_v29, %v12781_v58  ;;  %v3100_v12 = vshrl.u32 %v12557_v41, %v12781_v58  ;;  %v3102_v34 = vshll.u32 %v12557_v41, %v12782_v16 }
 0x2d7   :  { %v3244_v38 = vadd.s32 536870912, %v3243_v44  ;;  %1662 = vst [vmem:[%s12111_s13 + $0x60] sm:$0xff] %v12416_v27  ;;  %v3103_v28 = vshrl.u32 %v12470_v11, %v12781_v58  ;;  %vm9889_vm1 = vcmp.le.f32.partialorder %v2871_v43, 0.7853982  ;;  %v2927_v23 = vadd.s32 %v9710_v19, %v9702_v25 }
 0x2d8   :  { %vm5475_vm15 = vcmp.lt.s32.totalorder %v5474_v22, 0  ;;  %v3096_v7 = vshll.u32 %v12461_v2, %v12782_v16  ;;  %v3099_v20 = vshll.u32 %v12649_v29, %v12782_v16  ;;  %vm3071_vm11 = vcmp.eq.s32.totalorder %v9861_v54, 0 }
 0x2d9   :  { %v6159_v32 = vpop.eup %6158  ;;  %v2942_v55 = vsel %vm5475_vm15, 0, %v5474_v22  ;;  %v9897_v62 = vshrl.u32 %v3244_v38, 30  ;;  %v3104_v61 = vor.u32 %v3103_v28, %v3102_v34  ;;  %vm3074_vm4 = vcmp.eq.s32.totalorder %v9861_v54, 2 }
 0x2da   :  { %v6161_v18 = vpop.eup %6160  ;;  %v2943_v43 = vsub.s32 32, %v2942_v55  ;;  %v2947_v27 = vsub.s32 4294967266, %v2942_v55  ;;  %v2960_v25 = vsel %vm9889_vm1, 0, %v2958_v56  ;;  %v3095_v19 = vshrl.u32 %v12461_v2, %v12781_v58 }
 0x2db   :  { %v3246_v22 = vshll.u32 %v9897_v62, 30  ;;  %v3087_v38 = vor.u32 8388608, %v3086_v51  ;;  %v3098_v0 = vor.u32 %v3097_v10, %v3096_v7  ;;  %v3101_v9 = vor.u32 %v3100_v12, %v3099_v20  ;;  %v5881_v51 = vpop.f32.mrb[12].mxu1  ;;  %v12787_v10 = vld [vmem:[#allocation96_spill] sm:$0xff] }
 0x2dc   :  { %v3075_v16 = vxor.u32 2147483648, %v6159_v32  ;;  %v2944_v34 = vshll.u32 %v9817_v30, %v2942_v55  ;;  %v2945_v28 = vshrl.u32 %v2927_v23, %v2943_v43  ;;  %v2948_v39 = vadd.s32 127, %v2947_v27  ;;  %v12788_v43 = vld [vmem:[#allocation97_spill] sm:$0xff] }
 0x2dd   :  { %vm3070_vm14 = vcmp.lt.s32.totalorder %v9861_v54, 2  ;;  %v3072_v1 = vxor.u32 2147483648, %v6161_v18  ;;  %v9910_v15 = vsub.s32 %v3243_v44, %v3246_v22  ;;  %vm3111_vm5 = vcmp.lt.s32.totalorder %v12785_v49, 1  ;;  %v9919_v44 = vpop.f32.mrb[13].mxu1  ;;  %v12789_v22 = vld [vmem:[#allocation87_spill] sm:$0xff] }
 0x2de   :  { %vm12786_vm8 = vcmp.lt.s32.totalorder %v12785_v49, 4  ;;  %v2946_v58 = vor.u32 %v2945_v28, %v2944_v34  ;;  %v2949_v60 = vshll.u32 %v2948_v39, 23  ;;  %vm3112_vm7 = vcmp.lt.s32.totalorder %v12785_v49, 2 }
 0x2df   :  { %v3116_v56 = vsel %vm12786_vm8, %v3104_v61, 2102212464  ;;  %vm3113_vm10 = vcmp.lt.s32.totalorder %v12785_v49, 3  ;;  %v3249_v30 = vsub.s32 0, %v9910_v15  ;;  %v3119_v27 = vsel %vm3111_vm5, %v3098_v0, %v3101_v9 }
 0x2e0   :  { %v3121_v12 = vsel %vm3113_vm10, %v3104_v61, %v12787_v10  ;;  %v3123_v23 = vsel %vm3111_vm5, %v3101_v9, %v3104_v61  ;;  %v2950_v7 = vor.u32 4788187, %v2949_v60  ;;  %v3115_v55 = vsel %vm3111_vm5, %v3095_v19, %v3098_v0 }
 0x2e1   :  { %v3117_v20 = vsel %vm3113_vm10, %v3101_v9, %v3116_v56  ;;  %v3125_v34 = vsel %vm3113_vm10, %v12789_v22, %v12788_v43  ;;  %v2953_v39 = vcvt.s32.f32 %v2946_v58  ;;  %v2964_v28 = vadd.s32 3, %v2960_v25  ;;  %v12792_v22 = vld [vmem:[#allocation89_spill] sm:$0xff] }
 0x2e2   :  { %v5485_v40 = vmin.u32 %v3249_v30, %v9910_v15  ;;  %v3126_v59 = vsel %vm3112_vm7, %v3123_v23, %v3125_v34  ;;  %v2951_v17 = vand.u32 2147483647, %v2950_v7  ;;  %v3122_v10 = vsel %vm3112_vm7, %v3119_v27, %v3121_v12  ;;  %v12790_v30 = vld [vmem:[#allocation58_spill] sm:$0xff] }
 0x2e3   :  { %v3127_v61 = vshll.u32 %v3087_v38, 8  ;;  %v1562_v33 = vmul.f32 %v5881_v51, %v9504_v45  ;;  %v3073_v60 = vsel %vm3071_vm11, %v6159_v32, %v3072_v1  ;;  %v3076_v9 = vsel %vm3074_vm4, %v3075_v16, %v6161_v18  ;;  %v12791_v7 = vld [vmem:[#allocation82_spill] sm:$0xff] }
 0x2e4   :  { %v3251_v0 = vclz %v5485_v40  ;;  %v3118_v25 = vsel %vm3112_vm7, %v3115_v55, %v3117_v20  ;;  %v2954_v19 = vmul.f32 %v2953_v39, %v2951_v17  ;;  %v3391_v23 = vand.u32 2147483647, %v12790_v30 }
 0x2e5   :  { %v9935_v56 = vmul.u32.u64.low %v3127_v61, %v3126_v59  ;;  %v9936_v58 = vmul.u32.u64.high %v3127_v61, %v3126_v59, %v9935_v56  ;;  %v9939_v38 = vmul.u32.u64.low %v3127_v61, %v3122_v10  ;;  %v9940_v12 = vmul.u32.u64.high %v3127_v61, %v3122_v10, %v9939_v38 }
 0x2e6   :  { %v5486_v27 = vadd.s32 4294967294, %v3251_v0  ;;  %v9944_v1 = vadd.f32 %v9521_v24, %v1562_v33  ;;  %v9948_v40 = vsel %vm3070_vm14, %v3073_v60, %v3076_v9  ;;  %v2955_v49 = vxor.u32 2147483648, %v2954_v19 }
 0x2e7   :  { %v9950_v32 = vand.u32 3, %v2964_v28  ;;  %v3239_v17 = vadd.s32 %v9803_v52, %v9801_v14  ;;  %v3269_v59 = vsub.s32 4, %v9897_v62  ;;  %v3134_v18 = vmul.u32 %v3127_v61, %v3118_v25 }
 0x2e8   :  { %vm5487_vm0 = vcmp.lt.s32.totalorder %v5486_v27, 0  ;;  %v1633_v16 = vmax.f32 %v9944_v1, 0.0  ;;  %v2956_v33 = vsel %vm2873_vm9, %v2955_v49, %v2954_v19  ;;  %v3398_v54 = vand.u32 8388607, %v3391_v23 }
 0x2e9   :  { %v3254_v51 = vsel %vm5487_vm0, 0, %v5486_v27  ;;  %v3408_v55 = vshll.u32 %v12461_v2, %v12791_v7  ;;  %v2959_v14 = vsel %vm9889_vm1, %v12761_v8, %v2956_v33  ;;  %vm3185_vm2 = vcmp.lt.s32.totalorder %v12768_v37, 0 }
 0x2ea   :  { %v3255_v52 = vsub.s32 32, %v3254_v51  ;;  %v3259_v20 = vsub.s32 4294967266, %v3254_v51  ;;  %vm3136_vm3 = vc.u32 %v9936_v58, %v9939_v38  ;;  %1665 = vst [vmem:[%s12111_s13 + $0x78] sm:$0xff] %v1633_v16  ;;  %vm3067_vm6 = vweird.f32 %v12751_v21 }
 0x2eb   :  { %6162 = vcosq.f32 %v2959_v14  ;;  %v3256_v43 = vshll.u32 %v9910_v15, %v3254_v51  ;;  %v3137_v47 = vadd.s32 1, %v9940_v12  ;;  %v3409_v34 = vshrl.u32 %v12649_v29, %v12792_v22  ;;  %v12796_v51 = vld [vmem:[#allocation93_spill] sm:$0xff] }
 0x2ec   :  { %6164 = vsinq.f32 %v2959_v14  ;;  %v3257_v39 = vshrl.u32 %v3239_v17, %v3255_v52  ;;  %v3260_v28 = vadd.s32 127, %v3259_v20  ;;  %v3411_v10 = vshll.u32 %v12649_v29, %v12791_v7 }
 0x2ed   :  { %v12793_v61 = vand.u32 2147483647, %v12768_v37  ;;  %v3138_v9 = vsel %vm3136_vm3, %v3137_v47, %v9940_v12  ;;  %v3410_v15 = vor.u32 %v3409_v34, %v3408_v55  ;;  %v3412_v0 = vshrl.u32 %v12557_v41, %v12792_v22  ;;  %v9997_v55 = vpop.f32.mrb[14].mxu1  ;;  %v12798_v47 = vld [vmem:[#allocation98_spill] sm:$0xff] }
 0x2ee   :  { %v3414_v25 = vshll.u32 %v12557_v41, %v12791_v7  ;;  %v3258_v19 = vor.u32 %v3257_v39, %v3256_v43  ;;  %v3261_v56 = vshll.u32 %v3260_v28, 23  ;;  %v3139_v27 = vadd.s32 %v3138_v9, %v3134_v18  ;;  %v10001_v18 = vpop.f32.mrb[15].mxu1  ;;  %v12797_v43 = vld [vmem:[#allocation103_spill] sm:$0xff] }
 0x2ef   :  { %vm9982_vm13 = vcmp.le.f32.partialorder %v12793_v61, 0.7853982  ;;  %v3415_v49 = vshrl.u32 %v12470_v11, %v12792_v22  ;;  %vm2970_vm12 = vcmp.eq.s32.totalorder %v9950_v32, 2  ;;  %v3399_v17 = vor.u32 8388608, %v3398_v54 }
 0x2f0   :  { %v3407_v33 = vshrl.u32 %v12461_v2, %v12792_v22  ;;  %v3413_v12 = vor.u32 %v3412_v0, %v3411_v10  ;;  %vm3423_vm9 = vcmp.lt.s32.totalorder %v12796_v51, 1  ;;  %vm2967_vm1 = vcmp.eq.s32.totalorder %v9950_v32, 0  ;;  %v12800_v10 = vld [vmem:[#allocation102_spill] sm:$0xff] }
 0x2f1   :  { %v3262_v7 = vor.u32 4788187, %v3261_v56  ;;  %v3140_v14 = vadd.s32 536870912, %v3139_v27  ;;  %v3416_v52 = vor.u32 %v3415_v49, %v3414_v25  ;;  %vm3425_vm15 = vcmp.lt.s32.totalorder %v12796_v51, 3 }
 0x2f2   :  { %vm2966_vm11 = vcmp.lt.s32.totalorder %v9950_v32, 2  ;;  %v3265_v54 = vcvt.s32.f32 %v3258_v19  ;;  %vm3424_vm4 = vcmp.lt.s32.totalorder %v12796_v51, 2  ;;  %v3431_v20 = vsel %vm3423_vm9, %v3410_v15, %v3413_v12 }
 0x2f3   :  { %v3437_v22 = vsel %vm3425_vm15, %v12798_v47, %v12797_v43  ;;  %vm2963_vm14 = vweird.f32 %v12761_v8  ;;  %v3263_v34 = vand.u32 2147483647, %v3262_v7  ;;  %v3141_v39 = vshrl.u32 %v3140_v14, 30 }
 0x2f4   :  { %vm12799_vm5 = vcmp.lt.s32.totalorder %v12796_v51, 4  ;;  %v3433_v61 = vsel %vm3425_vm15, %v3416_v52, %v12800_v10  ;;  %v3270_v9 = vsel %vm3185_vm2, %v3269_v59, %v9897_v62  ;;  %v3435_v25 = vsel %vm3423_vm9, %v3413_v12, %v3416_v52 }
 0x2f5   :  { %v3428_v28 = vsel %vm12799_vm5, %v3416_v52, 2102212464  ;;  %v3434_v0 = vsel %vm3424_vm4, %v3431_v20, %v3433_v61  ;;  %v3439_v19 = vshll.u32 %v3399_v17, 8  ;;  %v3078_v56 = vsel %vm3067_vm6, nan, %v9948_v40  ;;  %v6163_v43 = vpop.eup %6162 }
 0x2f6   :  { %v3266_v49 = vmul.f32 %v3265_v54, %v3263_v34  ;;  %v3142_v7 = vshll.u32 %v3141_v39, 30  ;;  %v3427_v14 = vsel %vm3423_vm9, %v3407_v33, %v3410_v15  ;;  %v3429_v62 = vsel %vm3425_vm15, %v3413_v12, %v3428_v28  ;;  %v6165_v17 = vpop.eup %6164 }
 0x2f7   :  { %v3438_v59 = vsel %vm3424_vm4, %v3435_v25, %v3437_v22  ;;  %v10033_v20 = vmul.u32.u64.low %v3439_v19, %v3434_v0  ;;  %v10034_v47 = vmul.u32.u64.high %v3439_v19, %v3434_v0, %v10033_v20  ;;  %v2971_v52 = vxor.u32 2147483648, %v6163_v43 }
 0x2f8   :  { %v3267_v21 = vxor.u32 2147483648, %v3266_v49  ;;  %v3272_v40 = vsel %vm9982_vm13, 0, %v3270_v9  ;;  %v10039_v54 = vsub.s32 %v3139_v27, %v3142_v7  ;;  %v2968_v15 = vxor.u32 2147483648, %v6165_v17 }
 0x2f9   :  { %v3165_v33 = vsub.s32 4, %v3141_v39  ;;  %v10041_v34 = vmul.u32.u64.low %v3439_v19, %v3438_v59  ;;  %v10042_v10 = vmul.u32.u64.high %v3439_v19, %v3438_v59, %v10041_v34  ;;  %v2972_v12 = vsel %vm2970_vm12, %v2971_v52, %v6165_v17 }
 0x2fa   :  { %v3268_v22 = vsel %vm3185_vm2, %v3267_v21, %v3266_v49  ;;  %v3145_v28 = vsub.s32 0, %v10039_v54  ;;  %v3430_v61 = vsel %vm3424_vm4, %v3427_v14, %v3429_v62  ;;  %v2969_v27 = vsel %vm2967_vm1, %v6163_v43, %v2968_v15 }
 0x2fb   :  { %v3271_v9 = vsel %vm9982_vm13, %v12768_v37, %v3268_v22  ;;  %v3449_v0 = vadd.s32 1, %v10034_v47  ;;  %v1561_v25 = vmul.f32 %v9504_v45, %v9919_v44  ;;  %v12801_v7 = vmax.f32 %v9735_v42, 0.0 }
 0x2fc   :  { %v2973_v59 = vsel %vm2966_vm11, %v2969_v27, %v2972_v12  ;;  %vm3081_vm8 = vcmp.lt.s32.totalorder %v12780_v26, 0  ;;  %v5481_v51 = vmin.u32 %v3145_v28, %v10039_v54  ;;  %v3276_v60 = vadd.s32 3, %v3272_v40 }
 0x2fd   :  { %v5170_v49 = vadd.f32 %v3078_v56, %v12801_v7  ;;  %v2974_v14 = vsel %vm2963_vm14, nan, %v2973_v59  ;;  %v3166_v43 = vsel %vm3081_vm8, %v3165_v33, %v3141_v39  ;;  %vm3448_vm7 = vc.u32 %v10042_v10, %v10033_v20  ;;  %v12806_v39 = vld [vmem:[#allocation59_spill] sm:$0xff] }
 0x2fe   :  { %v12802_v45 = vmax.f32 %v9739_v35, 0.0  ;;  %6166 = vcosq.f32 %v3271_v9  ;;  %v3147_v44 = vclz %v5481_v51  ;;  %v3446_v32 = vmul.u32 %v3439_v19, %v3430_v61 }
 0x2ff   :  { %v12803_v56 = vand.u32 2147483647, %v12780_v26  ;;  %v3450_v8 = vsel %vm3448_vm7, %v3449_v0, %v10034_v47  ;;  %v10081_v17 = vadd.f32 %v9521_v24, %v1561_v25  ;;  %v3287_v52 = vand.u32 2147483647, %v12806_v39 }
 0x300   :  { %v5169_v42 = vadd.f32 %v2974_v14, %v12802_v45  ;;  %vm4983_vm0 = vcmp.lt.s32.totalorder %v8866_v3, 1  ;;  %v5482_v21 = vadd.s32 4294967294, %v3147_v44  ;;  %v3451_v40 = vadd.s32 %v3450_v8, %v3446_v32 }
 0x301   :  { %vm10075_vm10 = vcmp.le.f32.partialorder %v12803_v56, 0.7853982  ;;  %v10089_v15 = vor.u32 %v9825_v48, %v8895_v57  ;;  %v10093_v47 = vor.u32 %v9845_v50, %v9716_v63  ;;  %v10095_v24 = vand.u32 3, %v3276_v60  ;;  %v12807_v50 = vld [vmem:[#allocation94_spill] sm:$0xff] }
 0x302   :  { %v5652_v35 = vpack.c.bf16 %v5170_v49, %v5169_v42  ;;  %v3168_v19 = vsel %vm10075_vm10, 0, %v3166_v43  ;;  %v1632_v33 = vmax.f32 %v10081_v17, 0.0  ;;  %6168 = vsinq.f32 %v3271_v9  ;;  %v10124_v49 = vpop.f32.mrb[16].mxu1 }
 0x303   :  { %v3135_v34 = vadd.s32 %v9939_v38, %v9936_v58  ;;  %vm5483_vm2 = vcmp.lt.s32.totalorder %v5482_v21, 0  ;;  %v3452_v12 = vadd.s32 536870912, %v3451_v40  ;;  %v3172_v48 = vadd.s32 3, %v3168_v19  ;;  %v12808_v38 = vld [vmem:[#allocation86_spill] sm:$0xff] }
 0x304   :  { %5708 = vst [vmem:[%s12112_s14 + $0x28] sm:$0xff] %v5652_v35   ;;  %v3150_v57 = vsel %vm5483_vm2, 0, %v5482_v21  ;;  %1664 = vst [vmem:[%s12111_s13 + $0x70] sm:$0xff] %v1632_v33  ;;  %v3294_v63 = vand.u32 8388607, %v3287_v52  ;;  %v3305_v22 = vshrl.u32 %v12649_v29, %v12807_v50  ;;  %v3308_v58 = vshrl.u32 %v12557_v41, %v12807_v50 }
 0x305   :  { %v3151_v28 = vsub.s32 32, %v3150_v57  ;;  %v3155_v61 = vsub.s32 4294967266, %v3150_v57  ;;  %v10112_v27 = vshrl.u32 %v3452_v12, 30  ;;  %v3304_v9 = vshll.u32 %v12461_v2, %v12808_v38  ;;  %v12809_v12 = vld [vmem:[#allocation99_spill] sm:$0xff] }
 0x306   :  { %v3307_v0 = vshll.u32 %v12649_v29, %v12808_v38  ;;  %v3310_v25 = vshll.u32 %v12557_v41, %v12808_v38  ;;  %v3311_v7 = vshrl.u32 %v12470_v11, %v12807_v50  ;;  %v3152_v59 = vshll.u32 %v10039_v54, %v3150_v57  ;;  %v10157_v57 = vpop.f32.mrb[17].mxu1  ;;  %v12811_v38 = vld [vmem:[#allocation105_spill] sm:$0xff] }
 0x307   :  { %v3153_v51 = vshrl.u32 %v3135_v34, %v3151_v28  ;;  %v3156_v14 = vadd.s32 127, %v3155_v61  ;;  %v3454_v60 = vshll.u32 %v10112_v27, 30  ;;  %v10130_v43 = vor.u32 %v9851_v36, %v9776_v6 }
 0x308   :  { %v10134_v45 = vor.u32 %v9855_v4, %v9809_v31  ;;  %v3306_v42 = vor.u32 %v3305_v22, %v3304_v9  ;;  %v3312_v44 = vor.u32 %v3311_v7, %v3310_v25  ;;  %v6167_v32 = vpop.eup %6166  ;;  %v3309_v54 = vor.u32 %v3308_v58, %v3307_v0 }
 0x309   :  { %v3154_v56 = vor.u32 %v3153_v51, %v3152_v59  ;;  %v3157_v8 = vshll.u32 %v3156_v14, 23  ;;  %v10136_v35 = vsub.s32 %v3451_v40, %v3454_v60  ;;  %v4982_v21 = vor.u32 %v9859_v13, %v9813_v53  ;;  %v12812_v51 = vld [vmem:[#allocation106_spill] sm:$0xff]  ;;  %v12813_v14 = vld [vmem:[#allocation100_spill] sm:$0xff]  ;;  %v12837_v53 = vld [vmem:[#allocation91_spill] sm:$0xff] }
 0x30a   :  { %v10144_v6 = vsel %vm4983_vm0, %v9821_v46, %v10089_v15  ;;  %vm3282_vm3 = vcmp.eq.s32.totalorder %v10095_v24, 2  ;;  %v10147_v31 = vand.u32 3, %v3172_v48  ;;  %vm3279_vm6 = vcmp.eq.s32.totalorder %v10095_v24, 0 }
 0x30b   :  { %v3158_v36 = vor.u32 4788187, %v3157_v8  ;;  %v3457_v4 = vsub.s32 0, %v10136_v35  ;;  %v3295_v19 = vor.u32 8388608, %v3294_v63  ;;  %v3303_v40 = vshrl.u32 %v12461_v2, %v12807_v50 }
 0x30c   :  { %v3283_v34 = vxor.u32 2147483648, %v6167_v32  ;;  %vm3319_vm13 = vcmp.lt.s32.totalorder %v12809_v12, 1  ;;  %vm3321_vm12 = vcmp.lt.s32.totalorder %v12809_v12, 3  ;;  %vm12810_vm9 = vcmp.lt.s32.totalorder %v12809_v12, 4  ;;  %v6169_v48 = vpop.eup %6168 }
 0x30d   :  { %v3324_v46 = vsel %vm12810_vm9, %v3312_v44, 2102212464  ;;  %v3159_v22 = vand.u32 2147483647, %v3158_v36  ;;  %v3161_v28 = vcvt.s32.f32 %v3154_v56  ;;  %v5493_v61 = vmin.u32 %v3457_v4, %v10136_v35 }
 0x30e   :  { %v3327_v63 = vsel %vm3319_vm13, %v3306_v42, %v3309_v54  ;;  %v3447_v50 = vadd.s32 %v10033_v20, %v10042_v10  ;;  %vm3320_vm1 = vcmp.lt.s32.totalorder %v12809_v12, 2  ;;  %v3323_v58 = vsel %vm3319_vm13, %v3303_v40, %v3306_v42 }
 0x30f   :  { %v3329_v9 = vsel %vm3321_vm12, %v3312_v44, %v12811_v38  ;;  %v3162_v0 = vmul.f32 %v3161_v28, %v3159_v22  ;;  %vm3393_vm15 = vcmp.lt.s32.totalorder %v12790_v30, 0  ;;  %v3459_v25 = vclz %v5493_v61  ;;  %v10205_v61 = vld [vmem:[%s12109_s8] ss:$0 sm:$0xff] }
 0x310   :  { %v3325_v7 = vsel %vm3321_vm12, %v3309_v54, %v3324_v46  ;;  %v3331_v59 = vsel %vm3319_vm13, %v3309_v54, %v3312_v44  ;;  %v3280_v20 = vxor.u32 2147483648, %v6169_v48  ;;  %v3330_v10 = vsel %vm3320_vm1, %v3327_v63, %v3329_v9 }
 0x311   :  { %v3333_v60 = vsel %vm3321_vm12, %v12813_v14, %v12812_v51  ;;  %v3335_v42 = vshll.u32 %v3295_v19, 8  ;;  %v3284_v56 = vsel %vm3282_vm3, %v3283_v34, %v6169_v48  ;;  %v3163_v8 = vxor.u32 2147483648, %v3162_v0 }
 0x312   :  { %v5494_v36 = vadd.s32 4294967294, %v3459_v25  ;;  %v3477_v4 = vsub.s32 4, %v10112_v27  ;;  %v3326_v44 = vsel %vm3320_vm1, %v3323_v58, %v3325_v7  ;;  %v3334_v54 = vsel %vm3320_vm1, %v3331_v59, %v3333_v60  ;;  %v12814_v59 = vld [vmem:[#allocation75_spill] sm:$0xff] }
 0x313   :  { %v10188_v40 = vmul.u32.u64.low %v3335_v42, %v3330_v10  ;;  %v10189_v46 = vmul.u32.u64.high %v3335_v42, %v3330_v10, %v10188_v40  ;;  %v3164_v19 = vsel %vm3081_vm8, %v3163_v8, %v3162_v0  ;;  %v3281_v48 = vsel %vm3279_vm6, %v6167_v32, %v3280_v20  ;;  %v10215_v0 = vld [vmem:[%s12110_s9] ss:$0 sm:$0xff] }
 0x314   :  { %vm5495_vm11 = vcmp.lt.s32.totalorder %v5494_v36, 0  ;;  %v10194_v22 = vmul.u32.u64.low %v3335_v42, %v3334_v54  ;;  %v10195_v34 = vmul.u32.u64.high %v3335_v42, %v3334_v54, %v10194_v22  ;;  %v3167_v28 = vsel %vm10075_vm10, %v12780_v26, %v3164_v19 }
 0x315   :  { %v3462_v12 = vsel %vm5495_vm11, 0, %v5494_v36  ;;  %v1564_v63 = vmul.f32 %v10205_v61, %v9997_v55  ;;  %vm3275_vm4 = vweird.f32 %v12768_v37  ;;  %6170 = vcosq.f32 %v3167_v28 }
 0x316   :  { %v3463_v58 = vsub.s32 32, %v3462_v12  ;;  %v3467_v38 = vsub.s32 4294967266, %v3462_v12  ;;  %v3342_v9 = vmul.u32 %v3335_v42, %v3326_v44  ;;  %6172 = vsinq.f32 %v3167_v28 }
 0x317   :  { %v3464_v32 = vshll.u32 %v10136_v35, %v3462_v12  ;;  %v3345_v62 = vadd.s32 1, %v10189_v46  ;;  %v10218_v25 = vadd.f32 %v10215_v0, %v1564_v63  ;;  %vm3344_vm14 = vc.u32 %v10195_v34, %v10188_v40 }
 0x318   :  { %v3465_v55 = vshrl.u32 %v3447_v50, %v3463_v58  ;;  %v3468_v7 = vadd.s32 127, %v3467_v38  ;;  %v3599_v20 = vand.u32 2147483647, %v12814_v59  ;;  %vm3278_vm5 = vcmp.lt.s32.totalorder %v10095_v24, 2 }
 0x319   :  { %v3478_v35 = vsel %vm3393_vm15, %v3477_v4, %v10112_v27  ;;  %v3346_v10 = vsel %vm3344_vm14, %v3345_v62, %v10189_v46  ;;  %v12428_v51 = vmax.f32 %v10218_v25, 0.0  ;;  %vm10231_vm8 = vcmp.le.f32.partialorder %v3391_v23, 0.7853982  ;;  %v12817_v4 = vld [vmem:[#allocation104_spill] sm:$0xff] }
 0x31a   :  { %v3466_v14 = vor.u32 %v3465_v55, %v3464_v32  ;;  %v3469_v60 = vshll.u32 %v3468_v7, 23  ;;  %v3347_v42 = vadd.s32 %v3346_v10, %v3342_v9  ;;  %v3285_v8 = vsel %vm3278_vm5, %v3281_v48, %v3284_v56  ;;  %v12818_v10 = vld [vmem:[#allocation27_spill] sm:$0xff] }
 0x31b   :  { %vm3175_vm7 = vcmp.eq.s32.totalorder %v10147_v31, 0  ;;  %vm3178_vm10 = vcmp.eq.s32.totalorder %v10147_v31, 2  ;;  %1667 = vst [vmem:[%s12111_s13 + $0x88] sm:$0xff] %v12428_v51  ;;  %v3617_v23 = vshrl.u32 %v12649_v29, %v7631_v5  ;;  %vm3174_vm2 = vcmp.lt.s32.totalorder %v10147_v31, 2  ;;  %v12820_v51 = vld [vmem:[#allocation108_spill] sm:$0xff] }
 0x31c   :  { %v3470_v24 = vor.u32 4788187, %v3469_v60  ;;  %v3480_v27 = vsel %vm10231_vm8, 0, %v3478_v35  ;;  %v3348_v56 = vadd.s32 536870912, %v3347_v42  ;;  %v3606_v36 = vand.u32 8388607, %v3599_v20 }
 0x31d   :  { %vm3171_vm3 = vweird.f32 %v12780_v26  ;;  %v3616_v44 = vshll.u32 %v12461_v2, %v12817_v4  ;;  %v3619_v54 = vshll.u32 %v12649_v29, %v12817_v4  ;;  %v3620_v46 = vshrl.u32 %v12557_v41, %v7631_v5 }
 0x31e   :  { %v3623_v19 = vshrl.u32 %v12470_v11, %v7631_v5  ;;  %v3471_v22 = vand.u32 2147483647, %v3470_v24  ;;  %v3473_v48 = vcvt.s32.f32 %v3466_v14  ;;  %v3349_v28 = vshrl.u32 %v3348_v56, 30 }
 0x31f   :  { %v3622_v12 = vshll.u32 %v12557_v41, %v12817_v4  ;;  %v3286_v63 = vsel %vm3275_vm4, nan, %v3285_v8  ;;  %vm3289_vm6 = vcmp.lt.s32.totalorder %v12806_v39, 0  ;;  %v3618_v58 = vor.u32 %v3617_v23, %v3616_v44  ;;  %v6171_v9 = vpop.eup %6170 }
 0x320   :  { %v3621_v38 = vor.u32 %v3620_v46, %v3619_v54  ;;  %v3474_v32 = vmul.f32 %v3473_v48, %v3471_v22  ;;  %v3484_v62 = vadd.s32 3, %v3480_v27  ;;  %v3350_v55 = vshll.u32 %v3349_v28, 30  ;;  %v6173_v35 = vpop.eup %6172  ;;  %v12821_v54 = vld [vmem:[#allocation120_spill] sm:$0xff]  ;;  %v12823_v48 = vld [vmem:[#allocation119_spill] sm:$0xff] }
 0x321   :  { %v3624_v7 = vor.u32 %v3623_v19, %v3622_v12  ;;  %v12819_v60 = vmax.f32 %v12818_v10, 0.0  ;;  %v3179_v24 = vxor.u32 2147483648, %v6171_v9  ;;  %v3607_v56 = vor.u32 8388608, %v3606_v36  ;;  %v12822_v46 = vld [vmem:[#allocation116_spill] sm:$0xff] }
 0x322   :  { %vm3631_vm13 = vcmp.lt.s32.totalorder %v12820_v51, 1  ;;  %vm4986_vm12 = vcmp.lt.s32.totalorder %v8866_v3, 4  ;;  %v3176_v37 = vxor.u32 2147483648, %v6173_v35  ;;  %v3475_v8 = vxor.u32 2147483648, %v3474_v32 }
 0x323   :  { %v5172_v14 = vadd.f32 %v3286_v63, %v12819_v60  ;;  %v10267_v4 = vsub.s32 %v3347_v42, %v3350_v55  ;;  %vm3633_vm9 = vcmp.lt.s32.totalorder %v12820_v51, 3  ;;  %v3180_v23 = vsel %vm3178_vm10, %v3179_v24, %v6173_v35  ;;  %v12825_v60 = vld [vmem:[#allocation28_spill] sm:$0xff] }
 0x324   :  { %v3373_v27 = vsub.s32 4, %v3349_v28  ;;  %v3639_v44 = vsel %vm3631_vm13, %v3618_v58, %v3621_v38  ;;  %v3645_v36 = vsel %vm3633_vm9, %v12822_v46, %v12821_v54  ;;  %v3177_v19 = vsel %vm3175_vm7, %v6171_v9, %v3176_v37 }
 0x325   :  { %v3476_v42 = vsel %vm3393_vm15, %v3475_v8, %v3474_v32  ;;  %v3353_v22 = vsub.s32 0, %v10267_v4  ;;  %v3641_v12 = vsel %vm3633_vm9, %v3624_v7, %v12823_v48  ;;  %v3181_v63 = vsel %vm3174_vm2, %v3177_v19, %v3180_v23 }
 0x326   :  { %v3479_v55 = vsel %vm10231_vm8, %v12790_v30, %v3476_v42  ;;  %v3615_v35 = vshrl.u32 %v12461_v2, %v7631_v5  ;;  %v3643_v9 = vsel %vm3631_vm13, %v3621_v38, %v3624_v7  ;;  %v3182_v32 = vsel %vm3171_vm3, nan, %v3181_v63 }
 0x327   :  { %v5489_v10 = vmin.u32 %v3353_v22, %v10267_v4  ;;  %vm3632_vm1 = vcmp.lt.s32.totalorder %v12820_v51, 2  ;;  %vm12824_vm15 = vcmp.lt.s32.totalorder %v12820_v51, 4  ;;  %v12826_v24 = vmax.f32 %v12825_v60, 0.0 }
 0x328   :  { %v3636_v31 = vsel %vm12824_vm15, %v3624_v7, 2102212464  ;;  %v3642_v37 = vsel %vm3632_vm1, %v3639_v44, %v3641_v12  ;;  %v3646_v5 = vsel %vm3632_vm1, %v3643_v9, %v3645_v36  ;;  %v3647_v8 = vshll.u32 %v3607_v56, 8  ;;  %v10316_v44 = vpop.f32.mrb[18].mxu1 }
 0x329   :  { %v5171_v50 = vadd.f32 %v3182_v32, %v12826_v24  ;;  %6174 = vcosq.f32 %v3479_v55  ;;  %v3355_v26 = vclz %v5489_v10  ;;  %v3374_v23 = vsel %vm3289_vm6, %v3373_v27, %v3349_v28  ;;  %v12830_v32 = vld [vmem:[#allocation113_spill] sm:$0xff] }
 0x32a   :  { %v3635_v54 = vsel %vm3631_vm13, %v3615_v35, %v3618_v58  ;;  %v3637_v7 = vsel %vm3633_vm9, %v3621_v38, %v3636_v31  ;;  %v10313_v19 = vmul.u32.u64.low %v3647_v8, %v3646_v5  ;;  %v10314_v42 = vmul.u32.u64.high %v3647_v8, %v3646_v5, %v10313_v19  ;;  %v12829_v35 = vld [vmem:[#allocation83_spill] sm:$0xff] }
 0x32b   :  { %v5657_v46 = vpack.c.bf16 %v5172_v14, %v5171_v50  ;;  %vm4985_vm11 = vcmp.lt.s32.totalorder %v8866_v3, 3  ;;  %6176 = vsinq.f32 %v3479_v55  ;;  %v5490_v56 = vadd.s32 4294967294, %v3355_v26 }
 0x32c   :  { %v10319_v36 = vmul.u32.u64.low %v3647_v8, %v3642_v37  ;;  %v10320_v22 = vmul.u32.u64.high %v3647_v8, %v3642_v37, %v10319_v36  ;;  %v4988_v28 = vsel %vm4986_vm12, %v10130_v43, 2102212464  ;;  %v10330_v58 = vsel %vm4983_vm0, %v10089_v15, %v10093_v47 }
 0x32d   :  { %5709 = vst [vmem:[%s12112_s14 + $0x30] sm:$0xff] %v5657_v46   ;;  %vm10337_vm4 = vcmp.le.f32.partialorder %v3287_v52, 0.7853982  ;;  %v1563_v14 = vmul.f32 %v10205_v61, %v10001_v18  ;;  %v10343_v27 = vand.u32 3, %v3484_v62  ;;  %v3343_v48 = vadd.s32 %v10188_v40, %v10195_v34 }
 0x32e   :  { %vm5491_vm14 = vcmp.lt.s32.totalorder %v5490_v56, 0  ;;  %v3638_v15 = vsel %vm3632_vm1, %v3635_v54, %v3637_v7  ;;  %v3376_v63 = vsel %vm10337_vm4, 0, %v3374_v23  ;;  %vm3656_vm5 = vc.u32 %v10314_v42, %v10319_v36 }
 0x32f   :  { %v3358_v12 = vsel %vm5491_vm14, 0, %v5490_v56  ;;  %v10354_v52 = vadd.f32 %v10215_v0, %v1563_v14  ;;  %v3657_v55 = vadd.s32 1, %v10320_v22  ;;  %v3495_v40 = vand.u32 2147483647, %v12829_v35 }
 0x330   :  { %v3359_v18 = vsub.s32 32, %v3358_v12  ;;  %v3363_v62 = vsub.s32 4294967266, %v3358_v12  ;;  %v3360_v34 = vshll.u32 %v10267_v4, %v3358_v12  ;;  %v3654_v51 = vmul.u32 %v3647_v8, %v3638_v15  ;;  %v12831_v8 = vld [vmem:[#allocation112_spill] sm:$0xff] }
 0x331   :  { %v1634_v9 = vmax.f32 %v10354_v52, 0.0  ;;  %v3513_v10 = vshrl.u32 %v12649_v29, %v12830_v32  ;;  %v3658_v24 = vsel %vm3656_vm5, %v3657_v55, %v10320_v22  ;;  %v3516_v50 = vshrl.u32 %v12557_v41, %v12830_v32 }
 0x332   :  { %v3361_v31 = vshrl.u32 %v3343_v48, %v3359_v18  ;;  %v3364_v60 = vadd.s32 127, %v3363_v62  ;;  %v10369_v37 = vsel %vm4983_vm0, %v10093_v47, %v10130_v43  ;;  %v3380_v4 = vadd.s32 3, %v3376_v63 }
 0x333   :  { %v3659_v5 = vadd.s32 %v3658_v24, %v3654_v51  ;;  %1666 = vst [vmem:[%s12111_s13 + $0x80] sm:$0xff] %v1634_v9  ;;  %v3512_v26 = vshll.u32 %v12461_v2, %v12831_v8  ;;  %v6175_v23 = vpop.eup %6174  ;;  %v3502_v7 = vand.u32 8388607, %v3495_v40  ;;  %v3515_v19 = vshll.u32 %v12649_v29, %v12831_v8 }
 0x334   :  { %v3362_v54 = vor.u32 %v3361_v31, %v3360_v34  ;;  %v3365_v46 = vshll.u32 %v3364_v60, 23  ;;  %v10385_v56 = vsel %vm4985_vm11, %v10093_v47, %v4988_v28  ;;  %v3518_v14 = vshll.u32 %v12557_v41, %v12831_v8  ;;  %v12832_v8 = vld [vmem:[#allocation117_spill] sm:$0xff] }
 0x335   :  { %v3660_v22 = vadd.s32 536870912, %v3659_v5  ;;  %v3519_v48 = vshrl.u32 %v12470_v11, %v12830_v32  ;;  %v6177_v15 = vpop.eup %6176  ;;  %vm3487_vm0 = vcmp.eq.s32.totalorder %v10343_v27, 0  ;;  %v3514_v63 = vor.u32 %v3513_v10, %v3512_v26  ;;  %v12833_v26 = vld [vmem:[#allocation130_spill] sm:$0xff] }
 0x336   :  { %v3366_v12 = vor.u32 4788187, %v3365_v46  ;;  %v3517_v18 = vor.u32 %v3516_v50, %v3515_v19  ;;  %vm3486_vm8 = vcmp.lt.s32.totalorder %v10343_v27, 2  ;;  %vm3490_vm7 = vcmp.eq.s32.totalorder %v10343_v27, 2 }
 0x337   :  { %v3491_v62 = vxor.u32 2147483648, %v6175_v23  ;;  %v10394_v47 = vshrl.u32 %v3660_v22, 30  ;;  %v3520_v28 = vor.u32 %v3519_v48, %v3518_v14  ;;  %v3369_v34 = vcvt.s32.f32 %v3362_v54  ;;  %v12835_v48 = vld [vmem:[#allocation131_spill] sm:$0xff] }
 0x338   :  { %v3367_v55 = vand.u32 2147483647, %v3366_v12  ;;  %v10396_v51 = vand.u32 3, %v3380_v4  ;;  %v3503_v31 = vor.u32 8388608, %v3502_v7  ;;  %v3488_v60 = vxor.u32 2147483648, %v6177_v15  ;;  %v12836_v12 = vld [vmem:[#allocation123_spill] sm:$0xff] }
 0x339   :  { %v3662_v24 = vshll.u32 %v10394_v47, 30  ;;  %vm3527_vm10 = vcmp.lt.s32.totalorder %v12832_v8, 1  ;;  %vm3529_vm2 = vcmp.lt.s32.totalorder %v12832_v8, 3  ;;  %v3492_v54 = vsel %vm3490_vm7, %v3491_v62, %v6177_v15 }
 0x33a   :  { %v3370_v10 = vmul.f32 %v3369_v34, %v3367_v55  ;;  %v3535_v50 = vsel %vm3527_vm10, %v3514_v63, %v3517_v18  ;;  %v3537_v46 = vsel %vm3529_vm2, %v3520_v28, %v12833_v26  ;;  %v3539_v4 = vsel %vm3527_vm10, %v3517_v18, %v3520_v28 }
 0x33b   :  { %v10410_v7 = vsub.s32 %v3659_v5, %v3662_v24  ;;  %v3511_v19 = vshrl.u32 %v12461_v2, %v12830_v32  ;;  %vm3528_vm3 = vcmp.lt.s32.totalorder %v12832_v8, 2  ;;  %vm12834_vm13 = vcmp.lt.s32.totalorder %v12832_v8, 4  ;;  %v10428_v24 = vpop.f32.mrb[19].mxu1 }
 0x33c   :  { %v3371_v22 = vxor.u32 2147483648, %v3370_v10  ;;  %v3532_v14 = vsel %vm12834_vm13, %v3520_v28, 2102212464  ;;  %v3541_v55 = vsel %vm3529_vm2, %v12836_v12, %v12835_v48  ;;  %v3543_v34 = vshll.u32 %v3503_v31, 8  ;;  %v12838_v12 = vld [vmem:[#allocation114_spill] sm:$0xff] }
 0x33d   :  { %v3489_v15 = vsel %vm3487_vm0, %v6175_v23, %v3488_v60  ;;  %v3665_v5 = vsub.s32 0, %v10410_v7  ;;  %v3538_v32 = vsel %vm3528_vm3, %v3535_v50, %v3537_v46  ;;  %v3542_v62 = vsel %vm3528_vm3, %v3539_v4, %v3541_v55 }
 0x33e   :  { %v3372_v28 = vsel %vm3289_vm6, %v3371_v22, %v3370_v10  ;;  %v3531_v26 = vsel %vm3527_vm10, %v3511_v19, %v3514_v63  ;;  %v10434_v31 = vmul.u32.u64.low %v3543_v34, %v3542_v62  ;;  %v10435_v48 = vmul.u32.u64.high %v3543_v34, %v3542_v62, %v10434_v31 }
 0x33f   :  { %v3375_v23 = vsel %vm10337_vm4, %v12806_v39, %v3372_v28  ;;  %v5501_v60 = vmin.u32 %v3665_v5, %v10410_v7  ;;  %v3533_v50 = vsel %vm3529_vm2, %v3517_v18, %v3532_v14  ;;  %v1566_v46 = vmul.f32 %v10205_v61, %v10124_v49 }
 0x340   :  { %v3493_v10 = vsel %vm3486_vm8, %v3489_v15, %v3492_v54  ;;  %6178 = vcosq.f32 %v3375_v23  ;;  %v10447_v63 = vmul.u32.u64.low %v3543_v34, %v3538_v32  ;;  %v10448_v4 = vmul.u32.u64.high %v3543_v34, %v3538_v32, %v10447_v63  ;;  %v12839_v15 = vld [vmem:[#allocation118_spill] sm:$0xff] }
 0x341   :  { %v10454_v38 = vsel %vm4986_vm12, %v10134_v45, 920167782  ;;  %v10461_v18 = vsel %vm4986_vm12, %v4982_v21, 1326507024  ;;  %6180 = vsinq.f32 %v3375_v23  ;;  %v3667_v49 = vclz %v5501_v60 }
 0x342   :  { %vm3483_vm6 = vweird.f32 %v12790_v30  ;;  %v3655_v27 = vadd.s32 %v10319_v36, %v10314_v42  ;;  %v3534_v54 = vsel %vm3528_vm3, %v3531_v26, %v3533_v50  ;;  %v10469_v19 = vadd.f32 %v10215_v0, %v1566_v46 }
 0x343   :  { %v3494_v22 = vsel %vm3483_vm6, nan, %v3493_v10  ;;  %v5502_v14 = vadd.s32 4294967294, %v3667_v49  ;;  %vm3552_vm9 = vc.u32 %v10435_v48, %v10447_v63  ;;  %v3807_v13 = vand.u32 2147483647, %v12837_v53 }
 0x344   :  { %v10476_v21 = vadd.f32 %v3494_v22, %v1633_v16  ;;  %vm3386_vm12 = vcmp.eq.s32.totalorder %v10396_v51, 2  ;;  %v3685_v30 = vsub.s32 4, %v10394_v47  ;;  %v3553_v42 = vadd.s32 1, %v10448_v4 }
 0x345   :  { %v1637_v36 = vmax.f32 %v10469_v19, 0.0  ;;  %vm3383_vm1 = vcmp.eq.s32.totalorder %v10396_v51, 0  ;;  %vm5503_vm15 = vcmp.lt.s32.totalorder %v5502_v14, 0  ;;  %v3550_v8 = vmul.u32 %v3543_v34, %v3534_v54 }
 0x346   :  { %v3824_v55 = vshll.u32 %v12461_v2, %v12838_v12  ;;  %v3825_v1 = vshrl.u32 %v12649_v29, %v12839_v15  ;;  %vm3382_vm4 = vcmp.lt.s32.totalorder %v10396_v51, 2  ;;  %v3670_v16 = vsel %vm5503_vm15, 0, %v5502_v14 }
 0x347   :  { %v3554_v5 = vsel %vm3552_vm9, %v3553_v42, %v10448_v4  ;;  %1669 = vst [vmem:[%s12111_s13 + $0x98] sm:$0xff] %v1637_v36  ;;  %v3827_v34 = vshll.u32 %v12649_v29, %v12838_v12  ;;  %v3828_v32 = vshrl.u32 %v12557_v41, %v12839_v15  ;;  %vm3379_vm14 = vweird.f32 %v12806_v39 }
 0x348   :  { %v3671_v62 = vsub.s32 32, %v3670_v16  ;;  %v3675_v28 = vsub.s32 4294967266, %v3670_v16  ;;  %v3555_v26 = vadd.s32 %v3554_v5, %v3550_v8  ;;  %v3814_v31 = vand.u32 8388607, %v3807_v13  ;;  %v12840_v8 = vld [vmem:[#allocation124_spill] sm:$0xff] }
 0x349   :  { %v3826_v23 = vor.u32 %v3825_v1, %v3824_v55  ;;  %v3829_v60 = vor.u32 %v3828_v32, %v3827_v34  ;;  %v3830_v50 = vshll.u32 %v12557_v41, %v12838_v12  ;;  %v3831_v46 = vshrl.u32 %v12470_v11, %v12839_v15 }
 0x34a   :  { %v3672_v10 = vshll.u32 %v10410_v7, %v3670_v16  ;;  %v3673_v4 = vshrl.u32 %v3655_v27, %v3671_v62  ;;  %v3676_v49 = vadd.s32 127, %v3675_v28  ;;  %v3556_v54 = vadd.s32 536870912, %v3555_v26  ;;  %v6179_v22 = vpop.eup %6178  ;;  %v12841_v16 = vld [vmem:[#allocation134_spill] sm:$0xff] }
 0x34b   :  { %v3823_v14 = vshrl.u32 %v12461_v2, %v12839_v15  ;;  %v3832_v42 = vor.u32 %v3831_v46, %v3830_v50  ;;  %vm3839_vm5 = vcmp.lt.s32.totalorder %v12840_v8, 1  ;;  %vm3841_vm0 = vcmp.lt.s32.totalorder %v12840_v8, 3  ;;  %v6181_v55 = vpop.eup %6180 }
 0x34c   :  { %v3387_v1 = vxor.u32 2147483648, %v6179_v22  ;;  %v3674_v12 = vor.u32 %v3673_v4, %v3672_v10  ;;  %v3677_v5 = vshll.u32 %v3676_v49, 23  ;;  %v10510_v34 = vshrl.u32 %v3556_v54, 30 }
 0x34d   :  { %v3384_v32 = vxor.u32 2147483648, %v6181_v55  ;;  %v3815_v7 = vor.u32 8388608, %v3814_v31  ;;  %v3847_v27 = vsel %vm3839_vm5, %v3826_v23, %v3829_v60  ;;  %v3849_v15 = vsel %vm3841_vm0, %v3832_v42, %v12841_v16 }
 0x34e   :  { %vm4984_vm8 = vcmp.lt.s32.totalorder %v8866_v3, 2  ;;  %v3388_v62 = vsel %vm3386_vm12, %v3387_v1, %v6181_v55  ;;  %v3678_v28 = vor.u32 4788187, %v3677_v5  ;;  %v3558_v50 = vshll.u32 %v10510_v34, 30 }
 0x34f   :  { %vm3840_vm7 = vcmp.lt.s32.totalorder %v12840_v8, 2  ;;  %v3385_v31 = vsel %vm3383_vm1, %v6179_v22, %v3384_v32  ;;  %v3681_v46 = vcvt.s32.f32 %v3674_v12  ;;  %vm12842_vm10 = vcmp.lt.s32.totalorder %v12840_v8, 4  ;;  %v12843_v22 = vld [vmem:[#allocation135_spill] sm:$0xff]  ;;  %v12844_v12 = vld [vmem:[#allocation125_spill] sm:$0xff] }
 0x350   :  { %v3844_v10 = vsel %vm12842_vm10, %v3832_v42, 2102212464  ;;  %v3851_v4 = vsel %vm3839_vm5, %v3829_v60, %v3832_v42  ;;  %v3389_v49 = vsel %vm3382_vm4, %v3385_v31, %v3388_v62  ;;  %v3679_v54 = vand.u32 2147483647, %v3678_v28  ;;  %v10572_v31 = vpop.f32.mrb[20].mxu1 }
 0x351   :  { %v10530_v55 = vsub.s32 %v3555_v26, %v3558_v50  ;;  %v3850_v1 = vsel %vm3840_vm7, %v3847_v27, %v3849_v15  ;;  %v3390_v5 = vsel %vm3379_vm14, nan, %v3389_v49  ;;  %vm3601_vm2 = vcmp.lt.s32.totalorder %v12814_v59, 0 }
 0x352   :  { %v3853_v32 = vsel %vm3841_vm0, %v12844_v12, %v12843_v22  ;;  %v3855_v42 = vshll.u32 %v3815_v7, 8  ;;  %v5173_v51 = vadd.f32 %v3390_v5, %v1632_v33  ;;  %v3682_v16 = vmul.f32 %v3681_v46, %v3679_v54 }
 0x353   :  { %v3561_v26 = vsub.s32 0, %v10530_v55  ;;  %v3843_v27 = vsel %vm3839_vm5, %v3823_v14, %v3826_v23  ;;  %v3845_v39 = vsel %vm3841_vm0, %v3829_v60, %v3844_v10  ;;  %v3854_v15 = vsel %vm3840_vm7, %v3851_v4, %v3853_v32 }
 0x354   :  { %v10550_v62 = vmul.u32.u64.low %v3855_v42, %v3850_v1  ;;  %v10551_v28 = vmul.u32.u64.high %v3855_v42, %v3850_v1, %v10550_v62  ;;  %v5662_v7 = vpack.c.bf16 %v10476_v21, %v5173_v51  ;;  %v3683_v17 = vxor.u32 2147483648, %v3682_v16 }
 0x355   :  { %v3686_v33 = vsel %vm3601_vm2, %v3685_v30, %v10394_v47  ;;  %v5497_v23 = vmin.u32 %v3561_v26, %v10530_v55  ;;  %v4993_v60 = vsel %vm4985_vm11, %v10130_v43, %v10454_v38  ;;  %v4997_v14 = vsel %vm4985_vm11, %v10134_v45, %v10461_v18  ;;  %v12847_v30 = vld [vmem:[#allocation24_spill] sm:$0xff] }
 0x356   :  { %v10569_v21 = vmul.u32.u64.low %v3855_v42, %v3854_v15  ;;  %v10570_v50 = vmul.u32.u64.high %v3855_v42, %v3854_v15, %v10569_v21  ;;  %5710 = vst [vmem:[%s12112_s14 + $0x38] sm:$0xff] %v5662_v7   ;;  %vm10579_vm3 = vcmp.le.f32.partialorder %v3599_v20, 0.7853982  ;;  %v3846_v38 = vsel %vm3840_vm7, %v3843_v27, %v3845_v39  ;;  %v12849_v39 = vld [vmem:[#allocation101_spill] sm:$0xff] }
 0x357   :  { %v3563_v43 = vclz %v5497_v23  ;;  %v1565_v45 = vmul.f32 %v10205_v61, %v10157_v57  ;;  %v10591_v18 = vsel %vm4984_vm8, %v10144_v6, %v10385_v56  ;;  %v12848_v46 = vor.u32 8388608, %v12847_v30 }
 0x358   :  { %v3684_v20 = vsel %vm3601_vm2, %v3683_v17, %v3682_v16  ;;  %v3688_v8 = vsel %vm10579_vm3, 0, %v3686_v33  ;;  %v3581_v49 = vsub.s32 4, %v10510_v34  ;;  %v3865_v57 = vadd.s32 1, %v10551_v28  ;;  %v12851_v33 = vld [vmem:[#allocation121_spill] sm:$0xff] }
 0x359   :  { %v10595_v10 = vshll.u32 %v12848_v46, 8  ;;  %v5498_v4 = vadd.s32 4294967294, %v3563_v43  ;;  %v10604_v54 = vadd.f32 %v10215_v0, %v1565_v45  ;;  %v10609_v6 = vsel %vm4984_vm8, %v10330_v58, %v4993_v60 }
 0x35a   :  { %v10614_v56 = vsel %vm4984_vm8, %v10369_v37, %v4997_v14  ;;  %v3862_v1 = vmul.u32 %v3855_v42, %v3846_v38  ;;  %vm3864_vm11 = vc.u32 %v10570_v50, %v10550_v62  ;;  %v3687_v5 = vsel %vm10579_vm3, %v12814_v59, %v3684_v20 }
 0x35b   :  { %vm5499_vm13 = vcmp.lt.s32.totalorder %v5498_v4, 0  ;;  %v3866_v22 = vsel %vm3864_vm11, %v3865_v57, %v10551_v28  ;;  %v1636_v12 = vmax.f32 %v10604_v54, 0.0  ;;  %v3692_v58 = vadd.s32 3, %v3688_v8 }
 0x35c   :  { %vm3497_vm6 = vcmp.lt.s32.totalorder %v12829_v35, 0  ;;  %v3566_v32 = vsel %vm5499_vm13, 0, %v5498_v4  ;;  %v3867_v3 = vadd.s32 %v3866_v22, %v3862_v1  ;;  %v3551_v37 = vadd.s32 %v10447_v63, %v10435_v48  ;;  %v12850_v63 = vld [vmem:[#allocation127_spill] sm:$0xff] }
 0x35d   :  { %v3567_v42 = vsub.s32 32, %v3566_v32  ;;  %v3571_v51 = vsub.s32 4294967266, %v3566_v32  ;;  %v3582_v16 = vsel %vm3497_vm6, %v3581_v49, %v10510_v34  ;;  %1668 = vst [vmem:[%s12111_s13 + $0x90] sm:$0xff] %v1636_v12  ;;  %6182 = vcosq.f32 %v3687_v5 }
 0x35e   :  { %v3568_v26 = vshll.u32 %v10530_v55, %v3566_v32  ;;  %v3868_v27 = vadd.s32 536870912, %v3867_v3  ;;  %v3703_v15 = vand.u32 2147483647, %v12849_v39  ;;  %v3721_v7 = vshrl.u32 %v12649_v29, %v12850_v63 }
 0x35f   :  { %v3569_v28 = vshrl.u32 %v3551_v37, %v3567_v42  ;;  %v3572_v48 = vadd.s32 127, %v3571_v51  ;;  %v3724_v34 = vshrl.u32 %v12557_v41, %v12850_v63  ;;  %6184 = vsinq.f32 %v3687_v5  ;;  %v12854_v51 = vld [vmem:[#allocation126_spill] sm:$0xff] }
 0x360   :  { %v10640_v17 = vshrl.u32 %v3868_v27, 30  ;;  %v3720_v23 = vshll.u32 %v12461_v2, %v12851_v33  ;;  %v3727_v55 = vshrl.u32 %v12470_v11, %v12850_v63  ;;  %v3723_v21 = vshll.u32 %v12649_v29, %v12851_v33 }
 0x361   :  { %v3570_v60 = vor.u32 %v3569_v28, %v3568_v26  ;;  %v3573_v14 = vshll.u32 %v3572_v48, 23  ;;  %v3726_v47 = vshll.u32 %v12557_v41, %v12851_v33  ;;  %v10650_v43 = vand.u32 3, %v3692_v58  ;;  %v12855_v26 = vld [vmem:[#allocation137_spill] sm:$0xff]  ;;  %v10694_v33 = vpop.f32.mrb[21].mxu1 }
 0x362   :  { %vm10654_vm9 = vcmp.le.f32.partialorder %v3495_v40, 0.7853982  ;;  %v3870_v45 = vshll.u32 %v10640_v17, 30  ;;  %v3710_v30 = vand.u32 8388607, %v3703_v15  ;;  %v3722_v20 = vor.u32 %v3721_v7, %v3720_v23 }
 0x363   :  { %v3574_v46 = vor.u32 4788187, %v3573_v14  ;;  %v3725_v8 = vor.u32 %v3724_v34, %v3723_v21  ;;  %v3728_v4 = vor.u32 %v3727_v55, %v3726_v47  ;;  %v3584_v40 = vsel %vm10654_vm9, 0, %v3582_v16  ;;  %v12858_v14 = vld [vmem:[#allocation133_spill] sm:$0xff] }
 0x364   :  { %v10663_v49 = vmul.u32.u64.low %v10595_v10, %v10614_v56  ;;  %v10664_v57 = vmul.u32.u64.high %v10595_v10, %v10614_v56, %v10663_v49  ;;  %v10669_v1 = vsub.s32 %v3867_v3, %v3870_v45  ;;  %v3577_v32 = vcvt.s32.f32 %v3570_v60  ;;  %v12857_v60 = vld [vmem:[#allocation138_spill] sm:$0xff] }
 0x365   :  { %v10673_v5 = vmul.u32.u64.low %v10595_v10, %v10609_v6  ;;  %v10674_v22 = vmul.u32.u64.high %v10595_v10, %v10609_v6, %v10673_v5  ;;  %v3575_v58 = vand.u32 2147483647, %v3574_v46  ;;  %v3711_v42 = vor.u32 8388608, %v3710_v30 }
 0x366   :  { %v3873_v37 = vsub.s32 0, %v10669_v1  ;;  %vm3735_vm12 = vcmp.lt.s32.totalorder %v12854_v51, 1  ;;  %vm3737_vm1 = vcmp.lt.s32.totalorder %v12854_v51, 3  ;;  %vm3698_vm15 = vcmp.eq.s32.totalorder %v10650_v43, 2 }
 0x367   :  { %v3578_v56 = vmul.f32 %v3577_v32, %v3575_v58  ;;  %v3588_v3 = vadd.s32 3, %v3584_v40  ;;  %v3743_v16 = vsel %vm3735_vm12, %v3722_v20, %v3725_v8  ;;  %v3745_v6 = vsel %vm3737_vm1, %v3728_v4, %v12855_v26  ;;  %v6183_v27 = vpop.eup %6182 }
 0x368   :  { %vm3695_vm4 = vcmp.eq.s32.totalorder %v10650_v43, 0  ;;  %v5509_v28 = vmin.u32 %v3873_v37, %v10669_v1  ;;  %v3719_v48 = vshrl.u32 %v12461_v2, %v12850_v63  ;;  %vm12856_vm14 = vcmp.lt.s32.totalorder %v12854_v51, 4 }
 0x369   :  { %v3740_v7 = vsel %vm12856_vm14, %v3728_v4, 2102212464  ;;  %v3747_v34 = vsel %vm3735_vm12, %v3725_v8, %v3728_v4  ;;  %v3579_v23 = vxor.u32 2147483648, %v3578_v56  ;;  %v3893_v55 = vsub.s32 4, %v10640_v17  ;;  %v6185_v47 = vpop.eup %6184 }
 0x36a   :  { %vm3736_vm5 = vcmp.lt.s32.totalorder %v12854_v51, 2  ;;  %v3749_v21 = vsel %vm3737_vm1, %v12858_v14, %v12857_v60  ;;  %v3875_v63 = vclz %v5509_v28  ;;  %v3739_v45 = vsel %vm3735_vm12, %v3719_v48, %v3722_v20 }
 0x36b   :  { %v3746_v30 = vsel %vm3736_vm5, %v3743_v16, %v3745_v6  ;;  %v3751_v46 = vshll.u32 %v3711_v42, 8  ;;  %v3699_v4 = vxor.u32 2147483648, %v6183_v27  ;;  %v3580_v49 = vsel %vm3497_vm6, %v3579_v23, %v3578_v56 }
 0x36c   :  { %v3741_v40 = vsel %vm3737_vm1, %v3725_v8, %v3740_v7  ;;  %v3750_v58 = vsel %vm3736_vm5, %v3747_v34, %v3749_v21  ;;  %v3583_v32 = vsel %vm10654_vm9, %v12829_v35, %v3580_v49  ;;  %v5510_v37 = vadd.s32 4294967294, %v3875_v63  ;;  %v12862_v63 = vld [vmem:[#allocation132_spill] sm:$0xff]  ;;  %v12863_v49 = vld [vmem:[#allocation129_spill] sm:$0xff] }
 0x36d   :  { %v10715_v20 = vmul.u32.u64.low %v3751_v46, %v3750_v58  ;;  %v10716_v26 = vmul.u32.u64.high %v3751_v46, %v3750_v58, %v10715_v20  ;;  %vm3694_vm0 = vcmp.lt.s32.totalorder %v10650_v43, 2  ;;  %v3696_v42 = vxor.u32 2147483648, %v6185_v47 }
 0x36e   :  { %6186 = vcosq.f32 %v3583_v32  ;;  %vm10721_vm8 = vcmp.le.f32.partialorder %v3807_v13, 0.7853982  ;;  %v10725_v8 = vmul.u32.u64.low %v3751_v46, %v3746_v30  ;;  %v10726_v16 = vmul.u32.u64.high %v3751_v46, %v3746_v30, %v10725_v8 }
 0x36f   :  { %6188 = vsinq.f32 %v3583_v32  ;;  %v10729_v38 = vand.u32 3, %v3588_v3  ;;  %vm5511_vm7 = vcmp.lt.s32.totalorder %v5510_v37, 0  ;;  %v1568_v6 = vmul.f32 %v10205_v61, %v10316_v44 }
 0x370   :  { %vm3809_vm10 = vcmp.lt.s32.totalorder %v12837_v53, 0  ;;  %v3863_v28 = vadd.s32 %v10550_v62, %v10570_v50  ;;  %v3878_v13 = vsel %vm5511_vm7, 0, %v5510_v37  ;;  %v3742_v48 = vsel %vm3736_vm5, %v3739_v45, %v3741_v40 }
 0x371   :  { %vm3691_vm2 = vweird.f32 %v12814_v59  ;;  %v3700_v7 = vsel %vm3698_vm15, %v3699_v4, %v6185_v47  ;;  %v3879_v3 = vsub.s32 32, %v3878_v13  ;;  %v3883_v34 = vsub.s32 4294967266, %v3878_v13  ;;  %v12865_v59 = vld [vmem:[#allocation144_spill] sm:$0xff] }
 0x372   :  { %v10744_v44 = vsel %vm3809_vm10, %v3893_v55, %v10640_v17  ;;  %v3697_v23 = vsel %vm3695_vm4, %v6183_v27, %v3696_v42  ;;  %vm3760_vm3 = vc.u32 %v10716_v26, %v10725_v8  ;;  %v3761_v62 = vadd.s32 1, %v10726_v16  ;;  %v12861_v55 = vld [vmem:[#allocation111_spill] sm:$0xff] }
 0x373   :  { %v10752_v50 = vadd.f32 %v10215_v0, %v1568_v6  ;;  %vm3591_vm11 = vcmp.eq.s32.totalorder %v10729_v38, 0  ;;  %v3880_v51 = vshll.u32 %v10669_v1, %v3878_v13  ;;  %v3881_v60 = vshrl.u32 %v3863_v28, %v3879_v3 }
 0x374   :  { %v3884_v14 = vadd.s32 127, %v3883_v34  ;;  %v3758_v21 = vmul.u32 %v3751_v46, %v3742_v48  ;;  %vm3590_vm13 = vcmp.lt.s32.totalorder %v10729_v38, 2  ;;  %v3762_v17 = vsel %vm3760_vm3, %v3761_v62, %v10726_v16 }
 0x375   :  { %v1639_v27 = vmax.f32 %v10752_v50, 0.0  ;;  %v4015_v47 = vand.u32 2147483647, %v12861_v55  ;;  %v4036_v45 = vshrl.u32 %v12557_v41, %v12862_v63  ;;  %vm3587_vm6 = vweird.f32 %v12829_v35 }
 0x376   :  { %vm3594_vm9 = vcmp.eq.s32.totalorder %v10729_v38, 2  ;;  %v3882_v30 = vor.u32 %v3881_v60, %v3880_v51  ;;  %v3885_v1 = vshll.u32 %v3884_v14, 23  ;;  %v3763_v4 = vadd.s32 %v3762_v17, %v3758_v21  ;;  %v12864_v14 = vld [vmem:[#allocation139_spill] sm:$0xff] }
 0x377   :  { %1671 = vst [vmem:[%s12111_s13 + $0xa8] sm:$0xff] %v1639_v27  ;;  %v4033_v46 = vshrl.u32 %v12649_v29, %v12862_v63  ;;  %v4035_v40 = vshll.u32 %v12649_v29, %v12863_v49  ;;  %v4038_v58 = vshll.u32 %v12557_v41, %v12863_v49  ;;  %v4039_v32 = vshrl.u32 %v12470_v11, %v12862_v63 }
 0x378   :  { %v3701_v37 = vsel %vm3694_vm0, %v3697_v23, %v3700_v7  ;;  %v3886_v20 = vor.u32 4788187, %v3885_v1  ;;  %v3896_v42 = vsel %vm10721_vm8, 0, %v10744_v44  ;;  %v3764_v16 = vadd.s32 536870912, %v3763_v4  ;;  %v6187_v6 = vpop.eup %6186 }
 0x379   :  { %v4022_v28 = vand.u32 8388607, %v4015_v47  ;;  %v4032_v13 = vshll.u32 %v12461_v2, %v12863_v49  ;;  %v4037_v48 = vor.u32 %v4036_v45, %v4035_v40  ;;  %v4040_v3 = vor.u32 %v4039_v32, %v4038_v58  ;;  %v6189_v34 = vpop.eup %6188  ;;  %v12866_v40 = vld [vmem:[#allocation141_spill] sm:$0xff] }
 0x37a   :  { %v3595_v62 = vxor.u32 2147483648, %v6187_v6  ;;  %v3887_v51 = vand.u32 2147483647, %v3886_v20  ;;  %v3889_v43 = vcvt.s32.f32 %v3882_v30  ;;  %v3765_v7 = vshrl.u32 %v3764_v16, 30 }
 0x37b   :  { %v3702_v23 = vsel %vm3691_vm2, nan, %v3701_v37  ;;  %v3592_v60 = vxor.u32 2147483648, %v6189_v34  ;;  %v4034_v44 = vor.u32 %v4033_v46, %v4032_v13  ;;  %vm4047_vm12 = vcmp.lt.s32.totalorder %v12864_v14, 1  ;;  %v12868_v13 = vld [vmem:[#allocation143_spill] sm:$0xff] }
 0x37c   :  { %v3596_v21 = vsel %vm3594_vm9, %v3595_v62, %v6189_v34  ;;  %v3890_v17 = vmul.f32 %v3889_v43, %v3887_v51  ;;  %v3766_v1 = vshll.u32 %v3765_v7, 30  ;;  %vm4049_vm1 = vcmp.lt.s32.totalorder %v12864_v14, 3 }
 0x37d   :  { %v3593_v45 = vsel %vm3591_vm11, %v6187_v6, %v3592_v60  ;;  %v4023_v49 = vor.u32 8388608, %v4022_v28  ;;  %v4059_v30 = vsel %vm4047_vm12, %v4037_v48, %v4040_v3  ;;  %v4061_v46 = vsel %vm4049_vm1, %v12866_v40, %v12865_v59 }
 0x37e   :  { %v12867_v58 = vmax.f32 %v10218_v25, 0.0  ;;  %v3597_v37 = vsel %vm3590_vm13, %v3593_v45, %v3596_v21  ;;  %v3891_v20 = vxor.u32 2147483648, %v3890_v17  ;;  %v10804_v16 = vsub.s32 %v3763_v4, %v3766_v1 }
 0x37f   :  { %v3598_v6 = vsel %vm3587_vm6, nan, %v3597_v37  ;;  %vm4048_vm15 = vcmp.lt.s32.totalorder %v12864_v14, 2  ;;  %v4055_v28 = vsel %vm4047_vm12, %v4034_v44, %v4037_v48  ;;  %v4057_v34 = vsel %vm4049_vm1, %v4040_v3, %v12868_v13  ;;  %v12870_v37 = vld [vmem:[#allocation115_spill] sm:$0xff] }
 0x380   :  { %v5176_v32 = vadd.f32 %v3702_v23, %v12867_v58  ;;  %v5175_v25 = vadd.f32 %v3598_v6, %v1634_v9  ;;  %v3892_v38 = vsel %vm3809_vm10, %v3891_v20, %v3890_v17  ;;  %v3769_v4 = vsub.s32 0, %v10804_v16  ;;  %v10833_v17 = vpop.f32.mrb[22].mxu1 }
 0x381   :  { %v4062_v35 = vsel %vm4048_vm15, %v4059_v30, %v4061_v46  ;;  %v4031_v62 = vshrl.u32 %v12461_v2, %v12862_v63  ;;  %vm12869_vm4 = vcmp.lt.s32.totalorder %v12864_v14, 4  ;;  %v4063_v43 = vshll.u32 %v4023_v49, 8 }
 0x382   :  { %v4052_v51 = vsel %vm12869_vm4, %v4040_v3, 2102212464  ;;  %v1567_v23 = vmul.f32 %v10205_v61, %v10428_v24  ;;  %v5667_v52 = vpack.c.bf16 %v5176_v32, %v5175_v25  ;;  %v3895_v9 = vsel %vm10721_vm8, %v12837_v53, %v3892_v38  ;;  %v12872_v25 = vld [vmem:[#allocation136_spill] sm:$0xff] }
 0x383   :  { %v5505_v60 = vmin.u32 %v3769_v4, %v10804_v16  ;;  %v4058_v21 = vsel %vm4048_vm15, %v4055_v28, %v4057_v34  ;;  %v5006_v63 = vmul.u32 %v10595_v10, %v10591_v18  ;;  %v3900_v3 = vadd.s32 3, %v3896_v42 }
 0x384   :  { %v10837_v1 = vmul.u32.u64.low %v4063_v43, %v4062_v35  ;;  %v10838_v45 = vmul.u32.u64.high %v4063_v43, %v4062_v35, %v10837_v1  ;;  %vm5008_vm14 = vc.u32 %v10664_v57, %v10673_v5  ;;  %5711 = vst [vmem:[%s12112_s14 + $0x40] sm:$0xff] %v5667_v52   ;;  %v3789_v24 = vsub.s32 4, %v3765_v7 }
 0x385   :  { %v3771_v61 = vclz %v5505_v60  ;;  %v4051_v56 = vsel %vm4047_vm12, %v4031_v62, %v4034_v44  ;;  %v4053_v49 = vsel %vm4049_vm1, %v4037_v48, %v4052_v51  ;;  %6190 = vcosq.f32 %v3895_v9 }
 0x386   :  { %v10849_v42 = vmul.u32.u64.low %v4063_v43, %v4058_v21  ;;  %v10850_v30 = vmul.u32.u64.high %v4063_v43, %v4058_v21, %v10849_v42  ;;  %v10854_v59 = vadd.f32 %v10215_v0, %v1567_v23  ;;  %v5009_v40 = vadd.s32 1, %v10674_v22 }
 0x387   :  { %6192 = vsinq.f32 %v3895_v9  ;;  %vm3705_vm5 = vcmp.lt.s32.totalorder %v12849_v39, 0  ;;  %v5506_v46 = vadd.s32 4294967294, %v3771_v61  ;;  %v10858_v58 = vand.u32 3, %v3900_v3 }
 0x388   :  { %v3759_v44 = vadd.s32 %v10725_v8, %v10716_v26  ;;  %v4054_v48 = vsel %vm4048_vm15, %v4051_v56, %v4053_v49  ;;  %v1638_v32 = vmax.f32 %v10854_v59, 0.0  ;;  %v3790_v0 = vsel %vm3705_vm5, %v3789_v24, %v3765_v7  ;;  %v12871_v26 = vld [vmem:[#allocation142_spill] sm:$0xff] }
 0x389   :  { %vm5507_vm0 = vcmp.lt.s32.totalorder %v5506_v46, 0  ;;  %vm4072_vm8 = vc.u32 %v10838_v45, %v10849_v42  ;;  %v3911_v20 = vand.u32 2147483647, %v12870_v37  ;;  %v4073_v28 = vadd.s32 1, %v10850_v30 }
 0x38a   :  { %v3774_v6 = vsel %vm5507_vm0, 0, %v5506_v46  ;;  %1670 = vst [vmem:[%s12111_s13 + $0xa0] sm:$0xff] %v1638_v32  ;;  %v3929_v8 = vshrl.u32 %v12649_v29, %v12871_v26  ;;  %v3932_v7 = vshrl.u32 %v12557_v41, %v12871_v26  ;;  %v4070_v34 = vmul.u32 %v4063_v43, %v4054_v48  ;;  %v12875_v48 = vld [vmem:[#allocation7_spill] sm:$0xff] }
 0x38b   :  { %v3775_v14 = vsub.s32 32, %v3774_v6  ;;  %v3779_v13 = vsub.s32 4294967266, %v3774_v6  ;;  %v3928_v38 = vshll.u32 %v12461_v2, %v12872_v25  ;;  %v4074_v4 = vsel %vm4072_vm8, %v4073_v28, %v10850_v30 }
 0x38c   :  { %v3931_v35 = vshll.u32 %v12649_v29, %v12872_v25  ;;  %v3934_v62 = vshll.u32 %v12557_v41, %v12872_v25  ;;  %v3935_v51 = vshrl.u32 %v12470_v11, %v12871_v26  ;;  %v3776_v23 = vshll.u32 %v10804_v16, %v3774_v6 }
 0x38d   :  { %v3777_v52 = vshrl.u32 %v3759_v44, %v3775_v14  ;;  %v3780_v9 = vadd.s32 127, %v3779_v13  ;;  %v4075_v60 = vadd.s32 %v4074_v4, %v4070_v34  ;;  %v3918_v43 = vand.u32 8388607, %v3911_v20 }
 0x38e   :  { %v3930_v21 = vor.u32 %v3929_v8, %v3928_v38  ;;  %v3933_v3 = vor.u32 %v3932_v7, %v3931_v35  ;;  %v3936_v1 = vor.u32 %v3935_v51, %v3934_v62  ;;  %vm10894_vm7 = vcmp.le.f32.partialorder %v3703_v15, 0.7853982  ;;  %v12876_v8 = vld [vmem:[#allocation140_spill] sm:$0xff]  ;;  %v12880_v62 = vld [vmem:[#allocation107_spill] sm:$0xff] }
 0x38f   :  { %v3778_v24 = vor.u32 %v3777_v52, %v3776_v23  ;;  %v3781_v56 = vshll.u32 %v3780_v9, 23  ;;  %v4076_v49 = vadd.s32 536870912, %v4075_v60  ;;  %v6191_v30 = vpop.eup %6190  ;;  %v5010_v16 = vsel %vm5008_vm14, %v5009_v40, %v10674_v22  ;;  %v12877_v40 = vld [vmem:[#allocation146_spill] sm:$0xff]  ;;  %v12879_v35 = vld [vmem:[#allocation148_spill] sm:$0xff]  ;;  %v10927_v23 = vpop.f32.mrb[23].mxu1 }
 0x390   :  { %vm3903_vm10 = vcmp.eq.s32.totalorder %v10858_v58, 0  ;;  %v3792_v46 = vsel %vm10894_vm7, 0, %v3790_v0  ;;  %v3927_v15 = vshrl.u32 %v12461_v2, %v12871_v26  ;;  %vm5066_vm2 = vcmp.gt.s32.totalorder %v12875_v48, 0 }
 0x391   :  { %v6193_v44 = vpop.eup %6192  ;;  %v3782_v6 = vor.u32 4788187, %v3781_v56  ;;  %v10908_v28 = vshrl.u32 %v4076_v49, 30  ;;  %vm3943_vm3 = vcmp.lt.s32.totalorder %v12876_v8, 1  ;;  %vm3945_vm11 = vcmp.lt.s32.totalorder %v12876_v8, 3 }
 0x392   :  { %v3919_v7 = vor.u32 8388608, %v3918_v43  ;;  %v3951_v22 = vsel %vm3943_vm3, %v3930_v21, %v3933_v3  ;;  %v3953_v0 = vsel %vm3945_vm11, %v3936_v1, %v12877_v40  ;;  %v3955_v26 = vsel %vm3943_vm3, %v3933_v3, %v3936_v1  ;;  %v10939_v49 = vld [vmem:[%s12109_s8] ss:$0 sm:$0xff] }
 0x393   :  { %v3907_v14 = vxor.u32 2147483648, %v6191_v30  ;;  %v3783_v13 = vand.u32 2147483647, %v3782_v6  ;;  %v3785_v34 = vcvt.s32.f32 %v3778_v24  ;;  %v4078_v25 = vshll.u32 %v10908_v28, 30 }
 0x394   :  { %v3904_v38 = vxor.u32 2147483648, %v6193_v44  ;;  %vm3944_vm13 = vcmp.lt.s32.totalorder %v12876_v8, 2  ;;  %vm12878_vm6 = vcmp.lt.s32.totalorder %v12876_v8, 4  ;;  %v3957_v51 = vsel %vm3945_vm11, %v12880_v62, %v12879_v35 }
 0x395   :  { %v3948_v4 = vsel %vm12878_vm6, %v3936_v1, 2102212464  ;;  %v3786_v52 = vmul.f32 %v3785_v34, %v3783_v13  ;;  %v10929_v9 = vsub.s32 %v4075_v60, %v4078_v25  ;;  %v3954_v43 = vsel %vm3944_vm13, %v3951_v22, %v3953_v0 }
 0x396   :  { %v3958_v24 = vsel %vm3944_vm13, %v3955_v26, %v3957_v51  ;;  %vm3906_vm9 = vcmp.eq.s32.totalorder %v10858_v58, 2  ;;  %v3796_v56 = vadd.s32 3, %v3792_v46  ;;  %v3959_v1 = vshll.u32 %v3919_v7, 8 }
 0x397   :  { %v1570_v6 = vmul.f32 %v10939_v49, %v10572_v31  ;;  %v3787_v60 = vxor.u32 2147483648, %v3786_v52  ;;  %v4081_v40 = vsub.s32 0, %v10929_v9  ;;  %v3947_v22 = vsel %vm3943_vm3, %v3927_v15, %v3930_v21 }
 0x398   :  { %v3949_v0 = vsel %vm3945_vm11, %v3933_v3, %v3948_v4  ;;  %v10948_v26 = vmul.u32.u64.low %v3959_v1, %v3958_v24  ;;  %v10949_v46 = vmul.u32.u64.high %v3959_v1, %v3958_v24, %v10948_v26  ;;  %v3905_v34 = vsel %vm3903_vm10, %v6191_v30, %v3904_v38  ;;  %v10972_v30 = vld [vmem:[%s12110_s9] ss:$0 sm:$0xff]  ;;  %v12882_v24 = vld [vmem:[#allocation11_spill] sm:$0xff] }
 0x399   :  { %v10951_v7 = vmul.u32.u64.low %v3959_v1, %v3954_v43  ;;  %v10952_v13 = vmul.u32.u64.high %v3959_v1, %v3954_v43, %v10951_v7  ;;  %v3908_v31 = vsel %vm3906_vm9, %v3907_v14, %v6193_v44  ;;  %v3788_v25 = vsel %vm3705_vm5, %v3787_v60, %v3786_v52  ;;  %v12881_v38 = vld [vmem:[#allocation122_spill] sm:$0xff] }
 0x39a   :  { %v5517_v35 = vmin.u32 %v4081_v40, %v10929_v9  ;;  %v10963_v21 = vadd.s32 %v5010_v16, %v5006_v63  ;;  %vm3902_vm12 = vcmp.lt.s32.totalorder %v10858_v58, 2  ;;  %v3791_v3 = vsel %vm10894_vm7, %v12849_v39, %v3788_v25 }
 0x39b   :  { %v10975_v15 = vadd.f32 %v10972_v30, %v1570_v6  ;;  %6194 = vcosq.f32 %v3791_v3  ;;  %v10977_v44 = vand.u32 3, %v3796_v56  ;;  %v3950_v10 = vsel %vm3944_vm13, %v3947_v22, %v3949_v0  ;;  %v12883_v22 = vld [vmem:[#allocation22_spill] sm:$0xff] }
 0x39c   :  { %v4083_v18 = vclz %v5517_v35  ;;  %v10984_v63 = vsel %vm5066_vm2, %v12875_v48, 0  ;;  %v3909_v58 = vsel %vm3902_vm12, %v3905_v34, %v3908_v31  ;;  %6196 = vsinq.f32 %v3791_v3 }
 0x39d   :  { %vm3968_vm1 = vc.u32 %v10949_v46, %v10951_v7  ;;  %v3969_v16 = vadd.s32 1, %v10952_v13  ;;  %v1641_v14 = vmax.f32 %v10975_v15, 0.0  ;;  %v4223_v4 = vand.u32 2147483647, %v12881_v38 }
 0x39e   :  { %v5518_v61 = vadd.s32 4294967294, %v4083_v18  ;;  %v10992_v8 = vadd.s32 536870912, %v10963_v21  ;;  %vm3899_vm15 = vweird.f32 %v12837_v53  ;;  %vm4017_vm4 = vcmp.lt.s32.totalorder %v12861_v55, 0 }
 0x39f   :  { %v3966_v48 = vmul.u32 %v3959_v1, %v3950_v10  ;;  %v3910_v62 = vsel %vm3899_vm15, nan, %v3909_v58  ;;  %vm3802_vm14 = vcmp.eq.s32.totalorder %v10977_v44, 2  ;;  %v4071_v51 = vadd.s32 %v10849_v42, %v10838_v45  ;;  %1673 = vst [vmem:[%s12111_s13 + $0xb8] sm:$0xff] %v1641_v14 }
 0x3a0   :  { %vm5519_vm5 = vcmp.lt.s32.totalorder %v5518_v61, 0  ;;  %v3970_v52 = vsel %vm3968_vm1, %v3969_v16, %v10952_v13  ;;  %vm3799_vm0 = vcmp.eq.s32.totalorder %v10977_v44, 0  ;;  %v4241_v56 = vshrl.u32 %v12649_v29, %v12882_v24 }
 0x3a1   :  { %v4086_v53 = vsel %vm5519_vm5, 0, %v5518_v61  ;;  %v3971_v43 = vadd.s32 %v3970_v52, %v3966_v48  ;;  %v4244_v1 = vshrl.u32 %v12557_v41, %v12882_v24  ;;  %vm3798_vm8 = vcmp.lt.s32.totalorder %v10977_v44, 2 }
 0x3a2   :  { %v4087_v45 = vsub.s32 32, %v4086_v53  ;;  %v4091_v42 = vsub.s32 4294967266, %v4086_v53  ;;  %v4101_v6 = vsub.s32 4, %v10908_v28  ;;  %v4230_v60 = vand.u32 8388607, %v4223_v4 }
 0x3a3   :  { %vm3795_vm7 = vweird.f32 %v12849_v39  ;;  %v3972_v40 = vadd.s32 536870912, %v3971_v43  ;;  %v4240_v0 = vshll.u32 %v12461_v2, %v12883_v22  ;;  %v4243_v26 = vshll.u32 %v12649_v29, %v12883_v22 }
 0x3a4   :  { %v4247_v13 = vshrl.u32 %v12470_v11, %v12882_v24  ;;  %v4088_v34 = vshll.u32 %v10929_v9, %v4086_v53  ;;  %v4089_v31 = vshrl.u32 %v4071_v51, %v4087_v45  ;;  %v4092_v25 = vadd.s32 127, %v4091_v42 }
 0x3a5   :  { %v4246_v35 = vshll.u32 %v12557_v41, %v12883_v22  ;;  %v5178_v3 = vadd.f32 %v3910_v62, %v1637_v36  ;;  %v11026_v18 = vshrl.u32 %v3972_v40, 30  ;;  %v4242_v10 = vor.u32 %v4241_v56, %v4240_v0  ;;  %v6195_v61 = vpop.eup %6194  ;;  %v12884_v56 = vld [vmem:[#allocation147_spill] sm:$0xff]  ;;  %v12885_v40 = vld [vmem:[#allocation109_spill] sm:$0xff]  ;;  %v12886_v22 = vld [vmem:[#allocation150_spill] sm:$0xff] }
 0x3a6   :  { %v4245_v58 = vor.u32 %v4244_v1, %v4243_v26  ;;  %v4090_v16 = vor.u32 %v4089_v31, %v4088_v34  ;;  %v4093_v48 = vshll.u32 %v4092_v25, 23  ;;  %v11031_v52 = vsel %vm4017_vm4, %v4101_v6, %v10908_v28  ;;  %v6197_v51 = vpop.eup %6196 }
 0x3a7   :  { %v4248_v9 = vor.u32 %v4247_v13, %v4246_v35  ;;  %v3803_v53 = vxor.u32 2147483648, %v6195_v61  ;;  %v3974_v45 = vshll.u32 %v11026_v18, 30  ;;  %v4231_v42 = vor.u32 8388608, %v4230_v60  ;;  %v12887_v13 = vld [vmem:[#allocation15_spill] sm:$0xff] }
 0x3a8   :  { %v4239_v19 = vshrl.u32 %v12461_v2, %v12882_v24  ;;  %v3800_v36 = vxor.u32 2147483648, %v6197_v51  ;;  %v4094_v62 = vor.u32 4788187, %v4093_v48  ;;  %vm4255_vm10 = vcmp.lt.s32.totalorder %v12884_v56, 1 }
 0x3a9   :  { %vm4257_vm2 = vcmp.lt.s32.totalorder %v12884_v56, 3  ;;  %v3804_v1 = vsel %vm3802_vm14, %v3803_v53, %v6197_v51  ;;  %v11040_v28 = vsub.s32 %v3971_v43, %v3974_v45  ;;  %v4263_v6 = vsel %vm4255_vm10, %v4242_v10, %v4245_v58 }
 0x3aa   :  { %v4269_v60 = vsel %vm4257_vm2, %v12886_v22, %v12885_v40  ;;  %v3801_v24 = vsel %vm3799_vm0, %v6195_v61, %v3800_v36  ;;  %v4095_v0 = vand.u32 2147483647, %v4094_v62  ;;  %v4097_v26 = vcvt.s32.f32 %v4090_v16 }
 0x3ab   :  { %v4265_v34 = vsel %vm4257_vm2, %v4248_v9, %v12887_v13  ;;  %v3805_v43 = vsel %vm3798_vm8, %v3801_v24, %v3804_v1  ;;  %v3977_v31 = vsub.s32 0, %v11040_v28  ;;  %vm4256_vm3 = vcmp.lt.s32.totalorder %v12884_v56, 2 }
 0x3ac   :  { %v4271_v25 = vshll.u32 %v4231_v42, 8  ;;  %v3806_v35 = vsel %vm3795_vm7, nan, %v3805_v43  ;;  %v4098_v48 = vmul.f32 %v4097_v26, %v4095_v0  ;;  %vm12888_vm11 = vcmp.lt.s32.totalorder %v12884_v56, 4  ;;  %v12891_v43 = vld [vmem:[#allocation128_spill] sm:$0xff] }
 0x3ad   :  { %v4260_v61 = vsel %vm12888_vm11, %v4248_v9, 2102212464  ;;  %v4267_v16 = vsel %vm4255_vm10, %v4245_v58, %v4248_v9  ;;  %v5177_v51 = vadd.f32 %v3806_v35, %v1636_v12  ;;  %v5513_v44 = vmin.u32 %v3977_v31, %v11040_v28 }
 0x3ae   :  { %v4266_v53 = vsel %vm4256_vm3, %v4263_v6, %v4265_v34  ;;  %v4270_v45 = vsel %vm4256_vm3, %v4267_v16, %v4269_v60  ;;  %v4099_v39 = vxor.u32 2147483648, %v4098_v48  ;;  %v1569_v62 = vmul.f32 %v10939_v49, %v10694_v33  ;;  %v11091_v33 = vpop.f32.mrb[24].mxu1 }
 0x3af   :  { %v11070_v42 = vmul.u32.u64.low %v4271_v25, %v4270_v45  ;;  %v11071_v36 = vmul.u32.u64.high %v4271_v25, %v4270_v45, %v11070_v42  ;;  %v5672_v1 = vpack.c.bf16 %v5178_v3, %v5177_v51  ;;  %v3979_v9 = vclz %v5513_v44  ;;  %v12893_v51 = vld [vmem:[#allocation145_spill] sm:$0xff] }
 0x3b0   :  { %v4259_v54 = vsel %vm4255_vm10, %v4239_v19, %v4242_v10  ;;  %v4261_v12 = vsel %vm4257_vm2, %v4245_v58, %v4260_v61  ;;  %vm11081_vm13 = vcmp.le.f32.partialorder %v4015_v47, 0.7853982  ;;  %v4100_v40 = vsel %vm4017_vm4, %v4099_v39, %v4098_v48  ;;  %v12892_v61 = vld [vmem:[#allocation10_spill] sm:$0xff] }
 0x3b1   :  { %v11087_v22 = vmul.u32.u64.low %v4271_v25, %v4266_v53  ;;  %v11088_v60 = vmul.u32.u64.high %v4271_v25, %v4266_v53, %v11087_v22  ;;  %v11094_v3 = vand.u32 31, %v10984_v63  ;;  %5712 = vst [vmem:[%s12112_s14 + $0x48] sm:$0xff] %v5672_v1   ;;  %v4103_v47 = vsel %vm11081_vm13, %v12861_v55, %v4100_v40 }
 0x3b2   :  { %v5514_v10 = vadd.s32 4294967294, %v3979_v9  ;;  %v11103_v58 = vadd.f32 %v10972_v30, %v1569_v62  ;;  %v11106_v19 = vshrl.u32 %v10992_v8, 30  ;;  %v4104_v24 = vsel %vm11081_vm13, 0, %v11031_v52 }
 0x3b3   :  { %v3967_v0 = vadd.s32 %v10951_v7, %v10949_v46  ;;  %v4262_v26 = vsel %vm4256_vm3, %v4259_v54, %v4261_v12  ;;  %6198 = vcosq.f32 %v4103_v47  ;;  %vm4280_vm9 = vc.u32 %v11071_v36, %v11087_v22 }
 0x3b4   :  { %vm5515_vm6 = vcmp.lt.s32.totalorder %v5514_v10, 0  ;;  %v12433_v13 = vmax.f32 %v11103_v58, 0.0  ;;  %6200 = vsinq.f32 %v4103_v47  ;;  %v4281_v34 = vadd.s32 1, %v11088_v60 }
 0x3b5   :  { %v3982_v8 = vsel %vm5515_vm6, 0, %v5514_v10  ;;  %v4119_v31 = vand.u32 2147483647, %v12891_v43  ;;  %v3997_v46 = vsub.s32 4, %v11026_v18  ;;  %v4278_v7 = vmul.u32 %v4271_v25, %v4262_v26  ;;  %v12894_v26 = vld [vmem:[#allocation149_spill] sm:$0xff] }
 0x3b6   :  { %v3983_v52 = vsub.s32 32, %v3982_v8  ;;  %v3987_v35 = vsub.s32 4294967266, %v3982_v8  ;;  %1672 = vst [vmem:[%s12111_s13 + $0xb0] sm:$0xff] %v12433_v13  ;;  %v3984_v56 = vshll.u32 %v11040_v28, %v3982_v8  ;;  %v4282_v48 = vsel %vm4280_vm9, %v4281_v34, %v11088_v60 }
 0x3b7   :  { %v4137_v16 = vshrl.u32 %v12649_v29, %v12892_v61  ;;  %v4139_v44 = vshll.u32 %v12649_v29, %v12893_v51  ;;  %v4283_v39 = vadd.s32 %v4282_v48, %v4278_v7  ;;  %v4140_v25 = vshrl.u32 %v12557_v41, %v12892_v61 }
 0x3b8   :  { %v3985_v53 = vshrl.u32 %v3967_v0, %v3983_v52  ;;  %v3988_v45 = vadd.s32 127, %v3987_v35  ;;  %v4126_v42 = vand.u32 8388607, %v4119_v31  ;;  %v4136_v28 = vshll.u32 %v12461_v2, %v12893_v51  ;;  %v12896_v35 = vld [vmem:[#allocation110_spill] sm:$0xff] }
 0x3b9   :  { %v4142_v62 = vshll.u32 %v12557_v41, %v12893_v51  ;;  %v4143_v1 = vshrl.u32 %v12470_v11, %v12892_v61  ;;  %v4284_v12 = vadd.s32 536870912, %v4283_v39  ;;  %v4141_v6 = vor.u32 %v4140_v25, %v4139_v44 }
 0x3ba   :  { %v3986_v9 = vor.u32 %v3985_v53, %v3984_v56  ;;  %v3989_v54 = vshll.u32 %v3988_v45, 23  ;;  %v4108_v40 = vadd.s32 3, %v4104_v24  ;;  %vm3913_vm12 = vcmp.lt.s32.totalorder %v12870_v37, 0  ;;  %v12895_v24 = vld [vmem:[#allocation162_spill] sm:$0xff]  ;;  %v12899_v45 = vld [vmem:[#allocation152_spill] sm:$0xff] }
 0x3bb   :  { %v4138_v60 = vor.u32 %v4137_v16, %v4136_v28  ;;  %v4144_v47 = vor.u32 %v4143_v1, %v4142_v62  ;;  %v11143_v0 = vshrl.u32 %v4284_v12, 30  ;;  %vm4151_vm1 = vcmp.lt.s32.totalorder %v12894_v26, 1 }
 0x3bc   :  { %v3990_v10 = vor.u32 4788187, %v3989_v54  ;;  %vm4153_vm15 = vcmp.lt.s32.totalorder %v12894_v26, 3  ;;  %v3998_v8 = vsel %vm3913_vm12, %v3997_v46, %v11026_v18  ;;  %v4127_v34 = vor.u32 8388608, %v4126_v42 }
 0x3bd   :  { %v4163_v52 = vsel %vm4151_vm1, %v4141_v6, %v4144_v47  ;;  %v4165_v7 = vsel %vm4153_vm15, %v12896_v35, %v12895_v24  ;;  %v6199_v56 = vpop.eup %6198  ;;  %vm11158_vm4 = vcmp.le.f32.partialorder %v3911_v20, 0.7853982  ;;  %v3993_v51 = vcvt.s32.f32 %v3986_v9 }
 0x3be   :  { %v3991_v16 = vand.u32 2147483647, %v3990_v10  ;;  %v4286_v18 = vshll.u32 %v11143_v0, 30  ;;  %v6201_v46 = vpop.eup %6200  ;;  %v4109_v44 = vand.u32 3, %v4108_v40  ;;  %vm4152_vm14 = vcmp.lt.s32.totalorder %v12894_v26, 2 }
 0x3bf   :  { %v4159_v53 = vsel %vm4151_vm1, %v4138_v60, %v4141_v6  ;;  %v4161_v25 = vsel %vm4153_vm15, %v4144_v47, %v12899_v45  ;;  %v4000_v20 = vsel %vm11158_vm4, 0, %v3998_v8  ;;  %v4166_v62 = vsel %vm4152_vm14, %v4163_v52, %v4165_v7  ;;  %v11185_v52 = vpop.f32.mrb[25].mxu1 }
 0x3c0   :  { %v3994_v42 = vmul.f32 %v3993_v51, %v3991_v16  ;;  %v11171_v28 = vsub.s32 %v4283_v39, %v4286_v18  ;;  %v4115_v1 = vxor.u32 2147483648, %v6199_v56  ;;  %v4135_v9 = vshrl.u32 %v12461_v2, %v12892_v61 }
 0x3c1   :  { %vm12900_vm5 = vcmp.lt.s32.totalorder %v12894_v26, 4  ;;  %v4167_v12 = vshll.u32 %v4127_v34, 8  ;;  %v4112_v40 = vxor.u32 2147483648, %v6201_v46  ;;  %v4162_v8 = vsel %vm4152_vm14, %v4159_v53, %v4161_v25 }
 0x3c2   :  { %v4156_v54 = vsel %vm12900_vm5, %v4144_v47, 2102212464  ;;  %v3995_v10 = vxor.u32 2147483648, %v3994_v42  ;;  %v4289_v24 = vsub.s32 0, %v11171_v28  ;;  %vm4111_vm0 = vcmp.eq.s32.totalorder %v4109_v44, 0 }
 0x3c3   :  { %v4004_v39 = vadd.s32 3, %v4000_v20  ;;  %v11182_v35 = vmul.u32.u64.low %v4167_v12, %v4166_v62  ;;  %v11183_v16 = vmul.u32.u64.high %v4167_v12, %v4166_v62, %v11182_v35  ;;  %v4155_v34 = vsel %vm4151_vm1, %v4135_v9, %v4138_v60 }
 0x3c4   :  { %v3996_v61 = vsel %vm3913_vm12, %v3995_v10, %v3994_v42  ;;  %v5525_v47 = vmin.u32 %v4289_v24, %v11171_v28  ;;  %v4157_v7 = vsel %vm4153_vm15, %v4141_v6, %v4156_v54  ;;  %vm4114_vm8 = vcmp.eq.s32.totalorder %v4109_v44, 2 }
 0x3c5   :  { %v3999_v51 = vsel %vm11158_vm4, %v12870_v37, %v3996_v61  ;;  %v11197_v18 = vmul.u32.u64.low %v4167_v12, %v4162_v8  ;;  %v11198_v53 = vmul.u32.u64.high %v4167_v12, %v4162_v8, %v11197_v18  ;;  %vm4107_vm7 = vweird.f32 %v12861_v55 }
 0x3c6   :  { %v4113_v45 = vsel %vm4111_vm0, %v6199_v56, %v4112_v40  ;;  %v4116_v25 = vsel %vm4114_vm8, %v4115_v1, %v6201_v46  ;;  %6202 = vcosq.f32 %v3999_v51  ;;  %v4291_v42 = vclz %v5525_v47  ;;  %v12901_v56 = vld [vmem:[#allocation21_spill] sm:$0xff] }
 0x3c7   :  { %vm4110_vm10 = vcmp.lt.s32.totalorder %v4109_v44, 2  ;;  %6204 = vsinq.f32 %v3999_v51  ;;  %v11202_v60 = vand.u32 3, %v4004_v39  ;;  %v4158_v6 = vsel %vm4152_vm14, %v4155_v34, %v4157_v7  ;;  %v12902_v40 = vld [vmem:[#allocation153_spill] sm:$0xff] }
 0x3c8   :  { %vm4225_vm2 = vcmp.lt.s32.totalorder %v12881_v38, 0  ;;  %v5526_v48 = vadd.s32 4294967294, %v4291_v42  ;;  %vm4176_vm3 = vc.u32 %v11183_v16, %v11197_v18  ;;  %v1572_v20 = vmul.f32 %v10939_v49, %v10833_v17 }
 0x3c9   :  { %v12432_v46 = vand.u32 2147483647, %v12901_v56  ;;  %v4117_v62 = vsel %vm4110_vm10, %v4113_v45, %v4116_v25  ;;  %v4279_v44 = vadd.s32 %v11087_v22, %v11071_v36  ;;  %v4309_v1 = vsub.s32 4, %v11143_v0  ;;  %v12903_v22 = vld [vmem:[#allocation157_spill] sm:$0xff] }
 0x3ca   :  { %v4177_v26 = vadd.s32 1, %v11198_v53  ;;  %vm5527_vm11 = vcmp.lt.s32.totalorder %v5526_v48, 0  ;;  %v4174_v9 = vmul.u32 %v4167_v12, %v4158_v6  ;;  %v11217_v54 = vadd.f32 %v10972_v30, %v1572_v20 }
 0x3cb   :  { %v4448_v10 = vshll.u32 %v12461_v2, %v12902_v40  ;;  %vm4007_vm13 = vcmp.eq.s32.totalorder %v11202_v60, 0  ;;  %v4294_v17 = vsel %vm5527_vm11, 0, %v5526_v48  ;;  %v4438_v36 = vand.u32 8388607, %v12432_v46 }
 0x3cc   :  { %v4178_v24 = vsel %vm4176_vm3, %v4177_v26, %v11198_v53  ;;  %v4449_v8 = vshrl.u32 %v12649_v29, %v12903_v22  ;;  %vm4006_vm6 = vcmp.lt.s32.totalorder %v11202_v60, 2  ;;  %v4295_v12 = vsub.s32 32, %v4294_v17 }
 0x3cd   :  { %v4299_v39 = vsub.s32 4294967266, %v4294_v17  ;;  %v4179_v35 = vadd.s32 %v4178_v24, %v4174_v9  ;;  %v4451_v61 = vshll.u32 %v12649_v29, %v12902_v40  ;;  %vm4003_vm9 = vweird.f32 %v12870_v37 }
 0x3ce   :  { %v4296_v47 = vshll.u32 %v11171_v28, %v4294_v17  ;;  %v12430_v34 = vmax.f32 %v11217_v54, 0.0  ;;  %v4452_v7 = vshrl.u32 %v12557_v41, %v12903_v22  ;;  %v4454_v51 = vshll.u32 %v12557_v41, %v12902_v40 }
 0x3cf   :  { %v4297_v53 = vshrl.u32 %v4279_v44, %v4295_v12  ;;  %v4300_v45 = vadd.s32 127, %v4299_v39  ;;  %v4180_v25 = vadd.s32 536870912, %v4179_v35  ;;  %v4455_v42 = vshrl.u32 %v12470_v11, %v12903_v22 }
 0x3d0   :  { %v4118_v6 = vsel %vm4107_vm7, nan, %v4117_v62  ;;  %vm4010_vm12 = vcmp.eq.s32.totalorder %v11202_v60, 2  ;;  %1675 = vst [vmem:[%s12111_s13 + $0xc8] sm:$0xff] %v12430_v34  ;;  %v4450_v28 = vor.u32 %v4449_v8, %v4448_v10  ;;  %v4453_v48 = vor.u32 %v4452_v7, %v4451_v61  ;;  %v6203_v20 = vpop.eup %6202  ;;  %v12907_v7 = vld [vmem:[#allocation166_spill] sm:$0xff] }
 0x3d1   :  { %v4298_v44 = vor.u32 %v4297_v53, %v4296_v47  ;;  %v4301_v26 = vshll.u32 %v4300_v45, 23  ;;  %v11247_v9 = vshrl.u32 %v4180_v25, 30  ;;  %v4456_v40 = vor.u32 %v4455_v42, %v4454_v51  ;;  %v6205_v17 = vpop.eup %6204  ;;  %v12906_v47 = vld [vmem:[#allocation156_spill] sm:$0xff]  ;;  %v12908_v25 = vld [vmem:[#allocation167_spill] sm:$0xff] }
 0x3d2   :  { %v5180_v55 = vadd.f32 %v4118_v6, %v1639_v27  ;;  %v4011_v62 = vxor.u32 2147483648, %v6203_v20  ;;  %v4310_v24 = vsel %vm4225_vm2, %v4309_v1, %v11143_v0  ;;  %v4439_v12 = vor.u32 8388608, %v4438_v36  ;;  %v12909_v42 = vld [vmem:[#allocation163_spill] sm:$0xff] }
 0x3d3   :  { %v4008_v39 = vxor.u32 2147483648, %v6205_v17  ;;  %vm11256_vm1 = vcmp.le.f32.partialorder %v4223_v4, 0.7853982  ;;  %v4302_v8 = vor.u32 4788187, %v4301_v26  ;;  %v4182_v61 = vshll.u32 %v11247_v9, 30 }
 0x3d4   :  { %vm4463_vm15 = vcmp.lt.s32.totalorder %v12906_v47, 1  ;;  %v4012_v50 = vsel %vm4010_vm12, %v4011_v62, %v6205_v17  ;;  %v4305_v27 = vcvt.s32.f32 %v4298_v44  ;;  %vm4465_vm4 = vcmp.lt.s32.totalorder %v12906_v47, 3 }
 0x3d5   :  { %v4471_v0 = vsel %vm4463_vm15, %v4450_v28, %v4453_v48  ;;  %v4009_v4 = vsel %vm4007_vm13, %v6203_v20, %v4008_v39  ;;  %v4303_v1 = vand.u32 2147483647, %v4302_v8  ;;  %v11269_v36 = vsub.s32 %v4179_v35, %v4182_v61 }
 0x3d6   :  { %v4473_v51 = vsel %vm4465_vm4, %v4456_v40, %v12907_v7  ;;  %v4013_v53 = vsel %vm4006_vm6, %v4009_v4, %v4012_v50  ;;  %v4447_v45 = vshrl.u32 %v12461_v2, %v12903_v22  ;;  %vm4464_vm14 = vcmp.lt.s32.totalorder %v12906_v47, 2  ;;  %v12912_v7 = vld [vmem:[#allocation180_spill] sm:$0xff] }
 0x3d7   :  { %v4477_v6 = vsel %vm4465_vm4, %v12909_v42, %v12908_v25  ;;  %v4014_v35 = vsel %vm4003_vm9, nan, %v4013_v53  ;;  %v4306_v20 = vmul.f32 %v4305_v27, %v4303_v1  ;;  %v4185_v44 = vsub.s32 0, %v11269_v36 }
 0x3d8   :  { %vm12910_vm5 = vcmp.lt.s32.totalorder %v12906_v47, 4  ;;  %v5179_v26 = vadd.f32 %v4014_v35, %v1638_v32  ;;  %v4474_v22 = vsel %vm4464_vm14, %v4471_v0, %v4473_v51  ;;  %v4475_v17 = vsel %vm4463_vm15, %v4453_v48, %v4456_v40  ;;  %v11304_v0 = vpop.f32.mrb[26].mxu1 }
 0x3d9   :  { %v4468_v60 = vsel %vm12910_vm5, %v4456_v40, 2102212464  ;;  %v4479_v62 = vshll.u32 %v4439_v12, 8  ;;  %v4307_v39 = vxor.u32 2147483648, %v4306_v20  ;;  %v5521_v37 = vmin.u32 %v4185_v44, %v11269_v36 }
 0x3da   :  { %v4467_v8 = vsel %vm4463_vm15, %v4447_v45, %v4450_v28  ;;  %v4478_v61 = vsel %vm4464_vm14, %v4475_v17, %v4477_v6  ;;  %v5677_v50 = vpack.c.bf16 %v5180_v55, %v5179_v26  ;;  %v4469_v59 = vsel %vm4465_vm4, %v4453_v48, %v4468_v60  ;;  %v12911_v28 = vld [vmem:[#allocation182_spill] sm:$0xff] }
 0x3db   :  { %v11301_v32 = vmul.u32.u64.low %v4479_v62, %v4478_v61  ;;  %v11302_v27 = vmul.u32.u64.high %v4479_v62, %v4478_v61, %v11301_v32  ;;  %v4308_v40 = vsel %vm4225_vm2, %v4307_v39, %v4306_v20  ;;  %v4187_v12 = vclz %v5521_v37  ;;  %v12914_v55 = vld [vmem:[#allocation178_spill] sm:$0xff]  ;;  %v12916_v37 = vld [vmem:[#allocation12_spill] sm:$0xff] }
 0x3dc   :  { %v11308_v4 = vmul.u32.u64.low %v4479_v62, %v4474_v22  ;;  %v11309_v1 = vmul.u32.u64.high %v4479_v62, %v4474_v22, %v11308_v4  ;;  %v12913_v51 = vor.u32 %v12911_v28, %v12912_v7  ;;  %vm12915_vm0 = vcmp.lt.s32.totalorder %v12914_v55, 4  ;;  %5713 = vst [vmem:[%s12112_s14 + $0x50] sm:$0xff] %v5677_v50  }
 0x3dd   :  { %v11320_v48 = vsub.s32 32, %v11094_v3  ;;  %v4311_v45 = vsel %vm11256_vm1, %v12881_v38, %v4308_v40  ;;  %v4312_v25 = vsel %vm11256_vm1, 0, %v4310_v24  ;;  %v5014_v42 = vshll.u32 %v11106_v19, 30 }
 0x3de   :  { %v11317_v53 = vsel %vm12915_vm0, %v12913_v51, 1326507024  ;;  %v5522_v6 = vadd.s32 4294967294, %v4187_v12  ;;  %v4470_v35 = vsel %vm4464_vm14, %v4467_v8, %v4469_v59  ;;  %v1571_v20 = vmul.f32 %v10939_v49, %v10927_v23 }
 0x3df   :  { %6206 = vcosq.f32 %v4311_v45  ;;  %vm4121_vm8 = vcmp.lt.s32.totalorder %v12891_v43, 0  ;;  %v4205_v44 = vsub.s32 4, %v11247_v9  ;;  %vm4488_vm7 = vc.u32 %v11302_v27, %v11308_v4 }
 0x3e0   :  { %v4316_v60 = vadd.s32 3, %v4312_v25  ;;  %vm5523_vm10 = vcmp.lt.s32.totalorder %v5522_v6, 0  ;;  %v4489_v24 = vadd.s32 1, %v11309_v1  ;;  %v11341_v10 = vadd.f32 %v10972_v30, %v1571_v20 }
 0x3e1   :  { %6208 = vsinq.f32 %v4311_v45  ;;  %v4175_v47 = vadd.s32 %v11197_v18, %v11183_v16  ;;  %v4190_v23 = vsel %vm5523_vm10, 0, %v5522_v6  ;;  %v4486_v26 = vmul.u32 %v4479_v62, %v4470_v35  ;;  %v12920_v6 = vld [vmem:[#allocation154_spill] sm:$0xff] }
 0x3e2   :  { %v4191_v22 = vsub.s32 32, %v4190_v23  ;;  %v4195_v17 = vsub.s32 4294967266, %v4190_v23  ;;  %v4490_v39 = vsel %vm4488_vm7, %v4489_v24, %v11309_v1  ;;  %v12431_v8 = vand.u32 2147483647, %v12916_v37 }
 0x3e3   :  { %vm11349_vm2 = vcmp.le.f32.partialorder %v4119_v31, 0.7853982  ;;  %v4206_v50 = vsel %vm4121_vm8, %v4205_v44, %v11247_v9  ;;  %v4491_v59 = vadd.s32 %v4490_v39, %v4486_v26  ;;  %v12429_v16 = vmax.f32 %v11341_v10, 0.0  ;;  %v12919_v31 = vld [vmem:[#allocation158_spill] sm:$0xff] }
 0x3e4   :  { %v11357_v18 = vand.u32 3, %v4316_v60  ;;  %v4192_v62 = vshll.u32 %v11269_v36, %v4190_v23  ;;  %v4193_v32 = vshrl.u32 %v4175_v47, %v4191_v22  ;;  %v4196_v40 = vadd.s32 127, %v4195_v17 }
 0x3e5   :  { %v4492_v12 = vadd.s32 536870912, %v4491_v59  ;;  %1674 = vst [vmem:[%s12111_s13 + $0xc0] sm:$0xff] %v12429_v16  ;;  %v4345_v1 = vshrl.u32 %v12649_v29, %v12919_v31  ;;  %v4348_v9 = vshrl.u32 %v12557_v41, %v12919_v31  ;;  %v4351_v28 = vshrl.u32 %v12470_v11, %v12919_v31 }
 0x3e6   :  { %v4194_v7 = vor.u32 %v4193_v32, %v4192_v62  ;;  %v4197_v36 = vshll.u32 %v4196_v40, 23  ;;  %v4208_v51 = vsel %vm11349_vm2, 0, %v4206_v50  ;;  %v4334_v45 = vand.u32 8388607, %v12431_v8 }
 0x3e7   :  { %v11375_v25 = vshrl.u32 %v4492_v12, 30  ;;  %v4344_v35 = vshll.u32 %v12461_v2, %v12920_v6  ;;  %v4347_v20 = vshll.u32 %v12649_v29, %v12920_v6  ;;  %v4350_v44 = vshll.u32 %v12557_v41, %v12920_v6 }
 0x3e8   :  { %v11385_v60 = vshll.u32 %v12470_v11, %v11094_v3  ;;  %v12921_v24 = vmov 920167782   ;;  %v11392_v23 = vsub.s32 %v10963_v21, %v5014_v42  ;;  %v4198_v26 = vor.u32 4788187, %v4197_v36  ;;  %v12922_v42 = vld [vmem:[#allocation159_spill] sm:$0xff] }
 0x3e9   :  { %v11389_v47 = vshrl.u32 %v12921_v24, %v11320_v48  ;;  %v6207_v22 = vpop.eup %6206  ;;  %vm4319_vm3 = vcmp.eq.s32.totalorder %v11357_v18, 0  ;;  %v4494_v17 = vshll.u32 %v11375_v25, 30  ;;  %v4346_v39 = vor.u32 %v4345_v1, %v4344_v35  ;;  %v11404_v1 = vpop.f32.mrb[27].mxu1 }
 0x3ea   :  { %v4349_v50 = vor.u32 %v4348_v9, %v4347_v20  ;;  %v4352_v62 = vor.u32 %v4351_v28, %v4350_v44  ;;  %vm4322_vm11 = vcmp.eq.s32.totalorder %v11357_v18, 2  ;;  %v4199_v32 = vand.u32 2147483647, %v4198_v26  ;;  %v12925_v20 = vld [vmem:[#allocation170_spill] sm:$0xff]  ;;  %v12926_v44 = vld [vmem:[#allocation164_spill] sm:$0xff] }
 0x3eb   :  { %v4201_v40 = vcvt.s32.f32 %v4194_v7  ;;  %v4212_v12 = vadd.s32 3, %v4208_v51  ;;  %v6209_v6 = vpop.eup %6208  ;;  %v11397_v16 = vsub.s32 %v4491_v59, %v4494_v17  ;;  %v4335_v34 = vor.u32 8388608, %v4334_v45  ;;  %v12924_v7 = vld [vmem:[#allocation169_spill] sm:$0xff] }
 0x3ec   :  { %v4343_v21 = vshrl.u32 %v12461_v2, %v12919_v31  ;;  %vm4359_vm13 = vcmp.lt.s32.totalorder %v12922_v42, 1  ;;  %v4323_v36 = vxor.u32 2147483648, %v6207_v22  ;;  %vm4360_vm6 = vcmp.lt.s32.totalorder %v12922_v42, 2 }
 0x3ed   :  { %v4202_v8 = vmul.f32 %v4201_v40, %v4199_v32  ;;  %vm4361_vm9 = vcmp.lt.s32.totalorder %v12922_v42, 3  ;;  %v4497_v9 = vsub.s32 0, %v11397_v16  ;;  %vm12923_vm12 = vcmp.lt.s32.totalorder %v12922_v42, 4 }
 0x3ee   :  { %v4364_v59 = vsel %vm12923_vm12, %v4352_v62, 2102212464  ;;  %v4367_v28 = vsel %vm4359_vm13, %v4346_v39, %v4349_v50  ;;  %v4369_v31 = vsel %vm4361_vm9, %v4352_v62, %v12924_v7  ;;  %v4320_v51 = vxor.u32 2147483648, %v6209_v6 }
 0x3ef   :  { %v4203_v45 = vxor.u32 2147483648, %v4202_v8  ;;  %v4371_v35 = vsel %vm4359_vm13, %v4349_v50, %v4352_v62  ;;  %v4373_v26 = vsel %vm4361_vm9, %v12926_v44, %v12925_v20  ;;  %v11420_v17 = vand.u32 3, %v4212_v12 }
 0x3f0   :  { %v5533_v32 = vmin.u32 %v4497_v9, %v11397_v16  ;;  %v4363_v40 = vsel %vm4359_vm13, %v4343_v21, %v4346_v39  ;;  %v4374_v7 = vsel %vm4360_vm6, %v4371_v35, %v4373_v26  ;;  %v4370_v62 = vsel %vm4360_vm6, %v4367_v28, %v4369_v31 }
 0x3f1   :  { %v4204_v46 = vsel %vm4121_vm8, %v4203_v45, %v4202_v8  ;;  %v4375_v13 = vshll.u32 %v4335_v34, 8  ;;  %v1574_v20 = vmul.f32 %v10939_v49, %v11091_v33  ;;  %v4324_v12 = vsel %vm4322_vm11, %v4323_v36, %v6209_v6 }
 0x3f2   :  { %v4207_v39 = vsel %vm11349_vm2, %v12891_v43, %v4204_v46  ;;  %v4499_v21 = vclz %v5533_v32  ;;  %v4365_v9 = vsel %vm4361_vm9, %v4349_v50, %v4364_v59  ;;  %v4321_v8 = vsel %vm4319_vm3, %v6207_v22, %v4320_v51  ;;  %v12927_v59 = vld [vmem:[#allocation30_spill] sm:$0xff] }
 0x3f3   :  { %6210 = vcosq.f32 %v4207_v39  ;;  %v11442_v28 = vmul.u32.u64.low %v4375_v13, %v4374_v7  ;;  %v11443_v34 = vmul.u32.u64.high %v4375_v13, %v4374_v7, %v11442_v28  ;;  %v5017_v61 = vsub.s32 0, %v11392_v23 }
 0x3f4   :  { %6212 = vsinq.f32 %v4207_v39  ;;  %v5534_v33 = vadd.s32 4294967294, %v4499_v21  ;;  %v11445_v31 = vmul.u32.u64.low %v4375_v13, %v4370_v62  ;;  %v11446_v45 = vmul.u32.u64.high %v4375_v13, %v4370_v62, %v11445_v31  ;;  %v12928_v62 = vld [vmem:[#allocation165_spill] sm:$0xff] }
 0x3f5   :  { %vm4315_vm1 = vweird.f32 %v12881_v38  ;;  %vm4318_vm15 = vcmp.lt.s32.totalorder %v11357_v18, 2  ;;  %v11453_v46 = vadd.f32 %v10972_v30, %v1574_v20  ;;  %vm4433_vm4 = vcmp.lt.s32.totalorder %v12901_v56, 0 }
 0x3f6   :  { %v4325_v22 = vsel %vm4318_vm15, %v4321_v8, %v4324_v12  ;;  %vm5535_vm14 = vcmp.lt.s32.totalorder %v5534_v33, 0  ;;  %v4366_v50 = vsel %vm4360_vm6, %v4363_v40, %v4365_v9  ;;  %vm4218_vm5 = vcmp.eq.s32.totalorder %v11420_v17, 2  ;;  %v12929_v8 = vld [vmem:[#allocation160_spill] sm:$0xff] }
 0x3f7   :  { %v4502_v6 = vsel %vm5535_vm14, 0, %v5534_v33  ;;  %vm4384_vm0 = vc.u32 %v11443_v34, %v11445_v31  ;;  %v12436_v36 = vmax.f32 %v11453_v46, 0.0  ;;  %v4639_v18 = vand.u32 2147483647, %v12927_v59 }
 0x3f8   :  { %vm4215_vm8 = vcmp.eq.s32.totalorder %v11420_v17, 0  ;;  %v4487_v51 = vadd.s32 %v11308_v4, %v11302_v27  ;;  %v4503_v35 = vsub.s32 32, %v4502_v6  ;;  %v4507_v44 = vsub.s32 4294967266, %v4502_v6 }
 0x3f9   :  { %v4385_v42 = vadd.s32 1, %v11446_v45  ;;  %v4326_v26 = vsel %vm4315_vm1, nan, %v4325_v22  ;;  %vm4214_vm7 = vcmp.lt.s32.totalorder %v11420_v17, 2  ;;  %v4504_v32 = vshll.u32 %v11397_v16, %v4502_v6  ;;  %1677 = vst [vmem:[%s12111_s13 + $0xd8] sm:$0xff] %v12436_v36 }
 0x3fa   :  { %v4517_v40 = vsub.s32 4, %v11375_v25  ;;  %v4382_v7 = vmul.u32 %v4375_v13, %v4366_v50  ;;  %vm4211_vm10 = vweird.f32 %v12891_v43  ;;  %v4505_v27 = vshrl.u32 %v4487_v51, %v4503_v35 }
 0x3fb   :  { %v4508_v4 = vadd.s32 127, %v4507_v44  ;;  %v4386_v38 = vsel %vm4384_vm0, %v4385_v42, %v11446_v45  ;;  %v4660_v16 = vshrl.u32 %v12557_v41, %v12928_v62  ;;  %v4646_v13 = vand.u32 8388607, %v4639_v18 }
 0x3fc   :  { %v4387_v20 = vadd.s32 %v4386_v38, %v4382_v7  ;;  %v4657_v12 = vshrl.u32 %v12649_v29, %v12928_v62  ;;  %v4663_v39 = vshrl.u32 %v12470_v11, %v12928_v62  ;;  %v4506_v21 = vor.u32 %v4505_v27, %v4504_v32 }
 0x3fd   :  { %v4509_v9 = vshll.u32 %v4508_v4, 23  ;;  %v4659_v28 = vshll.u32 %v12649_v29, %v12929_v8  ;;  %v4662_v33 = vshll.u32 %v12557_v41, %v12929_v8  ;;  %v6211_v45 = vpop.eup %6210  ;;  %v5182_v22 = vadd.f32 %v4326_v26, %v1641_v14 }
 0x3fe   :  { %v4518_v50 = vsel %vm4433_vm4, %v4517_v40, %v11375_v25  ;;  %v4388_v6 = vadd.s32 536870912, %v4387_v20  ;;  %v4656_v51 = vshll.u32 %v12461_v2, %v12929_v8  ;;  %v6213_v35 = vpop.eup %6212  ;;  %v4219_v44 = vxor.u32 2147483648, %v6211_v45 }
 0x3ff   :  { %v4510_v42 = vor.u32 4788187, %v4509_v9  ;;  %v4661_v32 = vor.u32 %v4660_v16, %v4659_v28  ;;  %v4664_v7 = vor.u32 %v4663_v39, %v4662_v33  ;;  %v4216_v27 = vxor.u32 2147483648, %v6213_v35  ;;  %v12930_v16 = vld [vmem:[#allocation171_spill] sm:$0xff]  ;;  %v12932_v33 = vld [vmem:[#allocation49_spill] sm:$0xff] }
 0x400   :  { %v11501_v4 = vshrl.u32 %v4388_v6, 30  ;;  %v4655_v15 = vshrl.u32 %v12461_v2, %v12928_v62  ;;  %v4658_v14 = vor.u32 %v4657_v12, %v4656_v51  ;;  %v4220_v26 = vsel %vm4218_vm5, %v4219_v44, %v6213_v35 }
 0x401   :  { %v4511_v25 = vand.u32 2147483647, %v4510_v42  ;;  %v4513_v40 = vcvt.s32.f32 %v4506_v21  ;;  %v4647_v38 = vor.u32 8388608, %v4646_v13  ;;  %v4217_v8 = vsel %vm4215_vm8, %v6211_v45, %v4216_v27  ;;  %v12933_v45 = vld [vmem:[#allocation16_spill] sm:$0xff] }
 0x402   :  { %v4390_v9 = vshll.u32 %v11501_v4, 30  ;;  %vm4671_vm2 = vcmp.lt.s32.totalorder %v12930_v16, 1  ;;  %vm4673_vm3 = vcmp.lt.s32.totalorder %v12930_v16, 3  ;;  %v4221_v39 = vsel %vm4214_vm7, %v4217_v8, %v4220_v26  ;;  %v12935_v42 = vld [vmem:[#allocation40_spill] sm:$0xff] }
 0x403   :  { %v4514_v62 = vmul.f32 %v4513_v40, %v4511_v25  ;;  %vm12931_vm11 = vcmp.lt.s32.totalorder %v12930_v16, 4  ;;  %v4683_v28 = vsel %vm4671_vm2, %v4661_v32, %v4664_v7  ;;  %v4222_v13 = vsel %vm4211_vm10, nan, %v4221_v39 }
 0x404   :  { %v4676_v12 = vsel %vm12931_vm11, %v4664_v7, 2102212464  ;;  %v11518_v21 = vsub.s32 %v4387_v20, %v4390_v9  ;;  %vm4672_vm13 = vcmp.lt.s32.totalorder %v12930_v16, 2  ;;  %v4685_v6 = vsel %vm4673_vm3, %v12933_v45, %v12932_v33  ;;  %v11562_v33 = vpop.f32.mrb[28].mxu1 }
 0x405   :  { %v12934_v51 = vmax.f32 %v11103_v58, 0.0  ;;  %v4515_v17 = vxor.u32 2147483648, %v4514_v62  ;;  %v4679_v44 = vsel %vm4671_vm2, %v4658_v14, %v4661_v32  ;;  %v4681_v27 = vsel %vm4673_vm3, %v4664_v7, %v12935_v42 }
 0x406   :  { %v4393_v26 = vsub.s32 0, %v11518_v21  ;;  %v4675_v25 = vsel %vm4671_vm2, %v4655_v15, %v4658_v14  ;;  %v4677_v40 = vsel %vm4673_vm3, %v4661_v32, %v4676_v12  ;;  %v4686_v43 = vsel %vm4672_vm13, %v4683_v28, %v4685_v6  ;;  %v12939_v28 = vld [vmem:[#allocation151_spill] sm:$0xff] }
 0x407   :  { %v5181_v35 = vadd.f32 %v4222_v13, %v12934_v51  ;;  %v4516_v8 = vsel %vm4433_vm4, %v4515_v17, %v4514_v62  ;;  %v4687_v9 = vshll.u32 %v4647_v38, 8  ;;  %v1573_v58 = vmul.f32 %v10939_v49, %v11185_v52 }
 0x408   :  { %v5553_v39 = vmin.u32 %v5017_v61, %v11392_v23  ;;  %v12936_v7 = vand.u32 2147483647, %v12901_v56  ;;  %v5529_v32 = vmin.u32 %v4393_v26, %v11518_v21  ;;  %v4678_v12 = vsel %vm4672_vm13, %v4675_v25, %v4677_v40  ;;  %v12941_v25 = vld [vmem:[#allocation172_spill] sm:$0xff] }
 0x409   :  { %v5682_v20 = vpack.c.bf16 %v5182_v22, %v5181_v35  ;;  %v4682_v22 = vsel %vm4672_vm13, %v4679_v44, %v4681_v27  ;;  %v11550_v52 = vmul.u32.u64.low %v4687_v9, %v4686_v43  ;;  %v11551_v61 = vmul.u32.u64.high %v4687_v9, %v4686_v43, %v11550_v52 }
 0x40a   :  { %vm11538_vm6 = vcmp.le.f32.partialorder %v12936_v7, 0.7853982  ;;  %v11554_v14 = vadd.f32 %v10972_v30, %v1573_v58  ;;  %v4395_v62 = vclz %v5529_v32  ;;  %v12437_v13 = vand.u32 2147483647, %v12939_v28 }
 0x40b   :  { %5714 = vst [vmem:[%s12112_s14 + $0x58] sm:$0xff] %v5682_v20   ;;  %v4520_v49 = vsel %vm11538_vm6, 0, %v4518_v50  ;;  %v4519_v38 = vsel %vm11538_vm6, %v12901_v56, %v4516_v8  ;;  %v11565_v50 = vshrl.u32 %v10984_v63, 5  ;;  %v11574_v51 = vor.u32 %v11389_v47, %v11385_v60  ;;  %v12942_v20 = vld [vmem:[#allocation168_spill] sm:$0xff] }
 0x40c   :  { %v11567_v45 = vmul.u32.u64.low %v4687_v9, %v4682_v22  ;;  %v11568_v6 = vmul.u32.u64.high %v4687_v9, %v4682_v22, %v11567_v45  ;;  %v12434_v30 = vmax.f32 %v11554_v14, 0.0  ;;  %v12940_v16 = vmov 1326507024  }
 0x40d   :  { %v11578_v35 = vshrl.u32 %v12940_v16, %v11320_v48  ;;  %v5019_v17 = vclz %v5553_v39  ;;  %v5530_v44 = vadd.s32 4294967294, %v4395_v62  ;;  %6214 = vcosq.f32 %v4519_v38 }
 0x40e   :  { %v4524_v42 = vadd.s32 3, %v4520_v49  ;;  %v4383_v63 = vadd.s32 %v11445_v31, %v11443_v34  ;;  %v4694_v27 = vmul.u32 %v4687_v9, %v4678_v12  ;;  %1676 = vst [vmem:[%s12111_s13 + $0xd0] sm:$0xff] %v12434_v30  ;;  %6216 = vsinq.f32 %v4519_v38 }
 0x40f   :  { %vm5531_vm9 = vcmp.lt.s32.totalorder %v5530_v44, 0  ;;  %vm4696_vm12 = vc.u32 %v11551_v61, %v11567_v45  ;;  %v4542_v60 = vand.u32 8388607, %v12437_v13  ;;  %v4697_v26 = vadd.s32 1, %v11568_v6  ;;  %v12955_v13 = vld [vmem:[#allocation3_spill] sm:$0xff] }
 0x410   :  { %v4398_v47 = vsel %vm5531_vm9, 0, %v5530_v44  ;;  %v4553_v34 = vshrl.u32 %v12649_v29, %v12941_v25  ;;  %v4556_v31 = vshrl.u32 %v12557_v41, %v12941_v25  ;;  %v4552_v8 = vshll.u32 %v12461_v2, %v12942_v20 }
 0x411   :  { %v4399_v40 = vsub.s32 32, %v4398_v47  ;;  %v4403_v43 = vsub.s32 4294967266, %v4398_v47  ;;  %v4555_v9 = vshll.u32 %v12649_v29, %v12942_v20  ;;  %v4400_v58 = vshll.u32 %v11518_v21, %v4398_v47 }
 0x412   :  { %v4698_v39 = vsel %vm4696_vm12, %v4697_v26, %v11568_v6  ;;  %v4558_v7 = vshll.u32 %v12557_v41, %v12942_v20  ;;  %v4559_v15 = vshrl.u32 %v12470_v11, %v12941_v25  ;;  %v11606_v38 = vadd.s32 4294967294, %v5019_v17  ;;  %v12946_v17 = vld [vmem:[#allocation173_spill] sm:$0xff] }
 0x413   :  { %v4401_v32 = vshrl.u32 %v4383_v63, %v4399_v40  ;;  %v4404_v22 = vadd.s32 127, %v4403_v43  ;;  %v4699_v49 = vadd.s32 %v4698_v39, %v4694_v27  ;;  %v4557_v52 = vor.u32 %v4556_v31, %v4555_v9  ;;  %v12948_v9 = vld [vmem:[#allocation177_spill] sm:$0xff] }
 0x414   :  { %v4413_v62 = vsub.s32 4, %v11501_v4  ;;  %v4554_v12 = vor.u32 %v4553_v34, %v4552_v8  ;;  %v4560_v16 = vor.u32 %v4559_v15, %v4558_v7  ;;  %vm4329_vm1 = vcmp.lt.s32.totalorder %v12916_v37, 0  ;;  %v12947_v8 = vld [vmem:[#allocation51_spill] sm:$0xff] }
 0x415   :  { %v4402_v21 = vor.u32 %v4401_v32, %v4400_v58  ;;  %v4405_v6 = vshll.u32 %v4404_v22, 23  ;;  %v4700_v44 = vadd.s32 536870912, %v4699_v49  ;;  %v11610_v47 = vand.u32 3, %v4524_v42  ;;  %v12949_v58 = vld [vmem:[#allocation34_spill] sm:$0xff] }
 0x416   :  { %v12943_v26 = vand.u32 2147483647, %v12916_v37  ;;  %v4543_v27 = vor.u32 8388608, %v4542_v60  ;;  %vm4567_vm4 = vcmp.lt.s32.totalorder %v12946_v17, 1  ;;  %vm4569_vm14 = vcmp.lt.s32.totalorder %v12946_v17, 3 }
 0x417   :  { %v4406_v31 = vor.u32 4788187, %v4405_v6  ;;  %v11619_v40 = vshrl.u32 %v4700_v44, 30  ;;  %v4579_v34 = vsel %vm4567_vm4, %v4557_v52, %v4560_v16  ;;  %v6215_v43 = vpop.eup %6214  ;;  %v4414_v42 = vsel %vm4329_vm1, %v4413_v62, %v11501_v4 }
 0x418   :  { %vm11614_vm15 = vcmp.le.f32.partialorder %v12943_v26, 0.7853982  ;;  %v4575_v20 = vsel %vm4567_vm4, %v4554_v12, %v4557_v52  ;;  %v4577_v60 = vsel %vm4569_vm14, %v4560_v16, %v12947_v8  ;;  %v4581_v39 = vsel %vm4569_vm14, %v12949_v58, %v12948_v9  ;;  %v6217_v7 = vpop.eup %6216  ;;  %v11650_v9 = vpop.f32.mrb[29].mxu1 }
 0x419   :  { %v4407_v15 = vand.u32 2147483647, %v4406_v31  ;;  %v4409_v32 = vcvt.s32.f32 %v4402_v21  ;;  %v4702_v22 = vshll.u32 %v11619_v40, 30  ;;  %vm4568_vm5 = vcmp.lt.s32.totalorder %v12946_v17, 2 }
 0x41a   :  { %v4551_v4 = vshrl.u32 %v12461_v2, %v12941_v25  ;;  %vm12950_vm0 = vcmp.lt.s32.totalorder %v12946_v17, 4  ;;  %v4582_v6 = vsel %vm4568_vm5, %v4579_v34, %v4581_v39  ;;  %v4583_v44 = vshll.u32 %v4543_v27, 8 }
 0x41b   :  { %v4572_v62 = vsel %vm12950_vm0, %v4560_v16, 2102212464  ;;  %v4410_v26 = vmul.f32 %v4409_v32, %v4407_v15  ;;  %v4416_v8 = vsel %vm11614_vm15, 0, %v4414_v42  ;;  %v11646_v31 = vsub.s32 %v4699_v49, %v4702_v22 }
 0x41c   :  { %v4578_v21 = vsel %vm4568_vm5, %v4575_v20, %v4577_v60  ;;  %v4531_v58 = vxor.u32 2147483648, %v6215_v43  ;;  %v4571_v25 = vsel %vm4567_vm4, %v4551_v4, %v4554_v12  ;;  %v4528_v34 = vxor.u32 2147483648, %v6217_v7  ;;  %v11668_v12 = vld [vmem:[%s12109_s8] ss:$0 sm:$0xff] }
 0x41d   :  { %v11654_v16 = vmul.u32.u64.low %v4583_v44, %v4582_v6  ;;  %v11655_v30 = vmul.u32.u64.high %v4583_v44, %v4582_v6, %v11654_v16  ;;  %v4411_v27 = vxor.u32 2147483648, %v4410_v26  ;;  %v4705_v39 = vsub.s32 0, %v11646_v31 }
 0x41e   :  { %v4573_v49 = vsel %vm4569_vm14, %v4557_v52, %v4572_v62  ;;  %vm4523_vm8 = vweird.f32 %v12901_v56  ;;  %v4420_v42 = vadd.s32 3, %v4416_v8  ;;  %v1576_v15 = vmul.f32 %v11668_v12, %v11304_v0  ;;  %v11685_v0 = vld [vmem:[%s12110_s9] ss:$0 sm:$0xff] }
 0x41f   :  { %v11661_v20 = vmul.u32.u64.low %v4583_v44, %v4578_v21  ;;  %v11662_v60 = vmul.u32.u64.high %v4583_v44, %v4578_v21, %v11661_v20  ;;  %vm4527_vm7 = vcmp.eq.s32.totalorder %v11610_v47, 0  ;;  %vm4530_vm10 = vcmp.eq.s32.totalorder %v11610_v47, 2 }
 0x420   :  { %v4412_v52 = vsel %vm4329_vm1, %v4411_v27, %v4410_v26  ;;  %v5541_v32 = vmin.u32 %v4705_v39, %v11646_v31  ;;  %v4532_v22 = vsel %vm4530_vm10, %v4531_v58, %v6217_v7  ;;  %v4574_v62 = vsel %vm4568_vm5, %v4571_v25, %v4573_v49  ;;  %v12952_v39 = vld [vmem:[#allocation174_spill] sm:$0xff] }
 0x421   :  { %v4415_v4 = vsel %vm11614_vm15, %v12916_v37, %v4412_v52  ;;  %v11688_v6 = vadd.f32 %v11685_v0, %v1576_v15  ;;  %v4529_v8 = vsel %vm4527_vm7, %v6215_v43, %v4528_v34  ;;  %vm4592_vm2 = vc.u32 %v11655_v30, %v11661_v20  ;;  %v12951_v34 = vld [vmem:[#allocation155_spill] sm:$0xff] }
 0x422   :  { %6218 = vcosq.f32 %v4415_v4  ;;  %v4707_v26 = vclz %v5541_v32  ;;  %v11692_v63 = vand.u32 3, %v4420_v42  ;;  %v4593_v17 = vadd.s32 1, %v11662_v60  ;;  %v12953_v42 = vld [vmem:[#allocation37_spill] sm:$0xff] }
 0x423   :  { %6220 = vsinq.f32 %v4415_v4  ;;  %v12435_v7 = vmax.f32 %v11688_v6, 0.0  ;;  %vm4526_vm3 = vcmp.lt.s32.totalorder %v11610_v47, 2  ;;  %v4695_v21 = vadd.s32 %v11567_v45, %v11551_v61 }
 0x424   :  { %v5542_v58 = vadd.s32 4294967294, %v4707_v26  ;;  %v4590_v25 = vmul.u32 %v4583_v44, %v4574_v62  ;;  %v4533_v43 = vsel %vm4526_vm3, %v4529_v8, %v4532_v22  ;;  %v4594_v16 = vsel %vm4592_vm2, %v4593_v17, %v11662_v60 }
 0x425   :  { %1679 = vst [vmem:[%s12111_s13 + $0xe8] sm:$0xff] %v12435_v7  ;;  %v12438_v27 = vand.u32 2147483647, %v12951_v34  ;;  %v4865_v49 = vshrl.u32 %v12649_v29, %v12952_v39  ;;  %v4864_v61 = vshll.u32 %v12461_v2, %v12953_v42  ;;  %v4868_v45 = vshrl.u32 %v12557_v41, %v12952_v39 }
 0x426   :  { %vm5543_vm11 = vcmp.lt.s32.totalorder %v5542_v58, 0  ;;  %v4595_v47 = vadd.s32 %v4594_v16, %v4590_v25  ;;  %vm4423_vm13 = vcmp.eq.s32.totalorder %v11692_v63, 0  ;;  %v4867_v60 = vshll.u32 %v12649_v29, %v12953_v42 }
 0x427   :  { %v4710_v44 = vsel %vm5543_vm11, 0, %v5542_v58  ;;  %v4870_v15 = vshll.u32 %v12557_v41, %v12953_v42  ;;  %v4871_v52 = vshrl.u32 %v12470_v11, %v12952_v39  ;;  %v4534_v32 = vsel %vm4523_vm8, nan, %v4533_v43 }
 0x428   :  { %vm4422_vm6 = vcmp.lt.s32.totalorder %v11692_v63, 2  ;;  %v4711_v22 = vsub.s32 32, %v4710_v44  ;;  %v4715_v4 = vsub.s32 4294967266, %v4710_v44  ;;  %v4596_v62 = vadd.s32 536870912, %v4595_v47 }
 0x429   :  { %vm4419_vm9 = vweird.f32 %v12916_v37  ;;  %v4854_v8 = vand.u32 8388607, %v12438_v27  ;;  %v4866_v26 = vor.u32 %v4865_v49, %v4864_v61  ;;  %v4869_v17 = vor.u32 %v4868_v45, %v4867_v60  ;;  %v12956_v60 = vld [vmem:[#allocation179_spill] sm:$0xff] }
 0x42a   :  { %v4872_v58 = vor.u32 %v4871_v52, %v4870_v15  ;;  %v4712_v25 = vshll.u32 %v11646_v31, %v4710_v44  ;;  %v4713_v16 = vshrl.u32 %v4695_v21, %v4711_v22  ;;  %v4716_v42 = vadd.s32 127, %v4715_v4 }
 0x42b   :  { %v11726_v7 = vshrl.u32 %v4596_v62, 30  ;;  %v12954_v56 = vmax.f32 %v11217_v54, 0.0  ;;  %vm4426_vm12 = vcmp.eq.s32.totalorder %v11692_v63, 2  ;;  %v4863_v36 = vshrl.u32 %v12461_v2, %v12952_v39 }
 0x42c   :  { %vm4879_vm1 = vcmp.lt.s32.totalorder %v12955_v13, 1  ;;  %v6219_v27 = vpop.eup %6218  ;;  %v4714_v49 = vor.u32 %v4713_v16, %v4712_v25  ;;  %v4717_v61 = vshll.u32 %v4716_v42, 23  ;;  %vm4881_vm15 = vcmp.lt.s32.totalorder %v12955_v13, 3  ;;  %v12959_v25 = vld [vmem:[#allocation175_spill] sm:$0xff] }
 0x42d   :  { %v5184_v43 = vadd.f32 %v4534_v32, %v12954_v56  ;;  %v4598_v45 = vshll.u32 %v11726_v7, 30  ;;  %v6221_v31 = vpop.eup %6220  ;;  %v4427_v21 = vxor.u32 2147483648, %v6219_v27  ;;  %v4855_v44 = vor.u32 8388608, %v4854_v8  ;;  %v12958_v8 = vld [vmem:[#allocation4_spill] sm:$0xff] }
 0x42e   :  { %v4887_v54 = vsel %vm4879_vm1, %v4866_v26, %v4869_v17  ;;  %v4889_v15 = vsel %vm4881_vm15, %v4872_v58, %v12956_v60  ;;  %v4424_v39 = vxor.u32 2147483648, %v6221_v31  ;;  %v4718_v52 = vor.u32 4788187, %v4717_v61 }
 0x42f   :  { %v11741_v32 = vsub.s32 %v4595_v47, %v4598_v45  ;;  %v4891_v22 = vsel %vm4879_vm1, %v4869_v17, %v4872_v58  ;;  %v4428_v4 = vsel %vm4426_vm12, %v4427_v21, %v6221_v31  ;;  %vm4880_vm4 = vcmp.lt.s32.totalorder %v12955_v13, 2 }
 0x430   :  { %vm12957_vm14 = vcmp.lt.s32.totalorder %v12955_v13, 4  ;;  %v4893_v16 = vsel %vm4881_vm15, %v12959_v25, %v12958_v8  ;;  %v4425_v47 = vsel %vm4423_vm13, %v6219_v27, %v4424_v39  ;;  %v4719_v42 = vand.u32 2147483647, %v4718_v52 }
 0x431   :  { %v4884_v62 = vsel %vm12957_vm14, %v4872_v58, 2102212464  ;;  %v4721_v56 = vcvt.s32.f32 %v4714_v49  ;;  %v4601_v61 = vsub.s32 0, %v11741_v32  ;;  %v4429_v45 = vsel %vm4422_vm6, %v4425_v47, %v4428_v4 }
 0x432   :  { %v4890_v31 = vsel %vm4880_vm4, %v4887_v54, %v4889_v15  ;;  %v4894_v58 = vsel %vm4880_vm4, %v4891_v22, %v4893_v16  ;;  %v4895_v21 = vshll.u32 %v4855_v44, 8  ;;  %v4430_v60 = vsel %vm4419_vm9, nan, %v4429_v45 }
 0x433   :  { %v4722_v8 = vmul.f32 %v4721_v56, %v4719_v42  ;;  %v5537_v27 = vmin.u32 %v4601_v61, %v11741_v32  ;;  %v4883_v49 = vsel %vm4879_vm1, %v4863_v36, %v4866_v26  ;;  %v12960_v39 = vmax.f32 %v11341_v10, 0.0 }
 0x434   :  { %v4885_v52 = vsel %vm4881_vm15, %v4869_v17, %v4884_v62  ;;  %v11772_v54 = vmul.u32.u64.low %v4895_v21, %v4894_v58  ;;  %v11773_v15 = vmul.u32.u64.high %v4895_v21, %v4894_v58, %v11772_v54  ;;  %v5084_v25 = vshll.u32 %v12921_v24, %v11094_v3 }
 0x435   :  { %v5183_v63 = vadd.f32 %v4430_v60, %v12960_v39  ;;  %v4723_v22 = vxor.u32 2147483648, %v4722_v8  ;;  %v4603_v44 = vclz %v5537_v27  ;;  %vm5090_vm5 = vcmp.lt.s32.totalorder %v11565_v50, 4  ;;  %v12963_v39 = vld [vmem:[#allocation161_spill] sm:$0xff] }
 0x436   :  { %v11775_v4 = vmul.u32.u64.low %v4895_v21, %v4890_v31  ;;  %v11776_v37 = vmul.u32.u64.high %v4895_v21, %v4890_v31, %v11775_v4  ;;  %vm4641_vm0 = vcmp.lt.s32.totalorder %v12927_v59, 0  ;;  %v4886_v17 = vsel %vm4880_vm4, %v4883_v49, %v4885_v52 }
 0x437   :  { %v5687_v36 = vpack.c.bf16 %v5184_v43, %v5183_v63  ;;  %v4724_v10 = vsel %vm4641_vm0, %v4723_v22, %v4722_v8  ;;  %v5538_v26 = vadd.s32 4294967294, %v4603_v44  ;;  %v1575_v62 = vmul.f32 %v11668_v12, %v11404_v1  ;;  %v12964_v63 = vld [vmem:[#allocation176_spill] sm:$0xff] }
 0x438   :  { %v5086_v16 = vor.u32 %v11578_v35, %v5084_v25  ;;  %v11793_v24 = vsel %vm5090_vm5, %v11574_v51, 920167782  ;;  %v4725_v43 = vsub.s32 4, %v11619_v40  ;;  %vm4904_vm8 = vc.u32 %v11773_v15, %v11775_v4 }
 0x439   :  { %5715 = vst [vmem:[%s12112_s14 + $0x60] sm:$0xff] %v5687_v36   ;;  %vm5555_vm7 = vcmp.lt.s32.totalorder %v11606_v38, 0  ;;  %vm11804_vm10 = vcmp.le.f32.partialorder %v4639_v18, 0.7853982  ;;  %vm5539_vm2 = vcmp.lt.s32.totalorder %v5538_v26, 0  ;;  %v4905_v13 = vadd.s32 1, %v11776_v37 }
 0x43a   :  { %v11810_v35 = vadd.f32 %v11685_v0, %v1575_v62  ;;  %v4727_v47 = vsel %vm11804_vm10, %v12927_v59, %v4724_v10  ;;  %v4591_v42 = vadd.s32 %v11661_v20, %v11655_v30  ;;  %v4606_v56 = vsel %vm5539_vm2, 0, %v5538_v26  ;;  %v12968_v10 = vld [vmem:[#allocation43_spill] sm:$0xff] }
 0x43b   :  { %v4902_v61 = vmul.u32 %v4895_v21, %v4886_v17  ;;  %v4607_v45 = vsub.s32 32, %v4606_v56  ;;  %v4611_v18 = vsub.s32 4294967266, %v4606_v56  ;;  %v4621_v31 = vsub.s32 4, %v11726_v7 }
 0x43c   :  { %v4906_v58 = vsel %vm4904_vm8, %v4905_v13, %v11776_v37  ;;  %v4726_v60 = vsel %vm4641_vm0, %v4725_v43, %v11619_v40  ;;  %vm4537_vm3 = vcmp.lt.s32.totalorder %v12939_v28, 0  ;;  %v1646_v27 = vmax.f32 %v11810_v35, 0.0 }
 0x43d   :  { %v4907_v8 = vadd.s32 %v4906_v58, %v4902_v61  ;;  %6222 = vcosq.f32 %v4727_v47  ;;  %v4608_v30 = vshll.u32 %v11741_v32, %v4606_v56  ;;  %v4609_v20 = vshrl.u32 %v4591_v42, %v4607_v45 }
 0x43e   :  { %v4612_v21 = vadd.s32 127, %v4611_v18  ;;  %6224 = vsinq.f32 %v4727_v47  ;;  %1678 = vst [vmem:[%s12111_s13 + $0xe0] sm:$0xff] %v1646_v27  ;;  %v4743_v40 = vand.u32 2147483647, %v12963_v39  ;;  %v4761_v52 = vshrl.u32 %v12649_v29, %v12964_v63 }
 0x43f   :  { %v4908_v49 = vadd.s32 536870912, %v4907_v8  ;;  %v4610_v54 = vor.u32 %v4609_v20, %v4608_v30  ;;  %v4622_v32 = vsel %vm4537_vm3, %v4621_v31, %v11726_v7  ;;  %v4764_v44 = vshrl.u32 %v12557_v41, %v12964_v63 }
 0x440   :  { %v4613_v22 = vshll.u32 %v4612_v21, 23  ;;  %v12965_v37 = vand.u32 2147483647, %v12939_v28  ;;  %v4760_v26 = vshll.u32 %v12461_v2, %v12968_v10  ;;  %v4767_v17 = vshrl.u32 %v12470_v11, %v12964_v63 }
 0x441   :  { %v11844_v36 = vshrl.u32 %v4908_v49, 30  ;;  %v4728_v7 = vsel %vm11804_vm10, 0, %v4726_v60  ;;  %v4763_v43 = vshll.u32 %v12649_v29, %v12968_v10  ;;  %v4766_v13 = vshll.u32 %v12557_v41, %v12968_v10 }
 0x442   :  { %vm11840_vm11 = vcmp.le.f32.partialorder %v12965_v37, 0.7853982  ;;  %v4614_v62 = vor.u32 4788187, %v4613_v22  ;;  %v4750_v56 = vand.u32 8388607, %v4743_v40  ;;  %v4762_v61 = vor.u32 %v4761_v52, %v4760_v26 }
 0x443   :  { %v4624_v47 = vsel %vm11840_vm11, 0, %v4622_v32  ;;  %v4910_v42 = vshll.u32 %v11844_v36, 30  ;;  %v4617_v18 = vcvt.s32.f32 %v4610_v54  ;;  %v4765_v1 = vor.u32 %v4764_v44, %v4763_v43  ;;  %v12970_v37 = vld [vmem:[#allocation13_spill] sm:$0xff] }
 0x444   :  { %v4615_v45 = vand.u32 2147483647, %v4614_v62  ;;  %v4768_v31 = vor.u32 %v4767_v17, %v4766_v13  ;;  %v11863_v58 = vsel %vm5090_vm5, %v5086_v16, 1326507024  ;;  %v11868_v60 = vsel %vm5555_vm7, 0, %v11606_v38  ;;  %v12969_v16 = vld [vmem:[#allocation17_spill] sm:$0xff] }
 0x445   :  { %v4732_v30 = vadd.s32 3, %v4728_v7  ;;  %v11870_v20 = vsub.s32 %v4907_v8, %v4910_v42  ;;  %v4628_v49 = vadd.s32 3, %v4624_v47  ;;  %v4759_v52 = vshrl.u32 %v12461_v2, %v12964_v63 }
 0x446   :  { %v4618_v21 = vmul.f32 %v4617_v18, %v4615_v45  ;;  %vm4777_vm13 = vcmp.lt.s32.totalorder %v12914_v55, 3  ;;  %v4751_v22 = vor.u32 8388608, %v4750_v56  ;;  %vm4775_vm6 = vcmp.lt.s32.totalorder %v12914_v55, 1 }
 0x447   :  { %v4913_v54 = vsub.s32 0, %v11870_v20  ;;  %v4789_v38 = vsel %vm4777_vm13, %v12969_v16, %v11317_v53  ;;  %v6223_v32 = vpop.eup %6222  ;;  %v4783_v44 = vsel %vm4775_vm6, %v4762_v61, %v4765_v1  ;;  %v4785_v10 = vsel %vm4777_vm13, %v4768_v31, %v12970_v37 }
 0x448   :  { %v4619_v8 = vxor.u32 2147483648, %v4618_v21  ;;  %v4787_v63 = vsel %vm4775_vm6, %v4765_v1, %v4768_v31  ;;  %v6225_v26 = vpop.eup %6224  ;;  %v4733_v17 = vand.u32 3, %v4732_v30  ;;  %vm4776_vm9 = vcmp.lt.s32.totalorder %v12914_v55, 2 }
 0x449   :  { %v5549_v7 = vmin.u32 %v4913_v54, %v11870_v20  ;;  %vm12971_vm12 = vcmp.lt.s32.totalorder %v12914_v55, 4  ;;  %v11890_v43 = vand.u32 3, %v4628_v49  ;;  %v4779_v13 = vsel %vm4775_vm6, %v4759_v52, %v4762_v61 }
 0x44a   :  { %v4780_v62 = vsel %vm12971_vm12, %v4768_v31, 2102212464  ;;  %v4620_v53 = vsel %vm4537_vm3, %v4619_v8, %v4618_v21  ;;  %v4790_v47 = vsel %vm4776_vm9, %v4787_v63, %v4789_v38  ;;  %v4786_v45 = vsel %vm4776_vm9, %v4783_v44, %v4785_v10  ;;  %v12972_v63 = vld [vmem:[#allocation181_spill] sm:$0xff] }
 0x44b   :  { %v4623_v42 = vsel %vm11840_vm11, %v12939_v28, %v4620_v53  ;;  %v4915_v56 = vclz %v5549_v7  ;;  %v4791_v18 = vshll.u32 %v4751_v22, 8  ;;  %v4736_v30 = vxor.u32 2147483648, %v6225_v26 }
 0x44c   :  { %v4739_v31 = vxor.u32 2147483648, %v6223_v32  ;;  %6226 = vcosq.f32 %v4623_v42  ;;  %v4781_v21 = vsel %vm4777_vm13, %v4765_v1, %v4780_v62  ;;  %v5027_v54 = vsub.s32 4294967266, %v11868_v60 }
 0x44d   :  { %6228 = vsinq.f32 %v4623_v42  ;;  %v5550_v61 = vadd.s32 4294967294, %v4915_v56  ;;  %v11901_v49 = vmul.u32.u64.low %v4791_v18, %v4790_v47  ;;  %v11902_v52 = vmul.u32.u64.high %v4791_v18, %v4790_v47, %v11901_v49 }
 0x44e   :  { %v11905_v25 = vmul.u32.u64.low %v4791_v18, %v4786_v45  ;;  %v11906_v16 = vmul.u32.u64.high %v4791_v18, %v4786_v45, %v11905_v25  ;;  %v1578_v22 = vmul.f32 %v11668_v12, %v11562_v33  ;;  %vm4731_vm1 = vweird.f32 %v12927_v59 }
 0x44f   :  { %vm4734_vm15 = vcmp.lt.s32.totalorder %v4733_v17, 2  ;;  %vm4735_vm4 = vcmp.eq.s32.totalorder %v4733_v17, 0  ;;  %vm5551_vm14 = vcmp.lt.s32.totalorder %v5550_v61, 0  ;;  %vm4738_vm0 = vcmp.eq.s32.totalorder %v4733_v17, 2 }
 0x450   :  { %v4918_v1 = vsel %vm5551_vm14, 0, %v5550_v61  ;;  %v4782_v38 = vsel %vm4776_vm9, %v4779_v13, %v4781_v21  ;;  %v11915_v8 = vadd.f32 %v11685_v0, %v1578_v22  ;;  %v4737_v44 = vsel %vm4735_vm4, %v6223_v32, %v4736_v30 }
 0x451   :  { %v4740_v37 = vsel %vm4738_vm0, %v4739_v31, %v6225_v26  ;;  %vm4631_vm8 = vcmp.eq.s32.totalorder %v11890_v43, 0  ;;  %v4923_v10 = vsub.s32 4294967266, %v4918_v1  ;;  %v5055_v33 = vand.u32 2147483647, %v12972_v63 }
 0x452   :  { %vm4630_vm7 = vcmp.lt.s32.totalorder %v11890_v43, 2  ;;  %v4919_v7 = vsub.s32 32, %v4918_v1  ;;  %vm4800_vm10 = vc.u32 %v11902_v52, %v11905_v25  ;;  %v4801_v62 = vadd.s32 1, %v11906_v16 }
 0x453   :  { %v1649_v55 = vmax.f32 %v11915_v8, 0.0  ;;  %vm4627_vm2 = vweird.f32 %v12939_v28  ;;  %v4903_v32 = vadd.s32 %v11775_v4, %v11773_v15  ;;  %v4924_v26 = vadd.s32 127, %v4923_v10 }
 0x454   :  { %v4798_v53 = vmul.u32 %v4791_v18, %v4782_v38  ;;  %v5073_v13 = vshrl.u32 %v12649_v29, %v11320_v48  ;;  %v4741_v47 = vsel %vm4734_vm15, %v4737_v44, %v4740_v37  ;;  %v4802_v42 = vsel %vm4800_vm10, %v4801_v62, %v11906_v16 }
 0x455   :  { %1681 = vst [vmem:[%s12111_s13 + $0xf8] sm:$0xff] %v1649_v55  ;;  %v5076_v56 = vshrl.u32 %v12557_v41, %v11320_v48  ;;  %v5079_v15 = vshrl.u32 %v12470_v11, %v11320_v48  ;;  %v4925_v4 = vshll.u32 %v4924_v26, 23  ;;  %v5072_v17 = vshll.u32 %v12461_v2, %v11094_v3 }
 0x456   :  { %v4803_v45 = vadd.s32 %v4802_v42, %v4798_v53  ;;  %v5075_v18 = vshll.u32 %v12649_v29, %v11094_v3  ;;  %v6227_v30 = vpop.eup %6226  ;;  %vm4634_vm3 = vcmp.eq.s32.totalorder %v11890_v43, 2  ;;  %v4921_v31 = vshrl.u32 %v4903_v32, %v4919_v7 }
 0x457   :  { %v5062_v21 = vand.u32 8388607, %v5055_v33  ;;  %v5078_v61 = vshll.u32 %v12557_v41, %v11094_v3  ;;  %v6229_v49 = vpop.eup %6228  ;;  %v4635_v11 = vxor.u32 2147483648, %v6227_v30  ;;  %v5074_v22 = vor.u32 %v5073_v13, %v5072_v17 }
 0x458   :  { %v4804_v16 = vadd.s32 536870912, %v4803_v45  ;;  %v5077_v38 = vor.u32 %v5076_v56, %v5075_v18  ;;  %v4742_v44 = vsel %vm4731_vm1, nan, %v4741_v47  ;;  %v4632_v37 = vxor.u32 2147483648, %v6229_v49 }
 0x459   :  { %v4920_v29 = vshll.u32 %v11870_v20, %v4918_v1  ;;  %v5080_v10 = vor.u32 %v5079_v15, %v5078_v61  ;;  %v12973_v7 = vmax.f32 %v11453_v46, 0.0  ;;  %v4636_v32 = vsel %vm4634_vm3, %v4635_v11, %v6229_v49 }
 0x45a   :  { %v4926_v26 = vor.u32 4788187, %v4925_v4  ;;  %v11954_v53 = vshrl.u32 %v4804_v16, 30  ;;  %v4633_v41 = vsel %vm4631_vm8, %v6227_v30, %v4632_v37  ;;  %v5063_v13 = vor.u32 8388608, %v5062_v21 }
 0x45b   :  { %v5186_v62 = vadd.f32 %v4742_v44, %v12973_v7  ;;  %v4922_v3 = vor.u32 %v4921_v31, %v4920_v29  ;;  %vm5087_vm11 = vcmp.lt.s32.totalorder %v11565_v50, 1  ;;  %v4637_v59 = vsel %vm4630_vm7, %v4633_v41, %v4636_v32 }
 0x45c   :  { %v4806_v20 = vshll.u32 %v11954_v53, 30  ;;  %vm5089_vm13 = vcmp.lt.s32.totalorder %v11565_v50, 3  ;;  %v5095_v46 = vsel %vm5087_vm11, %v5074_v22, %v5077_v38  ;;  %v4638_v1 = vsel %vm4627_vm2, nan, %v4637_v59 }
 0x45d   :  { %v5097_v47 = vsel %vm5089_vm13, %v5080_v10, %v11793_v24  ;;  %v5099_v42 = vsel %vm5087_vm11, %v5077_v38, %v5080_v10  ;;  %v5101_v43 = vsel %vm5089_vm13, %v11574_v51, %v11863_v58  ;;  %v12974_v56 = vmax.f32 %v11554_v14, 0.0 }
 0x45e   :  { %v4927_v4 = vand.u32 2147483647, %v4926_v26  ;;  %v4807_v17 = vsub.s32 %v4803_v45, %v4806_v20  ;;  %vm5088_vm6 = vcmp.lt.s32.totalorder %v11565_v50, 2  ;;  %v5071_v28 = vshrl.u32 %v12461_v2, %v11320_v48 }
 0x45f   :  { %v5185_v15 = vadd.f32 %v4638_v1, %v12974_v56  ;;  %v5092_v24 = vsel %vm5090_vm5, %v5080_v10, 2102212464  ;;  %v5102_v18 = vsel %vm5088_vm6, %v5099_v42, %v5101_v43  ;;  %v5103_v30 = vshll.u32 %v5063_v13, 8 }
 0x460   :  { %v4929_v21 = vcvt.s32.f32 %v4922_v3  ;;  %v4809_v51 = vsub.s32 0, %v4807_v17  ;;  %v5098_v14 = vsel %vm5088_vm6, %v5095_v46, %v5097_v47  ;;  %v5091_v58 = vsel %vm5087_vm11, %v5071_v28, %v5074_v22 }
 0x461   :  { %v5692_v31 = vpack.c.bf16 %v5186_v62, %v5185_v15  ;;  %v11989_v45 = vmul.u32.u64.low %v5103_v30, %v5102_v18  ;;  %v11990_v61 = vmul.u32.u64.high %v5103_v30, %v5102_v18, %v11989_v45  ;;  %v5093_v49 = vsel %vm5089_vm13, %v5077_v38, %v5092_v24 }
 0x462   :  { %v4930_v2 = vmul.f32 %v4929_v21, %v4927_v4  ;;  %v5545_v48 = vmin.u32 %v4809_v51, %v4807_v17  ;;  %v1577_v11 = vmul.f32 %v11668_v12, %v11650_v9  ;;  %v5028_v16 = vadd.s32 127, %v5027_v54 }
 0x463   :  { %5716 = vst [vmem:[%s12112_s14 + $0x68] sm:$0xff] %v5692_v31   ;;  %v12001_v44 = vmul.u32.u64.low %v5103_v30, %v5098_v14  ;;  %v12002_v22 = vmul.u32.u64.high %v5103_v30, %v5098_v14, %v12001_v44  ;;  %v5023_v37 = vsub.s32 32, %v11868_v60  ;;  %v5094_v10 = vsel %vm5088_vm6, %v5091_v58, %v5093_v49 }
 0x464   :  { %v4811_v29 = vclz %v5545_v48  ;;  %v12009_v7 = vadd.f32 %v11685_v0, %v1577_v11  ;;  %v5007_v38 = vadd.s32 %v10673_v5, %v10664_v57  ;;  %v4931_v9 = vxor.u32 2147483648, %v4930_v2 }
 0x465   :  { %vm5112_vm5 = vc.u32 %v11990_v61, %v12001_v44  ;;  %v5029_v54 = vshll.u32 %v5028_v16, 23  ;;  %v5113_v62 = vadd.s32 1, %v12002_v22  ;;  %v5110_v50 = vmul.u32 %v5103_v30, %v5094_v10 }
 0x466   :  { %v5546_v12 = vadd.s32 4294967294, %v4811_v29  ;;  %v1648_v32 = vmax.f32 %v12009_v7, 0.0  ;;  %v5025_v26 = vshrl.u32 %v5007_v38, %v5023_v37  ;;  %vm4849_vm12 = vcmp.lt.s32.totalorder %v12951_v34, 0 }
 0x467   :  { %v4799_v0 = vadd.s32 %v11905_v25, %v11902_v52  ;;  %v5114_v57 = vsel %vm5112_vm5, %v5113_v62, %v12002_v22  ;;  %v4932_v5 = vsel %vm4849_vm12, %v4931_v9, %v4930_v2  ;;  %v5024_v20 = vshll.u32 %v11392_v23, %v11868_v60 }
 0x468   :  { %vm5547_vm9 = vcmp.lt.s32.totalorder %v5546_v12, 0  ;;  %1680 = vst [vmem:[%s12111_s13 + $0xf0] sm:$0xff] %v1648_v32  ;;  %v5115_v59 = vadd.s32 %v5114_v57, %v5110_v50  ;;  %v5030_v46 = vor.u32 4788187, %v5029_v54  ;;  %v12975_v52 = vand.u32 2147483647, %v12951_v34 }
 0x469   :  { %v4814_v41 = vsel %vm5547_vm9, 0, %v5546_v12  ;;  %v5026_v15 = vor.u32 %v5025_v26, %v5024_v20  ;;  %v4933_v23 = vsub.s32 4, %v11844_v36  ;;  %v4829_v58 = vsub.s32 4, %v11954_v53  ;;  %v12978_v26 = vld [vmem:[#allocation14_spill] sm:$0xff] }
 0x46a   :  { %v4815_v3 = vsub.s32 32, %v4814_v41  ;;  %v4819_v13 = vsub.s32 4294967266, %v4814_v41  ;;  %vm12032_vm1 = vcmp.le.f32.partialorder %v12975_v52, 0.7853982  ;;  %v4816_v1 = vshll.u32 %v4807_v17, %v4814_v41 }
 0x46b   :  { %v5116_v43 = vadd.s32 536870912, %v5115_v59  ;;  %v4935_v56 = vsel %vm12032_vm1, %v12951_v34, %v4932_v5  ;;  %v5031_v60 = vand.u32 2147483647, %v5030_v46  ;;  %v5033_v17 = vcvt.s32.f32 %v5026_v15 }
 0x46c   :  { %v4817_v47 = vshrl.u32 %v4799_v0, %v4815_v3  ;;  %v4820_v42 = vadd.s32 127, %v4819_v13  ;;  %6230 = vcosq.f32 %v4935_v56  ;;  %v4934_v14 = vsel %vm4849_vm12, %v4933_v23, %v11844_v36 }
 0x46d   :  { %v12039_v24 = vshrl.u32 %v5116_v43, 30  ;;  %6232 = vsinq.f32 %v4935_v56  ;;  %v5034_v45 = vmul.f32 %v5033_v17, %v5031_v60  ;;  %v4936_v49 = vsel %vm12032_vm1, 0, %v4934_v14 }
 0x46e   :  { %v4818_v4 = vor.u32 %v4817_v47, %v4816_v1  ;;  %v4821_v28 = vshll.u32 %v4820_v42, 23  ;;  %vm4745_vm15 = vcmp.lt.s32.totalorder %v12963_v39, 0  ;;  %vm4744_vm4 = vcmp.le.f32.partialorder %v4743_v40, 0.7853982 }
 0x46f   :  { %v5118_v30 = vshll.u32 %v12039_v24, 30  ;;  %v4830_v22 = vsel %vm4745_vm15, %v4829_v58, %v11954_v53  ;;  %v5035_v37 = vxor.u32 2147483648, %v5034_v45  ;;  %v4940_v10 = vadd.s32 3, %v4936_v49 }
 0x470   :  { %v4822_v18 = vor.u32 4788187, %v4821_v28  ;;  %v4825_v21 = vcvt.s32.f32 %v4818_v4  ;;  %v4832_v12 = vsel %vm4744_vm4, 0, %v4830_v22  ;;  %vm4953_vm14 = vcmp.lt.s32.totalorder %v12978_v26, 0 }
 0x471   :  { %v5119_v51 = vsub.s32 %v5115_v59, %v5118_v30  ;;  %v5036_v53 = vsel %vm4953_vm14, %v5035_v37, %v5034_v45  ;;  %v4941_v50 = vand.u32 3, %v4940_v10  ;;  %v4836_v0 = vadd.s32 3, %v4832_v12 }
 0x472   :  { %v4823_v31 = vand.u32 2147483647, %v4822_v18  ;;  %v5111_v40 = vadd.s32 %v12001_v44, %v11990_v61  ;;  %v12979_v52 = vand.u32 2147483647, %v12978_v26  ;;  %v5037_v56 = vsub.s32 4, %v11106_v19 }
 0x473   :  { %v5121_v48 = vsub.s32 0, %v5119_v51  ;;  %vm4943_vm7 = vcmp.eq.s32.totalorder %v4941_v50, 0  ;;  %vm4946_vm10 = vcmp.eq.s32.totalorder %v4941_v50, 2  ;;  %v4837_v1 = vand.u32 3, %v4836_v0 }
 0x474   :  { %v4826_v2 = vmul.f32 %v4825_v21, %v4823_v31  ;;  %vm12061_vm8 = vcmp.le.f32.partialorder %v12979_v52, 0.7853982  ;;  %vm4942_vm2 = vcmp.lt.s32.totalorder %v4941_v50, 2  ;;  %vm4939_vm3 = vweird.f32 %v12951_v34 }
 0x475   :  { %v5557_v16 = vmin.u32 %v5121_v48, %v5119_v51  ;;  %v5039_v61 = vsel %vm12061_vm8, %v12978_v26, %v5036_v53  ;;  %vm4842_vm11 = vcmp.eq.s32.totalorder %v4837_v1, 2  ;;  %vm4838_vm13 = vcmp.lt.s32.totalorder %v4837_v1, 2 }
 0x476   :  { %v4827_v11 = vxor.u32 2147483648, %v4826_v2  ;;  %v6231_v9 = vpop.eup %6230  ;;  %vm4839_vm6 = vcmp.eq.s32.totalorder %v4837_v1, 0  ;;  %v5038_v21 = vsel %vm4953_vm14, %v5037_v56, %v11106_v19  ;;  %v5141_v45 = vsub.s32 4, %v12039_v24 }
 0x477   :  { %v5123_v36 = vclz %v5557_v16  ;;  %v6233_v62 = vpop.eup %6232  ;;  %v4947_v5 = vxor.u32 2147483648, %v6231_v9  ;;  %v12982_v34 = vmax.f32 %v11688_v6, 0.0  ;;  %vm4835_vm5 = vweird.f32 %v12963_v39 }
 0x478   :  { %v4828_v29 = vsel %vm4745_vm15, %v4827_v11, %v4826_v2  ;;  %v4944_v57 = vxor.u32 2147483648, %v6233_v62  ;;  %v5040_v16 = vsel %vm12061_vm8, 0, %v5038_v21  ;;  %vm5057_vm9 = vcmp.lt.s32.totalorder %v12972_v63, 0 }
 0x479   :  { %v4831_v38 = vsel %vm4744_vm4, %v12963_v39, %v4828_v29  ;;  %v5558_v54 = vadd.s32 4294967294, %v5123_v36  ;;  %v4948_v47 = vsel %vm4946_vm10, %v4947_v5, %v6233_v62  ;;  %vm5056_vm12 = vcmp.le.f32.partialorder %v5055_v33, 0.7853982 }
 0x47a   :  { %6234 = vcosq.f32 %v4831_v38  ;;  %v4945_v44 = vsel %vm4943_vm7, %v6231_v9, %v4944_v57  ;;  %v5142_v6 = vsel %vm5057_vm9, %v5141_v45, %v12039_v24  ;;  %v5044_v29 = vadd.s32 3, %v5040_v16 }
 0x47b   :  { %6236 = vsinq.f32 %v4831_v38  ;;  %vm5559_vm0 = vcmp.lt.s32.totalorder %v5558_v54, 0  ;;  %v4949_v23 = vsel %vm4942_vm2, %v4945_v44, %v4948_v47  ;;  %v5144_v35 = vsel %vm5056_vm12, 0, %v5142_v6 }
 0x47c   :  { %v5126_v41 = vsel %vm5559_vm0, 0, %v5558_v54  ;;  %6238 = vcosq.f32 %v5039_v61  ;;  %v5148_v38 = vadd.s32 3, %v5144_v35  ;;  %vm5043_vm8 = vweird.f32 %v12978_v26 }
 0x47d   :  { %v5127_v3 = vsub.s32 32, %v5126_v41  ;;  %v5131_v13 = vsub.s32 4294967266, %v5126_v41  ;;  %v5128_v59 = vshll.u32 %v5119_v51, %v5126_v41  ;;  %6240 = vsinq.f32 %v5039_v61 }
 0x47e   :  { %v4950_v51 = vsel %vm4939_vm3, nan, %v4949_v23  ;;  %v5149_v24 = vand.u32 3, %v5148_v38  ;;  %vm5147_vm10 = vweird.f32 %v12972_v63 }
 0x47f   :  { %v5129_v20 = vshrl.u32 %v5111_v40, %v5127_v3  ;;  %v5132_v46 = vadd.s32 127, %v5131_v13  ;;  %v5188_v2 = vadd.f32 %v4950_v51, %v12982_v34 }
 0x480   :  { %vm5154_vm14 = vcmp.eq.s32.totalorder %v5149_v24, 2  ;;  %vm5151_vm0 = vcmp.eq.s32.totalorder %v5149_v24, 0  ;;  %vm5150_vm7 = vcmp.lt.s32.totalorder %v5149_v24, 2 }
 0x481   :  { %v5130_v42 = vor.u32 %v5129_v20, %v5128_v59  ;;  %v5133_v43 = vshll.u32 %v5132_v46, 23 }
 0x483   :  { %v5134_v4 = vor.u32 4788187, %v5133_v43  ;;  %v5137_v17 = vcvt.s32.f32 %v5130_v42 }
 0x484   :  { %v6235_v15 = vpop.eup %6234 }
 0x485   :  { %v6237_v28 = vpop.eup %6236  ;;  %v4843_v60 = vxor.u32 2147483648, %v6235_v15  ;;  %v5135_v30 = vand.u32 2147483647, %v5134_v4 }
 0x486   :  { %v4840_v18 = vxor.u32 2147483648, %v6237_v28  ;;  %v6239_v36 = vpop.eup %6238 }
 0x487   :  { %v4844_v31 = vsel %vm4842_vm11, %v4843_v60, %v6237_v28  ;;  %v5138_v58 = vmul.f32 %v5137_v17, %v5135_v30  ;;  %v6241_v10 = vpop.eup %6240  ;;  %v5051_v33 = vxor.u32 2147483648, %v6239_v36 }
 0x488   :  { %v4841_v14 = vsel %vm4839_vm6, %v6235_v15, %v4840_v18  ;;  %v5048_v9 = vxor.u32 2147483648, %v6241_v10 }
 0x489   :  { %v4845_v48 = vsel %vm4838_vm13, %v4841_v14, %v4844_v31  ;;  %v5139_v11 = vxor.u32 2147483648, %v5138_v58 }
 0x48a   :  { %v4846_v49 = vsel %vm4835_vm5, nan, %v4845_v48 }
 0x48b   :  { %v5187_v22 = vadd.f32 %v4846_v49, %v1646_v27  ;;  %v5140_v19 = vsel %vm5057_vm9, %v5139_v11, %v5138_v58  ;;  %v5045_v27 = vand.u32 3, %v5044_v29 }
 0x48c   :  { %v5143_v39 = vsel %vm5056_vm12, %v12972_v63, %v5140_v19 }
 0x48d   :  { %v5697_v37 = vpack.c.bf16 %v5188_v2, %v5187_v22  ;;  %6242 = vcosq.f32 %v5143_v39  ;;  %vm5047_vm1 = vcmp.eq.s32.totalorder %v5045_v27, 0  ;;  %vm5050_vm15 = vcmp.eq.s32.totalorder %v5045_v27, 2 }
 0x48e   :  { %6244 = vsinq.f32 %v5143_v39  ;;  %v5049_v12 = vsel %vm5047_vm1, %v6239_v36, %v5048_v9  ;;  %v5052_v54 = vsel %vm5050_vm15, %v5051_v33, %v6241_v10  ;;  %vm5046_vm4 = vcmp.lt.s32.totalorder %v5045_v27, 2 }
 0x48f   :  { %5717 = vst [vmem:[%s12112_s14 + $0x70] sm:$0xff] %v5697_v37   ;;  %v5053_v0 = vsel %vm5046_vm4, %v5049_v12, %v5052_v54 }
 0x490   :  { %v5054_v5 = vsel %vm5043_vm8, nan, %v5053_v0 }
 0x491   :  { %v5189_v13 = vadd.f32 %v5054_v5, %v1648_v32 }
 0x497   :  { %v6243_v62 = vpop.eup %6242 }
 0x498   :  { %v6245_v53 = vpop.eup %6244  ;;  %v5155_v50 = vxor.u32 2147483648, %v6243_v62 }
 0x499   :  { %v5152_v40 = vxor.u32 2147483648, %v6245_v53 }
 0x49a   :  { %v5156_v41 = vsel %vm5154_vm14, %v5155_v50, %v6245_v53 }
 0x49b   :  { %v5153_v57 = vsel %vm5151_vm0, %v6243_v62, %v5152_v40 }
 0x49c   :  { %v5157_v3 = vsel %vm5150_vm7, %v5153_v57, %v5156_v41 }
 0x49d   :  { %v5158_v59 = vsel %vm5147_vm10, nan, %v5157_v3 }
 0x49e   :  { %v5190_v20 = vadd.f32 %v5158_v59, %v1649_v55 }
 0x4a0   :  { %v5702_v46 = vpack.c.bf16 %v5190_v20, %v5189_v13 }
 0x4a2   :  { %5718 = vst [vmem:[%s12112_s14 + $0x78] sm:$0xff] %v5702_v46  }

// kernel: point_mlp_forward.3
= control target key start
LH: loop header
LB: loop body
LE: loop exit
PB: predicated region body
PF: predicated region fallthrough
CT: control target
= control target key end

     0   :  { %s3283_s13 = smov 0   ;;  %s3285_s14 = smov 0   ;;  %s4164_s0 = inlined_call_operand.vmem [shape: bf16[128,128], index: 0, kind: input, shape index: {}]   ;;  %s4165_s1 = inlined_call_operand.vmem [shape: bf16[2,128,128], index: 1, kind: input, shape index: {}]   ;;  %s4166_s2 = inlined_call_operand.vmem [shape: f32[128,128], index: 2, kind: input, shape index: {}]   ;;  %s4167_s3 = inlined_call_operand.vmem [shape: f32[1,128], index: 3, kind: input, shape index: {}]   ;;  %s4168_s4 = inlined_call_operand.vmem [shape: f32[128,128], index: 4, kind: input, shape index: {}]   ;;  %s4169_s5 = inlined_call_operand.vmem [shape: f32[1,128], index: 5, kind: input, shape index: {}]   ;;  %s4170_s6 = inlined_call_operand.vmem [shape: f32[128,128], index: 6, kind: input, shape index: {}]   ;;  %s4171_s7 = inlined_call_operand.vmem [shape: f32[1,128], index: 7, kind: input, shape index: {}]   ;;  %s4172_s8 = inlined_call_operand.vmem [shape: f32[128,128], index: 8, kind: input, shape index: {}]   ;;  %s4173_s9 = inlined_call_operand.vmem [shape: f32[1,128], index: 9, kind: input, shape index: {}]   ;;  %s4174_s10 = inlined_call_operand.vmem [shape: f32[2,128,128], index: 10, kind: output, shape index: {}]  }
   0x1   :  { %s3287_s15 = smov 0  }
   0x2 LB: > { %s32_s16 = sadd.s32 1, %s3219_s14  ;;  %p2359_p0 = scmp.ge.s32.totalorder %s3223_s15, 1  ;;  %s3223_s15 = sphi %s3287_s15, %s20_s15   ;;  %s3219_s14 = sphi %s3285_s14, %s4192_s14   ;;  %s3215_s13 = sphi %s3283_s13, %s4191_s13  }
   0x3   : > { %p34_p1 = scmp.ge.s32.totalorder %s32_s16, 2  ;;  %p331_p2 = scmp.lt.s32.totalorder %s3223_s15, 3 }
   0x5   : > { %s4194_s16 = smov (%p34_p1, %s32_s16), 0  ;;  %p332_p3 = pnand %p2359_p0, %p331_p2 }
   0x6   : > { %p374_p4 = scmp.lt.s32.totalorder (!%p332_p3), %s3215_s13, 1  ;;  %v3033_v0 = vld [vmem:[%s4164_s0] sm:$0xff] (!%p332_p3)   ;;  %v3034_v9 = vld [vmem:[%s4164_s0 + $0x8] sm:$0xff] (!%p332_p3)   ;;  %v3035_v10 = vld [vmem:[%s4164_s0 + $0x10] sm:$0xff] (!%p332_p3)   ;;  %vm393_vm0 = vcmask (!%p332_p3), 7168   ;;  %v3225_v16 = vmov (!%p332_p3), -inf  }
   0x7   : > { %335 = sbr.rel (%p332_p3) target bundleno = 1654 (0x676), region = 60  ;;  %2580 = vmatprep.mubr.bf16.mxu0 (!%p332_p3), %v3033_v0  ;;  %v3036_v11 = vld [vmem:[%s4164_s0 + $0x18] sm:$0xff] (!%p332_p3)   ;;  %v3037_v12 = vld [vmem:[%s4164_s0 + $0x20] sm:$0xff] (!%p332_p3)   ;;  %v3038_v13 = vld [vmem:[%s4164_s0 + $0x28] sm:$0xff] (!%p332_p3)   ;;  %396 = vst.msk [vmem:[#allocation2 + $0x10] sm:$0xff] (!%p332_p3), %vm393_vm0, %v3225_v16  ;;  %v3226_v26 = vmov (!%p332_p3), 0  }
   0x8   : > { %v3039_v14 = vld [vmem:[%s4164_s0 + $0x30] sm:$0xff] (!%p332_p3)   ;;  %v3040_v15 = vld [vmem:[%s4164_s0 + $0x38] sm:$0xff] (!%p332_p3)   ;;  %394 = vst.msk [vmem:[#allocation2] sm:$0xff] (!%p332_p3), %vm393_vm0, %v3225_v16  ;;  %395 = vst.msk [vmem:[#allocation2 + $0x8] sm:$0xff] (!%p332_p3), %vm393_vm0, %v3225_v16  ;;  %3024 = vset.pattern.permute.xlu1 (!%p332_p3), %v3226_v26  ;;  %3023 = vset.pattern.permute.xlu0 (!%p332_p3), %v3226_v26  ;;  %v3227_v31 = vmov (!%p332_p3), 0.0  }
   0x9   : > { %397 = vst.msk [vmem:[#allocation2 + $0x18] sm:$0xff] (!%p332_p3), %vm393_vm0, %v3225_v16  ;;  %398 = vst.msk [vmem:[#allocation2 + $0x20] sm:$0xff] (!%p332_p3), %vm393_vm0, %v3225_v16 }
   0xa   : > { %399 = vst.msk [vmem:[#allocation2 + $0x28] sm:$0xff] (!%p332_p3), %vm393_vm0, %v3225_v16  ;;  %400 = vst.msk [vmem:[#allocation2 + $0x30] sm:$0xff] (!%p332_p3), %vm393_vm0, %v3225_v16 }
   0xb   : > { %401 = vst.msk [vmem:[#allocation2 + $0x38] sm:$0xff] (!%p332_p3), %vm393_vm0, %v3225_v16  ;;  %402 = vst.msk [vmem:[#allocation2 + $0x40] sm:$0xff] (!%p332_p3), %vm393_vm0, %v3225_v16 }
   0xc   : > { %403 = vst.msk [vmem:[#allocation2 + $0x48] sm:$0xff] (!%p332_p3), %vm393_vm0, %v3225_v16  ;;  %404 = vst.msk [vmem:[#allocation2 + $0x50] sm:$0xff] (!%p332_p3), %vm393_vm0, %v3225_v16 }
   0xd   : > { %405 = vst.msk [vmem:[#allocation2 + $0x58] sm:$0xff] (!%p332_p3), %vm393_vm0, %v3225_v16  ;;  %406 = vst.msk [vmem:[#allocation2 + $0x60] sm:$0xff] (!%p332_p3), %vm393_vm0, %v3225_v16 }
   0xe   : > { %s4196_s13 = smov (!%p374_p4, %s3215_s13), 1  ;;  %407 = vst.msk [vmem:[#allocation2 + $0x68] sm:$0xff] %vm393_vm0, %v3225_v16  ;;  %408 = vst.msk [vmem:[#allocation2 + $0x70] sm:$0xff] %vm393_vm0, %v3225_v16  ;;  %v3411_v35 = vld [vmem:[#allocation2 + $0x10] sm:$0xff] }
   0xf   : > { %s2402_s19 = sshll.u32 %s4196_s13, 6  ;;  %409 = vst.msk [vmem:[#allocation2 + $0x78] sm:$0xff] %vm393_vm0, %v3225_v16  ;;  %410 = vst.msk [vmem:[#allocation3] sm:$0xff] %vm393_vm0, %v3227_v31  ;;  %v3413_v36 = vld [vmem:[#allocation2] sm:$0xff]  ;;  %v3428_v43 = vld [vmem:[#allocation2 + $0x8] sm:$0xff]  ;;  %s2403_s29 = sshll.u32 %s4196_s13, 7 }
  0x10   : > { %s381_s22 = scalar_lea.vmem %s4165_s1, %s2402_s19  ;;  %411 = vst.msk [vmem:[#allocation3 + $0x8] sm:$0xff] %vm393_vm0, %v3227_v31  ;;  %412 = vst.msk [vmem:[#allocation3 + $0x10] sm:$0xff] %vm393_vm0, %v3227_v31  ;;  %v3421_v41 = vld [vmem:[#allocation2 + $0x18] sm:$0xff]  ;;  %v3446_v50 = vld [vmem:[#allocation2 + $0x20] sm:$0xff]  ;;  %s4044_s11 = scalar_lea.vmem %s4174_s10, %s2403_s29 }
  0x11   : > { %v3025_v1 = vld [vmem:[%s381_s22] sm:$0xff]   ;;  %v3026_v2 = vld [vmem:[%s381_s22 + $0x8] sm:$0xff]   ;;  %v3027_v3 = vld [vmem:[%s381_s22 + $0x10] sm:$0xff]   ;;  %413 = vst.msk [vmem:[#allocation3 + $0x18] sm:$0xff] %vm393_vm0, %v3227_v31 }
  0x12   : > { %2564 = vmatprep.subr.bf16.mxu0 %v3025_v1  ;;  %2596 = vmatprep.subr.bf16.mxu1 %v3025_v1  ;;  %v3028_v4 = vld [vmem:[%s381_s22 + $0x18] sm:$0xff]   ;;  %v3029_v5 = vld [vmem:[%s381_s22 + $0x20] sm:$0xff]   ;;  %v3030_v6 = vld [vmem:[%s381_s22 + $0x28] sm:$0xff]   ;;  %414 = vst.msk [vmem:[#allocation3 + $0x20] sm:$0xff] %vm393_vm0, %v3227_v31 }
  0x13   : > { %2565 = vmatpush3.bf16.xpose.msra.mxu0 %v3025_v1  ;;  %2597 = vmatpush3.bf16.msra.mxu1 %v3025_v1  ;;  %v3031_v7 = vld [vmem:[%s381_s22 + $0x30] sm:$0xff]   ;;  %v3032_v8 = vld [vmem:[%s381_s22 + $0x38] sm:$0xff]   ;;  %415 = vst.msk [vmem:[#allocation3 + $0x28] sm:$0xff] %vm393_vm0, %v3227_v31  ;;  %416 = vst.msk [vmem:[#allocation3 + $0x30] sm:$0xff] %vm393_vm0, %v3227_v31 }
  0x14   : > { %2566 = vmatprep.subr.bf16.mxu0 %v3026_v2  ;;  %2598 = vmatprep.subr.bf16.mxu1 %v3026_v2  ;;  %417 = vst.msk [vmem:[#allocation3 + $0x38] sm:$0xff] %vm393_vm0, %v3227_v31  ;;  %418 = vst.msk [vmem:[#allocation3 + $0x40] sm:$0xff] %vm393_vm0, %v3227_v31  ;;  %v3452_v52 = vld [vmem:[#allocation2 + $0x38] sm:$0xff]  ;;  %v3461_v57 = vld [vmem:[#allocation2 + $0x30] sm:$0xff] }
  0x15   : > { %419 = vst.msk [vmem:[#allocation3 + $0x48] sm:$0xff] %vm393_vm0, %v3227_v31  ;;  %420 = vst.msk [vmem:[#allocation3 + $0x50] sm:$0xff] %vm393_vm0, %v3227_v31  ;;  %v3467_v59 = vld [vmem:[#allocation2 + $0x28] sm:$0xff]  ;;  %v3479_v1 = vld [vmem:[#allocation2 + $0x40] sm:$0xff] }
  0x16   : > { %421 = vst.msk [vmem:[#allocation3 + $0x58] sm:$0xff] %vm393_vm0, %v3227_v31  ;;  %422 = vst.msk [vmem:[#allocation3 + $0x60] sm:$0xff] %vm393_vm0, %v3227_v31  ;;  %v3517_v26 = vld [vmem:[#allocation2 + $0x60] sm:$0xff] }
  0x17   : > { %2599 = vmatpush3.bf16.msra.mxu1 %v3026_v2  ;;  %423 = vst.msk [vmem:[#allocation3 + $0x68] sm:$0xff] %vm393_vm0, %v3227_v31  ;;  %424 = vst.msk [vmem:[#allocation3 + $0x70] sm:$0xff] %vm393_vm0, %v3227_v31 }
  0x18   : > { %2600 = vmatprep.subr.bf16.mxu1 %v3027_v3  ;;  %425 = vst.msk [vmem:[#allocation3 + $0x78] sm:$0xff] %vm393_vm0, %v3227_v31 }
  0x1b   : > { %2567 = vmatpush3.bf16.xpose.msra.mxu0 %v3026_v2  ;;  %2601 = vmatpush3.bf16.msra.mxu1 %v3027_v3 }
  0x1c   : > { %2568 = vmatprep.subr.bf16.mxu0 %v3027_v3  ;;  %2602 = vmatprep.subr.bf16.mxu1 %v3028_v4 }
  0x1f   : > { %2603 = vmatpush3.bf16.msra.mxu1 %v3028_v4 }
  0x20   : > { %2604 = vmatprep.subr.bf16.mxu1 %v3029_v5 }
  0x23   : > { %2569 = vmatpush3.bf16.xpose.msra.mxu0 %v3027_v3  ;;  %2605 = vmatpush3.bf16.msra.mxu1 %v3029_v5  ;;  %v3486_v3 = vld [vmem:[#allocation2 + $0x58] sm:$0xff] }
  0x24   : > { %2570 = vmatprep.subr.bf16.mxu0 %v3028_v4  ;;  %2606 = vmatprep.subr.bf16.mxu1 %v3030_v6 }
  0x27   : > { %2607 = vmatpush3.bf16.msra.mxu1 %v3030_v6 }
  0x28   : > { %2608 = vmatprep.subr.bf16.mxu1 %v3031_v7 }
  0x2b   : > { %2571 = vmatpush3.bf16.xpose.msra.mxu0 %v3028_v4  ;;  %2609 = vmatpush3.bf16.msra.mxu1 %v3031_v7 }
  0x2c   : > { %2572 = vmatprep.subr.bf16.mxu0 %v3029_v5  ;;  %2610 = vmatprep.subr.bf16.mxu1 %v3032_v8 }
  0x2f   : > { %2611 = vmatpush3.bf16.msra.mxu1 %v3032_v8 }
  0x33   : > { %2573 = vmatpush3.bf16.xpose.msra.mxu0 %v3029_v5 }
  0x34   : > { %2574 = vmatprep.subr.bf16.mxu0 %v3030_v6 }
  0x3b   : > { %2575 = vmatpush3.bf16.xpose.msra.mxu0 %v3030_v6 }
  0x3c   : > { %2576 = vmatprep.subr.bf16.mxu0 %v3031_v7 }
  0x43   : > { %2577 = vmatpush3.bf16.xpose.msra.mxu0 %v3031_v7 }
  0x44   : > { %2578 = vmatprep.subr.bf16.mxu0 %v3032_v8 }
  0x4b   : > { %2579 = vmatpush3.bf16.xpose.msra.mxu0 %v3032_v8 }
  0x52   : > { %2581 = vmatmul.mubr.bf16.vlgmr.msra.gmra.mrb[0].mxu0 %v3034_v9  ;;  %v3498_v9 = vld [vmem:[#allocation2 + $0x50] sm:$0xff] }
  0x53   : > { %2584 = vmatprep.mubr.bf16.mxu0 %v3035_v10 }
  0x5a   : > { %2585 = vmatmul.mubr.bf16.gmra.mrb[4].mxu0 %v3036_v11  ;;  %v3505_v11 = vld [vmem:[#allocation2 + $0x48] sm:$0xff] }
  0x5b   : > { %2588 = vmatprep.mubr.bf16.mxu0 %v3037_v12 }
  0x62   : > { %2589 = vmatmul.mubr.bf16.gmra.mrb[8].mxu0 %v3038_v13 }
  0x63   : > { %2592 = vmatprep.mubr.bf16.mxu0 %v3039_v14 }
  0x6a   : > { %2593 = vmatmul.mubr.bf16.gmra.mrb[12].mxu0 %v3040_v15 }
 0x125   : > { %v3347_v17 = vpop.f32.mrb[0].mxu0 }
 0x126   : > { %687 = vmax.xlane.f32.xlu1 %v3347_v17  ;;  %v3350_v18 = vpop.f32.mrb[1].mxu0 }
 0x127   : > { %683 = vmax.xlane.f32.xlu0 %v3350_v18  ;;  %v3353_v19 = vpop.f32.mrb[2].mxu0 }
 0x128   : > { %v3355_v20 = vpop.f32.mrb[3].mxu0 }
 0x12a   : > { %689 = vmax.xlane.f32.xlu1 %v3353_v19 }
 0x12b   : > { %685 = vmax.xlane.f32.xlu0 %v3355_v20 }
 0x12d   : > { %v3359_v21 = vpop.f32.mrb[4].mxu0 }
 0x12e   : > { %v3361_v22 = vpop.f32.mrb[5].mxu0 }
 0x12f   : > { %691 = vmax.xlane.f32.xlu0 %v3361_v22  ;;  %v3364_v23 = vpop.f32.mrb[6].mxu0 }
 0x130   : > { %697 = vmax.xlane.f32.xlu1 %v3364_v23  ;;  %v3367_v24 = vpop.f32.mrb[7].mxu0 }
 0x133   : > { %695 = vmax.xlane.f32.xlu0 %v3359_v21 }
 0x134   : > { %693 = vmax.xlane.f32.xlu1 %v3367_v24 }
 0x135   : > { %v3371_v25 = vpop.f32.mrb[8].mxu0 }
 0x136   : > { %v3373_v27 = vpop.f32.mrb[9].mxu0 }
 0x137   : > { %v3375_v28 = vpop.f32.mrb[10].mxu0  ;;  %699 = vmax.xlane.f32.xlu0 %v3373_v27 }
 0x138   : > { %705 = vmax.xlane.f32.xlu1 %v3375_v28  ;;  %v3379_v29 = vpop.f32.mrb[11].mxu0 }
 0x13b   : > { %703 = vmax.xlane.f32.xlu0 %v3371_v25 }
 0x13c   : > { %701 = vmax.xlane.f32.xlu1 %v3379_v29 }
 0x13d   : > { %v3383_v30 = vpop.f32.mrb[12].mxu0 }
 0x13e   : > { %v3401_v32 = vpop.f32.mrb[13].mxu0 }
 0x13f   : > { %v3403_v33 = vpop.f32.mrb[14].mxu0  ;;  %707 = vmax.xlane.f32.xlu0 %v3401_v32 }
 0x140   : > { %713 = vmax.xlane.f32.xlu1 %v3403_v33  ;;  %v3407_v34 = vpop.f32.mrb[15].mxu0 }
 0x143   : > { %711 = vmax.xlane.f32.xlu0 %v3383_v30 }
 0x144   : > { %709 = vmax.xlane.f32.xlu1 %v3407_v34 }
 0x1b3   : > { %v688_v37 = vpop.xlane.xlu1 %687 }
 0x1b4   : > { %v3416_v38 = vmax.f32 %v3411_v35, %v688_v37  ;;  %v684_v39 = vpop.xlane.xlu0 %683  ;;  %v3524_v37 = vld [vmem:[#allocation2 + $0x78] sm:$0xff] }
 0x1b5   : > { %v3419_v40 = vmax.f32 %v3413_v36, %v684_v39 }
 0x1b6   : > { %1255 = vst.msk [vmem:[#allocation2 + $0x10] sm:$0xff] %vm393_vm0, %v3416_v38  ;;  %791 = vperm.xlu1 %3024, %v3416_v38  }
 0x1b7   : > { %v731_v44 = vsub.f32 %v3413_v36, %v3419_v40  ;;  %1253 = vst.msk [vmem:[#allocation2] sm:$0xff] %vm393_vm0, %v3419_v40  ;;  %v690_v45 = vpop.xlane.xlu1 %689  ;;  %781 = vperm.xlu0 %3023, %v3419_v40  }
 0x1b8   : > { %v3436_v46 = vmax.f32 %v3421_v41, %v690_v45  ;;  %v686_v47 = vpop.xlane.xlu0 %685 }
 0x1b9   : > { %v3439_v48 = vmax.f32 %v3428_v43, %v686_v47 }
 0x1ba   : > { %1256 = vst.msk [vmem:[#allocation2 + $0x18] sm:$0xff] %vm393_vm0, %v3436_v46  ;;  %796 = vperm.xlu1 %3024, %v3436_v46  }
 0x1bb   : > { %v732_v51 = vsub.f32 %v3428_v43, %v3439_v48  ;;  %1254 = vst.msk [vmem:[#allocation2 + $0x8] sm:$0xff] %vm393_vm0, %v3439_v48 }
 0x1bc   : > { %v692_v53 = vpop.xlane.xlu0 %691 }
 0x1bd   : > { %v3455_v54 = vmax.f32 %v3446_v50, %v692_v53  ;;  %v698_v55 = vpop.xlane.xlu1 %697 }
 0x1be   : > { %v3458_v56 = vmax.f32 %v3452_v52, %v698_v55  ;;  %786 = vperm.xlu1 %3024, %v3439_v48  }
 0x1bf   : > { %1257 = vst.msk [vmem:[#allocation2 + $0x20] sm:$0xff] %vm393_vm0, %v3455_v54 }
 0x1c0   : > { %1260 = vst.msk [vmem:[#allocation2 + $0x38] sm:$0xff] %vm393_vm0, %v3458_v56  ;;  %v696_v61 = vpop.xlane.xlu0 %695 }
 0x1c1   : > { %v3474_v62 = vmax.f32 %v3461_v57, %v696_v61  ;;  %v694_v63 = vpop.xlane.xlu1 %693  ;;  %v3537_v61 = vld [vmem:[#allocation2 + $0x70] sm:$0xff] }
 0x1c2   : > { %v3477_v0 = vmax.f32 %v3467_v59, %v694_v63  ;;  %v3540_v63 = vld [vmem:[#allocation2 + $0x68] sm:$0xff] }
 0x1c3   : > { %1259 = vst.msk [vmem:[#allocation2 + $0x30] sm:$0xff] %vm393_vm0, %v3474_v62  ;;  %811 = vperm.xlu1 %3024, %v3474_v62  }
 0x1c4   : > { %1258 = vst.msk [vmem:[#allocation2 + $0x28] sm:$0xff] %vm393_vm0, %v3477_v0  ;;  %v700_v5 = vpop.xlane.xlu0 %699  ;;  %v4176_v36 = vsub.f32 %v3467_v59, %v3477_v0 }
 0x1c5   : > { %v706_v6 = vpop.xlane.xlu1 %705  ;;  %v3493_v7 = vmax.f32 %v3479_v1, %v700_v5 }
 0x1c6   : > { %v3496_v8 = vmax.f32 %v3486_v3, %v706_v6  ;;  %v757_v40 = vmul.f32 1.442695, %v4176_v36 }
 0x1c7   : > { %1261 = vst.msk [vmem:[#allocation2 + $0x40] sm:$0xff] %vm393_vm0, %v3493_v7  ;;  %801 = vperm.xlu1 %3024, %v3455_v54  }
 0x1c8   : > { %1264 = vst.msk [vmem:[#allocation2 + $0x58] sm:$0xff] %vm393_vm0, %v3496_v8  ;;  %v704_v13 = vpop.xlane.xlu0 %703 }
 0x1c9   : > { %v702_v14 = vpop.xlane.xlu1 %701  ;;  %v3512_v15 = vmax.f32 %v3498_v9, %v704_v13 }
 0x1ca   : > { %v3515_v16 = vmax.f32 %v3505_v11, %v702_v14 }
 0x1cb   : > { %1263 = vst.msk [vmem:[#allocation2 + $0x50] sm:$0xff] %vm393_vm0, %v3512_v15  ;;  %806 = vperm.xlu1 %3024, %v3477_v0   ;;  %v4180_v0 = vsub.f32 %v3446_v50, %v3455_v54  ;;  %v1416_v54 = vld [vmem:[%s4166_s2] sm:$0xff] }
 0x1cc   : > { %1262 = vst.msk [vmem:[#allocation2 + $0x48] sm:$0xff] %vm393_vm0, %v3515_v16  ;;  %826 = vperm.xlu0 %3023, %v3515_v16   ;;  %v708_v45 = vpop.xlane.xlu0 %707 }
 0x1cd   : > { %v714_v47 = vpop.xlane.xlu1 %713  ;;  %v3532_v53 = vmax.f32 %v3517_v26, %v708_v45 }
 0x1ce   : > { %v3535_v55 = vmax.f32 %v3524_v37, %v714_v47 }
 0x1cf   : > { %816 = vperm.xlu1 %3024, %v3458_v56   ;;  %1265 = vst.msk [vmem:[#allocation2 + $0x60] sm:$0xff] %vm393_vm0, %v3532_v53 }
 0x1d0   : > { %1268 = vst.msk [vmem:[#allocation2 + $0x78] sm:$0xff] %vm393_vm0, %v3535_v55  ;;  %836 = vperm.xlu0 %3023, %v3496_v8   ;;  %v712_v13 = vpop.xlane.xlu0 %711 }
 0x1d1   : > { %v710_v14 = vpop.xlane.xlu1 %709  ;;  %v3552_v45 = vmax.f32 %v3537_v61, %v712_v13 }
 0x1d2   : > { %v3555_v47 = vmax.f32 %v3540_v63, %v710_v14 }
 0x1d3   : > { %821 = vperm.xlu1 %3024, %v3493_v7   ;;  %1267 = vst.msk [vmem:[#allocation2 + $0x70] sm:$0xff] %vm393_vm0, %v3552_v45 }
 0x1d4   : > { %1266 = vst.msk [vmem:[#allocation2 + $0x68] sm:$0xff] %vm393_vm0, %v3555_v47  ;;  %846 = vperm.xlu0 %3023, %v3555_v47  }
 0x1d7   : > { %831 = vperm.xlu1 %3024, %v3512_v15  }
 0x1d8   : > { %856 = vperm.xlu0 %3023, %v3535_v55  }
 0x1db   : > { %841 = vperm.xlu1 %3024, %v3532_v53  }
 0x1df   : > { %851 = vperm.xlu1 %3024, %v3552_v45  }
 0x235   : > { %v792_v13 = vpop.permute.xlu1 %791 }
 0x236   : > { %v861_v14 = vsub.f32 %v3347_v17, %v792_v13  ;;  %v782_v5 = vpop.permute.xlu0 %781 }
 0x237   : > { %v859_v31 = vsub.f32 %v3350_v18, %v782_v5 }
 0x238   : > { %v879_v6 = vmul.f32 1.442695, %v861_v14 }
 0x239   : > { %v875_v12 = vmul.f32 1.442695, %v859_v31  ;;  %v797_v10 = vpop.permute.xlu1 %796 }
 0x23a   : > { %v862_v2 = vsub.f32 %v3353_v19, %v797_v10 }
 0x23b   : > { %3041 = vpow2.f32 %v875_v12 }
 0x23c   : > { %v881_v58 = vmul.f32 1.442695, %v862_v2  ;;  %3043 = vpow2.f32 %v879_v6 }
 0x23d   : > { %v787_v42 = vpop.permute.xlu1 %786 }
 0x23e   : > { %3045 = vpow2.f32 %v881_v58  ;;  %v860_v39 = vsub.f32 %v3355_v20, %v787_v42 }
 0x240   : > { %v877_v60 = vmul.f32 1.442695, %v860_v39 }
 0x242   : > { %3047 = vpow2.f32 %v877_v60  ;;  %v812_v4 = vpop.permute.xlu1 %811 }
 0x243   : > { %v865_v17 = vsub.f32 %v3359_v21, %v812_v4 }
 0x245   : > { %v3042_v49 = vpop.eup %3041  ;;  %v887_v2 = vmul.f32 1.442695, %v865_v17 }
 0x246   : > { %939 = vadd.xlane.f32.xlu1 %v3042_v49  ;;  %v802_v18 = vpop.permute.xlu1 %801  ;;  %v3044_v5 = vpop.eup %3043 }
 0x247   : > { %v863_v31 = vsub.f32 %v3361_v22, %v802_v18 }
 0x248   : > { %v3046_v13 = vpop.eup %3045 }
 0x249   : > { %v883_v19 = vmul.f32 1.442695, %v863_v31  ;;  %v1117_v10 = vpack.c.bf16 %v3046_v13, %v3044_v5 }
 0x24a   : > { %945 = vadd.xlane.f32.xlu1 %v3046_v13  ;;  %v807_v12 = vpop.permute.xlu1 %806 }
 0x24b   : > { %3049 = vpow2.f32 %v883_v19  ;;  %v864_v20 = vsub.f32 %v3367_v24, %v807_v12  ;;  %v827_v42 = vpop.permute.xlu0 %826 }
 0x24c   : > { %v3048_v58 = vpop.eup %3047  ;;  %3051 = vpow2.f32 %v887_v2  ;;  %v868_v21 = vsub.f32 %v3379_v29, %v827_v42 }
 0x24d   : > { %v885_v60 = vmul.f32 1.442695, %v864_v20  ;;  %941 = vadd.xlane.f32.xlu0 %v3048_v58  ;;  %v1116_v39 = vpack.c.bf16 %v3048_v58, %v3042_v49 }
 0x24e   : > { %v817_v4 = vpop.permute.xlu1 %816  ;;  %v893_v17 = vmul.f32 1.442695, %v868_v21 }
 0x24f   : > { %3053 = vpow2.f32 %v885_v60  ;;  %v866_v22 = vsub.f32 %v3364_v23, %v817_v4  ;;  %v837_v6 = vpop.permute.xlu0 %836  ;;  %2612 = vmatprep.mubr.bf16.mxu1 %v1116_v39 }
 0x250   : > { %2613 = vmatmul.mubr.bf16.vlgmr.msra.gmra.mrb[0].mxu1 %v1117_v10  ;;  %v870_v24 = vsub.f32 %v3375_v28, %v837_v6 }
 0x251   : > { %v889_v14 = vmul.f32 1.442695, %v866_v22  ;;  %943 = vadd.xlane.f32.xlu0 %v3044_v5 }
 0x252   : > { %v822_v18 = vpop.permute.xlu1 %821  ;;  %v897_v29 = vmul.f32 1.442695, %v870_v24 }
 0x253   : > { %3055 = vpow2.f32 %v889_v14  ;;  %v867_v31 = vsub.f32 %v3373_v27, %v822_v18  ;;  %v847_v49 = vpop.permute.xlu0 %846 }
 0x254   : > { %3057 = vpow2.f32 %v893_v17  ;;  %v872_v2 = vsub.f32 %v3407_v34, %v847_v49 }
 0x255   : > { %v3050_v13 = vpop.eup %3049  ;;  %v891_v19 = vmul.f32 1.442695, %v867_v31 }
 0x256   : > { %947 = vadd.xlane.f32.xlu0 %v3050_v13  ;;  %v832_v23 = vpop.permute.xlu1 %831  ;;  %v3052_v12 = vpop.eup %3051  ;;  %v901_v42 = vmul.f32 1.442695, %v872_v2 }
 0x257   : > { %3059 = vpow2.f32 %v891_v19  ;;  %v869_v10 = vsub.f32 %v3371_v25, %v832_v23  ;;  %v857_v5 = vpop.permute.xlu0 %856 }
 0x258   : > { %3061 = vpow2.f32 %v897_v29  ;;  %v874_v27 = vsub.f32 %v3403_v33, %v857_v5  ;;  %v747_v29 = vmul.f32 1.442695, %v731_v44  ;;  %v4175_v5 = vsub.f32 %v3421_v41, %v3436_v46 }
 0x259   : > { %v3054_v20 = vpop.eup %3053  ;;  %v895_v28 = vmul.f32 1.442695, %v869_v10  ;;  %v749_v10 = vmul.f32 1.442695, %v732_v51  ;;  %v4177_v44 = vsub.f32 %v3452_v52, %v3458_v56  ;;  %v4178_v41 = vsub.f32 %v3505_v11, %v3515_v16 }
 0x25a   : > { %951 = vadd.xlane.f32.xlu0 %v3052_v12  ;;  %v842_v58 = vpop.permute.xlu1 %841  ;;  %v1118_v60 = vpack.c.bf16 %v3054_v20, %v3050_v13  ;;  %v905_v4 = vmul.f32 1.442695, %v874_v27  ;;  %v4179_v56 = vsub.f32 %v3411_v35, %v3416_v38  ;;  %v755_v11 = vmul.f32 1.442695, %v4180_v0 }
 0x25b   : > { %3063 = vpow2.f32 %v895_v28  ;;  %v871_v39 = vsub.f32 %v3401_v32, %v842_v58  ;;  %v761_v28 = vmul.f32 1.442695, %v4177_v44  ;;  %v765_v43 = vmul.f32 1.442695, %v4178_v41  ;;  %v1421_v44 = vld [vmem:[%s4166_s2 + $0x28] sm:$0xff] }
 0x25c   : > { %2616 = vmatprep.mubr.bf16.mxu1 %v1118_v60  ;;  %3065 = vpow2.f32 %v901_v42  ;;  %v751_v59 = vmul.f32 1.442695, %v4179_v56  ;;  %v4181_v16 = vsub.f32 %v3461_v57, %v3474_v62  ;;  %v4182_v58 = vsub.f32 %v3479_v1, %v3493_v7  ;;  %v1417_v57 = vld [vmem:[%s4166_s2 + $0x8] sm:$0xff]  ;;  %v1584_v62 = vld [vmem:[%s4168_s4] sm:$0xff] }
 0x25d   : > { %v3056_v34 = vpop.eup %3055  ;;  %v899_v21 = vmul.f32 1.442695, %v871_v39  ;;  %v2852_v1 = vpack.c.bf16 %v1417_v57, %v1416_v54  ;;  %v1585_v7 = vld [vmem:[%s4168_s4 + $0x8] sm:$0xff]  ;;  %v4184_v56 = vsub.f32 %v3498_v9, %v3512_v15  ;;  %v1590_v9 = vld [vmem:[%s4168_s4 + $0x30] sm:$0xff]  ;;  %v4185_v54 = vsub.f32 %v3517_v26, %v3532_v53  ;;  %v1592_v26 = vld [vmem:[%s4168_s4 + $0x40] sm:$0xff] }
 0x25e   : > { %953 = vadd.xlane.f32.xlu1 %v3056_v34  ;;  %v852_v25 = vpop.permute.xlu1 %851  ;;  %v1119_v22 = vpack.c.bf16 %v3056_v34, %v3052_v12  ;;  %v3058_v14 = vpop.eup %3057  ;;  %v753_v12 = vmul.f32 1.442695, %v4175_v5  ;;  %v759_v27 = vmul.f32 1.442695, %v4181_v16  ;;  %v763_v60 = vmul.f32 1.442695, %v4182_v58 }
 0x25f   : > { %3067 = vpow2.f32 %v899_v21  ;;  %v873_v6 = vsub.f32 %v3383_v30, %v852_v25  ;;  %v2884_v34 = vpack.c.bf16 %v1585_v7, %v1584_v62  ;;  %2853 = vmatprep.subr.bf16.mxu1 %v2852_v1  ;;  %v907_v21 = vld [vmem:[#allocation3] sm:$0xff]  ;;  %v771_v57 = vmul.f32 1.442695, %v4185_v54  ;;  %v1599_v54 = vld [vmem:[%s4168_s4 + $0x78] sm:$0xff] }
 0x260   : > { %2617 = vmatmul.mubr.bf16.gmra.mrb[4].mxu1 %v1119_v22  ;;  %3069 = vpow2.f32 %v905_v4  ;;  %v910_v22 = vld [vmem:[#allocation3 + $0x18] sm:$0xff] }
 0x261   : > { %v3060_v33 = vpop.eup %3059  ;;  %v903_v17 = vmul.f32 1.442695, %v873_v6  ;;  %2885 = vmatprep.subr.bf16.mxu0 %v2884_v34  ;;  %2855 = vmatpush3.bf16.msra.mxu1 %v2852_v1  ;;  %v914_v1 = vld [vmem:[#allocation3 + $0x38] sm:$0xff] }
 0x262   : > { %949 = vadd.xlane.f32.xlu1 %v3054_v20  ;;  %955 = vadd.xlane.f32.xlu0 %v3060_v33  ;;  %v1120_v24 = vpack.c.bf16 %v3058_v14, %v3060_v33  ;;  %v3062_v32 = vpop.eup %3061  ;;  %v908_v33 = vld [vmem:[#allocation3 + $0x8] sm:$0xff] }
 0x263   : > { %3071 = vpow2.f32 %v903_v17  ;;  %2887 = vmatpush3.bf16.msra.mxu0 %v2884_v34  ;;  %v1424_v34 = vld [vmem:[%s4166_s2 + $0x40] sm:$0xff] }
 0x264   : > { %2620 = vmatprep.mubr.bf16.mxu1 %v1120_v24  ;;  %3073 = vpow2.f32 %v747_v29 }
 0x265   : > { %v3064_v18 = vpop.eup %3063  ;;  %3075 = vpow2.f32 %v749_v10 }
 0x266   : > { %961 = vadd.xlane.f32.xlu1 %v3062_v32  ;;  %959 = vadd.xlane.f32.xlu0 %v3064_v18  ;;  %v1121_v31 = vpack.c.bf16 %v3062_v32, %v3064_v18  ;;  %v3066_v49 = vpop.eup %3065  ;;  %3077 = vpow2.f32 %v753_v12 }
 0x267   : > { %3079 = vpow2.f32 %v757_v40  ;;  %v1420_v40 = vld [vmem:[%s4166_s2 + $0x20] sm:$0xff] }
 0x268   : > { %2621 = vmatmul.mubr.bf16.gmra.mrb[8].mxu1 %v1121_v31  ;;  %3081 = vpow2.f32 %v761_v28  ;;  %v909_v31 = vld [vmem:[#allocation3 + $0x10] sm:$0xff]  ;;  %v1588_v28 = vld [vmem:[%s4168_s4 + $0x20] sm:$0xff] }
 0x269   : > { %v3068_v13 = vpop.eup %3067  ;;  %3083 = vpow2.f32 %v765_v43  ;;  %v2860_v43 = vpack.c.bf16 %v1421_v44, %v1420_v40  ;;  %v1429_v40 = vld [vmem:[%s4166_s2 + $0x68] sm:$0xff] }
 0x26a   : > { %957 = vadd.xlane.f32.xlu1 %v3058_v14  ;;  %963 = vadd.xlane.f32.xlu0 %v3068_v13  ;;  %v1122_v30 = vpack.c.bf16 %v3066_v49, %v3068_v13  ;;  %v3070_v19 = vpop.eup %3069  ;;  %3085 = vpow2.f32 %v751_v59  ;;  %v1418_v13 = vld [vmem:[%s4166_s2 + $0x10] sm:$0xff]  ;;  %v767_v59 = vmul.f32 1.442695, %v4184_v56 }
 0x26b   : > { %3087 = vpow2.f32 %v755_v11 }
 0x26c   : > { %2624 = vmatprep.mubr.bf16.mxu1 %v1122_v30  ;;  %3089 = vpow2.f32 %v759_v27  ;;  %v1419_v30 = vld [vmem:[%s4166_s2 + $0x18] sm:$0xff]  ;;  %v913_v27 = vld [vmem:[#allocation3 + $0x30] sm:$0xff] }
 0x26d   : > { %v3072_v2 = vpop.eup %3071  ;;  %3091 = vpow2.f32 %v763_v60  ;;  %v2856_v29 = vpack.c.bf16 %v1419_v30, %v1418_v13  ;;  %v1591_v60 = vld [vmem:[%s4168_s4 + $0x38] sm:$0xff] }
 0x26e   : > { %967 = vadd.xlane.f32.xlu0 %v3072_v2  ;;  %v1123_v23 = vpack.c.bf16 %v3070_v19, %v3072_v2  ;;  %v3074_v20 = vpop.eup %3073  ;;  %v1587_v2 = vld [vmem:[%s4168_s4 + $0x18] sm:$0xff] }
 0x26f   : > { %v3076_v42 = vpop.eup %3075  ;;  %v923_v4 = vmul.f32 %v3074_v20, %v907_v21  ;;  %2857 = vmatprep.subr.bf16.mxu1 %v2856_v29  ;;  %v1425_v21 = vld [vmem:[%s4166_s2 + $0x48] sm:$0xff]  ;;  %v1595_v13 = vld [vmem:[%s4168_s4 + $0x58] sm:$0xff] }
 0x270   : > { %2625 = vmatmul.mubr.bf16.gmra.mrb[12].mxu1 %v1123_v23  ;;  %v3078_v46 = vpop.eup %3077  ;;  %v924_v32 = vmul.f32 %v3076_v42, %v908_v33 }
 0x271   : > { %v3605_v48 = vpop.eup %3079  ;;  %v926_v14 = vmul.f32 %v3078_v46, %v910_v22  ;;  %2859 = vmatpush3.bf16.msra.mxu1 %v2856_v29  ;;  %v4186_v22 = vsub.f32 %v3537_v61, %v3552_v45  ;;  %v1427_v61 = vld [vmem:[%s4166_s2 + $0x58] sm:$0xff]  ;;  %v1594_v45 = vld [vmem:[%s4168_s4 + $0x50] sm:$0xff] }
 0x272   : > { %v3608_v51 = vpop.eup %3081  ;;  %2861 = vmatprep.subr.bf16.mxu1 %v2860_v43  ;;  %v2904_v30 = vpack.c.bf16 %v1595_v13, %v1594_v45  ;;  %v4188_v45 = vsub.f32 %v3540_v63, %v3555_v47 }
 0x273   : > { %v3611_v52 = vpop.eup %3083  ;;  %v930_v33 = vmul.f32 %v3608_v51, %v914_v1 }
 0x274   : > { %v3086_v39 = vpop.eup %3085 }
 0x275   : > { %v3088_v35 = vpop.eup %3087  ;;  %v925_v23 = vmul.f32 %v3086_v39, %v909_v31  ;;  %2863 = vmatpush3.bf16.msra.mxu1 %v2860_v43 }
 0x276   : > { %v3626_v38 = vpop.eup %3089 }
 0x277   : > { %v3629_v50 = vpop.eup %3091  ;;  %v929_v62 = vmul.f32 %v3626_v38, %v913_v27  ;;  %v1431_v27 = vld [vmem:[%s4166_s2 + $0x78] sm:$0xff] }
 0x27b   : > { %1022 = vperm.xlu1 %3024, %v3074_v20   ;;  %v911_v20 = vld [vmem:[#allocation3 + $0x20] sm:$0xff] }
 0x27c   : > { %v927_v16 = vmul.f32 %v3088_v35, %v911_v20 }
 0x284   : > { %1027 = vperm.xlu0 %3023, %v3076_v42   ;;  %v4183_v42 = vsub.f32 %v3486_v3, %v3496_v8  ;;  %v1422_v3 = vld [vmem:[%s4166_s2 + $0x30] sm:$0xff]  ;;  %v1423_v8 = vld [vmem:[%s4166_s2 + $0x38] sm:$0xff] }
 0x285   : > { %v2864_v58 = vpack.c.bf16 %v1423_v8, %v1422_v3  ;;  %v916_v3 = vld [vmem:[#allocation3 + $0x48] sm:$0xff] }
 0x286   : > { %v769_v41 = vmul.f32 1.442695, %v4183_v42  ;;  %v1597_v42 = vld [vmem:[%s4168_s4 + $0x68] sm:$0xff] }
 0x287   : > { %2865 = vmatprep.subr.bf16.mxu1 %v2864_v58 }
 0x288   : > { %1037 = vperm.xlu0 %3023, %v3078_v46   ;;  %v1589_v46 = vld [vmem:[%s4168_s4 + $0x28] sm:$0xff]  ;;  %3093 = vpow2.f32 %v769_v41  ;;  %2867 = vmatpush3.bf16.msra.mxu1 %v2864_v58  ;;  %v1598_v58 = vld [vmem:[%s4168_s4 + $0x70] sm:$0xff] }
 0x289   : > { %v2892_v11 = vpack.c.bf16 %v1589_v46, %v1588_v28  ;;  %3095 = vpow2.f32 %v767_v59  ;;  %v2912_v1 = vpack.c.bf16 %v1599_v54, %v1598_v58 }
 0x28a   : > { %3097 = vpow2.f32 %v771_v57 }
 0x28c   : > { %1047 = vperm.xlu0 %3023, %v3605_v48  }
 0x290   : > { %1057 = vperm.xlu0 %3023, %v3608_v51  }
 0x294   : > { %1067 = vperm.xlu0 %3023, %v3611_v52  }
 0x29f   : > { %969 = vadd.xlane.f32.xlu1 %v3070_v19  ;;  %v1586_v19 = vld [vmem:[%s4168_s4 + $0x10] sm:$0xff] }
 0x2a0   : > { %v2888_v5 = vpack.c.bf16 %v1587_v2, %v1586_v19  ;;  %v3724_v19 = vpop.eup %3093 }
 0x2a2   : > { %2889 = vmatprep.subr.bf16.mxu0 %v2888_v5 }
 0x2a3   : > { %965 = vadd.xlane.f32.xlu1 %v3066_v49  ;;  %2891 = vmatpush3.bf16.msra.mxu0 %v2888_v5  ;;  %v3729_v5 = vpop.eup %3095 }
 0x2a4   : > { %2893 = vmatprep.subr.bf16.mxu0 %v2892_v11  ;;  %v3098_v59 = vpop.eup %3097 }
 0x2a7   : > { %2895 = vmatpush3.bf16.msra.mxu0 %v2892_v11 }
 0x2b4   : > { %1032 = vperm.xlu1 %3024, %v3086_v39  }
 0x2b8   : > { %1042 = vperm.xlu1 %3024, %v3088_v35   ;;  %v2896_v35 = vpack.c.bf16 %v1591_v60, %v1590_v9 }
 0x2ba   : > { %2897 = vmatprep.subr.bf16.mxu0 %v2896_v35 }
 0x2bb   : > { %2899 = vmatpush3.bf16.msra.mxu0 %v2896_v35 }
 0x2bc   : > { %1052 = vperm.xlu1 %3024, %v3626_v38   ;;  %v2868_v38 = vpack.c.bf16 %v1425_v21, %v1424_v34 }
 0x2be   : > { %2869 = vmatprep.subr.bf16.mxu1 %v2868_v38 }
 0x2bf   : > { %2871 = vmatpush3.bf16.msra.mxu1 %v2868_v38 }
 0x2c0   : > { %1062 = vperm.xlu1 %3024, %v3629_v50  }
 0x2d3   : > { %v940_v25 = vpop.xlane.xlu1 %939 }
 0x2d4   : > { %v971_v6 = vadd.f32 %v940_v25, %v923_v4  ;;  %v1593_v25 = vld [vmem:[%s4168_s4 + $0x48] sm:$0xff] }
 0x2d6   : > { %988 = vst.msk [vmem:[#allocation3] sm:$0xff] %vm393_vm0, %v971_v6  ;;  %v775_v6 = vmul.f32 1.442695, %v4186_v22 }
 0x2d7   : > { %v946_v17 = vpop.xlane.xlu1 %945 }
 0x2d8   : > { %v974_v24 = vadd.f32 %v946_v17, %v926_v14  ;;  %v2900_v14 = vpack.c.bf16 %v1593_v25, %v1592_v26  ;;  %v915_v17 = vld [vmem:[#allocation3 + $0x40] sm:$0xff]  ;;  %3099 = vpow2.f32 %v775_v6  ;;  %v921_v26 = vld [vmem:[#allocation3 + $0x70] sm:$0xff] }
 0x2d9   : > { %v931_v29 = vmul.f32 %v3629_v50, %v915_v17 }
 0x2da   : > { %991 = vst.msk [vmem:[#allocation3 + $0x18] sm:$0xff] %vm393_vm0, %v974_v24  ;;  %v942_v18 = vpop.xlane.xlu0 %941  ;;  %v912_v24 = vld [vmem:[#allocation3 + $0x28] sm:$0xff]  ;;  %2901 = vmatprep.subr.bf16.mxu0 %v2900_v14 }
 0x2db   : > { %v972_v49 = vadd.f32 %v942_v18, %v924_v32  ;;  %v1426_v18 = vld [vmem:[%s4166_s2 + $0x50] sm:$0xff]  ;;  %2903 = vmatpush3.bf16.msra.mxu0 %v2900_v14  ;;  %v928_v2 = vmul.f32 %v3605_v48, %v912_v24  ;;  %v1596_v48 = vld [vmem:[%s4168_s4 + $0x60] sm:$0xff] }
 0x2dc   : > { %2905 = vmatprep.subr.bf16.mxu0 %v2904_v30  ;;  %v2908_v43 = vpack.c.bf16 %v1597_v42, %v1596_v48 }
 0x2dd   : > { %989 = vst.msk [vmem:[#allocation3 + $0x8] sm:$0xff] %vm393_vm0, %v972_v49  ;;  %v1288_v10 = vld [vmem:[#allocation3] sm:$0xff]  ;;  %v2872_v49 = vpack.c.bf16 %v1427_v61, %v1426_v18  ;;  %v4187_v18 = vsub.f32 %v3524_v37, %v3535_v55  ;;  %v920_v55 = vld [vmem:[#allocation3 + $0x68] sm:$0xff] }
 0x2de   : > { %v944_v12 = vpop.xlane.xlu0 %943  ;;  %1306 = vperm.xlu0 %3023, %v1288_v10   ;;  %v918_v10 = vld [vmem:[#allocation3 + $0x58] sm:$0xff] }
 0x2df   : > { %v973_v36 = vadd.f32 %v944_v12, %v925_v23  ;;  %v917_v23 = vld [vmem:[#allocation3 + $0x50] sm:$0xff]  ;;  %2873 = vmatprep.subr.bf16.mxu1 %v2872_v49  ;;  %2907 = vmatpush3.bf16.msra.mxu0 %v2904_v30  ;;  %v934_v56 = vmul.f32 %v3724_v19, %v918_v10  ;;  %v777_v61 = vmul.f32 1.442695, %v4187_v18 }
 0x2e0   : > { %2875 = vmatpush3.bf16.msra.mxu1 %v2872_v49  ;;  %v933_v46 = vmul.f32 %v3729_v5, %v917_v23  ;;  %2909 = vmatprep.subr.bf16.mxu0 %v2908_v43 }
 0x2e1   : > { %990 = vst.msk [vmem:[#allocation3 + $0x10] sm:$0xff] %vm393_vm0, %v973_v36  ;;  %v1291_v0 = vld [vmem:[#allocation3 + $0x18] sm:$0xff]  ;;  %v1428_v36 = vld [vmem:[%s4166_s2 + $0x60] sm:$0xff]  ;;  %3101 = vpow2.f32 %v777_v61 }
 0x2e2   : > { %1321 = vperm.xlu0 %3023, %v1291_v0   ;;  %v2876_v28 = vpack.c.bf16 %v1429_v40, %v1428_v36 }
 0x2e3   : > { %v948_v15 = vpop.xlane.xlu0 %947  ;;  %2911 = vmatpush3.bf16.msra.mxu0 %v2908_v43 }
 0x2e4   : > { %v975_v39 = vadd.f32 %v948_v15, %v927_v16  ;;  %v1289_v51 = vld [vmem:[#allocation3 + $0x8] sm:$0xff]  ;;  %2877 = vmatprep.subr.bf16.mxu1 %v2876_v28  ;;  %v919_v16 = vld [vmem:[#allocation3 + $0x60] sm:$0xff]  ;;  %v1430_v15 = vld [vmem:[%s4166_s2 + $0x70] sm:$0xff]  ;;  %2913 = vmatprep.subr.bf16.mxu0 %v2912_v1 }
 0x2e5   : > { %2879 = vmatpush3.bf16.msra.mxu1 %v2876_v28  ;;  %v2880_v35 = vpack.c.bf16 %v1431_v27, %v1430_v15  ;;  %v935_v57 = vmul.f32 %v3098_v59, %v919_v16 }
 0x2e6   : > { %992 = vst.msk [vmem:[#allocation3 + $0x20] sm:$0xff] %vm393_vm0, %v975_v39 }
 0x2e7   : > { %v952_v7 = vpop.xlane.xlu0 %951  ;;  %2881 = vmatprep.subr.bf16.mxu1 %v2880_v35  ;;  %2915 = vmatpush3.bf16.msra.mxu0 %v2912_v1 }
 0x2e8   : > { %v977_v53 = vadd.f32 %v952_v7, %v929_v62  ;;  %v1290_v4 = vld [vmem:[#allocation3 + $0x10] sm:$0xff]  ;;  %v932_v62 = vmul.f32 %v3611_v52, %v916_v3  ;;  %v3100_v7 = vpop.eup %3099 }
 0x2e9   : > { %1316 = vperm.xlu1 %3024, %v1290_v4   ;;  %2883 = vmatpush3.bf16.msra.mxu1 %v2880_v35  ;;  %v937_v25 = vmul.f32 %v3100_v7, %v921_v26 }
 0x2ea   : > { %994 = vst.msk [vmem:[#allocation3 + $0x30] sm:$0xff] %vm393_vm0, %v977_v53 }
 0x2eb   : > { %v954_v32 = vpop.xlane.xlu1 %953 }
 0x2ec   : > { %v978_v31 = vadd.f32 %v954_v32, %v930_v33 }
 0x2ed   : > { %1311 = vperm.xlu1 %3024, %v1289_v51   ;;  %v1292_v60 = vld [vmem:[#allocation3 + $0x20] sm:$0xff] }
 0x2ee   : > { %995 = vst.msk [vmem:[#allocation3 + $0x38] sm:$0xff] %vm393_vm0, %v978_v31  ;;  %v773_v31 = vmul.f32 1.442695, %v4188_v45 }
 0x2ef   : > { %v956_v12 = vpop.xlane.xlu0 %955  ;;  %v950_v20 = vpop.xlane.xlu1 %949 }
 0x2f0   : > { %v979_v50 = vadd.f32 %v956_v12, %v931_v29  ;;  %v976_v44 = vadd.f32 %v950_v20, %v928_v2  ;;  %3103 = vpow2.f32 %v773_v31  ;;  %v922_v2 = vld [vmem:[#allocation3 + $0x78] sm:$0xff] }
 0x2f1   : > { %v1294_v41 = vld [vmem:[#allocation3 + $0x30] sm:$0xff] }
 0x2f2   : > { %996 = vst.msk [vmem:[#allocation3 + $0x40] sm:$0xff] %vm393_vm0, %v979_v50  ;;  %993 = vst.msk [vmem:[#allocation3 + $0x28] sm:$0xff] %vm393_vm0, %v976_v44  ;;  %1336 = vperm.xlu1 %3024, %v1294_v41  }
 0x2f3   : > { %v960_v0 = vpop.xlane.xlu0 %959  ;;  %v962_v11 = vpop.xlane.xlu1 %961 }
 0x2f4   : > { %v981_v8 = vadd.f32 %v960_v0, %v933_v46  ;;  %v982_v9 = vadd.f32 %v962_v11, %v934_v56 }
 0x2f5   : > { %v1295_v39 = vld [vmem:[#allocation3 + $0x38] sm:$0xff] }
 0x2f6   : > { %998 = vst.msk [vmem:[#allocation3 + $0x50] sm:$0xff] %vm393_vm0, %v981_v8  ;;  %999 = vst.msk [vmem:[#allocation3 + $0x58] sm:$0xff] %vm393_vm0, %v982_v9  ;;  %1326 = vperm.xlu1 %3024, %v1292_v60   ;;  %1341 = vperm.xlu0 %3023, %v1295_v39   ;;  %v1768_v8 = vld [vmem:[%s4170_s6] sm:$0xff]  ;;  %v1769_v9 = vld [vmem:[%s4170_s6 + $0x8] sm:$0xff] }
 0x2f7   : > { %v964_v34 = vpop.xlane.xlu0 %963  ;;  %v958_v21 = vpop.xlane.xlu1 %957  ;;  %v2916_v15 = vpack.c.bf16 %v1769_v9, %v1768_v8 }
 0x2f8   : > { %v983_v53 = vadd.f32 %v964_v34, %v935_v57  ;;  %v980_v4 = vadd.f32 %v958_v21, %v932_v62 }
 0x2f9   : > { %v1293_v38 = vld [vmem:[#allocation3 + $0x28] sm:$0xff]  ;;  %v1296_v33 = vld [vmem:[#allocation3 + $0x40] sm:$0xff]  ;;  %2917 = vmatprep.subr.bf16.mxu1 %v2916_v15 }
 0x2fa   : > { %1000 = vst.msk [vmem:[#allocation3 + $0x60] sm:$0xff] %vm393_vm0, %v983_v53  ;;  %997 = vst.msk [vmem:[#allocation3 + $0x48] sm:$0xff] %vm393_vm0, %v980_v4  ;;  %1331 = vperm.xlu0 %3023, %v1293_v38  }
 0x2fb   : > { %v968_v22 = vpop.xlane.xlu0 %967  ;;  %v1023_v29 = vpop.permute.xlu1 %1022 }
 0x2fc   : > { %v985_v52 = vadd.f32 %v968_v22, %v937_v25  ;;  %v1100_v62 = vmul.f32 0.0, %v1023_v29  ;;  %v1772_v29 = vld [vmem:[%s4170_s6 + $0x20] sm:$0xff] }
 0x2fd   : > { %v1298_v6 = vld [vmem:[#allocation3 + $0x50] sm:$0xff]  ;;  %v1299_v14 = vld [vmem:[#allocation3 + $0x58] sm:$0xff] }
 0x2fe   : > { %1002 = vst.msk [vmem:[#allocation3 + $0x70] sm:$0xff] %vm393_vm0, %v985_v52  ;;  %1356 = vperm.xlu1 %3024, %v1298_v6   ;;  %1361 = vperm.xlu0 %3023, %v1299_v14  }
 0x301   : > { %v1297_v17 = vld [vmem:[#allocation3 + $0x48] sm:$0xff]  ;;  %v1300_v24 = vld [vmem:[#allocation3 + $0x60] sm:$0xff] }
 0x302   : > { %1346 = vperm.xlu1 %3024, %v1296_v33   ;;  %1351 = vperm.xlu0 %3023, %v1297_v17   ;;  %v1770_v33 = vld [vmem:[%s4170_s6 + $0x10] sm:$0xff]  ;;  %v1771_v17 = vld [vmem:[%s4170_s6 + $0x18] sm:$0xff] }
 0x303   : > { %v1028_v46 = vpop.permute.xlu0 %1027 }
 0x304   : > { %v1101_v25 = vmul.f32 0.0, %v1028_v46 }
 0x305   : > { %v1302_v32 = vld [vmem:[#allocation3 + $0x70] sm:$0xff] }
 0x306   : > { %1072 = vperm.xlu1 %3024, %v3729_v5   ;;  %1077 = vperm.xlu0 %3023, %v3724_v19   ;;  %v3102_v19 = vpop.eup %3101 }
 0x307   : > { %v938_v23 = vmul.f32 %v3102_v19, %v922_v2  ;;  %v3104_v10 = vpop.eup %3103  ;;  %v1038_v16 = vpop.permute.xlu0 %1037 }
 0x308   : > { %v936_v63 = vmul.f32 %v3104_v10, %v920_v55  ;;  %v1103_v18 = vmul.f32 0.0, %v1038_v16  ;;  %v1774_v55 = vld [vmem:[%s4170_s6 + $0x30] sm:$0xff] }
 0x30a   : > { %1366 = vperm.xlu1 %3024, %v1300_v24  }
 0x30b   : > { %v3805_v3 = vpop.permute.xlu0 %1047 }
 0x30e   : > { %1376 = vperm.xlu1 %3024, %v1302_v32  }
 0x30f   : > { %v3813_v58 = vpop.permute.xlu0 %1057 }
 0x312   : > { %1082 = vperm.xlu1 %3024, %v3098_v59  }
 0x313   : > { %v3815_v39 = vpop.permute.xlu0 %1067 }
 0x316   : > { %1092 = vperm.xlu1 %3024, %v3100_v7  }
 0x323   : > { %v3773_v51 = vpop.f32.mrb[0].mxu1 }
 0x324   : > { %v1158_v49 = vpop.f32.mrb[1].mxu1 }
 0x325   : > { %v3775_v13 = vpop.f32.mrb[2].mxu1  ;;  %v1221_v1 = vadd.f32 %v1158_v49, %v1100_v62 }
 0x326   : > { %v3777_v30 = vpop.f32.mrb[3].mxu1 }
 0x327   : > { %v1222_v14 = vadd.f32 %v3777_v30, %v1101_v25  ;;  %v1224_v30 = vadd.f32 %v3775_v13, %v1103_v18 }
 0x32c   : > { %v970_v37 = vpop.xlane.xlu1 %969 }
 0x32d   : > { %v986_v5 = vadd.f32 %v970_v37, %v938_v23 }
 0x32f   : > { %1003 = vst.msk [vmem:[#allocation3 + $0x78] sm:$0xff] %vm393_vm0, %v986_v5  ;;  %v1775_v5 = vld [vmem:[%s4170_s6 + $0x38] sm:$0xff] }
 0x330   : > { %v966_v47 = vpop.xlane.xlu1 %965  ;;  %v2928_v8 = vpack.c.bf16 %v1775_v5, %v1774_v55 }
 0x331   : > { %v984_v12 = vadd.f32 %v966_v47, %v936_v63 }
 0x333   : > { %1001 = vst.msk [vmem:[#allocation3 + $0x68] sm:$0xff] %vm393_vm0, %v984_v12  ;;  %v3781_v20 = vpop.f32.mrb[4].mxu1 }
 0x334   : > { %v3783_v36 = vpop.f32.mrb[5].mxu1  ;;  %v1033_v27 = vpop.permute.xlu1 %1032 }
 0x335   : > { %v3785_v40 = vpop.f32.mrb[6].mxu1  ;;  %v1102_v38 = vmul.f32 0.0, %v1033_v27  ;;  %v1777_v27 = vld [vmem:[%s4170_s6 + $0x48] sm:$0xff] }
 0x336   : > { %v3787_v48 = vpop.f32.mrb[7].mxu1  ;;  %v1303_v43 = vld [vmem:[#allocation3 + $0x78] sm:$0xff] }
 0x337   : > { %v1223_v32 = vadd.f32 %v3773_v51, %v1102_v38  ;;  %v1773_v51 = vld [vmem:[%s4170_s6 + $0x28] sm:$0xff] }
 0x338   : > { %v1043_v60 = vpop.permute.xlu1 %1042  ;;  %v2924_v13 = vpack.c.bf16 %v1773_v51, %v1772_v29 }
 0x339   : > { %v1104_v2 = vmul.f32 0.0, %v1043_v60 }
 0x33a   : > { %v1301_v50 = vld [vmem:[#allocation3 + $0x68] sm:$0xff] }
 0x33b   : > { %v3789_v44 = vpop.f32.mrb[8].mxu1  ;;  %1371 = vperm.xlu0 %3023, %v1301_v50   ;;  %v1225_v63 = vadd.f32 %v3783_v36, %v1104_v2  ;;  %v1105_v50 = vmul.f32 0.0, %v3805_v3  ;;  %v1776_v36 = vld [vmem:[%s4170_s6 + $0x40] sm:$0xff] }
 0x33c   : > { %v3791_v28 = vpop.f32.mrb[9].mxu1  ;;  %v1053_v54 = vpop.permute.xlu1 %1052 }
 0x33d   : > { %v3793_v42 = vpop.f32.mrb[10].mxu1  ;;  %v1106_v47 = vmul.f32 0.0, %v1053_v54 }
 0x33e   : > { %v3795_v41 = vpop.f32.mrb[11].mxu1 }
 0x33f   : > { %1381 = vperm.xlu0 %3023, %v1303_v43   ;;  %v1227_v60 = vadd.f32 %v3781_v20, %v1106_v47  ;;  %v1778_v20 = vld [vmem:[%s4170_s6 + $0x50] sm:$0xff] }
 0x340   : > { %v3817_v57 = vpop.permute.xlu1 %1062 }
 0x343   : > { %v3797_v56 = vpop.f32.mrb[12].mxu1  ;;  %1087 = vperm.xlu0 %3023, %v3104_v10  }
 0x344   : > { %v3799_v59 = vpop.f32.mrb[13].mxu1 }
 0x345   : > { %v3801_v0 = vpop.f32.mrb[14].mxu1 }
 0x346   : > { %v3803_v11 = vpop.f32.mrb[15].mxu1 }
 0x347   : > { %1097 = vperm.xlu0 %3023, %v3102_v19   ;;  %v2920_v19 = vpack.c.bf16 %v1771_v17, %v1770_v33 }
 0x35d   : > { %v1307_v35 = vpop.permute.xlu0 %1306 }
 0x35e   : > { %3105 = vrcp.f32 %v1307_v35  ;;  %v1107_v35 = vmul.f32 0.0, %v3813_v58  ;;  %v1779_v58 = vld [vmem:[%s4170_s6 + $0x58] sm:$0xff] }
 0x35f   : > { %v2936_v25 = vpack.c.bf16 %v1779_v58, %v1778_v20  ;;  %v1961_v20 = vld [vmem:[%s4172_s8 + $0x48] sm:$0xff] }
 0x361   : > { %v1322_v26 = vpop.permute.xlu0 %1321 }
 0x368   : > { %v3106_v7 = vpop.eup %3105  ;;  %v1317_v34 = vpop.permute.xlu1 %1316 }
 0x369   : > { %v1385_v21 = vmul.f32 %v3106_v7, %v1221_v1  ;;  %3107 = vrcp.f32 %v1317_v34  ;;  %v2932_v7 = vpack.c.bf16 %v1777_v27, %v1776_v36  ;;  %v1228_v34 = vadd.f32 %v3785_v40, %v1107_v35  ;;  %v1954_v36 = vld [vmem:[%s4172_s8 + $0x10] sm:$0xff]  ;;  %v1956_v35 = vld [vmem:[%s4172_s8 + $0x20] sm:$0xff] }
 0x36b   : > { %2660 = vmatprep.mubr.f32.mxu1 %v1385_v21  ;;  %2716 = vmatprep.mubr.f32.mxu0 %v1385_v21  ;;  %v1108_v21 = vmul.f32 0.0, %v3817_v57 }
 0x36c   : > { %v1312_v53 = vpop.permute.xlu1 %1311 }
 0x36d   : > { %3109 = vrcp.f32 %v1312_v53  ;;  %v1229_v57 = vadd.f32 %v3791_v28, %v1108_v21  ;;  %v1962_v21 = vld [vmem:[%s4172_s8 + $0x50] sm:$0xff] }
 0x36e   : > { %3111 = vrcp.f32 %v1322_v26 }
 0x371   : > { %v1337_v4 = vpop.permute.xlu1 %1336 }
 0x373   : > { %v3108_v6 = vpop.eup %3107 }
 0x374   : > { %v1389_v49 = vmul.f32 %v3108_v6, %v1223_v32  ;;  %v1780_v32 = vld [vmem:[%s4170_s6 + $0x60] sm:$0xff] }
 0x375   : > { %v1342_v22 = vpop.permute.xlu0 %1341  ;;  %v1327_v52 = vpop.permute.xlu1 %1326 }
 0x376   : > { %3113 = vrcp.f32 %v1327_v52 }
 0x377   : > { %v3110_v24 = vpop.eup %3109  ;;  %3115 = vrcp.f32 %v1337_v4  ;;  %v1109_v4 = vmul.f32 0.0, %v3815_v39 }
 0x378   : > { %v1387_v61 = vmul.f32 %v3110_v24, %v1222_v14  ;;  %v3112_v45 = vpop.eup %3111 }
 0x379   : > { %v1332_v31 = vpop.permute.xlu0 %1331  ;;  %v1391_v23 = vmul.f32 %v3112_v45, %v1224_v30  ;;  %v1230_v52 = vadd.f32 %v3795_v41, %v1109_v4  ;;  %v1781_v41 = vld [vmem:[%s4170_s6 + $0x68] sm:$0xff]  ;;  %v1964_v4 = vld [vmem:[%s4172_s8 + $0x60] sm:$0xff] }
 0x37a   : > { %3117 = vrcp.f32 %v1332_v31  ;;  %2661 = vmatmul.mubr.f32.vlgmr.msra.gmra.mrb[16].mxu1 %v1387_v61  ;;  %2717 = vmatmul.mubr.f32.vlgmr.msra.gmra.mrb[16].mxu0 %v1387_v61  ;;  %v2940_v28 = vpack.c.bf16 %v1781_v41, %v1780_v32 }
 0x37b   : > { %2663 = vmatprep.mubr.f32.mxu1 %v1389_v49  ;;  %2719 = vmatprep.mubr.f32.mxu0 %v1389_v49  ;;  %3119 = vrcp.f32 %v1342_v22 }
 0x37c   : > { %2919 = vmatpush3.bf16.msra.mxu1 %v2916_v15  ;;  %v1226_v15 = vadd.f32 %v3787_v48, %v1105_v50 }
 0x37d   : > { %v1362_v10 = vpop.permute.xlu0 %1361  ;;  %v1357_v37 = vpop.permute.xlu1 %1356  ;;  %2921 = vmatprep.subr.bf16.mxu1 %v2920_v19 }
 0x37e   : > { %2664 = vmatmul.mubr.f32.gmra.mrb[18].mxu1 %v1391_v23  ;;  %2720 = vmatmul.mubr.f32.gmra.mrb[18].mxu0 %v1391_v23  ;;  %3121 = vrcp.f32 %v1357_v37 }
 0x380   : > { %2923 = vmatpush3.bf16.msra.mxu1 %v2920_v19  ;;  %v3114_v12 = vpop.eup %3113 }
 0x381   : > { %v1352_v43 = vpop.permute.xlu0 %1351  ;;  %v1347_v46 = vpop.permute.xlu1 %1346  ;;  %2925 = vmatprep.subr.bf16.mxu1 %v2924_v13  ;;  %v1393_v16 = vmul.f32 %v3114_v12, %v1225_v63 }
 0x382   : > { %3123 = vrcp.f32 %v1352_v43  ;;  %v3116_v9 = vpop.eup %3115 }
 0x383   : > { %3125 = vrcp.f32 %v1347_v46  ;;  %2666 = vmatprep.mubr.f32.mxu1 %v1393_v16  ;;  %2722 = vmatprep.mubr.f32.mxu0 %v1393_v16  ;;  %v1397_v1 = vmul.f32 %v3116_v9, %v1227_v60 }
 0x384   : > { %v3118_v3 = vpop.eup %3117  ;;  %2927 = vmatpush3.bf16.msra.mxu1 %v2924_v13  ;;  %3127 = vrcp.f32 %v1362_v10 }
 0x385   : > { %v1073_v54 = vpop.permute.xlu1 %1072  ;;  %v1395_v62 = vmul.f32 %v3118_v3, %v1226_v15  ;;  %v3120_v48 = vpop.eup %3119  ;;  %2929 = vmatprep.subr.bf16.mxu1 %v2928_v8  ;;  %v1953_v15 = vld [vmem:[%s4172_s8 + $0x8] sm:$0xff]  ;;  %v1955_v3 = vld [vmem:[%s4172_s8 + $0x18] sm:$0xff] }
 0x386   : > { %v1078_v26 = vpop.permute.xlu0 %1077  ;;  %v1110_v53 = vmul.f32 0.0, %v1073_v54  ;;  %v1399_v40 = vmul.f32 %v3120_v48, %v1228_v34  ;;  %v2952_v60 = vpack.c.bf16 %v1955_v3, %v1954_v36  ;;  %v1957_v54 = vld [vmem:[%s4172_s8 + $0x28] sm:$0xff]  ;;  %v1958_v48 = vld [vmem:[%s4172_s8 + $0x30] sm:$0xff]  ;;  %v1960_v34 = vld [vmem:[%s4172_s8 + $0x40] sm:$0xff] }
 0x387   : > { %2667 = vmatmul.mubr.f32.gmra.mrb[20].mxu1 %v1395_v62  ;;  %2723 = vmatmul.mubr.f32.gmra.mrb[20].mxu0 %v1395_v62  ;;  %v1111_v6 = vmul.f32 0.0, %v1078_v26  ;;  %v2956_v62 = vpack.c.bf16 %v1957_v54, %v1956_v35  ;;  %v3910_v58 = vpack.c.bf16 %v1961_v20, %v1960_v34  ;;  %v1963_v26 = vld [vmem:[%s4172_s8 + $0x58] sm:$0xff] }
 0x388   : > { %2669 = vmatprep.mubr.f32.mxu1 %v1397_v1  ;;  %2725 = vmatprep.mubr.f32.mxu0 %v1397_v1  ;;  %v3122_v22 = vpop.eup %3121  ;;  %v1231_v33 = vadd.f32 %v3789_v44, %v1110_v53  ;;  %v1959_v1 = vld [vmem:[%s4172_s8 + $0x38] sm:$0xff]  ;;  %v3919_v53 = vpack.c.bf16 %v1963_v26, %v1962_v21 }
 0x389   : > { %v1367_v38 = vpop.permute.xlu1 %1366  ;;  %2931 = vmatpush3.bf16.msra.mxu1 %v2928_v8  ;;  %v1232_v61 = vadd.f32 %v3793_v42, %v1111_v6 }
 0x38a   : > { %3129 = vrcp.f32 %v1367_v38  ;;  %2933 = vmatprep.subr.bf16.mxu1 %v2932_v7  ;;  %v1405_v44 = vmul.f32 %v3122_v22, %v1231_v33  ;;  %v1965_v38 = vld [vmem:[%s4172_s8 + $0x68] sm:$0xff] }
 0x38b   : > { %2670 = vmatmul.mubr.f32.gmra.mrb[22].mxu1 %v1399_v40  ;;  %2726 = vmatmul.mubr.f32.gmra.mrb[22].mxu0 %v1399_v40  ;;  %v3929_v40 = vpack.c.bf16 %v1965_v38, %v1964_v4 }
 0x38c   : > { %v3124_v14 = vpop.eup %3123 }
 0x38d   : > { %v3126_v17 = vpop.eup %3125  ;;  %v1377_v24 = vpop.permute.xlu1 %1376  ;;  %v1403_v39 = vmul.f32 %v3124_v14, %v1230_v52  ;;  %2935 = vmatpush3.bf16.msra.mxu1 %v2932_v7  ;;  %v2960_v7 = vpack.c.bf16 %v1959_v1, %v1958_v48 }
 0x38e   : > { %v1401_v18 = vmul.f32 %v3126_v17, %v1229_v57  ;;  %2937 = vmatprep.subr.bf16.mxu1 %v2936_v25  ;;  %v3128_v45 = vpop.eup %3127  ;;  %3131 = vrcp.f32 %v1377_v24 }
 0x38f   : > { %v1407_v19 = vmul.f32 %v3128_v45, %v1232_v61 }
 0x390   : > { %2672 = vmatprep.mubr.f32.mxu1 %v1401_v18  ;;  %2728 = vmatprep.mubr.f32.mxu0 %v1401_v18 }
 0x391   : > { %2673 = vmatmul.mubr.f32.gmra.mrb[24].mxu1 %v1403_v39  ;;  %2729 = vmatmul.mubr.f32.gmra.mrb[24].mxu0 %v1403_v39  ;;  %v1083_v31 = vpop.permute.xlu1 %1082 }
 0x392   : > { %2675 = vmatprep.mubr.f32.mxu1 %v1405_v44  ;;  %2731 = vmatprep.mubr.f32.mxu0 %v1405_v44  ;;  %v1112_v49 = vmul.f32 0.0, %v1083_v31 }
 0x393   : > { %2939 = vmatpush3.bf16.msra.mxu1 %v2936_v25  ;;  %v3937_v25 = vld [vmem:[%s4169_s5] ss:$0 sm:$0xff] }
 0x394   : > { %v3130_v30 = vpop.eup %3129  ;;  %v1233_v29 = vadd.f32 %v3799_v59, %v1112_v49  ;;  %2941 = vmatprep.subr.bf16.mxu1 %v2940_v28 }
 0x395   : > { %2676 = vmatmul.mubr.f32.gmra.mrb[26].mxu1 %v1407_v19  ;;  %2732 = vmatmul.mubr.f32.gmra.mrb[26].mxu0 %v1407_v19  ;;  %v1093_v2 = vpop.permute.xlu1 %1092 }
 0x396   : > { %v1409_v42 = vmul.f32 %v3130_v30, %v1233_v29  ;;  %v1114_v10 = vmul.f32 0.0, %v1093_v2 }
 0x397   : > { %2943 = vmatpush3.bf16.msra.mxu1 %v2940_v28 }
 0x398   : > { %2678 = vmatprep.mubr.f32.mxu1 %v1409_v42  ;;  %2734 = vmatprep.mubr.f32.mxu0 %v1409_v42  ;;  %v3132_v55 = vpop.eup %3131  ;;  %v1235_v5 = vadd.f32 %v3797_v56, %v1114_v10  ;;  %v1782_v56 = vld [vmem:[%s4170_s6 + $0x70] sm:$0xff] }
 0x39a   : > { %v1413_v43 = vmul.f32 %v3132_v55, %v1235_v5 }
 0x3ba   : > { %v1372_v51 = vpop.permute.xlu0 %1371 }
 0x3bb   : > { %3133 = vrcp.f32 %v1372_v51 }
 0x3be   : > { %v1382_v23 = vpop.permute.xlu0 %1381 }
 0x3bf   : > { %3135 = vrcp.f32 %v1382_v23 }
 0x3c2   : > { %v1088_v37 = vpop.permute.xlu0 %1087 }
 0x3c3   : > { %v1113_v13 = vmul.f32 0.0, %v1088_v37 }
 0x3c5   : > { %v3134_v59 = vpop.eup %3133  ;;  %v1234_v63 = vadd.f32 %v3803_v11, %v1113_v13  ;;  %v1783_v11 = vld [vmem:[%s4170_s6 + $0x78] sm:$0xff] }
 0x3c6   : > { %v1098_v47 = vpop.permute.xlu0 %1097  ;;  %v2944_v9 = vpack.c.bf16 %v1783_v11, %v1782_v56 }
 0x3c7   : > { %v1115_v12 = vmul.f32 0.0, %v1098_v47  ;;  %v1411_v50 = vmul.f32 %v3134_v59, %v1234_v63 }
 0x3c8   : > { %2945 = vmatprep.subr.bf16.mxu1 %v2944_v9 }
 0x3c9   : > { %v3136_v46 = vpop.eup %3135  ;;  %v1236_v16 = vadd.f32 %v3801_v0, %v1115_v12  ;;  %2679 = vmatmul.mubr.f32.gmra.mrb[28].mxu1 %v1411_v50  ;;  %2735 = vmatmul.mubr.f32.gmra.mrb[28].mxu0 %v1411_v50  ;;  %v1952_v0 = vld [vmem:[%s4172_s8] sm:$0xff] }
 0x3ca   : > { %2681 = vmatprep.mubr.f32.mxu1 %v1413_v43  ;;  %2737 = vmatprep.mubr.f32.mxu0 %v1413_v43  ;;  %v2948_v27 = vpack.c.bf16 %v1953_v15, %v1952_v0 }
 0x3cb   : > { %v1415_v8 = vmul.f32 %v3136_v46, %v1236_v16  ;;  %2947 = vmatpush3.bf16.msra.mxu1 %v2944_v9 }
 0x3cc   : > { %2949 = vmatprep.subr.bf16.mxu0 %v2948_v27  ;;  %2980 = vmatprep.subr.bf16.mxu1 %v2948_v27 }
 0x3cd   : > { %2682 = vmatmul.mubr.f32.gmra.mrb[30].mxu1 %v1415_v8  ;;  %2738 = vmatmul.mubr.f32.gmra.mrb[30].mxu0 %v1415_v8 }
 0x3ce   : > { %2951 = vmatpush3.bf16.msra.mxu0 %v2948_v27 }
 0x3cf   : > { %2953 = vmatprep.subr.bf16.mxu0 %v2952_v60 }
 0x3d2   : > { %2955 = vmatpush3.bf16.msra.mxu0 %v2952_v60 }
 0x3d3   : > { %2957 = vmatprep.subr.bf16.mxu0 %v2956_v62 }
 0x3d6   : > { %2959 = vmatpush3.bf16.msra.mxu0 %v2956_v62 }
 0x3d7   : > { %2961 = vmatprep.subr.bf16.mxu0 %v2960_v7 }
 0x3da   : > { %2963 = vmatpush3.bf16.msra.mxu0 %v2960_v7 }
 0x3db   : > { %2965 = vmatprep.subr.bf16.mxu0 %v3910_v58 }
 0x3de   : > { %2967 = vmatpush3.bf16.msra.mxu0 %v3910_v58 }
 0x3df   : > { %2969 = vmatprep.subr.bf16.mxu0 %v3919_v53 }
 0x3e2   : > { %2971 = vmatpush3.bf16.msra.mxu0 %v3919_v53 }
 0x3e3   : > { %2973 = vmatprep.subr.bf16.mxu0 %v3929_v40 }
 0x3e6   : > { %2975 = vmatpush3.bf16.msra.mxu0 %v3929_v40 }
 0x44d   : > { %v3939_v22 = vpop.f32.mrb[16].mxu1  ;;  %v2718_v52 = vpop.f32.mrb[16].mxu0 }
 0x44e   : > { %v1679_v6 = vadd.f32 %v2718_v52, %v3937_v25  ;;  %v3942_v14 = vpop.f32.mrb[17].mxu1  ;;  %v1673_v57 = vpop.f32.mrb[17].mxu0 }
 0x44f   : > { %v1674_v33 = vadd.f32 %v3937_v25, %v1673_v57  ;;  %v1967_v57 = vld [vmem:[%s4172_s8 + $0x78] sm:$0xff] }
 0x450   : > { %v1753_v32 = vmax.f32 %v1679_v6, 0.0  ;;  %v1966_v6 = vld [vmem:[%s4172_s8 + $0x70] sm:$0xff] }
 0x451   : > { %v1752_v17 = vmax.f32 %v1674_v33, 0.0  ;;  %v3945_v24 = vpop.f32.mrb[18].mxu1  ;;  %v2721_v39 = vpop.f32.mrb[18].mxu0  ;;  %v2976_v33 = vpack.c.bf16 %v1967_v57, %v1966_v6 }
 0x452   : > { %v1689_v41 = vadd.f32 %v2721_v39, %v3937_v25  ;;  %v3948_v18 = vpop.f32.mrb[19].mxu1  ;;  %v1683_v61 = vpop.f32.mrb[19].mxu0 }
 0x453   : > { %v1684_v45 = vadd.f32 %v3937_v25, %v1683_v61  ;;  %2772 = vmatprep.mubr.f32.mxu1 %v1752_v17  ;;  %2977 = vmatprep.subr.bf16.mxu0 %v2976_v33 }
 0x454   : > { %2773 = vmatmul.mubr.f32.vlgmr.msra.gmra.mrb[32].mxu1 %v1753_v32  ;;  %v1755_v28 = vmax.f32 %v1689_v41, 0.0  ;;  %2979 = vmatpush3.bf16.msra.mxu0 %v2976_v33 }
 0x455   : > { %v1754_v44 = vmax.f32 %v1684_v45, 0.0  ;;  %2988 = vmatpush3.bf16.msra.mxu1 %v2948_v27 }
 0x456   : > { %2981 = vmatprep.subr.bf16.mxu1 %v2952_v60 }
 0x457   : > { %2775 = vmatprep.mubr.f32.mxu1 %v1754_v44 }
 0x458   : > { %2776 = vmatmul.mubr.f32.gmra.mrb[34].mxu1 %v1755_v28 }
 0x459   : > { %2989 = vmatpush3.bf16.msra.mxu1 %v2952_v60 }
 0x45a   : > { %v3951_v31 = vpop.f32.mrb[20].mxu1  ;;  %v2724_v49 = vpop.f32.mrb[20].mxu0  ;;  %2982 = vmatprep.subr.bf16.mxu1 %v2956_v62 }
 0x45b   : > { %v1699_v19 = vadd.f32 %v2724_v49, %v3937_v25  ;;  %v3954_v30 = vpop.f32.mrb[21].mxu1  ;;  %v1693_v29 = vpop.f32.mrb[21].mxu0 }
 0x45c   : > { %v1694_v42 = vadd.f32 %v3937_v25, %v1693_v29 }
 0x45d   : > { %2990 = vmatpush3.bf16.msra.mxu1 %v2956_v62  ;;  %v1757_v10 = vmax.f32 %v1699_v19, 0.0 }
 0x45e   : > { %v1756_v51 = vmax.f32 %v1694_v42, 0.0  ;;  %v3957_v2 = vpop.f32.mrb[22].mxu1  ;;  %v2727_v23 = vpop.f32.mrb[22].mxu0  ;;  %2983 = vmatprep.subr.bf16.mxu1 %v2960_v7 }
 0x45f   : > { %v1709_v37 = vadd.f32 %v2727_v23, %v3937_v25  ;;  %v3960_v13 = vpop.f32.mrb[23].mxu1  ;;  %v1703_v55 = vpop.f32.mrb[23].mxu0 }
 0x460   : > { %v1704_v5 = vadd.f32 %v3937_v25, %v1703_v55  ;;  %2778 = vmatprep.mubr.f32.mxu1 %v1756_v51 }
 0x461   : > { %2779 = vmatmul.mubr.f32.gmra.mrb[36].mxu1 %v1757_v10  ;;  %v1759_v63 = vmax.f32 %v1709_v37, 0.0 }
 0x462   : > { %v1758_v59 = vmax.f32 %v1704_v5, 0.0  ;;  %2991 = vmatpush3.bf16.msra.mxu1 %v2960_v7 }
 0x463   : > { %2984 = vmatprep.subr.bf16.mxu1 %v3910_v58 }
 0x464   : > { %v3964_v47 = vpop.f32.mrb[24].mxu1  ;;  %v2730_v12 = vpop.f32.mrb[24].mxu0  ;;  %2781 = vmatprep.mubr.f32.mxu1 %v1758_v59 }
 0x465   : > { %v1719_v50 = vadd.f32 %v2730_v12, %v3937_v25  ;;  %v3967_v43 = vpop.f32.mrb[25].mxu1  ;;  %v1713_v46 = vpop.f32.mrb[25].mxu0  ;;  %2782 = vmatmul.mubr.f32.gmra.mrb[38].mxu1 %v1759_v63 }
 0x466   : > { %v1714_v16 = vadd.f32 %v3937_v25, %v1713_v46  ;;  %2992 = vmatpush3.bf16.msra.mxu1 %v3910_v58 }
 0x467   : > { %2985 = vmatprep.subr.bf16.mxu1 %v3919_v53  ;;  %v1761_v9 = vmax.f32 %v1719_v50, 0.0 }
 0x468   : > { %v1760_v8 = vmax.f32 %v1714_v16, 0.0  ;;  %v3972_v56 = vpop.f32.mrb[26].mxu1  ;;  %v2733_v11 = vpop.f32.mrb[26].mxu0 }
 0x469   : > { %v1729_v0 = vadd.f32 %v2733_v11, %v3937_v25  ;;  %v3975_v15 = vpop.f32.mrb[27].mxu1  ;;  %v1723_v36 = vpop.f32.mrb[27].mxu0 }
 0x46a   : > { %v1724_v27 = vadd.f32 %v3937_v25, %v1723_v36  ;;  %2784 = vmatprep.mubr.f32.mxu1 %v1760_v8  ;;  %2993 = vmatpush3.bf16.msra.mxu1 %v3919_v53 }
 0x46b   : > { %2785 = vmatmul.mubr.f32.gmra.mrb[40].mxu1 %v1761_v9  ;;  %2986 = vmatprep.subr.bf16.mxu1 %v3929_v40  ;;  %v1763_v60 = vmax.f32 %v1729_v0, 0.0 }
 0x46c   : > { %v1762_v3 = vmax.f32 %v1724_v27, 0.0 }
 0x46e   : > { %2787 = vmatprep.mubr.f32.mxu1 %v1762_v3  ;;  %2994 = vmatpush3.bf16.msra.mxu1 %v3929_v40 }
 0x46f   : > { %2788 = vmatmul.mubr.f32.gmra.mrb[42].mxu1 %v1763_v60  ;;  %2987 = vmatprep.subr.bf16.mxu1 %v2976_v33 }
 0x472   : > { %2995 = vmatpush3.bf16.msra.mxu1 %v2976_v33 }
 0x49c   : > { %v3981_v35 = vpop.f32.mrb[28].mxu1  ;;  %v2736_v54 = vpop.f32.mrb[28].mxu0 }
 0x49d   : > { %v1739_v62 = vadd.f32 %v2736_v54, %v3937_v25  ;;  %v3984_v48 = vpop.f32.mrb[29].mxu1  ;;  %v1733_v1 = vpop.f32.mrb[29].mxu0 }
 0x49e   : > { %v1734_v7 = vadd.f32 %v3937_v25, %v1733_v1 }
 0x49f   : > { %v1765_v21 = vmax.f32 %v1739_v62, 0.0 }
 0x4a0   : > { %v1764_v34 = vmax.f32 %v1734_v7, 0.0  ;;  %v3987_v20 = vpop.f32.mrb[30].mxu1  ;;  %v2739_v58 = vpop.f32.mrb[30].mxu0 }
 0x4a1   : > { %v1749_v26 = vadd.f32 %v2739_v58, %v3937_v25  ;;  %v3990_v53 = vpop.f32.mrb[31].mxu1  ;;  %v1743_v4 = vpop.f32.mrb[31].mxu0 }
 0x4a2   : > { %v1744_v38 = vadd.f32 %v3937_v25, %v1743_v4  ;;  %2790 = vmatprep.mubr.f32.mxu1 %v1764_v34  ;;  %v2382_v25 = vld [vmem:[%s4171_s7] ss:$0 sm:$0xff] }
 0x4a3   : > { %2791 = vmatmul.mubr.f32.gmra.mrb[44].mxu1 %v1765_v21  ;;  %v1767_v52 = vmax.f32 %v1749_v26, 0.0 }
 0x4a4   : > { %v1766_v40 = vmax.f32 %v1744_v38, 0.0 }
 0x4a6   : > { %2793 = vmatprep.mubr.f32.mxu1 %v1766_v40 }
 0x4a7   : > { %2794 = vmatmul.mubr.f32.gmra.mrb[46].mxu1 %v1767_v52 }
 0x527   : > { %v2774_v17 = vpop.f32.mrb[32].mxu1 }
 0x528   : > { %v1863_v39 = vadd.f32 %v2774_v17, %v2382_v25  ;;  %v1857_v32 = vpop.f32.mrb[33].mxu1 }
 0x529   : > { %v1858_v41 = vadd.f32 %v2382_v25, %v1857_v32 }
 0x52a   : > { %v1937_v44 = vmax.f32 %v1863_v39, 0.0  ;;  %v4005_v39 = vld [vmem:[%s4173_s9] ss:$0 sm:$0xff] }
 0x52b   : > { %v1936_v61 = vmax.f32 %v1858_v41, 0.0  ;;  %v2777_v45 = vpop.f32.mrb[34].mxu1 }
 0x52c   : > { %v1873_v28 = vadd.f32 %v2777_v45, %v2382_v25  ;;  %v1867_v49 = vpop.f32.mrb[35].mxu1 }
 0x52d   : > { %v1868_v19 = vadd.f32 %v2382_v25, %v1867_v49  ;;  %2828 = vmatprep.mubr.f32.mxu0 %v1936_v61 }
 0x52e   : > { %2829 = vmatmul.mubr.f32.vlgmr.msra.gmra.mrb[32].mxu0 %v1937_v44  ;;  %v1939_v42 = vmax.f32 %v1873_v28, 0.0 }
 0x52f   : > { %v1938_v29 = vmax.f32 %v1868_v19, 0.0 }
 0x531   : > { %2831 = vmatprep.mubr.f32.mxu0 %v1938_v29 }
 0x532   : > { %2832 = vmatmul.mubr.f32.gmra.mrb[34].mxu0 %v1939_v42 }
 0x534   : > { %v2780_v51 = vpop.f32.mrb[36].mxu1 }
 0x535   : > { %v1883_v23 = vadd.f32 %v2780_v51, %v2382_v25  ;;  %v1877_v10 = vpop.f32.mrb[37].mxu1 }
 0x536   : > { %v1878_v37 = vadd.f32 %v2382_v25, %v1877_v10 }
 0x537   : > { %v1941_v59 = vmax.f32 %v1883_v23, 0.0 }
 0x538   : > { %v1940_v55 = vmax.f32 %v1878_v37, 0.0  ;;  %v2783_v5 = vpop.f32.mrb[38].mxu1 }
 0x539   : > { %v1893_v63 = vadd.f32 %v2783_v5, %v2382_v25  ;;  %v1887_v12 = vpop.f32.mrb[39].mxu1 }
 0x53a   : > { %v1888_v50 = vadd.f32 %v2382_v25, %v1887_v12  ;;  %2834 = vmatprep.mubr.f32.mxu0 %v1940_v55 }
 0x53b   : > { %2835 = vmatmul.mubr.f32.gmra.mrb[36].mxu0 %v1941_v59  ;;  %v1943_v16 = vmax.f32 %v1893_v63, 0.0 }
 0x53c   : > { %v1942_v46 = vmax.f32 %v1888_v50, 0.0  ;;  %v2120_v50 = vlaneseq }
 0x53e   : > { %v2786_v8 = vpop.f32.mrb[40].mxu1  ;;  %2837 = vmatprep.mubr.f32.mxu0 %v1942_v46 }
 0x53f   : > { %v1903_v11 = vadd.f32 %v2786_v8, %v2382_v25  ;;  %v1897_v9 = vpop.f32.mrb[41].mxu1  ;;  %2838 = vmatmul.mubr.f32.gmra.mrb[38].mxu0 %v1943_v16 }
 0x540   : > { %v1898_v0 = vadd.f32 %v2382_v25, %v1897_v9 }
 0x541   : > { %v1945_v3 = vmax.f32 %v1903_v11, 0.0 }
 0x542   : > { %v1944_v36 = vmax.f32 %v1898_v0, 0.0  ;;  %v2789_v27 = vpop.f32.mrb[42].mxu1 }
 0x543   : > { %v1913_v60 = vadd.f32 %v2789_v27, %v2382_v25  ;;  %v1907_v54 = vpop.f32.mrb[43].mxu1 }
 0x544   : > { %v1908_v62 = vadd.f32 %v2382_v25, %v1907_v54  ;;  %2840 = vmatprep.mubr.f32.mxu1 %v1944_v36  ;;  %v4018_v54 = vld [vmem:[%s4167_s3] ss:$0 sm:$0xff] }
 0x545   : > { %2841 = vmatmul.mubr.f32.vlgmr.msra.gmra.mrb[48].mxu1 %v1945_v3  ;;  %v1947_v7 = vmax.f32 %v1913_v60, 0.0 }
 0x546   : > { %v1946_v1 = vmax.f32 %v1908_v62, 0.0  ;;  %v4020_v62 = vand.u32 127, %v2120_v50 }
 0x548   : > { %2843 = vmatprep.mubr.f32.mxu1 %v1946_v1  ;;  %vm2123_vm1 = vcmp.ge.s32.totalorder %v4020_v62, 2  ;;  %vm2124_vm2 = vcmp.lt.s32.totalorder %v4020_v62, 6  ;;  %vm2122_vm3 = vcmp.lt.s32.totalorder %v4020_v62, 2 }
 0x549   : > { %2844 = vmatmul.mubr.f32.gmra.mrb[50].mxu1 %v1947_v7  ;;  %vm4032_vm4 = vmand %vm2123_vm1, %vm2124_vm2 }
 0x576   : > { %v2792_v34 = vpop.f32.mrb[44].mxu1 }
 0x577   : > { %v1923_v58 = vadd.f32 %v2792_v34, %v2382_v25  ;;  %v1917_v21 = vpop.f32.mrb[45].mxu1 }
 0x578   : > { %v1918_v26 = vadd.f32 %v2382_v25, %v1917_v21  ;;  %v1506_v21 = vadd.f32 %v4018_v54, %v3942_v14 }
 0x579   : > { %v1949_v40 = vmax.f32 %v1923_v58, 0.0  ;;  %v1511_v58 = vadd.f32 %v3939_v22, %v4018_v54 }
 0x57a   : > { %v1948_v4 = vmax.f32 %v1918_v26, 0.0  ;;  %v2795_v38 = vpop.f32.mrb[46].mxu1 }
 0x57b   : > { %v1933_v52 = vadd.f32 %v2795_v38, %v2382_v25  ;;  %v1927_v6 = vpop.f32.mrb[47].mxu1  ;;  %v2127_v14 = vsel %vm2122_vm3, %v1511_v58, 0.0 }
 0x57c   : > { %v1928_v57 = vadd.f32 %v2382_v25, %v1927_v6  ;;  %2846 = vmatprep.mubr.f32.mxu1 %v1948_v4 }
 0x57d   : > { %2847 = vmatmul.mubr.f32.gmra.mrb[52].mxu1 %v1949_v40  ;;  %v1951_v17 = vmax.f32 %v1933_v52, 0.0 }
 0x57e   : > { %v1950_v33 = vmax.f32 %v1928_v57, 0.0 }
 0x580   : > { %2849 = vmatprep.mubr.f32.mxu1 %v1950_v33  ;;  %v2126_v33 = vsel %vm2122_vm3, %v1506_v21, 0.0 }
 0x581   : > { %2850 = vmatmul.mubr.f32.gmra.mrb[54].mxu1 %v1951_v17 }
 0x601   : > { %v2830_v32 = vpop.f32.mrb[32].mxu0 }
 0x602   : > { %v2047_v41 = vadd.f32 %v2830_v32, %v4005_v39  ;;  %v2041_v61 = vpop.f32.mrb[33].mxu0 }
 0x603   : > { %v2042_v45 = vadd.f32 %v4005_v39, %v2041_v61  ;;  %v1521_v61 = vadd.f32 %v3945_v24, %v4018_v54 }
 0x604   : > { %v2385_v44 = vmul.f32 -1.442695, %v2047_v41 }
 0x605   : > { %v2384_v28 = vmul.f32 -1.442695, %v2042_v45  ;;  %v2833_v25 = vpop.f32.mrb[34].mxu0 }
 0x606   : > { %3137 = vpow2.f32 %v2385_v44  ;;  %v2057_v49 = vadd.f32 %v2833_v25, %v4005_v39  ;;  %v2051_v19 = vpop.f32.mrb[35].mxu0  ;;  %v1516_v25 = vadd.f32 %v4018_v54, %v3948_v18 }
 0x607   : > { %3139 = vpow2.f32 %v2384_v28  ;;  %v2052_v29 = vadd.f32 %v4005_v39, %v2051_v19 }
 0x608   : > { %v2387_v42 = vmul.f32 -1.442695, %v2057_v49 }
 0x609   : > { %v2386_v51 = vmul.f32 -1.442695, %v2052_v29 }
 0x60a   : > { %3141 = vpow2.f32 %v2387_v42 }
 0x60b   : > { %3143 = vpow2.f32 %v2386_v51 }
 0x60e   : > { %v2836_v23 = vpop.f32.mrb[36].mxu0 }
 0x60f   : > { %v2067_v10 = vadd.f32 %v2836_v23, %v4005_v39  ;;  %v2061_v37 = vpop.f32.mrb[37].mxu0 }
 0x610   : > { %v3138_v55 = vpop.eup %3137  ;;  %v2062_v5 = vadd.f32 %v4005_v39, %v2061_v37 }
 0x611   : > { %v3140_v59 = vpop.eup %3139  ;;  %v2191_v63 = vadd.f32 1.0, %v3138_v55  ;;  %v2389_v12 = vmul.f32 -1.442695, %v2067_v10 }
 0x612   : > { %v2190_v46 = vadd.f32 1.0, %v3140_v59  ;;  %v2388_v16 = vmul.f32 -1.442695, %v2062_v5  ;;  %v2839_v8 = vpop.f32.mrb[38].mxu0  ;;  %v2129_v5 = vsel %vm2122_vm3, %v1521_v61, 0.0 }
 0x613   : > { %3145 = vrcp.f32 %v2191_v63  ;;  %v2077_v11 = vadd.f32 %v2839_v8, %v4005_v39  ;;  %v2071_v9 = vpop.f32.mrb[39].mxu0  ;;  %v2128_v63 = vsel %vm2122_vm3, %v1516_v25, 0.0 }
 0x614   : > { %v3142_v0 = vpop.eup %3141  ;;  %3147 = vrcp.f32 %v2190_v46  ;;  %v2072_v36 = vadd.f32 %v4005_v39, %v2071_v9 }
 0x615   : > { %v3144_v27 = vpop.eup %3143  ;;  %v2193_v3 = vadd.f32 1.0, %v3142_v0  ;;  %3149 = vpow2.f32 %v2389_v12  ;;  %v2391_v60 = vmul.f32 -1.442695, %v2077_v11 }
 0x616   : > { %v2192_v1 = vadd.f32 1.0, %v3144_v27  ;;  %3151 = vpow2.f32 %v2388_v16  ;;  %v2390_v7 = vmul.f32 -1.442695, %v2072_v36  ;;  %v1531_v27 = vadd.f32 %v3951_v31, %v4018_v54 }
 0x617   : > { %3153 = vrcp.f32 %v2193_v3  ;;  %v1526_v3 = vadd.f32 %v4018_v54, %v3954_v30  ;;  %v1541_v31 = vadd.f32 %v3957_v2, %v4018_v54 }
 0x618   : > { %3155 = vrcp.f32 %v2192_v1  ;;  %v2842_v34 = vpop.f32.mrb[48].mxu1  ;;  %v2131_v21 = vsel %vm2122_vm3, %v1531_v27, 0.0 }
 0x619   : > { %3157 = vpow2.f32 %v2391_v60  ;;  %v2087_v26 = vadd.f32 %v2842_v34, %v4005_v39  ;;  %v2081_v4 = vpop.f32.mrb[49].mxu1  ;;  %v2133_v2 = vsel %vm2122_vm3, %v1541_v31, 0.0  ;;  %v1566_v31 = vadd.f32 %v4018_v54, %v3984_v48 }
 0x61a   : > { %3159 = vpow2.f32 %v2390_v7  ;;  %v2082_v38 = vadd.f32 %v4005_v39, %v2081_v4 }
 0x61b   : > { %v2393_v52 = vmul.f32 -1.442695, %v2087_v26  ;;  %v2130_v26 = vsel %vm2122_vm3, %v1526_v3, 0.0 }
 0x61c   : > { %v2392_v6 = vmul.f32 -1.442695, %v2082_v38  ;;  %v2845_v22 = vpop.f32.mrb[50].mxu1  ;;  %v1536_v38 = vadd.f32 %v4018_v54, %v3960_v13 }
 0x61d   : > { %v3146_v57 = vpop.eup %3145  ;;  %3161 = vpow2.f32 %v2393_v52  ;;  %v2097_v17 = vadd.f32 %v2845_v22, %v4005_v39  ;;  %v2091_v32 = vpop.f32.mrb[51].mxu1 }
 0x61e   : > { %v3148_v41 = vpop.eup %3147  ;;  %v2239_v45 = vsel %vm4032_vm4, %v3146_v57, 0.0  ;;  %3163 = vpow2.f32 %v2392_v6  ;;  %v2092_v44 = vadd.f32 %v4005_v39, %v2091_v32  ;;  %v2132_v32 = vsel %vm2122_vm3, %v1536_v38, 0.0 }
 0x61f   : > { %v3150_v28 = vpop.eup %3149  ;;  %v2255_v49 = vadd.f32 %v2239_v45, %v2127_v14  ;;  %v2238_v19 = vsel %vm4032_vm4, %v3148_v41, 0.0  ;;  %v2395_v29 = vmul.f32 -1.442695, %v2097_v17  ;;  %v1551_v17 = vadd.f32 %v3964_v47, %v4018_v54 }
 0x620   : > { %v3152_v42 = vpop.eup %3151  ;;  %v2254_v51 = vadd.f32 %v2238_v19, %v2126_v33  ;;  %v2195_v23 = vadd.f32 1.0, %v3150_v28  ;;  %v2394_v24 = vmul.f32 -1.442695, %v2092_v44  ;;  %v1546_v41 = vadd.f32 %v4018_v54, %v3967_v43 }
 0x621   : > { %v3154_v10 = vpop.eup %3153  ;;  %2271 = vst [vmem:[%s4044_s11 + $0x8] sm:$0xff] %v2255_v49  ;;  %v2194_v37 = vadd.f32 1.0, %v3152_v42  ;;  %3165 = vpow2.f32 %v2395_v29  ;;  %v2135_v25 = vsel %vm2122_vm3, %v1551_v17, 0.0  ;;  %v1561_v49 = vadd.f32 %v3972_v56, %v4018_v54 }
 0x622   : > { %v3156_v55 = vpop.eup %3155  ;;  %2270 = vst [vmem:[%s4044_s11] sm:$0xff] %v2254_v51  ;;  %v2241_v18 = vsel %vm4032_vm4, %v3154_v10, 0.0  ;;  %3167 = vrcp.f32 %v2195_v23  ;;  %v2134_v19 = vsel %vm2122_vm3, %v1546_v41, 0.0 }
 0x623   : > { %v3158_v59 = vpop.eup %3157  ;;  %v2257_v12 = vadd.f32 %v2241_v18, %v2129_v5  ;;  %v2240_v50 = vsel %vm4032_vm4, %v3156_v55, 0.0  ;;  %3169 = vrcp.f32 %v2194_v37  ;;  %v2137_v56 = vsel %vm2122_vm3, %v1561_v49, 0.0 }
 0x624   : > { %v3160_v46 = vpop.eup %3159  ;;  %v2256_v16 = vadd.f32 %v2240_v50, %v2128_v63  ;;  %v2197_v8 = vadd.f32 1.0, %v3158_v59  ;;  %3171 = vpow2.f32 %v2394_v24  ;;  %v1556_v24 = vadd.f32 %v4018_v54, %v3975_v15 }
 0x625   : > { %2273 = vst [vmem:[%s4044_s11 + $0x18] sm:$0xff] %v2257_v12  ;;  %v2196_v11 = vadd.f32 1.0, %v3160_v46 }
 0x626   : > { %2272 = vst [vmem:[%s4044_s11 + $0x10] sm:$0xff] %v2256_v16  ;;  %3173 = vrcp.f32 %v2197_v8  ;;  %v2136_v5 = vsel %vm2122_vm3, %v1556_v24, 0.0 }
 0x627   : > { %v3162_v9 = vpop.eup %3161  ;;  %3175 = vrcp.f32 %v2196_v11 }
 0x628   : > { %v3164_v0 = vpop.eup %3163  ;;  %v2199_v36 = vadd.f32 1.0, %v3162_v9 }
 0x629   : > { %v2198_v60 = vadd.f32 1.0, %v3164_v0 }
 0x62a   : > { %3177 = vrcp.f32 %v2199_v36 }
 0x62b   : > { %v3166_v1 = vpop.eup %3165  ;;  %3179 = vrcp.f32 %v2198_v60 }
 0x62c   : > { %v3168_v7 = vpop.eup %3167  ;;  %v2201_v34 = vadd.f32 1.0, %v3166_v1 }
 0x62d   : > { %v3170_v58 = vpop.eup %3169  ;;  %v2243_v30 = vsel %vm4032_vm4, %v3168_v7, 0.0 }
 0x62e   : > { %v3172_v4 = vpop.eup %3171  ;;  %v2259_v52 = vadd.f32 %v2243_v30, %v2131_v21  ;;  %v2242_v6 = vsel %vm4032_vm4, %v3170_v58, 0.0  ;;  %3181 = vrcp.f32 %v2201_v34 }
 0x62f   : > { %v2258_v22 = vadd.f32 %v2242_v6, %v2130_v26  ;;  %v2200_v57 = vadd.f32 1.0, %v3172_v4 }
 0x630   : > { %v3174_v14 = vpop.eup %3173  ;;  %2275 = vst [vmem:[%s4044_s11 + $0x28] sm:$0xff] %v2259_v52  ;;  %v1581_v52 = vadd.f32 %v3987_v20, %v4018_v54 }
 0x631   : > { %v3176_v33 = vpop.eup %3175  ;;  %2274 = vst [vmem:[%s4044_s11 + $0x20] sm:$0xff] %v2258_v22  ;;  %v2245_v13 = vsel %vm4032_vm4, %v3174_v14, 0.0  ;;  %3183 = vrcp.f32 %v2200_v57  ;;  %v2138_v22 = vsel %vm2122_vm3, %v1566_v31, 0.0 }
 0x632   : > { %v2261_v61 = vadd.f32 %v2245_v13, %v2133_v2  ;;  %v2244_v45 = vsel %vm4032_vm4, %v3176_v33, 0.0  ;;  %v2141_v20 = vsel %vm2122_vm3, %v1581_v52, 0.0 }
 0x633   : > { %v2260_v44 = vadd.f32 %v2244_v45, %v2132_v32 }
 0x634   : > { %v3178_v28 = vpop.eup %3177  ;;  %2277 = vst [vmem:[%s4044_s11 + $0x38] sm:$0xff] %v2261_v61 }
 0x635   : > { %v3180_v47 = vpop.eup %3179  ;;  %2276 = vst [vmem:[%s4044_s11 + $0x30] sm:$0xff] %v2260_v44  ;;  %v2247_v43 = vsel %vm4032_vm4, %v3178_v28, 0.0 }
 0x636   : > { %v2263_v29 = vadd.f32 %v2247_v43, %v2135_v25  ;;  %v2246_v42 = vsel %vm4032_vm4, %v3180_v47, 0.0 }
 0x637   : > { %v2262_v51 = vadd.f32 %v2246_v42, %v2134_v19 }
 0x638   : > { %v3182_v23 = vpop.eup %3181  ;;  %2279 = vst [vmem:[%s4044_s11 + $0x48] sm:$0xff] %v2263_v29 }
 0x639   : > { %2278 = vst [vmem:[%s4044_s11 + $0x40] sm:$0xff] %v2262_v51  ;;  %v2249_v10 = vsel %vm4032_vm4, %v3182_v23, 0.0 }
 0x63a   : > { %v2265_v37 = vadd.f32 %v2249_v10, %v2137_v56 }
 0x63b   : > { %v3184_v55 = vpop.eup %3183 }
 0x63c   : > { %2281 = vst [vmem:[%s4044_s11 + $0x58] sm:$0xff] %v2265_v37  ;;  %v2248_v18 = vsel %vm4032_vm4, %v3184_v55, 0.0 }
 0x63d   : > { %v2264_v59 = vadd.f32 %v2248_v18, %v2136_v5 }
 0x63f   : > { %2280 = vst [vmem:[%s4044_s11 + $0x50] sm:$0xff] %v2264_v59 }
 0x650   : > { %v2848_v15 = vpop.f32.mrb[52].mxu1 }
 0x651   : > { %v2107_v63 = vadd.f32 %v2848_v15, %v4005_v39  ;;  %v2101_v12 = vpop.f32.mrb[53].mxu1 }
 0x652   : > { %v2102_v50 = vadd.f32 %v4005_v39, %v2101_v12 }
 0x653   : > { %v2397_v46 = vmul.f32 -1.442695, %v2107_v63 }
 0x654   : > { %v2396_v16 = vmul.f32 -1.442695, %v2102_v50  ;;  %v2851_v8 = vpop.f32.mrb[54].mxu1 }
 0x655   : > { %3185 = vpow2.f32 %v2397_v46  ;;  %v2117_v11 = vadd.f32 %v2851_v8, %v4005_v39  ;;  %v2111_v9 = vpop.f32.mrb[55].mxu1 }
 0x656   : > { %3187 = vpow2.f32 %v2396_v16  ;;  %v2112_v0 = vadd.f32 %v4005_v39, %v2111_v9  ;;  %v1571_v39 = vadd.f32 %v3981_v35, %v4018_v54  ;;  %v1576_v35 = vadd.f32 %v4018_v54, %v3990_v53 }
 0x657   : > { %v2399_v36 = vmul.f32 -1.442695, %v2117_v11 }
 0x658   : > { %v2398_v27 = vmul.f32 -1.442695, %v2112_v0  ;;  %v2139_v38 = vsel %vm2122_vm3, %v1571_v39, 0.0  ;;  %v2140_v13 = vsel %vm2122_vm3, %v1576_v35, 0.0 }
 0x659   : > { %3189 = vpow2.f32 %v2399_v36 }
 0x65a   : > { %3191 = vpow2.f32 %v2398_v27 }
 0x65f   : > { %v3186_v3 = vpop.eup %3185 }
 0x660   : > { %v3188_v60 = vpop.eup %3187  ;;  %v2203_v1 = vadd.f32 1.0, %v3186_v3 }
 0x661   : > { %v2202_v7 = vadd.f32 1.0, %v3188_v60 }
 0x662   : > { %3193 = vrcp.f32 %v2203_v1 }
 0x663   : > { %v3190_v34 = vpop.eup %3189  ;;  %3195 = vrcp.f32 %v2202_v7 }
 0x664   : > { %v3192_v58 = vpop.eup %3191  ;;  %v2205_v21 = vadd.f32 1.0, %v3190_v34 }
 0x665   : > { %v2204_v26 = vadd.f32 1.0, %v3192_v58 }
 0x666   : > { %3197 = vrcp.f32 %v2205_v21 }
 0x667   : > { %3199 = vrcp.f32 %v2204_v26 }
 0x66c   : > { %v3194_v30 = vpop.eup %3193 }
 0x66d   : > { %v3196_v4 = vpop.eup %3195  ;;  %v2251_v6 = vsel %vm4032_vm4, %v3194_v30, 0.0 }
 0x66e   : > { %v2267_v48 = vadd.f32 %v2251_v6, %v2139_v38  ;;  %v2250_v57 = vsel %vm4032_vm4, %v3196_v4, 0.0 }
 0x66f   : > { %v2266_v14 = vadd.f32 %v2250_v57, %v2138_v22 }
 0x670   : > { %v3198_v33 = vpop.eup %3197  ;;  %2283 = vst [vmem:[%s4044_s11 + $0x68] sm:$0xff] %v2267_v48 }
 0x671   : > { %v3200_v2 = vpop.eup %3199  ;;  %2282 = vst [vmem:[%s4044_s11 + $0x60] sm:$0xff] %v2266_v14  ;;  %v2253_v17 = vsel %vm4032_vm4, %v3198_v33, 0.0 }
 0x672   : > { %v2269_v32 = vadd.f32 %v2253_v17, %v2141_v20  ;;  %v2252_v53 = vsel %vm4032_vm4, %v3200_v2, 0.0 }
 0x673   : > { %v2268_v54 = vadd.f32 %v2252_v53, %v2140_v13 }
 0x674   : > { %2285 = vst [vmem:[%s4044_s11 + $0x78] sm:$0xff] %v2269_v32 }
 0x675   : > { %2284 = vst [vmem:[%s4044_s11 + $0x70] sm:$0xff] %v2268_v54 }
 0x676 PF: > { %s20_s15 = sadd.s32 1, %s3223_s15   ;;  %s4191_s13 = smov %s3219_s14 }
 0x677   : > { %p17_p5 = scmp.ge.s32.totalorder %s20_s15, 4   ;;  %s4192_s14 = smov %s4194_s16 }
 0x679   :  { %19 = sbr.rel (!%p17_p5) target bundleno = 2 (0x2), region = 98 }

</bundles_post_ra>
